<compile_context>
chip_gen: v5e
topology: v5e:2x2
jax: 0.10.0
libtpu: 0.0.40
codegen_flags: <defaults>
</compile_context>

<pallas_src>
import functools

import jax
import jax.numpy as jnp
from jax.experimental import pallas as pl
from jax.experimental.pallas import tpu as pltpu

LANE = 128      # TPU lane width; all channel dims padded to this.
EPS = 1e-5      # PyTorch BatchNorm2d default eps.


def _conv_out(n, k, s):
    return (n - k) // s + 1


# ------------------------------- Fused kernel ------------------------------- #

def _fused_cnn_kernel(p1_ref, cw1_ref, g1_ref, b1_ref,
                      cw2_ref, g2_ref, b2_ref,
                      cw3_ref, g3_ref, b3_ref,
                      fw1_ref, fb1_ref, fw2_ref, fb2_ref,
                      o_ref, y1_ref, *, n, h1, w1, h2, w2, h3, w3, eps):
    C = LANE

    def bn_fold(s, s2, rows, g, b):
        # One-pass batch stats folded into per-channel scale/shift.
        mean = s / rows
        var = s2 / rows - mean * mean            # biased variance (torch BN)
        scale = g * jax.lax.rsqrt(var + eps)
        return scale, b - mean * scale

    # ---- conv1: one im2col matmul (patches built in wrapper) + BN1 + ReLU ----
    y = jnp.dot(p1_ref[...], cw1_ref[...], preferred_element_type=jnp.float32)
    scale, shift = bn_fold(jnp.sum(y, 0, keepdims=True),
                           jnp.sum(y * y, 0, keepdims=True),
                           float(n * h1 * w1), g1_ref[...], b1_ref[...])
    y1_ref[...] = jnp.maximum(y * scale + shift, 0.0).astype(jnp.bfloat16)

    # ---- conv2 (k4,s2): tap-wise matmuls over VMEM-resident y1 + BN2 --------
    # y1 rows ordered (h1, w1%2, w1//2, n) -> every tap slice is contiguous.
    # Output row-block `oh` holds rows ordered (w2, n).
    half = w1 // 2
    g_h1 = 2 * half * n          # rows per input-row group
    blk = w2 * n                 # rows per output-row block
    y2 = []
    for oh in range(h2):
        acc = jnp.zeros((blk, C), jnp.float32)
        for i in range(4):
            for j in range(4):
                t = i * 4 + j
                rin = (2 * oh + i) * g_h1 + (j % 2) * (half * n) + (j // 2) * n
                acc = acc + jnp.dot(y1_ref[rin:rin + blk, :],
                                    cw2_ref[t * C:(t + 1) * C, :],
                                    preferred_element_type=jnp.float32)
        y2.append(acc)
    scale, shift = bn_fold(sum(v.sum(0, keepdims=True) for v in y2),
                           sum((v * v).sum(0, keepdims=True) for v in y2),
                           float(n * h2 * w2), g2_ref[...], b2_ref[...])
    y2 = [v * scale + shift for v in y2]                      # no ReLU (spec)

    # ---- conv3 (k3,s2): tap-wise over the y2 value blocks + BN3 + ReLU ------
    y3 = []
    for oh in range(h3):
        for ow in range(w3):
            acc = jnp.zeros((n, C), jnp.float32)
            for i in range(3):
                for j in range(3):
                    t = i * 3 + j
                    r = (2 * ow + j) * n
                    a = y2[2 * oh + i][r:r + n, :].astype(jnp.bfloat16)
                    acc = acc + jnp.dot(a, cw3_ref[t * C:(t + 1) * C, :],
                                        preferred_element_type=jnp.float32)
            y3.append(acc)
    scale, shift = bn_fold(sum(v.sum(0, keepdims=True) for v in y3),
                           sum((v * v).sum(0, keepdims=True) for v in y3),
                           float(n * h3 * w3), g3_ref[...], b3_ref[...])
    y3 = [jnp.maximum(v * scale + shift, 0.0) for v in y3]

    # ---- NCHW flatten + fc1 + ReLU + fc2 (fc1 pre-permuted per position) ----
    hid = fw1_ref.shape[1]
    hacc = jnp.zeros((n, hid), jnp.float32)
    for p, v in enumerate(y3):
        hacc = hacc + jnp.dot(v.astype(jnp.bfloat16),
                              fw1_ref[p * C:(p + 1) * C, :],
                              preferred_element_type=jnp.float32)
    hvec = jnp.maximum(hacc + fb1_ref[...], 0.0).astype(jnp.bfloat16)
    o_ref[...] = (jnp.dot(hvec, fw2_ref[...], preferred_element_type=jnp.float32)
                  + fb2_ref[...])


# --------------------------------- Forward ---------------------------------- #

def fused_cnn_forward(pp, x_nchw, *, n_actions):
    N, Cin, H, W = x_nchw.shape
    h1, w1 = _conv_out(H, 8, 2), _conv_out(W, 8, 2)
    h2, w2 = _conv_out(h1, 4, 2), _conv_out(w1, 4, 2)
    h3, w3 = _conv_out(h2, 3, 2), _conv_out(w2, 3, 2)
    assert h3 >= 1 and w3 >= 1, "input too small for this conv stack"
    assert w1 % 2 == 0, "post-conv1 width must be even for the parity layout"

    x = jnp.transpose(x_nchw, (0, 2, 3, 1)).astype(jnp.bfloat16)   # NHWC bf16
    # conv1 im2col: cols ordered (kh, kw, cin); rows ordered (h1, w1%2, w1//2, n).
    cols = []
    for i in range(8):
        for j in range(8):
            cols.append(x[:, i:i + 2 * (h1 - 1) + 1:2, j:j + 2 * (w1 - 1) + 1:2, :])
    k1 = 64 * Cin
    p1 = jnp.stack(cols, axis=3).reshape(N, h1, w1, k1)
    p1 = p1.reshape(N, h1, w1 // 2, 2, k1)
    p1 = jnp.transpose(p1, (1, 3, 2, 0, 4)).reshape(N * h1 * w1, k1)

    kernel = functools.partial(_fused_cnn_kernel, n=N, h1=h1, w1=w1,
                               h2=h2, w2=w2, h3=h3, w3=w3, eps=EPS)
    full = lambda shp: pl.BlockSpec(shp, lambda i: (0,) * len(shp))
    args = (p1, pp["w1"], pp["g1"], pp["beta1"],
            pp["w2"], pp["g2"], pp["beta2"],
            pp["w3"], pp["g3"], pp["beta3"],
            pp["wf1"], pp["bf1"], pp["wf2"], pp["bf2"])
    out = pl.pallas_call(
        kernel,
        out_shape=jax.ShapeDtypeStruct((N, LANE), jnp.float32),
        grid=(1,),
        in_specs=[full(a.shape) for a in args],
        out_specs=full((N, LANE)),
        scratch_shapes=[pltpu.VMEM((N * h1 * w1, LANE), jnp.bfloat16)],
        compiler_params=pltpu.CompilerParams(
            dimension_semantics=("arbitrary",)),
    )(*args)
    return out[:, :n_actions]


# ----------------------------- Parameters (torch layout) -------------------- #

def init_params(key, input_channels, n_actions, H, W):
    ks = jax.random.split(key, 16)
    nrm = lambda k, shape, s=0.05: s * jax.random.normal(k, shape, jnp.float32)
    h3 = _conv_out(_conv_out(_conv_out(H, 8, 2), 4, 2), 3, 2)
    w3 = _conv_out(_conv_out(_conv_out(W, 8, 2), 4, 2), 3, 2)
    flatten_dim = 96 * h3 * w3
    return {
        "conv1_w": nrm(ks[0], (32, input_channels, 8, 8)),
        "conv1_b": nrm(ks[1], (32,)),     # unused in forward: bias+train-BN == BN
        "bn1_g": 1.0 + nrm(ks[2], (32,), 0.1), "bn1_b": nrm(ks[3], (32,), 0.1),
        "conv2_w": nrm(ks[4], (64, 32, 4, 4)),
        "conv2_b": nrm(ks[5], (64,)),
        "bn2_g": 1.0 + nrm(ks[6], (64,), 0.1), "bn2_b": nrm(ks[7], (64,), 0.1),
        "conv3_w": nrm(ks[8], (96, 64, 3, 3)),
        "conv3_b": nrm(ks[9], (96,)),
        "bn3_g": 1.0 + nrm(ks[10], (96,), 0.1), "bn3_b": nrm(ks[11], (96,), 0.1),
        "fc1_w": nrm(ks[12], (512, flatten_dim)), "fc1_b": nrm(ks[13], (512,)),
        "fc2_w": nrm(ks[14], (n_actions, 512)), "fc2_b": nrm(ks[15], (n_actions,)),
    }


# --------------------- One-time weight pre-layout (bf16, padded) ------------ #

def _prep_conv_w(w_oihw, cin_pad, cout_pad):
    Cout, Cin, KH, KW = w_oihw.shape
    w = jnp.transpose(w_oihw, (2, 3, 1, 0))                   # (KH,KW,Cin,Cout)
    w = jnp.pad(w, ((0, 0), (0, 0), (0, cin_pad - Cin), (0, cout_pad - Cout)))
    return w.reshape(KH * KW * cin_pad, cout_pad).astype(jnp.bfloat16)


def _prep_vec(v, pad):
    return jnp.pad(v, (0, pad - v.shape[0])).reshape(1, pad).astype(jnp.float32)


def _prep_fc1_w(w, c_real, c_pad, h3, w3):
    # torch flatten idx = c*h3*w3 + h*w3 + w  ->  kernel row (h*w3+w)*c_pad + c
    hidden = w.shape[0]
    wt = jnp.transpose(w.reshape(hidden, c_real, h3, w3), (2, 3, 1, 0))
    wt = jnp.pad(wt, ((0, 0), (0, 0), (0, c_pad - c_real), (0, 0)))
    return wt.reshape(h3 * w3 * c_pad, hidden).astype(jnp.bfloat16)


def _prep_fc2_w(w, out_pad):
    return jnp.pad(jnp.transpose(w),
                   ((0, 0), (0, out_pad - w.shape[0]))).astype(jnp.bfloat16)


def prepack_params(params, *, input_channels, H, W):
    h3 = _conv_out(_conv_out(_conv_out(H, 8, 2), 4, 2), 3, 2)
    w3 = _conv_out(_conv_out(_conv_out(W, 8, 2), 4, 2), 3, 2)
    # Conv biases intentionally dropped (no-op before training-mode BatchNorm).
    return {
        "w1": _prep_conv_w(params["conv1_w"], input_channels, LANE),
        "g1": _prep_vec(params["bn1_g"], LANE), "beta1": _prep_vec(params["bn1_b"], LANE),
        "w2": _prep_conv_w(params["conv2_w"], LANE, LANE),
        "g2": _prep_vec(params["bn2_g"], LANE), "beta2": _prep_vec(params["bn2_b"], LANE),
        "w3": _prep_conv_w(params["conv3_w"], LANE, LANE),
        "g3": _prep_vec(params["bn3_g"], LANE), "beta3": _prep_vec(params["bn3_b"], LANE),
        "wf1": _prep_fc1_w(params["fc1_w"], 96, LANE, h3, w3),
        "bf1": params["fc1_b"].reshape(1, -1).astype(jnp.float32),
        "wf2": _prep_fc2_w(params["fc2_w"], LANE),
        "bf2": _prep_vec(params["fc2_b"], LANE),
    }


if __name__ == "__main__":
    N, C, H, W = 2, 4, 34, 34
    n_actions = 6

    key = jax.random.PRNGKey(0)
    pkey, xkey = jax.random.split(key)
    params = init_params(pkey, C, n_actions, H, W)
    pp = prepack_params(params, input_channels=C, H=H, W=W)
    x = jax.random.normal(xkey, (N, C, H, W), jnp.float32)

    fwd = jax.jit(functools.partial(fused_cnn_forward, n_actions=n_actions))
    out = jax.block_until_ready(fwd(pp, x))
    assert out.shape == (N, n_actions), out.shape
    assert bool(jnp.all(jnp.isfinite(out)))
    print("KERNEL_OK")
</pallas_src>

<mosaic_0001>
module attributes {stable_mosaic.version = 11 : i64} {
  func.func @_fused_cnn_kernel(%arg0: i32, %arg1: memref<392x256xbf16, #tpu.memory_space<vmem>>, %arg2: memref<256x128xbf16, #tpu.memory_space<vmem>>, %arg3: memref<1x128xf32, #tpu.memory_space<vmem>>, %arg4: memref<1x128xf32, #tpu.memory_space<vmem>>, %arg5: memref<2048x128xbf16, #tpu.memory_space<vmem>>, %arg6: memref<1x128xf32, #tpu.memory_space<vmem>>, %arg7: memref<1x128xf32, #tpu.memory_space<vmem>>, %arg8: memref<1152x128xbf16, #tpu.memory_space<vmem>>, %arg9: memref<1x128xf32, #tpu.memory_space<vmem>>, %arg10: memref<1x128xf32, #tpu.memory_space<vmem>>, %arg11: memref<512x512xbf16, #tpu.memory_space<vmem>>, %arg12: memref<1x512xf32, #tpu.memory_space<vmem>>, %arg13: memref<512x128xbf16, #tpu.memory_space<vmem>>, %arg14: memref<1x128xf32, #tpu.memory_space<vmem>>, %arg15: memref<2x128xf32, #tpu.memory_space<vmem>>, %arg16: memref<392x128xbf16, #tpu.memory_space<vmem>>) attributes {dimension_semantics = [#tpu.dimension_semantics<arbitrary>], iteration_bounds = array<i64: 1>, scalar_prefetch = 0 : i64, scratch_operands = 1 : i64, tpu.core_type = #tpu.core_type<tc>, window_params = [{pipeline_mode = #tpu.pipeline_mode<synchronous>, transform_indices = @transform_0, window_bounds = array<i64: 392, 256>}, {pipeline_mode = #tpu.pipeline_mode<synchronous>, transform_indices = @transform_1, window_bounds = array<i64: 256, 128>}, {pipeline_mode = #tpu.pipeline_mode<synchronous>, transform_indices = @transform_2, window_bounds = array<i64: 1, 128>}, {pipeline_mode = #tpu.pipeline_mode<synchronous>, transform_indices = @transform_3, window_bounds = array<i64: 1, 128>}, {pipeline_mode = #tpu.pipeline_mode<synchronous>, transform_indices = @transform_4, window_bounds = array<i64: 2048, 128>}, {pipeline_mode = #tpu.pipeline_mode<synchronous>, transform_indices = @transform_5, window_bounds = array<i64: 1, 128>}, {pipeline_mode = #tpu.pipeline_mode<synchronous>, transform_indices = @transform_6, window_bounds = array<i64: 1, 128>}, {pipeline_mode = #tpu.pipeline_mode<synchronous>, transform_indices = @transform_7, window_bounds = array<i64: 1152, 128>}, {pipeline_mode = #tpu.pipeline_mode<synchronous>, transform_indices = @transform_8, window_bounds = array<i64: 1, 128>}, {pipeline_mode = #tpu.pipeline_mode<synchronous>, transform_indices = @transform_9, window_bounds = array<i64: 1, 128>}, {pipeline_mode = #tpu.pipeline_mode<synchronous>, transform_indices = @transform_10, window_bounds = array<i64: 512, 512>}, {pipeline_mode = #tpu.pipeline_mode<synchronous>, transform_indices = @transform_11, window_bounds = array<i64: 1, 512>}, {pipeline_mode = #tpu.pipeline_mode<synchronous>, transform_indices = @transform_12, window_bounds = array<i64: 512, 128>}, {pipeline_mode = #tpu.pipeline_mode<synchronous>, transform_indices = @transform_13, window_bounds = array<i64: 1, 128>}, {pipeline_mode = #tpu.pipeline_mode<synchronous>, transform_indices = @transform_14, window_bounds = array<i64: 2, 128>}]} {
    %c0 = arith.constant 0 : index
    %c0_0 = arith.constant 0 : index
    %0 = vector.load %arg1[%c0, %c0_0] : memref<392x256xbf16, #tpu.memory_space<vmem>>, vector<392x256xbf16>
    %c0_1 = arith.constant 0 : index
    %c0_2 = arith.constant 0 : index
    %1 = vector.load %arg2[%c0_1, %c0_2] : memref<256x128xbf16, #tpu.memory_space<vmem>>, vector<256x128xbf16>
    %cst = arith.constant dense<0.000000e+00> : vector<392x128xf32>
    %2 = tpu.matmul %0, %1, %cst {dimension_numbers = #tpu.dot_dimension_numbers<[1], [0], [0], [1], [0, 0, 1, 1], [], []>} : vector<392x256xbf16>, vector<256x128xbf16>, vector<392x128xf32> -> vector<392x128xf32>
    %cst_3 = arith.constant dense<0.000000e+00> : vector<128xf32>
    %3 = vector.multi_reduction <add>, %2, %cst_3 [0] : vector<392x128xf32> to vector<128xf32>
    %4 = vector.shape_cast %3 : vector<128xf32> to vector<1x128xf32>
    %5 = arith.mulf %2, %2 : vector<392x128xf32>
    %cst_4 = arith.constant dense<0.000000e+00> : vector<128xf32>
    %6 = vector.multi_reduction <add>, %5, %cst_4 [0] : vector<392x128xf32> to vector<128xf32>
    %7 = vector.shape_cast %6 : vector<128xf32> to vector<1x128xf32>
    %c0_5 = arith.constant 0 : index
    %c0_6 = arith.constant 0 : index
    %8 = vector.load %arg3[%c0_5, %c0_6] : memref<1x128xf32, #tpu.memory_space<vmem>>, vector<1x128xf32>
    %c0_7 = arith.constant 0 : index
    %c0_8 = arith.constant 0 : index
    %9 = vector.load %arg4[%c0_7, %c0_8] : memref<1x128xf32, #tpu.memory_space<vmem>>, vector<1x128xf32>
    %cst_9 = arith.constant 3.920000e+02 : f32
    %10 = vector.broadcast %cst_9 : f32 to vector<1x128xf32>
    %11 = arith.divf %4, %10 : vector<1x128xf32>
    %cst_10 = arith.constant 3.920000e+02 : f32
    %12 = vector.broadcast %cst_10 : f32 to vector<1x128xf32>
    %13 = arith.divf %7, %12 : vector<1x128xf32>
    %14 = arith.mulf %11, %11 : vector<1x128xf32>
    %15 = arith.subf %13, %14 : vector<1x128xf32>
    %cst_11 = arith.constant 9.99999974E-6 : f32
    %16 = vector.broadcast %cst_11 : f32 to vector<1x128xf32>
    %17 = arith.addf %15, %16 : vector<1x128xf32>
    %18 = math.rsqrt %17 : vector<1x128xf32>
    %19 = arith.mulf %8, %18 : vector<1x128xf32>
    %20 = arith.mulf %11, %19 : vector<1x128xf32>
    %21 = arith.subf %9, %20 : vector<1x128xf32>
    %22 = vector.broadcast %19 : vector<1x128xf32> to vector<392x128xf32>
    %23 = arith.mulf %2, %22 : vector<392x128xf32>
    %24 = vector.broadcast %21 : vector<1x128xf32> to vector<392x128xf32>
    %25 = arith.addf %23, %24 : vector<392x128xf32>
    %cst_12 = arith.constant 0.000000e+00 : f32
    %26 = vector.broadcast %cst_12 : f32 to vector<392x128xf32>
    %27 = arith.maximumf %25, %26 : vector<392x128xf32>
    %28 = arith.truncf %27 : vector<392x128xf32> to vector<392x128xbf16>
    %c0_13 = arith.constant 0 : index
    %c0_14 = arith.constant 0 : index
    %29 = vector.load %arg16[%c0_13, %c0_14] : memref<392x128xbf16, #tpu.memory_space<vmem>>, vector<392x128xbf16>
    tpu.vector_store %arg16[%c0_13, %c0_14], %28 {strides = array<i32>} : memref<392x128xbf16, #tpu.memory_space<vmem>>, vector<392x128xbf16>,
    %cst_15 = arith.constant 0.000000e+00 : f32
    %30 = vector.broadcast %cst_15 : f32 to vector<12x128xf32>
    %c0_16 = arith.constant 0 : index
    %c0_17 = arith.constant 0 : index
    %31 = vector.load %arg16[%c0_16, %c0_17] : memref<392x128xbf16, #tpu.memory_space<vmem>>, vector<12x128xbf16>
    %c0_18 = arith.constant 0 : index
    %c0_19 = arith.constant 0 : index
    %32 = vector.load %arg5[%c0_18, %c0_19] : memref<2048x128xbf16, #tpu.memory_space<vmem>>, vector<128x128xbf16>
    %cst_20 = arith.constant dense<0.000000e+00> : vector<12x128xf32>
    %33 = tpu.matmul %31, %32, %cst_20 {dimension_numbers = #tpu.dot_dimension_numbers<[1], [0], [0], [1], [0, 0, 1, 1], [], []>} : vector<12x128xbf16>, vector<128x128xbf16>, vector<12x128xf32> -> vector<12x128xf32>
    %34 = arith.addf %30, %33 : vector<12x128xf32>
    %c14 = arith.constant 14 : index
    %c0_21 = arith.constant 0 : index
    %35 = vector.load %arg16[%c14, %c0_21] : memref<392x128xbf16, #tpu.memory_space<vmem>>, vector<12x128xbf16>
    %c128 = arith.constant 128 : index
    %c0_22 = arith.constant 0 : index
    %36 = vector.load %arg5[%c128, %c0_22] : memref<2048x128xbf16, #tpu.memory_space<vmem>>, vector<128x128xbf16>
    %cst_23 = arith.constant dense<0.000000e+00> : vector<12x128xf32>
    %37 = tpu.matmul %35, %36, %cst_23 {dimension_numbers = #tpu.dot_dimension_numbers<[1], [0], [0], [1], [0, 0, 1, 1], [], []>} : vector<12x128xbf16>, vector<128x128xbf16>, vector<12x128xf32> -> vector<12x128xf32>
    %38 = arith.addf %34, %37 : vector<12x128xf32>
    %c2 = arith.constant 2 : index
    %c0_24 = arith.constant 0 : index
    %39 = vector.load %arg16[%c2, %c0_24] : memref<392x128xbf16, #tpu.memory_space<vmem>>, vector<12x128xbf16>
    %c256 = arith.constant 256 : index
    %c0_25 = arith.constant 0 : index
    %40 = vector.load %arg5[%c256, %c0_25] : memref<2048x128xbf16, #tpu.memory_space<vmem>>, vector<128x128xbf16>
    %cst_26 = arith.constant dense<0.000000e+00> : vector<12x128xf32>
    %41 = tpu.matmul %39, %40, %cst_26 {dimension_numbers = #tpu.dot_dimension_numbers<[1], [0], [0], [1], [0, 0, 1, 1], [], []>} : vector<12x128xbf16>, vector<128x128xbf16>, vector<12x128xf32> -> vector<12x128xf32>
    %42 = arith.addf %38, %41 : vector<12x128xf32>
    %c16 = arith.constant 16 : index
    %c0_27 = arith.constant 0 : index
    %43 = vector.load %arg16[%c16, %c0_27] : memref<392x128xbf16, #tpu.memory_space<vmem>>, vector<12x128xbf16>
    %c384 = arith.constant 384 : index
    %c0_28 = arith.constant 0 : index
    %44 = vector.load %arg5[%c384, %c0_28] : memref<2048x128xbf16, #tpu.memory_space<vmem>>, vector<128x128xbf16>
    %cst_29 = arith.constant dense<0.000000e+00> : vector<12x128xf32>
    %45 = tpu.matmul %43, %44, %cst_29 {dimension_numbers = #tpu.dot_dimension_numbers<[1], [0], [0], [1], [0, 0, 1, 1], [], []>} : vector<12x128xbf16>, vector<128x128xbf16>, vector<12x128xf32> -> vector<12x128xf32>
    %46 = arith.addf %42, %45 : vector<12x128xf32>
    %c28 = arith.constant 28 : index
    %c0_30 = arith.constant 0 : index
    %47 = vector.load %arg16[%c28, %c0_30] : memref<392x128xbf16, #tpu.memory_space<vmem>>, vector<12x128xbf16>
    %c512 = arith.constant 512 : index
    %c0_31 = arith.constant 0 : index
    %48 = vector.load %arg5[%c512, %c0_31] : memref<2048x128xbf16, #tpu.memory_space<vmem>>, vector<128x128xbf16>
    %cst_32 = arith.constant dense<0.000000e+00> : vector<12x128xf32>
    %49 = tpu.matmul %47, %48, %cst_32 {dimension_numbers = #tpu.dot_dimension_numbers<[1], [0], [0], [1], [0, 0, 1, 1], [], []>} : vector<12x128xbf16>, vector<128x128xbf16>, vector<12x128xf32> -> vector<12x128xf32>
    %50 = arith.addf %46, %49 : vector<12x128xf32>
    %c42 = arith.constant 42 : index
    %c0_33 = arith.constant 0 : index
    %51 = vector.load %arg16[%c42, %c0_33] : memref<392x128xbf16, #tpu.memory_space<vmem>>, vector<12x128xbf16>
    %c640 = arith.constant 640 : index
    %c0_34 = arith.constant 0 : index
    %52 = vector.load %arg5[%c640, %c0_34] : memref<2048x128xbf16, #tpu.memory_space<vmem>>, vector<128x128xbf16>
    %cst_35 = arith.constant dense<0.000000e+00> : vector<12x128xf32>
    %53 = tpu.matmul %51, %52, %cst_35 {dimension_numbers = #tpu.dot_dimension_numbers<[1], [0], [0], [1], [0, 0, 1, 1], [], []>} : vector<12x128xbf16>, vector<128x128xbf16>, vector<12x128xf32> -> vector<12x128xf32>
    %54 = arith.addf %50, %53 : vector<12x128xf32>
    %c30 = arith.constant 30 : index
    %c0_36 = arith.constant 0 : index
    %55 = vector.load %arg16[%c30, %c0_36] : memref<392x128xbf16, #tpu.memory_space<vmem>>, vector<12x128xbf16>
    %c768 = arith.constant 768 : index
    %c0_37 = arith.constant 0 : index
    %56 = vector.load %arg5[%c768, %c0_37] : memref<2048x128xbf16, #tpu.memory_space<vmem>>, vector<128x128xbf16>
    %cst_38 = arith.constant dense<0.000000e+00> : vector<12x128xf32>
    %57 = tpu.matmul %55, %56, %cst_38 {dimension_numbers = #tpu.dot_dimension_numbers<[1], [0], [0], [1], [0, 0, 1, 1], [], []>} : vector<12x128xbf16>, vector<128x128xbf16>, vector<12x128xf32> -> vector<12x128xf32>
    %58 = arith.addf %54, %57 : vector<12x128xf32>
    %c44 = arith.constant 44 : index
    %c0_39 = arith.constant 0 : index
    %59 = vector.load %arg16[%c44, %c0_39] : memref<392x128xbf16, #tpu.memory_space<vmem>>, vector<12x128xbf16>
    %c896 = arith.constant 896 : index
    %c0_40 = arith.constant 0 : index
    %60 = vector.load %arg5[%c896, %c0_40] : memref<2048x128xbf16, #tpu.memory_space<vmem>>, vector<128x128xbf16>
    %cst_41 = arith.constant dense<0.000000e+00> : vector<12x128xf32>
    %61 = tpu.matmul %59, %60, %cst_41 {dimension_numbers = #tpu.dot_dimension_numbers<[1], [0], [0], [1], [0, 0, 1, 1], [], []>} : vector<12x128xbf16>, vector<128x128xbf16>, vector<12x128xf32> -> vector<12x128xf32>
    %62 = arith.addf %58, %61 : vector<12x128xf32>
    %c56 = arith.constant 56 : index
    %c0_42 = arith.constant 0 : index
    %63 = vector.load %arg16[%c56, %c0_42] : memref<392x128xbf16, #tpu.memory_space<vmem>>, vector<12x128xbf16>
    %c1024 = arith.constant 1024 : index
    %c0_43 = arith.constant 0 : index
    %64 = vector.load %arg5[%c1024, %c0_43] : memref<2048x128xbf16, #tpu.memory_space<vmem>>, vector<128x128xbf16>
    %cst_44 = arith.constant dense<0.000000e+00> : vector<12x128xf32>
    %65 = tpu.matmul %63, %64, %cst_44 {dimension_numbers = #tpu.dot_dimension_numbers<[1], [0], [0], [1], [0, 0, 1, 1], [], []>} : vector<12x128xbf16>, vector<128x128xbf16>, vector<12x128xf32> -> vector<12x128xf32>
    %66 = arith.addf %62, %65 : vector<12x128xf32>
    %c70 = arith.constant 70 : index
    %c0_45 = arith.constant 0 : index
    %67 = vector.load %arg16[%c70, %c0_45] : memref<392x128xbf16, #tpu.memory_space<vmem>>, vector<12x128xbf16>
    %c1152 = arith.constant 1152 : index
    %c0_46 = arith.constant 0 : index
    %68 = vector.load %arg5[%c1152, %c0_46] : memref<2048x128xbf16, #tpu.memory_space<vmem>>, vector<128x128xbf16>
    %cst_47 = arith.constant dense<0.000000e+00> : vector<12x128xf32>
    %69 = tpu.matmul %67, %68, %cst_47 {dimension_numbers = #tpu.dot_dimension_numbers<[1], [0], [0], [1], [0, 0, 1, 1], [], []>} : vector<12x128xbf16>, vector<128x128xbf16>, vector<12x128xf32> -> vector<12x128xf32>
    %70 = arith.addf %66, %69 : vector<12x128xf32>
    %c58 = arith.constant 58 : index
    %c0_48 = arith.constant 0 : index
    %71 = vector.load %arg16[%c58, %c0_48] : memref<392x128xbf16, #tpu.memory_space<vmem>>, vector<12x128xbf16>
    %c1280 = arith.constant 1280 : index
    %c0_49 = arith.constant 0 : index
    %72 = vector.load %arg5[%c1280, %c0_49] : memref<2048x128xbf16, #tpu.memory_space<vmem>>, vector<128x128xbf16>
    %cst_50 = arith.constant dense<0.000000e+00> : vector<12x128xf32>
    %73 = tpu.matmul %71, %72, %cst_50 {dimension_numbers = #tpu.dot_dimension_numbers<[1], [0], [0], [1], [0, 0, 1, 1], [], []>} : vector<12x128xbf16>, vector<128x128xbf16>, vector<12x128xf32> -> vector<12x128xf32>
    %74 = arith.addf %70, %73 : vector<12x128xf32>
    %c72 = arith.constant 72 : index
    %c0_51 = arith.constant 0 : index
    %75 = vector.load %arg16[%c72, %c0_51] : memref<392x128xbf16, #tpu.memory_space<vmem>>, vector<12x128xbf16>
    %c1408 = arith.constant 1408 : index
    %c0_52 = arith.constant 0 : index
    %76 = vector.load %arg5[%c1408, %c0_52] : memref<2048x128xbf16, #tpu.memory_space<vmem>>, vector<128x128xbf16>
    %cst_53 = arith.constant dense<0.000000e+00> : vector<12x128xf32>
    %77 = tpu.matmul %75, %76, %cst_53 {dimension_numbers = #tpu.dot_dimension_numbers<[1], [0], [0], [1], [0, 0, 1, 1], [], []>} : vector<12x128xbf16>, vector<128x128xbf16>, vector<12x128xf32> -> vector<12x128xf32>
    %78 = arith.addf %74, %77 : vector<12x128xf32>
    %c84 = arith.constant 84 : index
    %c0_54 = arith.constant 0 : index
    %79 = vector.load %arg16[%c84, %c0_54] : memref<392x128xbf16, #tpu.memory_space<vmem>>, vector<12x128xbf16>
    %c1536 = arith.constant 1536 : index
    %c0_55 = arith.constant 0 : index
    %80 = vector.load %arg5[%c1536, %c0_55] : memref<2048x128xbf16, #tpu.memory_space<vmem>>, vector<128x128xbf16>
    %cst_56 = arith.constant dense<0.000000e+00> : vector<12x128xf32>
    %81 = tpu.matmul %79, %80, %cst_56 {dimension_numbers = #tpu.dot_dimension_numbers<[1], [0], [0], [1], [0, 0, 1, 1], [], []>} : vector<12x128xbf16>, vector<128x128xbf16>, vector<12x128xf32> -> vector<12x128xf32>
    %82 = arith.addf %78, %81 : vector<12x128xf32>
    %c98 = arith.constant 98 : index
    %c0_57 = arith.constant 0 : index
    %83 = vector.load %arg16[%c98, %c0_57] : memref<392x128xbf16, #tpu.memory_space<vmem>>, vector<12x128xbf16>
    %c1664 = arith.constant 1664 : index
    %c0_58 = arith.constant 0 : index
    %84 = vector.load %arg5[%c1664, %c0_58] : memref<2048x128xbf16, #tpu.memory_space<vmem>>, vector<128x128xbf16>
    %cst_59 = arith.constant dense<0.000000e+00> : vector<12x128xf32>
    %85 = tpu.matmul %83, %84, %cst_59 {dimension_numbers = #tpu.dot_dimension_numbers<[1], [0], [0], [1], [0, 0, 1, 1], [], []>} : vector<12x128xbf16>, vector<128x128xbf16>, vector<12x128xf32> -> vector<12x128xf32>
    %86 = arith.addf %82, %85 : vector<12x128xf32>
    %c86 = arith.constant 86 : index
    %c0_60 = arith.constant 0 : index
    %87 = vector.load %arg16[%c86, %c0_60] : memref<392x128xbf16, #tpu.memory_space<vmem>>, vector<12x128xbf16>
    %c1792 = arith.constant 1792 : index
    %c0_61 = arith.constant 0 : index
    %88 = vector.load %arg5[%c1792, %c0_61] : memref<2048x128xbf16, #tpu.memory_space<vmem>>, vector<128x128xbf16>
    %cst_62 = arith.constant dense<0.000000e+00> : vector<12x128xf32>
    %89 = tpu.matmul %87, %88, %cst_62 {dimension_numbers = #tpu.dot_dimension_numbers<[1], [0], [0], [1], [0, 0, 1, 1], [], []>} : vector<12x128xbf16>, vector<128x128xbf16>, vector<12x128xf32> -> vector<12x128xf32>
    %90 = arith.addf %86, %89 : vector<12x128xf32>
    %c100 = arith.constant 100 : index
    %c0_63 = arith.constant 0 : index
    %91 = vector.load %arg16[%c100, %c0_63] : memref<392x128xbf16, #tpu.memory_space<vmem>>, vector<12x128xbf16>
    %c1920 = arith.constant 1920 : index
    %c0_64 = arith.constant 0 : index
    %92 = vector.load %arg5[%c1920, %c0_64] : memref<2048x128xbf16, #tpu.memory_space<vmem>>, vector<128x128xbf16>
    %cst_65 = arith.constant dense<0.000000e+00> : vector<12x128xf32>
    %93 = tpu.matmul %91, %92, %cst_65 {dimension_numbers = #tpu.dot_dimension_numbers<[1], [0], [0], [1], [0, 0, 1, 1], [], []>} : vector<12x128xbf16>, vector<128x128xbf16>, vector<12x128xf32> -> vector<12x128xf32>
    %94 = arith.addf %90, %93 : vector<12x128xf32>
    %cst_66 = arith.constant 0.000000e+00 : f32
    %95 = vector.broadcast %cst_66 : f32 to vector<12x128xf32>
    %c56_67 = arith.constant 56 : index
    %c0_68 = arith.constant 0 : index
    %96 = vector.load %arg16[%c56_67, %c0_68] : memref<392x128xbf16, #tpu.memory_space<vmem>>, vector<12x128xbf16>
    %c0_69 = arith.constant 0 : index
    %c0_70 = arith.constant 0 : index
    %97 = vector.load %arg5[%c0_69, %c0_70] : memref<2048x128xbf16, #tpu.memory_space<vmem>>, vector<128x128xbf16>
    %cst_71 = arith.constant dense<0.000000e+00> : vector<12x128xf32>
    %98 = tpu.matmul %96, %97, %cst_71 {dimension_numbers = #tpu.dot_dimension_numbers<[1], [0], [0], [1], [0, 0, 1, 1], [], []>} : vector<12x128xbf16>, vector<128x128xbf16>, vector<12x128xf32> -> vector<12x128xf32>
    %99 = arith.addf %95, %98 : vector<12x128xf32>
    %c70_72 = arith.constant 70 : index
    %c0_73 = arith.constant 0 : index
    %100 = vector.load %arg16[%c70_72, %c0_73] : memref<392x128xbf16, #tpu.memory_space<vmem>>, vector<12x128xbf16>
    %c128_74 = arith.constant 128 : index
    %c0_75 = arith.constant 0 : index
    %101 = vector.load %arg5[%c128_74, %c0_75] : memref<2048x128xbf16, #tpu.memory_space<vmem>>, vector<128x128xbf16>
    %cst_76 = arith.constant dense<0.000000e+00> : vector<12x128xf32>
    %102 = tpu.matmul %100, %101, %cst_76 {dimension_numbers = #tpu.dot_dimension_numbers<[1], [0], [0], [1], [0, 0, 1, 1], [], []>} : vector<12x128xbf16>, vector<128x128xbf16>, vector<12x128xf32> -> vector<12x128xf32>
    %103 = arith.addf %99, %102 : vector<12x128xf32>
    %c58_77 = arith.constant 58 : index
    %c0_78 = arith.constant 0 : index
    %104 = vector.load %arg16[%c58_77, %c0_78] : memref<392x128xbf16, #tpu.memory_space<vmem>>, vector<12x128xbf16>
    %c256_79 = arith.constant 256 : index
    %c0_80 = arith.constant 0 : index
    %105 = vector.load %arg5[%c256_79, %c0_80] : memref<2048x128xbf16, #tpu.memory_space<vmem>>, vector<128x128xbf16>
    %cst_81 = arith.constant dense<0.000000e+00> : vector<12x128xf32>
    %106 = tpu.matmul %104, %105, %cst_81 {dimension_numbers = #tpu.dot_dimension_numbers<[1], [0], [0], [1], [0, 0, 1, 1], [], []>} : vector<12x128xbf16>, vector<128x128xbf16>, vector<12x128xf32> -> vector<12x128xf32>
    %107 = arith.addf %103, %106 : vector<12x128xf32>
    %c72_82 = arith.constant 72 : index
    %c0_83 = arith.constant 0 : index
    %108 = vector.load %arg16[%c72_82, %c0_83] : memref<392x128xbf16, #tpu.memory_space<vmem>>, vector<12x128xbf16>
    %c384_84 = arith.constant 384 : index
    %c0_85 = arith.constant 0 : index
    %109 = vector.load %arg5[%c384_84, %c0_85] : memref<2048x128xbf16, #tpu.memory_space<vmem>>, vector<128x128xbf16>
    %cst_86 = arith.constant dense<0.000000e+00> : vector<12x128xf32>
    %110 = tpu.matmul %108, %109, %cst_86 {dimension_numbers = #tpu.dot_dimension_numbers<[1], [0], [0], [1], [0, 0, 1, 1], [], []>} : vector<12x128xbf16>, vector<128x128xbf16>, vector<12x128xf32> -> vector<12x128xf32>
    %111 = arith.addf %107, %110 : vector<12x128xf32>
    %c84_87 = arith.constant 84 : index
    %c0_88 = arith.constant 0 : index
    %112 = vector.load %arg16[%c84_87, %c0_88] : memref<392x128xbf16, #tpu.memory_space<vmem>>, vector<12x128xbf16>
    %c512_89 = arith.constant 512 : index
    %c0_90 = arith.constant 0 : index
    %113 = vector.load %arg5[%c512_89, %c0_90] : memref<2048x128xbf16, #tpu.memory_space<vmem>>, vector<128x128xbf16>
    %cst_91 = arith.constant dense<0.000000e+00> : vector<12x128xf32>
    %114 = tpu.matmul %112, %113, %cst_91 {dimension_numbers = #tpu.dot_dimension_numbers<[1], [0], [0], [1], [0, 0, 1, 1], [], []>} : vector<12x128xbf16>, vector<128x128xbf16>, vector<12x128xf32> -> vector<12x128xf32>
    %115 = arith.addf %111, %114 : vector<12x128xf32>
    %c98_92 = arith.constant 98 : index
    %c0_93 = arith.constant 0 : index
    %116 = vector.load %arg16[%c98_92, %c0_93] : memref<392x128xbf16, #tpu.memory_space<vmem>>, vector<12x128xbf16>
    %c640_94 = arith.constant 640 : index
    %c0_95 = arith.constant 0 : index
    %117 = vector.load %arg5[%c640_94, %c0_95] : memref<2048x128xbf16, #tpu.memory_space<vmem>>, vector<128x128xbf16>
    %cst_96 = arith.constant dense<0.000000e+00> : vector<12x128xf32>
    %118 = tpu.matmul %116, %117, %cst_96 {dimension_numbers = #tpu.dot_dimension_numbers<[1], [0], [0], [1], [0, 0, 1, 1], [], []>} : vector<12x128xbf16>, vector<128x128xbf16>, vector<12x128xf32> -> vector<12x128xf32>
    %119 = arith.addf %115, %118 : vector<12x128xf32>
    %c86_97 = arith.constant 86 : index
    %c0_98 = arith.constant 0 : index
    %120 = vector.load %arg16[%c86_97, %c0_98] : memref<392x128xbf16, #tpu.memory_space<vmem>>, vector<12x128xbf16>
    %c768_99 = arith.constant 768 : index
    %c0_100 = arith.constant 0 : index
    %121 = vector.load %arg5[%c768_99, %c0_100] : memref<2048x128xbf16, #tpu.memory_space<vmem>>, vector<128x128xbf16>
    %cst_101 = arith.constant dense<0.000000e+00> : vector<12x128xf32>
    %122 = tpu.matmul %120, %121, %cst_101 {dimension_numbers = #tpu.dot_dimension_numbers<[1], [0], [0], [1], [0, 0, 1, 1], [], []>} : vector<12x128xbf16>, vector<128x128xbf16>, vector<12x128xf32> -> vector<12x128xf32>
    %123 = arith.addf %119, %122 : vector<12x128xf32>
    %c100_102 = arith.constant 100 : index
    %c0_103 = arith.constant 0 : index
    %124 = vector.load %arg16[%c100_102, %c0_103] : memref<392x128xbf16, #tpu.memory_space<vmem>>, vector<12x128xbf16>
    %c896_104 = arith.constant 896 : index
    %c0_105 = arith.constant 0 : index
    %125 = vector.load %arg5[%c896_104, %c0_105] : memref<2048x128xbf16, #tpu.memory_space<vmem>>, vector<128x128xbf16>
    %cst_106 = arith.constant dense<0.000000e+00> : vector<12x128xf32>
    %126 = tpu.matmul %124, %125, %cst_106 {dimension_numbers = #tpu.dot_dimension_numbers<[1], [0], [0], [1], [0, 0, 1, 1], [], []>} : vector<12x128xbf16>, vector<128x128xbf16>, vector<12x128xf32> -> vector<12x128xf32>
    %127 = arith.addf %123, %126 : vector<12x128xf32>
    %c112 = arith.constant 112 : index
    %c0_107 = arith.constant 0 : index
    %128 = vector.load %arg16[%c112, %c0_107] : memref<392x128xbf16, #tpu.memory_space<vmem>>, vector<12x128xbf16>
    %c1024_108 = arith.constant 1024 : index
    %c0_109 = arith.constant 0 : index
    %129 = vector.load %arg5[%c1024_108, %c0_109] : memref<2048x128xbf16, #tpu.memory_space<vmem>>, vector<128x128xbf16>
    %cst_110 = arith.constant dense<0.000000e+00> : vector<12x128xf32>
    %130 = tpu.matmul %128, %129, %cst_110 {dimension_numbers = #tpu.dot_dimension_numbers<[1], [0], [0], [1], [0, 0, 1, 1], [], []>} : vector<12x128xbf16>, vector<128x128xbf16>, vector<12x128xf32> -> vector<12x128xf32>
    %131 = arith.addf %127, %130 : vector<12x128xf32>
    %c126 = arith.constant 126 : index
    %c0_111 = arith.constant 0 : index
    %132 = vector.load %arg16[%c126, %c0_111] : memref<392x128xbf16, #tpu.memory_space<vmem>>, vector<12x128xbf16>
    %c1152_112 = arith.constant 1152 : index
    %c0_113 = arith.constant 0 : index
    %133 = vector.load %arg5[%c1152_112, %c0_113] : memref<2048x128xbf16, #tpu.memory_space<vmem>>, vector<128x128xbf16>
    %cst_114 = arith.constant dense<0.000000e+00> : vector<12x128xf32>
    %134 = tpu.matmul %132, %133, %cst_114 {dimension_numbers = #tpu.dot_dimension_numbers<[1], [0], [0], [1], [0, 0, 1, 1], [], []>} : vector<12x128xbf16>, vector<128x128xbf16>, vector<12x128xf32> -> vector<12x128xf32>
    %135 = arith.addf %131, %134 : vector<12x128xf32>
    %c114 = arith.constant 114 : index
    %c0_115 = arith.constant 0 : index
    %136 = vector.load %arg16[%c114, %c0_115] : memref<392x128xbf16, #tpu.memory_space<vmem>>, vector<12x128xbf16>
    %c1280_116 = arith.constant 1280 : index
    %c0_117 = arith.constant 0 : index
    %137 = vector.load %arg5[%c1280_116, %c0_117] : memref<2048x128xbf16, #tpu.memory_space<vmem>>, vector<128x128xbf16>
    %cst_118 = arith.constant dense<0.000000e+00> : vector<12x128xf32>
    %138 = tpu.matmul %136, %137, %cst_118 {dimension_numbers = #tpu.dot_dimension_numbers<[1], [0], [0], [1], [0, 0, 1, 1], [], []>} : vector<12x128xbf16>, vector<128x128xbf16>, vector<12x128xf32> -> vector<12x128xf32>
    %139 = arith.addf %135, %138 : vector<12x128xf32>
    %c128_119 = arith.constant 128 : index
    %c0_120 = arith.constant 0 : index
    %140 = vector.load %arg16[%c128_119, %c0_120] : memref<392x128xbf16, #tpu.memory_space<vmem>>, vector<12x128xbf16>
    %c1408_121 = arith.constant 1408 : index
    %c0_122 = arith.constant 0 : index
    %141 = vector.load %arg5[%c1408_121, %c0_122] : memref<2048x128xbf16, #tpu.memory_space<vmem>>, vector<128x128xbf16>
    %cst_123 = arith.constant dense<0.000000e+00> : vector<12x128xf32>
    %142 = tpu.matmul %140, %141, %cst_123 {dimension_numbers = #tpu.dot_dimension_numbers<[1], [0], [0], [1], [0, 0, 1, 1], [], []>} : vector<12x128xbf16>, vector<128x128xbf16>, vector<12x128xf32> -> vector<12x128xf32>
    %143 = arith.addf %139, %142 : vector<12x128xf32>
    %c140 = arith.constant 140 : index
    %c0_124 = arith.constant 0 : index
    %144 = vector.load %arg16[%c140, %c0_124] : memref<392x128xbf16, #tpu.memory_space<vmem>>, vector<12x128xbf16>
    %c1536_125 = arith.constant 1536 : index
    %c0_126 = arith.constant 0 : index
    %145 = vector.load %arg5[%c1536_125, %c0_126] : memref<2048x128xbf16, #tpu.memory_space<vmem>>, vector<128x128xbf16>
    %cst_127 = arith.constant dense<0.000000e+00> : vector<12x128xf32>
    %146 = tpu.matmul %144, %145, %cst_127 {dimension_numbers = #tpu.dot_dimension_numbers<[1], [0], [0], [1], [0, 0, 1, 1], [], []>} : vector<12x128xbf16>, vector<128x128xbf16>, vector<12x128xf32> -> vector<12x128xf32>
    %147 = arith.addf %143, %146 : vector<12x128xf32>
    %c154 = arith.constant 154 : index
    %c0_128 = arith.constant 0 : index
    %148 = vector.load %arg16[%c154, %c0_128] : memref<392x128xbf16, #tpu.memory_space<vmem>>, vector<12x128xbf16>
    %c1664_129 = arith.constant 1664 : index
    %c0_130 = arith.constant 0 : index
    %149 = vector.load %arg5[%c1664_129, %c0_130] : memref<2048x128xbf16, #tpu.memory_space<vmem>>, vector<128x128xbf16>
    %cst_131 = arith.constant dense<0.000000e+00> : vector<12x128xf32>
    %150 = tpu.matmul %148, %149, %cst_131 {dimension_numbers = #tpu.dot_dimension_numbers<[1], [0], [0], [1], [0, 0, 1, 1], [], []>} : vector<12x128xbf16>, vector<128x128xbf16>, vector<12x128xf32> -> vector<12x128xf32>
    %151 = arith.addf %147, %150 : vector<12x128xf32>
    %c142 = arith.constant 142 : index
    %c0_132 = arith.constant 0 : index
    %152 = vector.load %arg16[%c142, %c0_132] : memref<392x128xbf16, #tpu.memory_space<vmem>>, vector<12x128xbf16>
    %c1792_133 = arith.constant 1792 : index
    %c0_134 = arith.constant 0 : index
    %153 = vector.load %arg5[%c1792_133, %c0_134] : memref<2048x128xbf16, #tpu.memory_space<vmem>>, vector<128x128xbf16>
    %cst_135 = arith.constant dense<0.000000e+00> : vector<12x128xf32>
    %154 = tpu.matmul %152, %153, %cst_135 {dimension_numbers = #tpu.dot_dimension_numbers<[1], [0], [0], [1], [0, 0, 1, 1], [], []>} : vector<12x128xbf16>, vector<128x128xbf16>, vector<12x128xf32> -> vector<12x128xf32>
    %155 = arith.addf %151, %154 : vector<12x128xf32>
    %c156 = arith.constant 156 : index
    %c0_136 = arith.constant 0 : index
    %156 = vector.load %arg16[%c156, %c0_136] : memref<392x128xbf16, #tpu.memory_space<vmem>>, vector<12x128xbf16>
    %c1920_137 = arith.constant 1920 : index
    %c0_138 = arith.constant 0 : index
    %157 = vector.load %arg5[%c1920_137, %c0_138] : memref<2048x128xbf16, #tpu.memory_space<vmem>>, vector<128x128xbf16>
    %cst_139 = arith.constant dense<0.000000e+00> : vector<12x128xf32>
    %158 = tpu.matmul %156, %157, %cst_139 {dimension_numbers = #tpu.dot_dimension_numbers<[1], [0], [0], [1], [0, 0, 1, 1], [], []>} : vector<12x128xbf16>, vector<128x128xbf16>, vector<12x128xf32> -> vector<12x128xf32>
    %159 = arith.addf %155, %158 : vector<12x128xf32>
    %cst_140 = arith.constant 0.000000e+00 : f32
    %160 = vector.broadcast %cst_140 : f32 to vector<12x128xf32>
    %c112_141 = arith.constant 112 : index
    %c0_142 = arith.constant 0 : index
    %161 = vector.load %arg16[%c112_141, %c0_142] : memref<392x128xbf16, #tpu.memory_space<vmem>>, vector<12x128xbf16>
    %c0_143 = arith.constant 0 : index
    %c0_144 = arith.constant 0 : index
    %162 = vector.load %arg5[%c0_143, %c0_144] : memref<2048x128xbf16, #tpu.memory_space<vmem>>, vector<128x128xbf16>
    %cst_145 = arith.constant dense<0.000000e+00> : vector<12x128xf32>
    %163 = tpu.matmul %161, %162, %cst_145 {dimension_numbers = #tpu.dot_dimension_numbers<[1], [0], [0], [1], [0, 0, 1, 1], [], []>} : vector<12x128xbf16>, vector<128x128xbf16>, vector<12x128xf32> -> vector<12x128xf32>
    %164 = arith.addf %160, %163 : vector<12x128xf32>
    %c126_146 = arith.constant 126 : index
    %c0_147 = arith.constant 0 : index
    %165 = vector.load %arg16[%c126_146, %c0_147] : memref<392x128xbf16, #tpu.memory_space<vmem>>, vector<12x128xbf16>
    %c128_148 = arith.constant 128 : index
    %c0_149 = arith.constant 0 : index
    %166 = vector.load %arg5[%c128_148, %c0_149] : memref<2048x128xbf16, #tpu.memory_space<vmem>>, vector<128x128xbf16>
    %cst_150 = arith.constant dense<0.000000e+00> : vector<12x128xf32>
    %167 = tpu.matmul %165, %166, %cst_150 {dimension_numbers = #tpu.dot_dimension_numbers<[1], [0], [0], [1], [0, 0, 1, 1], [], []>} : vector<12x128xbf16>, vector<128x128xbf16>, vector<12x128xf32> -> vector<12x128xf32>
    %168 = arith.addf %164, %167 : vector<12x128xf32>
    %c114_151 = arith.constant 114 : index
    %c0_152 = arith.constant 0 : index
    %169 = vector.load %arg16[%c114_151, %c0_152] : memref<392x128xbf16, #tpu.memory_space<vmem>>, vector<12x128xbf16>
    %c256_153 = arith.constant 256 : index
    %c0_154 = arith.constant 0 : index
    %170 = vector.load %arg5[%c256_153, %c0_154] : memref<2048x128xbf16, #tpu.memory_space<vmem>>, vector<128x128xbf16>
    %cst_155 = arith.constant dense<0.000000e+00> : vector<12x128xf32>
    %171 = tpu.matmul %169, %170, %cst_155 {dimension_numbers = #tpu.dot_dimension_numbers<[1], [0], [0], [1], [0, 0, 1, 1], [], []>} : vector<12x128xbf16>, vector<128x128xbf16>, vector<12x128xf32> -> vector<12x128xf32>
    %172 = arith.addf %168, %171 : vector<12x128xf32>
    %c128_156 = arith.constant 128 : index
    %c0_157 = arith.constant 0 : index
    %173 = vector.load %arg16[%c128_156, %c0_157] : memref<392x128xbf16, #tpu.memory_space<vmem>>, vector<12x128xbf16>
    %c384_158 = arith.constant 384 : index
    %c0_159 = arith.constant 0 : index
    %174 = vector.load %arg5[%c384_158, %c0_159] : memref<2048x128xbf16, #tpu.memory_space<vmem>>, vector<128x128xbf16>
    %cst_160 = arith.constant dense<0.000000e+00> : vector<12x128xf32>
    %175 = tpu.matmul %173, %174, %cst_160 {dimension_numbers = #tpu.dot_dimension_numbers<[1], [0], [0], [1], [0, 0, 1, 1], [], []>} : vector<12x128xbf16>, vector<128x128xbf16>, vector<12x128xf32> -> vector<12x128xf32>
    %176 = arith.addf %172, %175 : vector<12x128xf32>
    %c140_161 = arith.constant 140 : index
    %c0_162 = arith.constant 0 : index
    %177 = vector.load %arg16[%c140_161, %c0_162] : memref<392x128xbf16, #tpu.memory_space<vmem>>, vector<12x128xbf16>
    %c512_163 = arith.constant 512 : index
    %c0_164 = arith.constant 0 : index
    %178 = vector.load %arg5[%c512_163, %c0_164] : memref<2048x128xbf16, #tpu.memory_space<vmem>>, vector<128x128xbf16>
    %cst_165 = arith.constant dense<0.000000e+00> : vector<12x128xf32>
    %179 = tpu.matmul %177, %178, %cst_165 {dimension_numbers = #tpu.dot_dimension_numbers<[1], [0], [0], [1], [0, 0, 1, 1], [], []>} : vector<12x128xbf16>, vector<128x128xbf16>, vector<12x128xf32> -> vector<12x128xf32>
    %180 = arith.addf %176, %179 : vector<12x128xf32>
    %c154_166 = arith.constant 154 : index
    %c0_167 = arith.constant 0 : index
    %181 = vector.load %arg16[%c154_166, %c0_167] : memref<392x128xbf16, #tpu.memory_space<vmem>>, vector<12x128xbf16>
    %c640_168 = arith.constant 640 : index
    %c0_169 = arith.constant 0 : index
    %182 = vector.load %arg5[%c640_168, %c0_169] : memref<2048x128xbf16, #tpu.memory_space<vmem>>, vector<128x128xbf16>
    %cst_170 = arith.constant dense<0.000000e+00> : vector<12x128xf32>
    %183 = tpu.matmul %181, %182, %cst_170 {dimension_numbers = #tpu.dot_dimension_numbers<[1], [0], [0], [1], [0, 0, 1, 1], [], []>} : vector<12x128xbf16>, vector<128x128xbf16>, vector<12x128xf32> -> vector<12x128xf32>
    %184 = arith.addf %180, %183 : vector<12x128xf32>
    %c142_171 = arith.constant 142 : index
    %c0_172 = arith.constant 0 : index
    %185 = vector.load %arg16[%c142_171, %c0_172] : memref<392x128xbf16, #tpu.memory_space<vmem>>, vector<12x128xbf16>
    %c768_173 = arith.constant 768 : index
    %c0_174 = arith.constant 0 : index
    %186 = vector.load %arg5[%c768_173, %c0_174] : memref<2048x128xbf16, #tpu.memory_space<vmem>>, vector<128x128xbf16>
    %cst_175 = arith.constant dense<0.000000e+00> : vector<12x128xf32>
    %187 = tpu.matmul %185, %186, %cst_175 {dimension_numbers = #tpu.dot_dimension_numbers<[1], [0], [0], [1], [0, 0, 1, 1], [], []>} : vector<12x128xbf16>, vector<128x128xbf16>, vector<12x128xf32> -> vector<12x128xf32>
    %188 = arith.addf %184, %187 : vector<12x128xf32>
    %c156_176 = arith.constant 156 : index
    %c0_177 = arith.constant 0 : index
    %189 = vector.load %arg16[%c156_176, %c0_177] : memref<392x128xbf16, #tpu.memory_space<vmem>>, vector<12x128xbf16>
    %c896_178 = arith.constant 896 : index
    %c0_179 = arith.constant 0 : index
    %190 = vector.load %arg5[%c896_178, %c0_179] : memref<2048x128xbf16, #tpu.memory_space<vmem>>, vector<128x128xbf16>
    %cst_180 = arith.constant dense<0.000000e+00> : vector<12x128xf32>
    %191 = tpu.matmul %189, %190, %cst_180 {dimension_numbers = #tpu.dot_dimension_numbers<[1], [0], [0], [1], [0, 0, 1, 1], [], []>} : vector<12x128xbf16>, vector<128x128xbf16>, vector<12x128xf32> -> vector<12x128xf32>
    %192 = arith.addf %188, %191 : vector<12x128xf32>
    %c168 = arith.constant 168 : index
    %c0_181 = arith.constant 0 : index
    %193 = vector.load %arg16[%c168, %c0_181] : memref<392x128xbf16, #tpu.memory_space<vmem>>, vector<12x128xbf16>
    %c1024_182 = arith.constant 1024 : index
    %c0_183 = arith.constant 0 : index
    %194 = vector.load %arg5[%c1024_182, %c0_183] : memref<2048x128xbf16, #tpu.memory_space<vmem>>, vector<128x128xbf16>
    %cst_184 = arith.constant dense<0.000000e+00> : vector<12x128xf32>
    %195 = tpu.matmul %193, %194, %cst_184 {dimension_numbers = #tpu.dot_dimension_numbers<[1], [0], [0], [1], [0, 0, 1, 1], [], []>} : vector<12x128xbf16>, vector<128x128xbf16>, vector<12x128xf32> -> vector<12x128xf32>
    %196 = arith.addf %192, %195 : vector<12x128xf32>
    %c182 = arith.constant 182 : index
    %c0_185 = arith.constant 0 : index
    %197 = vector.load %arg16[%c182, %c0_185] : memref<392x128xbf16, #tpu.memory_space<vmem>>, vector<12x128xbf16>
    %c1152_186 = arith.constant 1152 : index
    %c0_187 = arith.constant 0 : index
    %198 = vector.load %arg5[%c1152_186, %c0_187] : memref<2048x128xbf16, #tpu.memory_space<vmem>>, vector<128x128xbf16>
    %cst_188 = arith.constant dense<0.000000e+00> : vector<12x128xf32>
    %199 = tpu.matmul %197, %198, %cst_188 {dimension_numbers = #tpu.dot_dimension_numbers<[1], [0], [0], [1], [0, 0, 1, 1], [], []>} : vector<12x128xbf16>, vector<128x128xbf16>, vector<12x128xf32> -> vector<12x128xf32>
    %200 = arith.addf %196, %199 : vector<12x128xf32>
    %c170 = arith.constant 170 : index
    %c0_189 = arith.constant 0 : index
    %201 = vector.load %arg16[%c170, %c0_189] : memref<392x128xbf16, #tpu.memory_space<vmem>>, vector<12x128xbf16>
    %c1280_190 = arith.constant 1280 : index
    %c0_191 = arith.constant 0 : index
    %202 = vector.load %arg5[%c1280_190, %c0_191] : memref<2048x128xbf16, #tpu.memory_space<vmem>>, vector<128x128xbf16>
    %cst_192 = arith.constant dense<0.000000e+00> : vector<12x128xf32>
    %203 = tpu.matmul %201, %202, %cst_192 {dimension_numbers = #tpu.dot_dimension_numbers<[1], [0], [0], [1], [0, 0, 1, 1], [], []>} : vector<12x128xbf16>, vector<128x128xbf16>, vector<12x128xf32> -> vector<12x128xf32>
    %204 = arith.addf %200, %203 : vector<12x128xf32>
    %c184 = arith.constant 184 : index
    %c0_193 = arith.constant 0 : index
    %205 = vector.load %arg16[%c184, %c0_193] : memref<392x128xbf16, #tpu.memory_space<vmem>>, vector<12x128xbf16>
    %c1408_194 = arith.constant 1408 : index
    %c0_195 = arith.constant 0 : index
    %206 = vector.load %arg5[%c1408_194, %c0_195] : memref<2048x128xbf16, #tpu.memory_space<vmem>>, vector<128x128xbf16>
    %cst_196 = arith.constant dense<0.000000e+00> : vector<12x128xf32>
    %207 = tpu.matmul %205, %206, %cst_196 {dimension_numbers = #tpu.dot_dimension_numbers<[1], [0], [0], [1], [0, 0, 1, 1], [], []>} : vector<12x128xbf16>, vector<128x128xbf16>, vector<12x128xf32> -> vector<12x128xf32>
    %208 = arith.addf %204, %207 : vector<12x128xf32>
    %c196 = arith.constant 196 : index
    %c0_197 = arith.constant 0 : index
    %209 = vector.load %arg16[%c196, %c0_197] : memref<392x128xbf16, #tpu.memory_space<vmem>>, vector<12x128xbf16>
    %c1536_198 = arith.constant 1536 : index
    %c0_199 = arith.constant 0 : index
    %210 = vector.load %arg5[%c1536_198, %c0_199] : memref<2048x128xbf16, #tpu.memory_space<vmem>>, vector<128x128xbf16>
    %cst_200 = arith.constant dense<0.000000e+00> : vector<12x128xf32>
    %211 = tpu.matmul %209, %210, %cst_200 {dimension_numbers = #tpu.dot_dimension_numbers<[1], [0], [0], [1], [0, 0, 1, 1], [], []>} : vector<12x128xbf16>, vector<128x128xbf16>, vector<12x128xf32> -> vector<12x128xf32>
    %212 = arith.addf %208, %211 : vector<12x128xf32>
    %c210 = arith.constant 210 : index
    %c0_201 = arith.constant 0 : index
    %213 = vector.load %arg16[%c210, %c0_201] : memref<392x128xbf16, #tpu.memory_space<vmem>>, vector<12x128xbf16>
    %c1664_202 = arith.constant 1664 : index
    %c0_203 = arith.constant 0 : index
    %214 = vector.load %arg5[%c1664_202, %c0_203] : memref<2048x128xbf16, #tpu.memory_space<vmem>>, vector<128x128xbf16>
    %cst_204 = arith.constant dense<0.000000e+00> : vector<12x128xf32>
    %215 = tpu.matmul %213, %214, %cst_204 {dimension_numbers = #tpu.dot_dimension_numbers<[1], [0], [0], [1], [0, 0, 1, 1], [], []>} : vector<12x128xbf16>, vector<128x128xbf16>, vector<12x128xf32> -> vector<12x128xf32>
    %216 = arith.addf %212, %215 : vector<12x128xf32>
    %c198 = arith.constant 198 : index
    %c0_205 = arith.constant 0 : index
    %217 = vector.load %arg16[%c198, %c0_205] : memref<392x128xbf16, #tpu.memory_space<vmem>>, vector<12x128xbf16>
    %c1792_206 = arith.constant 1792 : index
    %c0_207 = arith.constant 0 : index
    %218 = vector.load %arg5[%c1792_206, %c0_207] : memref<2048x128xbf16, #tpu.memory_space<vmem>>, vector<128x128xbf16>
    %cst_208 = arith.constant dense<0.000000e+00> : vector<12x128xf32>
    %219 = tpu.matmul %217, %218, %cst_208 {dimension_numbers = #tpu.dot_dimension_numbers<[1], [0], [0], [1], [0, 0, 1, 1], [], []>} : vector<12x128xbf16>, vector<128x128xbf16>, vector<12x128xf32> -> vector<12x128xf32>
    %220 = arith.addf %216, %219 : vector<12x128xf32>
    %c212 = arith.constant 212 : index
    %c0_209 = arith.constant 0 : index
    %221 = vector.load %arg16[%c212, %c0_209] : memref<392x128xbf16, #tpu.memory_space<vmem>>, vector<12x128xbf16>
    %c1920_210 = arith.constant 1920 : index
    %c0_211 = arith.constant 0 : index
    %222 = vector.load %arg5[%c1920_210, %c0_211] : memref<2048x128xbf16, #tpu.memory_space<vmem>>, vector<128x128xbf16>
    %cst_212 = arith.constant dense<0.000000e+00> : vector<12x128xf32>
    %223 = tpu.matmul %221, %222, %cst_212 {dimension_numbers = #tpu.dot_dimension_numbers<[1], [0], [0], [1], [0, 0, 1, 1], [], []>} : vector<12x128xbf16>, vector<128x128xbf16>, vector<12x128xf32> -> vector<12x128xf32>
    %224 = arith.addf %220, %223 : vector<12x128xf32>
    %cst_213 = arith.constant 0.000000e+00 : f32
    %225 = vector.broadcast %cst_213 : f32 to vector<12x128xf32>
    %c168_214 = arith.constant 168 : index
    %c0_215 = arith.constant 0 : index
    %226 = vector.load %arg16[%c168_214, %c0_215] : memref<392x128xbf16, #tpu.memory_space<vmem>>, vector<12x128xbf16>
    %c0_216 = arith.constant 0 : index
    %c0_217 = arith.constant 0 : index
    %227 = vector.load %arg5[%c0_216, %c0_217] : memref<2048x128xbf16, #tpu.memory_space<vmem>>, vector<128x128xbf16>
    %cst_218 = arith.constant dense<0.000000e+00> : vector<12x128xf32>
    %228 = tpu.matmul %226, %227, %cst_218 {dimension_numbers = #tpu.dot_dimension_numbers<[1], [0], [0], [1], [0, 0, 1, 1], [], []>} : vector<12x128xbf16>, vector<128x128xbf16>, vector<12x128xf32> -> vector<12x128xf32>
    %229 = arith.addf %225, %228 : vector<12x128xf32>
    %c182_219 = arith.constant 182 : index
    %c0_220 = arith.constant 0 : index
    %230 = vector.load %arg16[%c182_219, %c0_220] : memref<392x128xbf16, #tpu.memory_space<vmem>>, vector<12x128xbf16>
    %c128_221 = arith.constant 128 : index
    %c0_222 = arith.constant 0 : index
    %231 = vector.load %arg5[%c128_221, %c0_222] : memref<2048x128xbf16, #tpu.memory_space<vmem>>, vector<128x128xbf16>
    %cst_223 = arith.constant dense<0.000000e+00> : vector<12x128xf32>
    %232 = tpu.matmul %230, %231, %cst_223 {dimension_numbers = #tpu.dot_dimension_numbers<[1], [0], [0], [1], [0, 0, 1, 1], [], []>} : vector<12x128xbf16>, vector<128x128xbf16>, vector<12x128xf32> -> vector<12x128xf32>
    %233 = arith.addf %229, %232 : vector<12x128xf32>
    %c170_224 = arith.constant 170 : index
    %c0_225 = arith.constant 0 : index
    %234 = vector.load %arg16[%c170_224, %c0_225] : memref<392x128xbf16, #tpu.memory_space<vmem>>, vector<12x128xbf16>
    %c256_226 = arith.constant 256 : index
    %c0_227 = arith.constant 0 : index
    %235 = vector.load %arg5[%c256_226, %c0_227] : memref<2048x128xbf16, #tpu.memory_space<vmem>>, vector<128x128xbf16>
    %cst_228 = arith.constant dense<0.000000e+00> : vector<12x128xf32>
    %236 = tpu.matmul %234, %235, %cst_228 {dimension_numbers = #tpu.dot_dimension_numbers<[1], [0], [0], [1], [0, 0, 1, 1], [], []>} : vector<12x128xbf16>, vector<128x128xbf16>, vector<12x128xf32> -> vector<12x128xf32>
    %237 = arith.addf %233, %236 : vector<12x128xf32>
    %c184_229 = arith.constant 184 : index
    %c0_230 = arith.constant 0 : index
    %238 = vector.load %arg16[%c184_229, %c0_230] : memref<392x128xbf16, #tpu.memory_space<vmem>>, vector<12x128xbf16>
    %c384_231 = arith.constant 384 : index
    %c0_232 = arith.constant 0 : index
    %239 = vector.load %arg5[%c384_231, %c0_232] : memref<2048x128xbf16, #tpu.memory_space<vmem>>, vector<128x128xbf16>
    %cst_233 = arith.constant dense<0.000000e+00> : vector<12x128xf32>
    %240 = tpu.matmul %238, %239, %cst_233 {dimension_numbers = #tpu.dot_dimension_numbers<[1], [0], [0], [1], [0, 0, 1, 1], [], []>} : vector<12x128xbf16>, vector<128x128xbf16>, vector<12x128xf32> -> vector<12x128xf32>
    %241 = arith.addf %237, %240 : vector<12x128xf32>
    %c196_234 = arith.constant 196 : index
    %c0_235 = arith.constant 0 : index
    %242 = vector.load %arg16[%c196_234, %c0_235] : memref<392x128xbf16, #tpu.memory_space<vmem>>, vector<12x128xbf16>
    %c512_236 = arith.constant 512 : index
    %c0_237 = arith.constant 0 : index
    %243 = vector.load %arg5[%c512_236, %c0_237] : memref<2048x128xbf16, #tpu.memory_space<vmem>>, vector<128x128xbf16>
    %cst_238 = arith.constant dense<0.000000e+00> : vector<12x128xf32>
    %244 = tpu.matmul %242, %243, %cst_238 {dimension_numbers = #tpu.dot_dimension_numbers<[1], [0], [0], [1], [0, 0, 1, 1], [], []>} : vector<12x128xbf16>, vector<128x128xbf16>, vector<12x128xf32> -> vector<12x128xf32>
    %245 = arith.addf %241, %244 : vector<12x128xf32>
    %c210_239 = arith.constant 210 : index
    %c0_240 = arith.constant 0 : index
    %246 = vector.load %arg16[%c210_239, %c0_240] : memref<392x128xbf16, #tpu.memory_space<vmem>>, vector<12x128xbf16>
    %c640_241 = arith.constant 640 : index
    %c0_242 = arith.constant 0 : index
    %247 = vector.load %arg5[%c640_241, %c0_242] : memref<2048x128xbf16, #tpu.memory_space<vmem>>, vector<128x128xbf16>
    %cst_243 = arith.constant dense<0.000000e+00> : vector<12x128xf32>
    %248 = tpu.matmul %246, %247, %cst_243 {dimension_numbers = #tpu.dot_dimension_numbers<[1], [0], [0], [1], [0, 0, 1, 1], [], []>} : vector<12x128xbf16>, vector<128x128xbf16>, vector<12x128xf32> -> vector<12x128xf32>
    %249 = arith.addf %245, %248 : vector<12x128xf32>
    %c198_244 = arith.constant 198 : index
    %c0_245 = arith.constant 0 : index
    %250 = vector.load %arg16[%c198_244, %c0_245] : memref<392x128xbf16, #tpu.memory_space<vmem>>, vector<12x128xbf16>
    %c768_246 = arith.constant 768 : index
    %c0_247 = arith.constant 0 : index
    %251 = vector.load %arg5[%c768_246, %c0_247] : memref<2048x128xbf16, #tpu.memory_space<vmem>>, vector<128x128xbf16>
    %cst_248 = arith.constant dense<0.000000e+00> : vector<12x128xf32>
    %252 = tpu.matmul %250, %251, %cst_248 {dimension_numbers = #tpu.dot_dimension_numbers<[1], [0], [0], [1], [0, 0, 1, 1], [], []>} : vector<12x128xbf16>, vector<128x128xbf16>, vector<12x128xf32> -> vector<12x128xf32>
    %253 = arith.addf %249, %252 : vector<12x128xf32>
    %c212_249 = arith.constant 212 : index
    %c0_250 = arith.constant 0 : index
    %254 = vector.load %arg16[%c212_249, %c0_250] : memref<392x128xbf16, #tpu.memory_space<vmem>>, vector<12x128xbf16>
    %c896_251 = arith.constant 896 : index
    %c0_252 = arith.constant 0 : index
    %255 = vector.load %arg5[%c896_251, %c0_252] : memref<2048x128xbf16, #tpu.memory_space<vmem>>, vector<128x128xbf16>
    %cst_253 = arith.constant dense<0.000000e+00> : vector<12x128xf32>
    %256 = tpu.matmul %254, %255, %cst_253 {dimension_numbers = #tpu.dot_dimension_numbers<[1], [0], [0], [1], [0, 0, 1, 1], [], []>} : vector<12x128xbf16>, vector<128x128xbf16>, vector<12x128xf32> -> vector<12x128xf32>
    %257 = arith.addf %253, %256 : vector<12x128xf32>
    %c224 = arith.constant 224 : index
    %c0_254 = arith.constant 0 : index
    %258 = vector.load %arg16[%c224, %c0_254] : memref<392x128xbf16, #tpu.memory_space<vmem>>, vector<12x128xbf16>
    %c1024_255 = arith.constant 1024 : index
    %c0_256 = arith.constant 0 : index
    %259 = vector.load %arg5[%c1024_255, %c0_256] : memref<2048x128xbf16, #tpu.memory_space<vmem>>, vector<128x128xbf16>
    %cst_257 = arith.constant dense<0.000000e+00> : vector<12x128xf32>
    %260 = tpu.matmul %258, %259, %cst_257 {dimension_numbers = #tpu.dot_dimension_numbers<[1], [0], [0], [1], [0, 0, 1, 1], [], []>} : vector<12x128xbf16>, vector<128x128xbf16>, vector<12x128xf32> -> vector<12x128xf32>
    %261 = arith.addf %257, %260 : vector<12x128xf32>
    %c238 = arith.constant 238 : index
    %c0_258 = arith.constant 0 : index
    %262 = vector.load %arg16[%c238, %c0_258] : memref<392x128xbf16, #tpu.memory_space<vmem>>, vector<12x128xbf16>
    %c1152_259 = arith.constant 1152 : index
    %c0_260 = arith.constant 0 : index
    %263 = vector.load %arg5[%c1152_259, %c0_260] : memref<2048x128xbf16, #tpu.memory_space<vmem>>, vector<128x128xbf16>
    %cst_261 = arith.constant dense<0.000000e+00> : vector<12x128xf32>
    %264 = tpu.matmul %262, %263, %cst_261 {dimension_numbers = #tpu.dot_dimension_numbers<[1], [0], [0], [1], [0, 0, 1, 1], [], []>} : vector<12x128xbf16>, vector<128x128xbf16>, vector<12x128xf32> -> vector<12x128xf32>
    %265 = arith.addf %261, %264 : vector<12x128xf32>
    %c226 = arith.constant 226 : index
    %c0_262 = arith.constant 0 : index
    %266 = vector.load %arg16[%c226, %c0_262] : memref<392x128xbf16, #tpu.memory_space<vmem>>, vector<12x128xbf16>
    %c1280_263 = arith.constant 1280 : index
    %c0_264 = arith.constant 0 : index
    %267 = vector.load %arg5[%c1280_263, %c0_264] : memref<2048x128xbf16, #tpu.memory_space<vmem>>, vector<128x128xbf16>
    %cst_265 = arith.constant dense<0.000000e+00> : vector<12x128xf32>
    %268 = tpu.matmul %266, %267, %cst_265 {dimension_numbers = #tpu.dot_dimension_numbers<[1], [0], [0], [1], [0, 0, 1, 1], [], []>} : vector<12x128xbf16>, vector<128x128xbf16>, vector<12x128xf32> -> vector<12x128xf32>
    %269 = arith.addf %265, %268 : vector<12x128xf32>
    %c240 = arith.constant 240 : index
    %c0_266 = arith.constant 0 : index
    %270 = vector.load %arg16[%c240, %c0_266] : memref<392x128xbf16, #tpu.memory_space<vmem>>, vector<12x128xbf16>
    %c1408_267 = arith.constant 1408 : index
    %c0_268 = arith.constant 0 : index
    %271 = vector.load %arg5[%c1408_267, %c0_268] : memref<2048x128xbf16, #tpu.memory_space<vmem>>, vector<128x128xbf16>
    %cst_269 = arith.constant dense<0.000000e+00> : vector<12x128xf32>
    %272 = tpu.matmul %270, %271, %cst_269 {dimension_numbers = #tpu.dot_dimension_numbers<[1], [0], [0], [1], [0, 0, 1, 1], [], []>} : vector<12x128xbf16>, vector<128x128xbf16>, vector<12x128xf32> -> vector<12x128xf32>
    %273 = arith.addf %269, %272 : vector<12x128xf32>
    %c252 = arith.constant 252 : index
    %c0_270 = arith.constant 0 : index
    %274 = vector.load %arg16[%c252, %c0_270] : memref<392x128xbf16, #tpu.memory_space<vmem>>, vector<12x128xbf16>
    %c1536_271 = arith.constant 1536 : index
    %c0_272 = arith.constant 0 : index
    %275 = vector.load %arg5[%c1536_271, %c0_272] : memref<2048x128xbf16, #tpu.memory_space<vmem>>, vector<128x128xbf16>
    %cst_273 = arith.constant dense<0.000000e+00> : vector<12x128xf32>
    %276 = tpu.matmul %274, %275, %cst_273 {dimension_numbers = #tpu.dot_dimension_numbers<[1], [0], [0], [1], [0, 0, 1, 1], [], []>} : vector<12x128xbf16>, vector<128x128xbf16>, vector<12x128xf32> -> vector<12x128xf32>
    %277 = arith.addf %273, %276 : vector<12x128xf32>
    %c266 = arith.constant 266 : index
    %c0_274 = arith.constant 0 : index
    %278 = vector.load %arg16[%c266, %c0_274] : memref<392x128xbf16, #tpu.memory_space<vmem>>, vector<12x128xbf16>
    %c1664_275 = arith.constant 1664 : index
    %c0_276 = arith.constant 0 : index
    %279 = vector.load %arg5[%c1664_275, %c0_276] : memref<2048x128xbf16, #tpu.memory_space<vmem>>, vector<128x128xbf16>
    %cst_277 = arith.constant dense<0.000000e+00> : vector<12x128xf32>
    %280 = tpu.matmul %278, %279, %cst_277 {dimension_numbers = #tpu.dot_dimension_numbers<[1], [0], [0], [1], [0, 0, 1, 1], [], []>} : vector<12x128xbf16>, vector<128x128xbf16>, vector<12x128xf32> -> vector<12x128xf32>
    %281 = arith.addf %277, %280 : vector<12x128xf32>
    %c254 = arith.constant 254 : index
    %c0_278 = arith.constant 0 : index
    %282 = vector.load %arg16[%c254, %c0_278] : memref<392x128xbf16, #tpu.memory_space<vmem>>, vector<12x128xbf16>
    %c1792_279 = arith.constant 1792 : index
    %c0_280 = arith.constant 0 : index
    %283 = vector.load %arg5[%c1792_279, %c0_280] : memref<2048x128xbf16, #tpu.memory_space<vmem>>, vector<128x128xbf16>
    %cst_281 = arith.constant dense<0.000000e+00> : vector<12x128xf32>
    %284 = tpu.matmul %282, %283, %cst_281 {dimension_numbers = #tpu.dot_dimension_numbers<[1], [0], [0], [1], [0, 0, 1, 1], [], []>} : vector<12x128xbf16>, vector<128x128xbf16>, vector<12x128xf32> -> vector<12x128xf32>
    %285 = arith.addf %281, %284 : vector<12x128xf32>
    %c268 = arith.constant 268 : index
    %c0_282 = arith.constant 0 : index
    %286 = vector.load %arg16[%c268, %c0_282] : memref<392x128xbf16, #tpu.memory_space<vmem>>, vector<12x128xbf16>
    %c1920_283 = arith.constant 1920 : index
    %c0_284 = arith.constant 0 : index
    %287 = vector.load %arg5[%c1920_283, %c0_284] : memref<2048x128xbf16, #tpu.memory_space<vmem>>, vector<128x128xbf16>
    %cst_285 = arith.constant dense<0.000000e+00> : vector<12x128xf32>
    %288 = tpu.matmul %286, %287, %cst_285 {dimension_numbers = #tpu.dot_dimension_numbers<[1], [0], [0], [1], [0, 0, 1, 1], [], []>} : vector<12x128xbf16>, vector<128x128xbf16>, vector<12x128xf32> -> vector<12x128xf32>
    %289 = arith.addf %285, %288 : vector<12x128xf32>
    %cst_286 = arith.constant 0.000000e+00 : f32
    %290 = vector.broadcast %cst_286 : f32 to vector<12x128xf32>
    %c224_287 = arith.constant 224 : index
    %c0_288 = arith.constant 0 : index
    %291 = vector.load %arg16[%c224_287, %c0_288] : memref<392x128xbf16, #tpu.memory_space<vmem>>, vector<12x128xbf16>
    %c0_289 = arith.constant 0 : index
    %c0_290 = arith.constant 0 : index
    %292 = vector.load %arg5[%c0_289, %c0_290] : memref<2048x128xbf16, #tpu.memory_space<vmem>>, vector<128x128xbf16>
    %cst_291 = arith.constant dense<0.000000e+00> : vector<12x128xf32>
    %293 = tpu.matmul %291, %292, %cst_291 {dimension_numbers = #tpu.dot_dimension_numbers<[1], [0], [0], [1], [0, 0, 1, 1], [], []>} : vector<12x128xbf16>, vector<128x128xbf16>, vector<12x128xf32> -> vector<12x128xf32>
    %294 = arith.addf %290, %293 : vector<12x128xf32>
    %c238_292 = arith.constant 238 : index
    %c0_293 = arith.constant 0 : index
    %295 = vector.load %arg16[%c238_292, %c0_293] : memref<392x128xbf16, #tpu.memory_space<vmem>>, vector<12x128xbf16>
    %c128_294 = arith.constant 128 : index
    %c0_295 = arith.constant 0 : index
    %296 = vector.load %arg5[%c128_294, %c0_295] : memref<2048x128xbf16, #tpu.memory_space<vmem>>, vector<128x128xbf16>
    %cst_296 = arith.constant dense<0.000000e+00> : vector<12x128xf32>
    %297 = tpu.matmul %295, %296, %cst_296 {dimension_numbers = #tpu.dot_dimension_numbers<[1], [0], [0], [1], [0, 0, 1, 1], [], []>} : vector<12x128xbf16>, vector<128x128xbf16>, vector<12x128xf32> -> vector<12x128xf32>
    %298 = arith.addf %294, %297 : vector<12x128xf32>
    %c226_297 = arith.constant 226 : index
    %c0_298 = arith.constant 0 : index
    %299 = vector.load %arg16[%c226_297, %c0_298] : memref<392x128xbf16, #tpu.memory_space<vmem>>, vector<12x128xbf16>
    %c256_299 = arith.constant 256 : index
    %c0_300 = arith.constant 0 : index
    %300 = vector.load %arg5[%c256_299, %c0_300] : memref<2048x128xbf16, #tpu.memory_space<vmem>>, vector<128x128xbf16>
    %cst_301 = arith.constant dense<0.000000e+00> : vector<12x128xf32>
    %301 = tpu.matmul %299, %300, %cst_301 {dimension_numbers = #tpu.dot_dimension_numbers<[1], [0], [0], [1], [0, 0, 1, 1], [], []>} : vector<12x128xbf16>, vector<128x128xbf16>, vector<12x128xf32> -> vector<12x128xf32>
    %302 = arith.addf %298, %301 : vector<12x128xf32>
    %c240_302 = arith.constant 240 : index
    %c0_303 = arith.constant 0 : index
    %303 = vector.load %arg16[%c240_302, %c0_303] : memref<392x128xbf16, #tpu.memory_space<vmem>>, vector<12x128xbf16>
    %c384_304 = arith.constant 384 : index
    %c0_305 = arith.constant 0 : index
    %304 = vector.load %arg5[%c384_304, %c0_305] : memref<2048x128xbf16, #tpu.memory_space<vmem>>, vector<128x128xbf16>
    %cst_306 = arith.constant dense<0.000000e+00> : vector<12x128xf32>
    %305 = tpu.matmul %303, %304, %cst_306 {dimension_numbers = #tpu.dot_dimension_numbers<[1], [0], [0], [1], [0, 0, 1, 1], [], []>} : vector<12x128xbf16>, vector<128x128xbf16>, vector<12x128xf32> -> vector<12x128xf32>
    %306 = arith.addf %302, %305 : vector<12x128xf32>
    %c252_307 = arith.constant 252 : index
    %c0_308 = arith.constant 0 : index
    %307 = vector.load %arg16[%c252_307, %c0_308] : memref<392x128xbf16, #tpu.memory_space<vmem>>, vector<12x128xbf16>
    %c512_309 = arith.constant 512 : index
    %c0_310 = arith.constant 0 : index
    %308 = vector.load %arg5[%c512_309, %c0_310] : memref<2048x128xbf16, #tpu.memory_space<vmem>>, vector<128x128xbf16>
    %cst_311 = arith.constant dense<0.000000e+00> : vector<12x128xf32>
    %309 = tpu.matmul %307, %308, %cst_311 {dimension_numbers = #tpu.dot_dimension_numbers<[1], [0], [0], [1], [0, 0, 1, 1], [], []>} : vector<12x128xbf16>, vector<128x128xbf16>, vector<12x128xf32> -> vector<12x128xf32>
    %310 = arith.addf %306, %309 : vector<12x128xf32>
    %c266_312 = arith.constant 266 : index
    %c0_313 = arith.constant 0 : index
    %311 = vector.load %arg16[%c266_312, %c0_313] : memref<392x128xbf16, #tpu.memory_space<vmem>>, vector<12x128xbf16>
    %c640_314 = arith.constant 640 : index
    %c0_315 = arith.constant 0 : index
    %312 = vector.load %arg5[%c640_314, %c0_315] : memref<2048x128xbf16, #tpu.memory_space<vmem>>, vector<128x128xbf16>
    %cst_316 = arith.constant dense<0.000000e+00> : vector<12x128xf32>
    %313 = tpu.matmul %311, %312, %cst_316 {dimension_numbers = #tpu.dot_dimension_numbers<[1], [0], [0], [1], [0, 0, 1, 1], [], []>} : vector<12x128xbf16>, vector<128x128xbf16>, vector<12x128xf32> -> vector<12x128xf32>
    %314 = arith.addf %310, %313 : vector<12x128xf32>
    %c254_317 = arith.constant 254 : index
    %c0_318 = arith.constant 0 : index
    %315 = vector.load %arg16[%c254_317, %c0_318] : memref<392x128xbf16, #tpu.memory_space<vmem>>, vector<12x128xbf16>
    %c768_319 = arith.constant 768 : index
    %c0_320 = arith.constant 0 : index
    %316 = vector.load %arg5[%c768_319, %c0_320] : memref<2048x128xbf16, #tpu.memory_space<vmem>>, vector<128x128xbf16>
    %cst_321 = arith.constant dense<0.000000e+00> : vector<12x128xf32>
    %317 = tpu.matmul %315, %316, %cst_321 {dimension_numbers = #tpu.dot_dimension_numbers<[1], [0], [0], [1], [0, 0, 1, 1], [], []>} : vector<12x128xbf16>, vector<128x128xbf16>, vector<12x128xf32> -> vector<12x128xf32>
    %318 = arith.addf %314, %317 : vector<12x128xf32>
    %c268_322 = arith.constant 268 : index
    %c0_323 = arith.constant 0 : index
    %319 = vector.load %arg16[%c268_322, %c0_323] : memref<392x128xbf16, #tpu.memory_space<vmem>>, vector<12x128xbf16>
    %c896_324 = arith.constant 896 : index
    %c0_325 = arith.constant 0 : index
    %320 = vector.load %arg5[%c896_324, %c0_325] : memref<2048x128xbf16, #tpu.memory_space<vmem>>, vector<128x128xbf16>
    %cst_326 = arith.constant dense<0.000000e+00> : vector<12x128xf32>
    %321 = tpu.matmul %319, %320, %cst_326 {dimension_numbers = #tpu.dot_dimension_numbers<[1], [0], [0], [1], [0, 0, 1, 1], [], []>} : vector<12x128xbf16>, vector<128x128xbf16>, vector<12x128xf32> -> vector<12x128xf32>
    %322 = arith.addf %318, %321 : vector<12x128xf32>
    %c280 = arith.constant 280 : index
    %c0_327 = arith.constant 0 : index
    %323 = vector.load %arg16[%c280, %c0_327] : memref<392x128xbf16, #tpu.memory_space<vmem>>, vector<12x128xbf16>
    %c1024_328 = arith.constant 1024 : index
    %c0_329 = arith.constant 0 : index
    %324 = vector.load %arg5[%c1024_328, %c0_329] : memref<2048x128xbf16, #tpu.memory_space<vmem>>, vector<128x128xbf16>
    %cst_330 = arith.constant dense<0.000000e+00> : vector<12x128xf32>
    %325 = tpu.matmul %323, %324, %cst_330 {dimension_numbers = #tpu.dot_dimension_numbers<[1], [0], [0], [1], [0, 0, 1, 1], [], []>} : vector<12x128xbf16>, vector<128x128xbf16>, vector<12x128xf32> -> vector<12x128xf32>
    %326 = arith.addf %322, %325 : vector<12x128xf32>
    %c294 = arith.constant 294 : index
    %c0_331 = arith.constant 0 : index
    %327 = vector.load %arg16[%c294, %c0_331] : memref<392x128xbf16, #tpu.memory_space<vmem>>, vector<12x128xbf16>
    %c1152_332 = arith.constant 1152 : index
    %c0_333 = arith.constant 0 : index
    %328 = vector.load %arg5[%c1152_332, %c0_333] : memref<2048x128xbf16, #tpu.memory_space<vmem>>, vector<128x128xbf16>
    %cst_334 = arith.constant dense<0.000000e+00> : vector<12x128xf32>
    %329 = tpu.matmul %327, %328, %cst_334 {dimension_numbers = #tpu.dot_dimension_numbers<[1], [0], [0], [1], [0, 0, 1, 1], [], []>} : vector<12x128xbf16>, vector<128x128xbf16>, vector<12x128xf32> -> vector<12x128xf32>
    %330 = arith.addf %326, %329 : vector<12x128xf32>
    %c282 = arith.constant 282 : index
    %c0_335 = arith.constant 0 : index
    %331 = vector.load %arg16[%c282, %c0_335] : memref<392x128xbf16, #tpu.memory_space<vmem>>, vector<12x128xbf16>
    %c1280_336 = arith.constant 1280 : index
    %c0_337 = arith.constant 0 : index
    %332 = vector.load %arg5[%c1280_336, %c0_337] : memref<2048x128xbf16, #tpu.memory_space<vmem>>, vector<128x128xbf16>
    %cst_338 = arith.constant dense<0.000000e+00> : vector<12x128xf32>
    %333 = tpu.matmul %331, %332, %cst_338 {dimension_numbers = #tpu.dot_dimension_numbers<[1], [0], [0], [1], [0, 0, 1, 1], [], []>} : vector<12x128xbf16>, vector<128x128xbf16>, vector<12x128xf32> -> vector<12x128xf32>
    %334 = arith.addf %330, %333 : vector<12x128xf32>
    %c296 = arith.constant 296 : index
    %c0_339 = arith.constant 0 : index
    %335 = vector.load %arg16[%c296, %c0_339] : memref<392x128xbf16, #tpu.memory_space<vmem>>, vector<12x128xbf16>
    %c1408_340 = arith.constant 1408 : index
    %c0_341 = arith.constant 0 : index
    %336 = vector.load %arg5[%c1408_340, %c0_341] : memref<2048x128xbf16, #tpu.memory_space<vmem>>, vector<128x128xbf16>
    %cst_342 = arith.constant dense<0.000000e+00> : vector<12x128xf32>
    %337 = tpu.matmul %335, %336, %cst_342 {dimension_numbers = #tpu.dot_dimension_numbers<[1], [0], [0], [1], [0, 0, 1, 1], [], []>} : vector<12x128xbf16>, vector<128x128xbf16>, vector<12x128xf32> -> vector<12x128xf32>
    %338 = arith.addf %334, %337 : vector<12x128xf32>
    %c308 = arith.constant 308 : index
    %c0_343 = arith.constant 0 : index
    %339 = vector.load %arg16[%c308, %c0_343] : memref<392x128xbf16, #tpu.memory_space<vmem>>, vector<12x128xbf16>
    %c1536_344 = arith.constant 1536 : index
    %c0_345 = arith.constant 0 : index
    %340 = vector.load %arg5[%c1536_344, %c0_345] : memref<2048x128xbf16, #tpu.memory_space<vmem>>, vector<128x128xbf16>
    %cst_346 = arith.constant dense<0.000000e+00> : vector<12x128xf32>
    %341 = tpu.matmul %339, %340, %cst_346 {dimension_numbers = #tpu.dot_dimension_numbers<[1], [0], [0], [1], [0, 0, 1, 1], [], []>} : vector<12x128xbf16>, vector<128x128xbf16>, vector<12x128xf32> -> vector<12x128xf32>
    %342 = arith.addf %338, %341 : vector<12x128xf32>
    %c322 = arith.constant 322 : index
    %c0_347 = arith.constant 0 : index
    %343 = vector.load %arg16[%c322, %c0_347] : memref<392x128xbf16, #tpu.memory_space<vmem>>, vector<12x128xbf16>
    %c1664_348 = arith.constant 1664 : index
    %c0_349 = arith.constant 0 : index
    %344 = vector.load %arg5[%c1664_348, %c0_349] : memref<2048x128xbf16, #tpu.memory_space<vmem>>, vector<128x128xbf16>
    %cst_350 = arith.constant dense<0.000000e+00> : vector<12x128xf32>
    %345 = tpu.matmul %343, %344, %cst_350 {dimension_numbers = #tpu.dot_dimension_numbers<[1], [0], [0], [1], [0, 0, 1, 1], [], []>} : vector<12x128xbf16>, vector<128x128xbf16>, vector<12x128xf32> -> vector<12x128xf32>
    %346 = arith.addf %342, %345 : vector<12x128xf32>
    %c310 = arith.constant 310 : index
    %c0_351 = arith.constant 0 : index
    %347 = vector.load %arg16[%c310, %c0_351] : memref<392x128xbf16, #tpu.memory_space<vmem>>, vector<12x128xbf16>
    %c1792_352 = arith.constant 1792 : index
    %c0_353 = arith.constant 0 : index
    %348 = vector.load %arg5[%c1792_352, %c0_353] : memref<2048x128xbf16, #tpu.memory_space<vmem>>, vector<128x128xbf16>
    %cst_354 = arith.constant dense<0.000000e+00> : vector<12x128xf32>
    %349 = tpu.matmul %347, %348, %cst_354 {dimension_numbers = #tpu.dot_dimension_numbers<[1], [0], [0], [1], [0, 0, 1, 1], [], []>} : vector<12x128xbf16>, vector<128x128xbf16>, vector<12x128xf32> -> vector<12x128xf32>
    %350 = arith.addf %346, %349 : vector<12x128xf32>
    %c324 = arith.constant 324 : index
    %c0_355 = arith.constant 0 : index
    %351 = vector.load %arg16[%c324, %c0_355] : memref<392x128xbf16, #tpu.memory_space<vmem>>, vector<12x128xbf16>
    %c1920_356 = arith.constant 1920 : index
    %c0_357 = arith.constant 0 : index
    %352 = vector.load %arg5[%c1920_356, %c0_357] : memref<2048x128xbf16, #tpu.memory_space<vmem>>, vector<128x128xbf16>
    %cst_358 = arith.constant dense<0.000000e+00> : vector<12x128xf32>
    %353 = tpu.matmul %351, %352, %cst_358 {dimension_numbers = #tpu.dot_dimension_numbers<[1], [0], [0], [1], [0, 0, 1, 1], [], []>} : vector<12x128xbf16>, vector<128x128xbf16>, vector<12x128xf32> -> vector<12x128xf32>
    %354 = arith.addf %350, %353 : vector<12x128xf32>
    %cst_359 = arith.constant 0.000000e+00 : f32
    %355 = vector.broadcast %cst_359 : f32 to vector<12x128xf32>
    %c280_360 = arith.constant 280 : index
    %c0_361 = arith.constant 0 : index
    %356 = vector.load %arg16[%c280_360, %c0_361] : memref<392x128xbf16, #tpu.memory_space<vmem>>, vector<12x128xbf16>
    %c0_362 = arith.constant 0 : index
    %c0_363 = arith.constant 0 : index
    %357 = vector.load %arg5[%c0_362, %c0_363] : memref<2048x128xbf16, #tpu.memory_space<vmem>>, vector<128x128xbf16>
    %cst_364 = arith.constant dense<0.000000e+00> : vector<12x128xf32>
    %358 = tpu.matmul %356, %357, %cst_364 {dimension_numbers = #tpu.dot_dimension_numbers<[1], [0], [0], [1], [0, 0, 1, 1], [], []>} : vector<12x128xbf16>, vector<128x128xbf16>, vector<12x128xf32> -> vector<12x128xf32>
    %359 = arith.addf %355, %358 : vector<12x128xf32>
    %c294_365 = arith.constant 294 : index
    %c0_366 = arith.constant 0 : index
    %360 = vector.load %arg16[%c294_365, %c0_366] : memref<392x128xbf16, #tpu.memory_space<vmem>>, vector<12x128xbf16>
    %c128_367 = arith.constant 128 : index
    %c0_368 = arith.constant 0 : index
    %361 = vector.load %arg5[%c128_367, %c0_368] : memref<2048x128xbf16, #tpu.memory_space<vmem>>, vector<128x128xbf16>
    %cst_369 = arith.constant dense<0.000000e+00> : vector<12x128xf32>
    %362 = tpu.matmul %360, %361, %cst_369 {dimension_numbers = #tpu.dot_dimension_numbers<[1], [0], [0], [1], [0, 0, 1, 1], [], []>} : vector<12x128xbf16>, vector<128x128xbf16>, vector<12x128xf32> -> vector<12x128xf32>
    %363 = arith.addf %359, %362 : vector<12x128xf32>
    %c282_370 = arith.constant 282 : index
    %c0_371 = arith.constant 0 : index
    %364 = vector.load %arg16[%c282_370, %c0_371] : memref<392x128xbf16, #tpu.memory_space<vmem>>, vector<12x128xbf16>
    %c256_372 = arith.constant 256 : index
    %c0_373 = arith.constant 0 : index
    %365 = vector.load %arg5[%c256_372, %c0_373] : memref<2048x128xbf16, #tpu.memory_space<vmem>>, vector<128x128xbf16>
    %cst_374 = arith.constant dense<0.000000e+00> : vector<12x128xf32>
    %366 = tpu.matmul %364, %365, %cst_374 {dimension_numbers = #tpu.dot_dimension_numbers<[1], [0], [0], [1], [0, 0, 1, 1], [], []>} : vector<12x128xbf16>, vector<128x128xbf16>, vector<12x128xf32> -> vector<12x128xf32>
    %367 = arith.addf %363, %366 : vector<12x128xf32>
    %c296_375 = arith.constant 296 : index
    %c0_376 = arith.constant 0 : index
    %368 = vector.load %arg16[%c296_375, %c0_376] : memref<392x128xbf16, #tpu.memory_space<vmem>>, vector<12x128xbf16>
    %c384_377 = arith.constant 384 : index
    %c0_378 = arith.constant 0 : index
    %369 = vector.load %arg5[%c384_377, %c0_378] : memref<2048x128xbf16, #tpu.memory_space<vmem>>, vector<128x128xbf16>
    %cst_379 = arith.constant dense<0.000000e+00> : vector<12x128xf32>
    %370 = tpu.matmul %368, %369, %cst_379 {dimension_numbers = #tpu.dot_dimension_numbers<[1], [0], [0], [1], [0, 0, 1, 1], [], []>} : vector<12x128xbf16>, vector<128x128xbf16>, vector<12x128xf32> -> vector<12x128xf32>
    %371 = arith.addf %367, %370 : vector<12x128xf32>
    %c308_380 = arith.constant 308 : index
    %c0_381 = arith.constant 0 : index
    %372 = vector.load %arg16[%c308_380, %c0_381] : memref<392x128xbf16, #tpu.memory_space<vmem>>, vector<12x128xbf16>
    %c512_382 = arith.constant 512 : index
    %c0_383 = arith.constant 0 : index
    %373 = vector.load %arg5[%c512_382, %c0_383] : memref<2048x128xbf16, #tpu.memory_space<vmem>>, vector<128x128xbf16>
    %cst_384 = arith.constant dense<0.000000e+00> : vector<12x128xf32>
    %374 = tpu.matmul %372, %373, %cst_384 {dimension_numbers = #tpu.dot_dimension_numbers<[1], [0], [0], [1], [0, 0, 1, 1], [], []>} : vector<12x128xbf16>, vector<128x128xbf16>, vector<12x128xf32> -> vector<12x128xf32>
    %375 = arith.addf %371, %374 : vector<12x128xf32>
    %c322_385 = arith.constant 322 : index
    %c0_386 = arith.constant 0 : index
    %376 = vector.load %arg16[%c322_385, %c0_386] : memref<392x128xbf16, #tpu.memory_space<vmem>>, vector<12x128xbf16>
    %c640_387 = arith.constant 640 : index
    %c0_388 = arith.constant 0 : index
    %377 = vector.load %arg5[%c640_387, %c0_388] : memref<2048x128xbf16, #tpu.memory_space<vmem>>, vector<128x128xbf16>
    %cst_389 = arith.constant dense<0.000000e+00> : vector<12x128xf32>
    %378 = tpu.matmul %376, %377, %cst_389 {dimension_numbers = #tpu.dot_dimension_numbers<[1], [0], [0], [1], [0, 0, 1, 1], [], []>} : vector<12x128xbf16>, vector<128x128xbf16>, vector<12x128xf32> -> vector<12x128xf32>
    %379 = arith.addf %375, %378 : vector<12x128xf32>
    %c310_390 = arith.constant 310 : index
    %c0_391 = arith.constant 0 : index
    %380 = vector.load %arg16[%c310_390, %c0_391] : memref<392x128xbf16, #tpu.memory_space<vmem>>, vector<12x128xbf16>
    %c768_392 = arith.constant 768 : index
    %c0_393 = arith.constant 0 : index
    %381 = vector.load %arg5[%c768_392, %c0_393] : memref<2048x128xbf16, #tpu.memory_space<vmem>>, vector<128x128xbf16>
    %cst_394 = arith.constant dense<0.000000e+00> : vector<12x128xf32>
    %382 = tpu.matmul %380, %381, %cst_394 {dimension_numbers = #tpu.dot_dimension_numbers<[1], [0], [0], [1], [0, 0, 1, 1], [], []>} : vector<12x128xbf16>, vector<128x128xbf16>, vector<12x128xf32> -> vector<12x128xf32>
    %383 = arith.addf %379, %382 : vector<12x128xf32>
    %c324_395 = arith.constant 324 : index
    %c0_396 = arith.constant 0 : index
    %384 = vector.load %arg16[%c324_395, %c0_396] : memref<392x128xbf16, #tpu.memory_space<vmem>>, vector<12x128xbf16>
    %c896_397 = arith.constant 896 : index
    %c0_398 = arith.constant 0 : index
    %385 = vector.load %arg5[%c896_397, %c0_398] : memref<2048x128xbf16, #tpu.memory_space<vmem>>, vector<128x128xbf16>
    %cst_399 = arith.constant dense<0.000000e+00> : vector<12x128xf32>
    %386 = tpu.matmul %384, %385, %cst_399 {dimension_numbers = #tpu.dot_dimension_numbers<[1], [0], [0], [1], [0, 0, 1, 1], [], []>} : vector<12x128xbf16>, vector<128x128xbf16>, vector<12x128xf32> -> vector<12x128xf32>
    %387 = arith.addf %383, %386 : vector<12x128xf32>
    %c336 = arith.constant 336 : index
    %c0_400 = arith.constant 0 : index
    %388 = vector.load %arg16[%c336, %c0_400] : memref<392x128xbf16, #tpu.memory_space<vmem>>, vector<12x128xbf16>
    %c1024_401 = arith.constant 1024 : index
    %c0_402 = arith.constant 0 : index
    %389 = vector.load %arg5[%c1024_401, %c0_402] : memref<2048x128xbf16, #tpu.memory_space<vmem>>, vector<128x128xbf16>
    %cst_403 = arith.constant dense<0.000000e+00> : vector<12x128xf32>
    %390 = tpu.matmul %388, %389, %cst_403 {dimension_numbers = #tpu.dot_dimension_numbers<[1], [0], [0], [1], [0, 0, 1, 1], [], []>} : vector<12x128xbf16>, vector<128x128xbf16>, vector<12x128xf32> -> vector<12x128xf32>
    %391 = arith.addf %387, %390 : vector<12x128xf32>
    %c350 = arith.constant 350 : index
    %c0_404 = arith.constant 0 : index
    %392 = vector.load %arg16[%c350, %c0_404] : memref<392x128xbf16, #tpu.memory_space<vmem>>, vector<12x128xbf16>
    %c1152_405 = arith.constant 1152 : index
    %c0_406 = arith.constant 0 : index
    %393 = vector.load %arg5[%c1152_405, %c0_406] : memref<2048x128xbf16, #tpu.memory_space<vmem>>, vector<128x128xbf16>
    %cst_407 = arith.constant dense<0.000000e+00> : vector<12x128xf32>
    %394 = tpu.matmul %392, %393, %cst_407 {dimension_numbers = #tpu.dot_dimension_numbers<[1], [0], [0], [1], [0, 0, 1, 1], [], []>} : vector<12x128xbf16>, vector<128x128xbf16>, vector<12x128xf32> -> vector<12x128xf32>
    %395 = arith.addf %391, %394 : vector<12x128xf32>
    %c338 = arith.constant 338 : index
    %c0_408 = arith.constant 0 : index
    %396 = vector.load %arg16[%c338, %c0_408] : memref<392x128xbf16, #tpu.memory_space<vmem>>, vector<12x128xbf16>
    %c1280_409 = arith.constant 1280 : index
    %c0_410 = arith.constant 0 : index
    %397 = vector.load %arg5[%c1280_409, %c0_410] : memref<2048x128xbf16, #tpu.memory_space<vmem>>, vector<128x128xbf16>
    %cst_411 = arith.constant dense<0.000000e+00> : vector<12x128xf32>
    %398 = tpu.matmul %396, %397, %cst_411 {dimension_numbers = #tpu.dot_dimension_numbers<[1], [0], [0], [1], [0, 0, 1, 1], [], []>} : vector<12x128xbf16>, vector<128x128xbf16>, vector<12x128xf32> -> vector<12x128xf32>
    %399 = arith.addf %395, %398 : vector<12x128xf32>
    %c352 = arith.constant 352 : index
    %c0_412 = arith.constant 0 : index
    %400 = vector.load %arg16[%c352, %c0_412] : memref<392x128xbf16, #tpu.memory_space<vmem>>, vector<12x128xbf16>
    %c1408_413 = arith.constant 1408 : index
    %c0_414 = arith.constant 0 : index
    %401 = vector.load %arg5[%c1408_413, %c0_414] : memref<2048x128xbf16, #tpu.memory_space<vmem>>, vector<128x128xbf16>
    %cst_415 = arith.constant dense<0.000000e+00> : vector<12x128xf32>
    %402 = tpu.matmul %400, %401, %cst_415 {dimension_numbers = #tpu.dot_dimension_numbers<[1], [0], [0], [1], [0, 0, 1, 1], [], []>} : vector<12x128xbf16>, vector<128x128xbf16>, vector<12x128xf32> -> vector<12x128xf32>
    %403 = arith.addf %399, %402 : vector<12x128xf32>
    %c364 = arith.constant 364 : index
    %c0_416 = arith.constant 0 : index
    %404 = vector.load %arg16[%c364, %c0_416] : memref<392x128xbf16, #tpu.memory_space<vmem>>, vector<12x128xbf16>
    %c1536_417 = arith.constant 1536 : index
    %c0_418 = arith.constant 0 : index
    %405 = vector.load %arg5[%c1536_417, %c0_418] : memref<2048x128xbf16, #tpu.memory_space<vmem>>, vector<128x128xbf16>
    %cst_419 = arith.constant dense<0.000000e+00> : vector<12x128xf32>
    %406 = tpu.matmul %404, %405, %cst_419 {dimension_numbers = #tpu.dot_dimension_numbers<[1], [0], [0], [1], [0, 0, 1, 1], [], []>} : vector<12x128xbf16>, vector<128x128xbf16>, vector<12x128xf32> -> vector<12x128xf32>
    %407 = arith.addf %403, %406 : vector<12x128xf32>
    %c378 = arith.constant 378 : index
    %c0_420 = arith.constant 0 : index
    %408 = vector.load %arg16[%c378, %c0_420] : memref<392x128xbf16, #tpu.memory_space<vmem>>, vector<12x128xbf16>
    %c1664_421 = arith.constant 1664 : index
    %c0_422 = arith.constant 0 : index
    %409 = vector.load %arg5[%c1664_421, %c0_422] : memref<2048x128xbf16, #tpu.memory_space<vmem>>, vector<128x128xbf16>
    %cst_423 = arith.constant dense<0.000000e+00> : vector<12x128xf32>
    %410 = tpu.matmul %408, %409, %cst_423 {dimension_numbers = #tpu.dot_dimension_numbers<[1], [0], [0], [1], [0, 0, 1, 1], [], []>} : vector<12x128xbf16>, vector<128x128xbf16>, vector<12x128xf32> -> vector<12x128xf32>
    %411 = arith.addf %407, %410 : vector<12x128xf32>
    %c366 = arith.constant 366 : index
    %c0_424 = arith.constant 0 : index
    %412 = vector.load %arg16[%c366, %c0_424] : memref<392x128xbf16, #tpu.memory_space<vmem>>, vector<12x128xbf16>
    %c1792_425 = arith.constant 1792 : index
    %c0_426 = arith.constant 0 : index
    %413 = vector.load %arg5[%c1792_425, %c0_426] : memref<2048x128xbf16, #tpu.memory_space<vmem>>, vector<128x128xbf16>
    %cst_427 = arith.constant dense<0.000000e+00> : vector<12x128xf32>
    %414 = tpu.matmul %412, %413, %cst_427 {dimension_numbers = #tpu.dot_dimension_numbers<[1], [0], [0], [1], [0, 0, 1, 1], [], []>} : vector<12x128xbf16>, vector<128x128xbf16>, vector<12x128xf32> -> vector<12x128xf32>
    %415 = arith.addf %411, %414 : vector<12x128xf32>
    %c380 = arith.constant 380 : index
    %c0_428 = arith.constant 0 : index
    %416 = vector.load %arg16[%c380, %c0_428] : memref<392x128xbf16, #tpu.memory_space<vmem>>, vector<12x128xbf16>
    %c1920_429 = arith.constant 1920 : index
    %c0_430 = arith.constant 0 : index
    %417 = vector.load %arg5[%c1920_429, %c0_430] : memref<2048x128xbf16, #tpu.memory_space<vmem>>, vector<128x128xbf16>
    %cst_431 = arith.constant dense<0.000000e+00> : vector<12x128xf32>
    %418 = tpu.matmul %416, %417, %cst_431 {dimension_numbers = #tpu.dot_dimension_numbers<[1], [0], [0], [1], [0, 0, 1, 1], [], []>} : vector<12x128xbf16>, vector<128x128xbf16>, vector<12x128xf32> -> vector<12x128xf32>
    %419 = arith.addf %415, %418 : vector<12x128xf32>
    %cst_432 = arith.constant dense<0.000000e+00> : vector<128xf32>
    %420 = vector.multi_reduction <add>, %94, %cst_432 [0] : vector<12x128xf32> to vector<128xf32>
    %421 = vector.shape_cast %420 : vector<128xf32> to vector<1x128xf32>
    %cst_433 = arith.constant 0.000000e+00 : f32
    %422 = vector.broadcast %cst_433 : f32 to vector<1x128xf32>
    %423 = arith.addf %422, %421 : vector<1x128xf32>
    %cst_434 = arith.constant dense<0.000000e+00> : vector<128xf32>
    %424 = vector.multi_reduction <add>, %159, %cst_434 [0] : vector<12x128xf32> to vector<128xf32>
    %425 = vector.shape_cast %424 : vector<128xf32> to vector<1x128xf32>
    %426 = arith.addf %423, %425 : vector<1x128xf32>
    %cst_435 = arith.constant dense<0.000000e+00> : vector<128xf32>
    %427 = vector.multi_reduction <add>, %224, %cst_435 [0] : vector<12x128xf32> to vector<128xf32>
    %428 = vector.shape_cast %427 : vector<128xf32> to vector<1x128xf32>
    %429 = arith.addf %426, %428 : vector<1x128xf32>
    %cst_436 = arith.constant dense<0.000000e+00> : vector<128xf32>
    %430 = vector.multi_reduction <add>, %289, %cst_436 [0] : vector<12x128xf32> to vector<128xf32>
    %431 = vector.shape_cast %430 : vector<128xf32> to vector<1x128xf32>
    %432 = arith.addf %429, %431 : vector<1x128xf32>
    %cst_437 = arith.constant dense<0.000000e+00> : vector<128xf32>
    %433 = vector.multi_reduction <add>, %354, %cst_437 [0] : vector<12x128xf32> to vector<128xf32>
    %434 = vector.shape_cast %433 : vector<128xf32> to vector<1x128xf32>
    %435 = arith.addf %432, %434 : vector<1x128xf32>
    %cst_438 = arith.constant dense<0.000000e+00> : vector<128xf32>
    %436 = vector.multi_reduction <add>, %419, %cst_438 [0] : vector<12x128xf32> to vector<128xf32>
    %437 = vector.shape_cast %436 : vector<128xf32> to vector<1x128xf32>
    %438 = arith.addf %435, %437 : vector<1x128xf32>
    %439 = arith.mulf %94, %94 : vector<12x128xf32>
    %cst_439 = arith.constant dense<0.000000e+00> : vector<128xf32>
    %440 = vector.multi_reduction <add>, %439, %cst_439 [0] : vector<12x128xf32> to vector<128xf32>
    %441 = vector.shape_cast %440 : vector<128xf32> to vector<1x128xf32>
    %cst_440 = arith.constant 0.000000e+00 : f32
    %442 = vector.broadcast %cst_440 : f32 to vector<1x128xf32>
    %443 = arith.addf %442, %441 : vector<1x128xf32>
    %444 = arith.mulf %159, %159 : vector<12x128xf32>
    %cst_441 = arith.constant dense<0.000000e+00> : vector<128xf32>
    %445 = vector.multi_reduction <add>, %444, %cst_441 [0] : vector<12x128xf32> to vector<128xf32>
    %446 = vector.shape_cast %445 : vector<128xf32> to vector<1x128xf32>
    %447 = arith.addf %443, %446 : vector<1x128xf32>
    %448 = arith.mulf %224, %224 : vector<12x128xf32>
    %cst_442 = arith.constant dense<0.000000e+00> : vector<128xf32>
    %449 = vector.multi_reduction <add>, %448, %cst_442 [0] : vector<12x128xf32> to vector<128xf32>
    %450 = vector.shape_cast %449 : vector<128xf32> to vector<1x128xf32>
    %451 = arith.addf %447, %450 : vector<1x128xf32>
    %452 = arith.mulf %289, %289 : vector<12x128xf32>
    %cst_443 = arith.constant dense<0.000000e+00> : vector<128xf32>
    %453 = vector.multi_reduction <add>, %452, %cst_443 [0] : vector<12x128xf32> to vector<128xf32>
    %454 = vector.shape_cast %453 : vector<128xf32> to vector<1x128xf32>
    %455 = arith.addf %451, %454 : vector<1x128xf32>
    %456 = arith.mulf %354, %354 : vector<12x128xf32>
    %cst_444 = arith.constant dense<0.000000e+00> : vector<128xf32>
    %457 = vector.multi_reduction <add>, %456, %cst_444 [0] : vector<12x128xf32> to vector<128xf32>
    %458 = vector.shape_cast %457 : vector<128xf32> to vector<1x128xf32>
    %459 = arith.addf %455, %458 : vector<1x128xf32>
    %460 = arith.mulf %419, %419 : vector<12x128xf32>
    %cst_445 = arith.constant dense<0.000000e+00> : vector<128xf32>
    %461 = vector.multi_reduction <add>, %460, %cst_445 [0] : vector<12x128xf32> to vector<128xf32>
    %462 = vector.shape_cast %461 : vector<128xf32> to vector<1x128xf32>
    %463 = arith.addf %459, %462 : vector<1x128xf32>
    %c0_446 = arith.constant 0 : index
    %c0_447 = arith.constant 0 : index
    %464 = vector.load %arg6[%c0_446, %c0_447] : memref<1x128xf32, #tpu.memory_space<vmem>>, vector<1x128xf32>
    %c0_448 = arith.constant 0 : index
    %c0_449 = arith.constant 0 : index
    %465 = vector.load %arg7[%c0_448, %c0_449] : memref<1x128xf32, #tpu.memory_space<vmem>>, vector<1x128xf32>
    %cst_450 = arith.constant 7.200000e+01 : f32
    %466 = vector.broadcast %cst_450 : f32 to vector<1x128xf32>
    %467 = arith.divf %438, %466 : vector<1x128xf32>
    %cst_451 = arith.constant 7.200000e+01 : f32
    %468 = vector.broadcast %cst_451 : f32 to vector<1x128xf32>
    %469 = arith.divf %463, %468 : vector<1x128xf32>
    %470 = arith.mulf %467, %467 : vector<1x128xf32>
    %471 = arith.subf %469, %470 : vector<1x128xf32>
    %cst_452 = arith.constant 9.99999974E-6 : f32
    %472 = vector.broadcast %cst_452 : f32 to vector<1x128xf32>
    %473 = arith.addf %471, %472 : vector<1x128xf32>
    %474 = math.rsqrt %473 : vector<1x128xf32>
    %475 = arith.mulf %464, %474 : vector<1x128xf32>
    %476 = arith.mulf %467, %475 : vector<1x128xf32>
    %477 = arith.subf %465, %476 : vector<1x128xf32>
    %478 = vector.broadcast %475 : vector<1x128xf32> to vector<12x128xf32>
    %479 = arith.mulf %94, %478 : vector<12x128xf32>
    %480 = vector.broadcast %477 : vector<1x128xf32> to vector<12x128xf32>
    %481 = arith.addf %479, %480 : vector<12x128xf32>
    %482 = vector.broadcast %475 : vector<1x128xf32> to vector<12x128xf32>
    %483 = arith.mulf %159, %482 : vector<12x128xf32>
    %484 = vector.broadcast %477 : vector<1x128xf32> to vector<12x128xf32>
    %485 = arith.addf %483, %484 : vector<12x128xf32>
    %486 = vector.broadcast %475 : vector<1x128xf32> to vector<12x128xf32>
    %487 = arith.mulf %224, %486 : vector<12x128xf32>
    %488 = vector.broadcast %477 : vector<1x128xf32> to vector<12x128xf32>
    %489 = arith.addf %487, %488 : vector<12x128xf32>
    %490 = vector.broadcast %475 : vector<1x128xf32> to vector<12x128xf32>
    %491 = arith.mulf %289, %490 : vector<12x128xf32>
    %492 = vector.broadcast %477 : vector<1x128xf32> to vector<12x128xf32>
    %493 = arith.addf %491, %492 : vector<12x128xf32>
    %494 = vector.broadcast %475 : vector<1x128xf32> to vector<12x128xf32>
    %495 = arith.mulf %354, %494 : vector<12x128xf32>
    %496 = vector.broadcast %477 : vector<1x128xf32> to vector<12x128xf32>
    %497 = arith.addf %495, %496 : vector<12x128xf32>
    %cst_453 = arith.constant 0.000000e+00 : f32
    %498 = vector.broadcast %cst_453 : f32 to vector<2x128xf32>
    %499 = vector.extract_strided_slice %481 {offsets = [0, 0], sizes = [2, 128], strides = [1, 1]} : vector<12x128xf32> to vector<2x128xf32>
    %500 = arith.truncf %499 : vector<2x128xf32> to vector<2x128xbf16>
    %c0_454 = arith.constant 0 : index
    %c0_455 = arith.constant 0 : index
    %501 = vector.load %arg8[%c0_454, %c0_455] : memref<1152x128xbf16, #tpu.memory_space<vmem>>, vector<128x128xbf16>
    %cst_456 = arith.constant dense<0.000000e+00> : vector<2x128xf32>
    %502 = tpu.matmul %500, %501, %cst_456 {dimension_numbers = #tpu.dot_dimension_numbers<[1], [0], [0], [1], [0, 0, 1, 1], [], []>} : vector<2x128xbf16>, vector<128x128xbf16>, vector<2x128xf32> -> vector<2x128xf32>
    %503 = arith.addf %498, %502 : vector<2x128xf32>
    %504 = vector.extract_strided_slice %481 {offsets = [2, 0], sizes = [2, 128], strides = [1, 1]} : vector<12x128xf32> to vector<2x128xf32>
    %505 = arith.truncf %504 : vector<2x128xf32> to vector<2x128xbf16>
    %c128_457 = arith.constant 128 : index
    %c0_458 = arith.constant 0 : index
    %506 = vector.load %arg8[%c128_457, %c0_458] : memref<1152x128xbf16, #tpu.memory_space<vmem>>, vector<128x128xbf16>
    %cst_459 = arith.constant dense<0.000000e+00> : vector<2x128xf32>
    %507 = tpu.matmul %505, %506, %cst_459 {dimension_numbers = #tpu.dot_dimension_numbers<[1], [0], [0], [1], [0, 0, 1, 1], [], []>} : vector<2x128xbf16>, vector<128x128xbf16>, vector<2x128xf32> -> vector<2x128xf32>
    %508 = arith.addf %503, %507 : vector<2x128xf32>
    %509 = vector.extract_strided_slice %481 {offsets = [4, 0], sizes = [2, 128], strides = [1, 1]} : vector<12x128xf32> to vector<2x128xf32>
    %510 = arith.truncf %509 : vector<2x128xf32> to vector<2x128xbf16>
    %c256_460 = arith.constant 256 : index
    %c0_461 = arith.constant 0 : index
    %511 = vector.load %arg8[%c256_460, %c0_461] : memref<1152x128xbf16, #tpu.memory_space<vmem>>, vector<128x128xbf16>
    %cst_462 = arith.constant dense<0.000000e+00> : vector<2x128xf32>
    %512 = tpu.matmul %510, %511, %cst_462 {dimension_numbers = #tpu.dot_dimension_numbers<[1], [0], [0], [1], [0, 0, 1, 1], [], []>} : vector<2x128xbf16>, vector<128x128xbf16>, vector<2x128xf32> -> vector<2x128xf32>
    %513 = arith.addf %508, %512 : vector<2x128xf32>
    %514 = vector.extract_strided_slice %485 {offsets = [0, 0], sizes = [2, 128], strides = [1, 1]} : vector<12x128xf32> to vector<2x128xf32>
    %515 = arith.truncf %514 : vector<2x128xf32> to vector<2x128xbf16>
    %c384_463 = arith.constant 384 : index
    %c0_464 = arith.constant 0 : index
    %516 = vector.load %arg8[%c384_463, %c0_464] : memref<1152x128xbf16, #tpu.memory_space<vmem>>, vector<128x128xbf16>
    %cst_465 = arith.constant dense<0.000000e+00> : vector<2x128xf32>
    %517 = tpu.matmul %515, %516, %cst_465 {dimension_numbers = #tpu.dot_dimension_numbers<[1], [0], [0], [1], [0, 0, 1, 1], [], []>} : vector<2x128xbf16>, vector<128x128xbf16>, vector<2x128xf32> -> vector<2x128xf32>
    %518 = arith.addf %513, %517 : vector<2x128xf32>
    %519 = vector.extract_strided_slice %485 {offsets = [2, 0], sizes = [2, 128], strides = [1, 1]} : vector<12x128xf32> to vector<2x128xf32>
    %520 = arith.truncf %519 : vector<2x128xf32> to vector<2x128xbf16>
    %c512_466 = arith.constant 512 : index
    %c0_467 = arith.constant 0 : index
    %521 = vector.load %arg8[%c512_466, %c0_467] : memref<1152x128xbf16, #tpu.memory_space<vmem>>, vector<128x128xbf16>
    %cst_468 = arith.constant dense<0.000000e+00> : vector<2x128xf32>
    %522 = tpu.matmul %520, %521, %cst_468 {dimension_numbers = #tpu.dot_dimension_numbers<[1], [0], [0], [1], [0, 0, 1, 1], [], []>} : vector<2x128xbf16>, vector<128x128xbf16>, vector<2x128xf32> -> vector<2x128xf32>
    %523 = arith.addf %518, %522 : vector<2x128xf32>
    %524 = vector.extract_strided_slice %485 {offsets = [4, 0], sizes = [2, 128], strides = [1, 1]} : vector<12x128xf32> to vector<2x128xf32>
    %525 = arith.truncf %524 : vector<2x128xf32> to vector<2x128xbf16>
    %c640_469 = arith.constant 640 : index
    %c0_470 = arith.constant 0 : index
    %526 = vector.load %arg8[%c640_469, %c0_470] : memref<1152x128xbf16, #tpu.memory_space<vmem>>, vector<128x128xbf16>
    %cst_471 = arith.constant dense<0.000000e+00> : vector<2x128xf32>
    %527 = tpu.matmul %525, %526, %cst_471 {dimension_numbers = #tpu.dot_dimension_numbers<[1], [0], [0], [1], [0, 0, 1, 1], [], []>} : vector<2x128xbf16>, vector<128x128xbf16>, vector<2x128xf32> -> vector<2x128xf32>
    %528 = arith.addf %523, %527 : vector<2x128xf32>
    %529 = vector.extract_strided_slice %489 {offsets = [0, 0], sizes = [2, 128], strides = [1, 1]} : vector<12x128xf32> to vector<2x128xf32>
    %530 = arith.truncf %529 : vector<2x128xf32> to vector<2x128xbf16>
    %c768_472 = arith.constant 768 : index
    %c0_473 = arith.constant 0 : index
    %531 = vector.load %arg8[%c768_472, %c0_473] : memref<1152x128xbf16, #tpu.memory_space<vmem>>, vector<128x128xbf16>
    %cst_474 = arith.constant dense<0.000000e+00> : vector<2x128xf32>
    %532 = tpu.matmul %530, %531, %cst_474 {dimension_numbers = #tpu.dot_dimension_numbers<[1], [0], [0], [1], [0, 0, 1, 1], [], []>} : vector<2x128xbf16>, vector<128x128xbf16>, vector<2x128xf32> -> vector<2x128xf32>
    %533 = arith.addf %528, %532 : vector<2x128xf32>
    %534 = vector.extract_strided_slice %489 {offsets = [2, 0], sizes = [2, 128], strides = [1, 1]} : vector<12x128xf32> to vector<2x128xf32>
    %535 = arith.truncf %534 : vector<2x128xf32> to vector<2x128xbf16>
    %c896_475 = arith.constant 896 : index
    %c0_476 = arith.constant 0 : index
    %536 = vector.load %arg8[%c896_475, %c0_476] : memref<1152x128xbf16, #tpu.memory_space<vmem>>, vector<128x128xbf16>
    %cst_477 = arith.constant dense<0.000000e+00> : vector<2x128xf32>
    %537 = tpu.matmul %535, %536, %cst_477 {dimension_numbers = #tpu.dot_dimension_numbers<[1], [0], [0], [1], [0, 0, 1, 1], [], []>} : vector<2x128xbf16>, vector<128x128xbf16>, vector<2x128xf32> -> vector<2x128xf32>
    %538 = arith.addf %533, %537 : vector<2x128xf32>
    %539 = vector.extract_strided_slice %489 {offsets = [4, 0], sizes = [2, 128], strides = [1, 1]} : vector<12x128xf32> to vector<2x128xf32>
    %540 = arith.truncf %539 : vector<2x128xf32> to vector<2x128xbf16>
    %c1024_478 = arith.constant 1024 : index
    %c0_479 = arith.constant 0 : index
    %541 = vector.load %arg8[%c1024_478, %c0_479] : memref<1152x128xbf16, #tpu.memory_space<vmem>>, vector<128x128xbf16>
    %cst_480 = arith.constant dense<0.000000e+00> : vector<2x128xf32>
    %542 = tpu.matmul %540, %541, %cst_480 {dimension_numbers = #tpu.dot_dimension_numbers<[1], [0], [0], [1], [0, 0, 1, 1], [], []>} : vector<2x128xbf16>, vector<128x128xbf16>, vector<2x128xf32> -> vector<2x128xf32>
    %543 = arith.addf %538, %542 : vector<2x128xf32>
    %cst_481 = arith.constant 0.000000e+00 : f32
    %544 = vector.broadcast %cst_481 : f32 to vector<2x128xf32>
    %545 = vector.extract_strided_slice %481 {offsets = [4, 0], sizes = [2, 128], strides = [1, 1]} : vector<12x128xf32> to vector<2x128xf32>
    %546 = arith.truncf %545 : vector<2x128xf32> to vector<2x128xbf16>
    %c0_482 = arith.constant 0 : index
    %c0_483 = arith.constant 0 : index
    %547 = vector.load %arg8[%c0_482, %c0_483] : memref<1152x128xbf16, #tpu.memory_space<vmem>>, vector<128x128xbf16>
    %cst_484 = arith.constant dense<0.000000e+00> : vector<2x128xf32>
    %548 = tpu.matmul %546, %547, %cst_484 {dimension_numbers = #tpu.dot_dimension_numbers<[1], [0], [0], [1], [0, 0, 1, 1], [], []>} : vector<2x128xbf16>, vector<128x128xbf16>, vector<2x128xf32> -> vector<2x128xf32>
    %549 = arith.addf %544, %548 : vector<2x128xf32>
    %550 = vector.extract_strided_slice %481 {offsets = [6, 0], sizes = [2, 128], strides = [1, 1]} : vector<12x128xf32> to vector<2x128xf32>
    %551 = arith.truncf %550 : vector<2x128xf32> to vector<2x128xbf16>
    %c128_485 = arith.constant 128 : index
    %c0_486 = arith.constant 0 : index
    %552 = vector.load %arg8[%c128_485, %c0_486] : memref<1152x128xbf16, #tpu.memory_space<vmem>>, vector<128x128xbf16>
    %cst_487 = arith.constant dense<0.000000e+00> : vector<2x128xf32>
    %553 = tpu.matmul %551, %552, %cst_487 {dimension_numbers = #tpu.dot_dimension_numbers<[1], [0], [0], [1], [0, 0, 1, 1], [], []>} : vector<2x128xbf16>, vector<128x128xbf16>, vector<2x128xf32> -> vector<2x128xf32>
    %554 = arith.addf %549, %553 : vector<2x128xf32>
    %555 = vector.extract_strided_slice %481 {offsets = [8, 0], sizes = [2, 128], strides = [1, 1]} : vector<12x128xf32> to vector<2x128xf32>
    %556 = arith.truncf %555 : vector<2x128xf32> to vector<2x128xbf16>
    %c256_488 = arith.constant 256 : index
    %c0_489 = arith.constant 0 : index
    %557 = vector.load %arg8[%c256_488, %c0_489] : memref<1152x128xbf16, #tpu.memory_space<vmem>>, vector<128x128xbf16>
    %cst_490 = arith.constant dense<0.000000e+00> : vector<2x128xf32>
    %558 = tpu.matmul %556, %557, %cst_490 {dimension_numbers = #tpu.dot_dimension_numbers<[1], [0], [0], [1], [0, 0, 1, 1], [], []>} : vector<2x128xbf16>, vector<128x128xbf16>, vector<2x128xf32> -> vector<2x128xf32>
    %559 = arith.addf %554, %558 : vector<2x128xf32>
    %560 = vector.extract_strided_slice %485 {offsets = [4, 0], sizes = [2, 128], strides = [1, 1]} : vector<12x128xf32> to vector<2x128xf32>
    %561 = arith.truncf %560 : vector<2x128xf32> to vector<2x128xbf16>
    %c384_491 = arith.constant 384 : index
    %c0_492 = arith.constant 0 : index
    %562 = vector.load %arg8[%c384_491, %c0_492] : memref<1152x128xbf16, #tpu.memory_space<vmem>>, vector<128x128xbf16>
    %cst_493 = arith.constant dense<0.000000e+00> : vector<2x128xf32>
    %563 = tpu.matmul %561, %562, %cst_493 {dimension_numbers = #tpu.dot_dimension_numbers<[1], [0], [0], [1], [0, 0, 1, 1], [], []>} : vector<2x128xbf16>, vector<128x128xbf16>, vector<2x128xf32> -> vector<2x128xf32>
    %564 = arith.addf %559, %563 : vector<2x128xf32>
    %565 = vector.extract_strided_slice %485 {offsets = [6, 0], sizes = [2, 128], strides = [1, 1]} : vector<12x128xf32> to vector<2x128xf32>
    %566 = arith.truncf %565 : vector<2x128xf32> to vector<2x128xbf16>
    %c512_494 = arith.constant 512 : index
    %c0_495 = arith.constant 0 : index
    %567 = vector.load %arg8[%c512_494, %c0_495] : memref<1152x128xbf16, #tpu.memory_space<vmem>>, vector<128x128xbf16>
    %cst_496 = arith.constant dense<0.000000e+00> : vector<2x128xf32>
    %568 = tpu.matmul %566, %567, %cst_496 {dimension_numbers = #tpu.dot_dimension_numbers<[1], [0], [0], [1], [0, 0, 1, 1], [], []>} : vector<2x128xbf16>, vector<128x128xbf16>, vector<2x128xf32> -> vector<2x128xf32>
    %569 = arith.addf %564, %568 : vector<2x128xf32>
    %570 = vector.extract_strided_slice %485 {offsets = [8, 0], sizes = [2, 128], strides = [1, 1]} : vector<12x128xf32> to vector<2x128xf32>
    %571 = arith.truncf %570 : vector<2x128xf32> to vector<2x128xbf16>
    %c640_497 = arith.constant 640 : index
    %c0_498 = arith.constant 0 : index
    %572 = vector.load %arg8[%c640_497, %c0_498] : memref<1152x128xbf16, #tpu.memory_space<vmem>>, vector<128x128xbf16>
    %cst_499 = arith.constant dense<0.000000e+00> : vector<2x128xf32>
    %573 = tpu.matmul %571, %572, %cst_499 {dimension_numbers = #tpu.dot_dimension_numbers<[1], [0], [0], [1], [0, 0, 1, 1], [], []>} : vector<2x128xbf16>, vector<128x128xbf16>, vector<2x128xf32> -> vector<2x128xf32>
    %574 = arith.addf %569, %573 : vector<2x128xf32>
    %575 = vector.extract_strided_slice %489 {offsets = [4, 0], sizes = [2, 128], strides = [1, 1]} : vector<12x128xf32> to vector<2x128xf32>
    %576 = arith.truncf %575 : vector<2x128xf32> to vector<2x128xbf16>
    %c768_500 = arith.constant 768 : index
    %c0_501 = arith.constant 0 : index
    %577 = vector.load %arg8[%c768_500, %c0_501] : memref<1152x128xbf16, #tpu.memory_space<vmem>>, vector<128x128xbf16>
    %cst_502 = arith.constant dense<0.000000e+00> : vector<2x128xf32>
    %578 = tpu.matmul %576, %577, %cst_502 {dimension_numbers = #tpu.dot_dimension_numbers<[1], [0], [0], [1], [0, 0, 1, 1], [], []>} : vector<2x128xbf16>, vector<128x128xbf16>, vector<2x128xf32> -> vector<2x128xf32>
    %579 = arith.addf %574, %578 : vector<2x128xf32>
    %580 = vector.extract_strided_slice %489 {offsets = [6, 0], sizes = [2, 128], strides = [1, 1]} : vector<12x128xf32> to vector<2x128xf32>
    %581 = arith.truncf %580 : vector<2x128xf32> to vector<2x128xbf16>
    %c896_503 = arith.constant 896 : index
    %c0_504 = arith.constant 0 : index
    %582 = vector.load %arg8[%c896_503, %c0_504] : memref<1152x128xbf16, #tpu.memory_space<vmem>>, vector<128x128xbf16>
    %cst_505 = arith.constant dense<0.000000e+00> : vector<2x128xf32>
    %583 = tpu.matmul %581, %582, %cst_505 {dimension_numbers = #tpu.dot_dimension_numbers<[1], [0], [0], [1], [0, 0, 1, 1], [], []>} : vector<2x128xbf16>, vector<128x128xbf16>, vector<2x128xf32> -> vector<2x128xf32>
    %584 = arith.addf %579, %583 : vector<2x128xf32>
    %585 = vector.extract_strided_slice %489 {offsets = [8, 0], sizes = [2, 128], strides = [1, 1]} : vector<12x128xf32> to vector<2x128xf32>
    %586 = arith.truncf %585 : vector<2x128xf32> to vector<2x128xbf16>
    %c1024_506 = arith.constant 1024 : index
    %c0_507 = arith.constant 0 : index
    %587 = vector.load %arg8[%c1024_506, %c0_507] : memref<1152x128xbf16, #tpu.memory_space<vmem>>, vector<128x128xbf16>
    %cst_508 = arith.constant dense<0.000000e+00> : vector<2x128xf32>
    %588 = tpu.matmul %586, %587, %cst_508 {dimension_numbers = #tpu.dot_dimension_numbers<[1], [0], [0], [1], [0, 0, 1, 1], [], []>} : vector<2x128xbf16>, vector<128x128xbf16>, vector<2x128xf32> -> vector<2x128xf32>
    %589 = arith.addf %584, %588 : vector<2x128xf32>
    %cst_509 = arith.constant 0.000000e+00 : f32
    %590 = vector.broadcast %cst_509 : f32 to vector<2x128xf32>
    %591 = vector.extract_strided_slice %489 {offsets = [0, 0], sizes = [2, 128], strides = [1, 1]} : vector<12x128xf32> to vector<2x128xf32>
    %592 = arith.truncf %591 : vector<2x128xf32> to vector<2x128xbf16>
    %c0_510 = arith.constant 0 : index
    %c0_511 = arith.constant 0 : index
    %593 = vector.load %arg8[%c0_510, %c0_511] : memref<1152x128xbf16, #tpu.memory_space<vmem>>, vector<128x128xbf16>
    %cst_512 = arith.constant dense<0.000000e+00> : vector<2x128xf32>
    %594 = tpu.matmul %592, %593, %cst_512 {dimension_numbers = #tpu.dot_dimension_numbers<[1], [0], [0], [1], [0, 0, 1, 1], [], []>} : vector<2x128xbf16>, vector<128x128xbf16>, vector<2x128xf32> -> vector<2x128xf32>
    %595 = arith.addf %590, %594 : vector<2x128xf32>
    %596 = vector.extract_strided_slice %489 {offsets = [2, 0], sizes = [2, 128], strides = [1, 1]} : vector<12x128xf32> to vector<2x128xf32>
    %597 = arith.truncf %596 : vector<2x128xf32> to vector<2x128xbf16>
    %c128_513 = arith.constant 128 : index
    %c0_514 = arith.constant 0 : index
    %598 = vector.load %arg8[%c128_513, %c0_514] : memref<1152x128xbf16, #tpu.memory_space<vmem>>, vector<128x128xbf16>
    %cst_515 = arith.constant dense<0.000000e+00> : vector<2x128xf32>
    %599 = tpu.matmul %597, %598, %cst_515 {dimension_numbers = #tpu.dot_dimension_numbers<[1], [0], [0], [1], [0, 0, 1, 1], [], []>} : vector<2x128xbf16>, vector<128x128xbf16>, vector<2x128xf32> -> vector<2x128xf32>
    %600 = arith.addf %595, %599 : vector<2x128xf32>
    %601 = vector.extract_strided_slice %489 {offsets = [4, 0], sizes = [2, 128], strides = [1, 1]} : vector<12x128xf32> to vector<2x128xf32>
    %602 = arith.truncf %601 : vector<2x128xf32> to vector<2x128xbf16>
    %c256_516 = arith.constant 256 : index
    %c0_517 = arith.constant 0 : index
    %603 = vector.load %arg8[%c256_516, %c0_517] : memref<1152x128xbf16, #tpu.memory_space<vmem>>, vector<128x128xbf16>
    %cst_518 = arith.constant dense<0.000000e+00> : vector<2x128xf32>
    %604 = tpu.matmul %602, %603, %cst_518 {dimension_numbers = #tpu.dot_dimension_numbers<[1], [0], [0], [1], [0, 0, 1, 1], [], []>} : vector<2x128xbf16>, vector<128x128xbf16>, vector<2x128xf32> -> vector<2x128xf32>
    %605 = arith.addf %600, %604 : vector<2x128xf32>
    %606 = vector.extract_strided_slice %493 {offsets = [0, 0], sizes = [2, 128], strides = [1, 1]} : vector<12x128xf32> to vector<2x128xf32>
    %607 = arith.truncf %606 : vector<2x128xf32> to vector<2x128xbf16>
    %c384_519 = arith.constant 384 : index
    %c0_520 = arith.constant 0 : index
    %608 = vector.load %arg8[%c384_519, %c0_520] : memref<1152x128xbf16, #tpu.memory_space<vmem>>, vector<128x128xbf16>
    %cst_521 = arith.constant dense<0.000000e+00> : vector<2x128xf32>
    %609 = tpu.matmul %607, %608, %cst_521 {dimension_numbers = #tpu.dot_dimension_numbers<[1], [0], [0], [1], [0, 0, 1, 1], [], []>} : vector<2x128xbf16>, vector<128x128xbf16>, vector<2x128xf32> -> vector<2x128xf32>
    %610 = arith.addf %605, %609 : vector<2x128xf32>
    %611 = vector.extract_strided_slice %493 {offsets = [2, 0], sizes = [2, 128], strides = [1, 1]} : vector<12x128xf32> to vector<2x128xf32>
    %612 = arith.truncf %611 : vector<2x128xf32> to vector<2x128xbf16>
    %c512_522 = arith.constant 512 : index
    %c0_523 = arith.constant 0 : index
    %613 = vector.load %arg8[%c512_522, %c0_523] : memref<1152x128xbf16, #tpu.memory_space<vmem>>, vector<128x128xbf16>
    %cst_524 = arith.constant dense<0.000000e+00> : vector<2x128xf32>
    %614 = tpu.matmul %612, %613, %cst_524 {dimension_numbers = #tpu.dot_dimension_numbers<[1], [0], [0], [1], [0, 0, 1, 1], [], []>} : vector<2x128xbf16>, vector<128x128xbf16>, vector<2x128xf32> -> vector<2x128xf32>
    %615 = arith.addf %610, %614 : vector<2x128xf32>
    %616 = vector.extract_strided_slice %493 {offsets = [4, 0], sizes = [2, 128], strides = [1, 1]} : vector<12x128xf32> to vector<2x128xf32>
    %617 = arith.truncf %616 : vector<2x128xf32> to vector<2x128xbf16>
    %c640_525 = arith.constant 640 : index
    %c0_526 = arith.constant 0 : index
    %618 = vector.load %arg8[%c640_525, %c0_526] : memref<1152x128xbf16, #tpu.memory_space<vmem>>, vector<128x128xbf16>
    %cst_527 = arith.constant dense<0.000000e+00> : vector<2x128xf32>
    %619 = tpu.matmul %617, %618, %cst_527 {dimension_numbers = #tpu.dot_dimension_numbers<[1], [0], [0], [1], [0, 0, 1, 1], [], []>} : vector<2x128xbf16>, vector<128x128xbf16>, vector<2x128xf32> -> vector<2x128xf32>
    %620 = arith.addf %615, %619 : vector<2x128xf32>
    %621 = vector.extract_strided_slice %497 {offsets = [0, 0], sizes = [2, 128], strides = [1, 1]} : vector<12x128xf32> to vector<2x128xf32>
    %622 = arith.truncf %621 : vector<2x128xf32> to vector<2x128xbf16>
    %c768_528 = arith.constant 768 : index
    %c0_529 = arith.constant 0 : index
    %623 = vector.load %arg8[%c768_528, %c0_529] : memref<1152x128xbf16, #tpu.memory_space<vmem>>, vector<128x128xbf16>
    %cst_530 = arith.constant dense<0.000000e+00> : vector<2x128xf32>
    %624 = tpu.matmul %622, %623, %cst_530 {dimension_numbers = #tpu.dot_dimension_numbers<[1], [0], [0], [1], [0, 0, 1, 1], [], []>} : vector<2x128xbf16>, vector<128x128xbf16>, vector<2x128xf32> -> vector<2x128xf32>
    %625 = arith.addf %620, %624 : vector<2x128xf32>
    %626 = vector.extract_strided_slice %497 {offsets = [2, 0], sizes = [2, 128], strides = [1, 1]} : vector<12x128xf32> to vector<2x128xf32>
    %627 = arith.truncf %626 : vector<2x128xf32> to vector<2x128xbf16>
    %c896_531 = arith.constant 896 : index
    %c0_532 = arith.constant 0 : index
    %628 = vector.load %arg8[%c896_531, %c0_532] : memref<1152x128xbf16, #tpu.memory_space<vmem>>, vector<128x128xbf16>
    %cst_533 = arith.constant dense<0.000000e+00> : vector<2x128xf32>
    %629 = tpu.matmul %627, %628, %cst_533 {dimension_numbers = #tpu.dot_dimension_numbers<[1], [0], [0], [1], [0, 0, 1, 1], [], []>} : vector<2x128xbf16>, vector<128x128xbf16>, vector<2x128xf32> -> vector<2x128xf32>
    %630 = arith.addf %625, %629 : vector<2x128xf32>
    %631 = vector.extract_strided_slice %497 {offsets = [4, 0], sizes = [2, 128], strides = [1, 1]} : vector<12x128xf32> to vector<2x128xf32>
    %632 = arith.truncf %631 : vector<2x128xf32> to vector<2x128xbf16>
    %c1024_534 = arith.constant 1024 : index
    %c0_535 = arith.constant 0 : index
    %633 = vector.load %arg8[%c1024_534, %c0_535] : memref<1152x128xbf16, #tpu.memory_space<vmem>>, vector<128x128xbf16>
    %cst_536 = arith.constant dense<0.000000e+00> : vector<2x128xf32>
    %634 = tpu.matmul %632, %633, %cst_536 {dimension_numbers = #tpu.dot_dimension_numbers<[1], [0], [0], [1], [0, 0, 1, 1], [], []>} : vector<2x128xbf16>, vector<128x128xbf16>, vector<2x128xf32> -> vector<2x128xf32>
    %635 = arith.addf %630, %634 : vector<2x128xf32>
    %cst_537 = arith.constant 0.000000e+00 : f32
    %636 = vector.broadcast %cst_537 : f32 to vector<2x128xf32>
    %637 = vector.extract_strided_slice %489 {offsets = [4, 0], sizes = [2, 128], strides = [1, 1]} : vector<12x128xf32> to vector<2x128xf32>
    %638 = arith.truncf %637 : vector<2x128xf32> to vector<2x128xbf16>
    %c0_538 = arith.constant 0 : index
    %c0_539 = arith.constant 0 : index
    %639 = vector.load %arg8[%c0_538, %c0_539] : memref<1152x128xbf16, #tpu.memory_space<vmem>>, vector<128x128xbf16>
    %cst_540 = arith.constant dense<0.000000e+00> : vector<2x128xf32>
    %640 = tpu.matmul %638, %639, %cst_540 {dimension_numbers = #tpu.dot_dimension_numbers<[1], [0], [0], [1], [0, 0, 1, 1], [], []>} : vector<2x128xbf16>, vector<128x128xbf16>, vector<2x128xf32> -> vector<2x128xf32>
    %641 = arith.addf %636, %640 : vector<2x128xf32>
    %642 = vector.extract_strided_slice %489 {offsets = [6, 0], sizes = [2, 128], strides = [1, 1]} : vector<12x128xf32> to vector<2x128xf32>
    %643 = arith.truncf %642 : vector<2x128xf32> to vector<2x128xbf16>
    %c128_541 = arith.constant 128 : index
    %c0_542 = arith.constant 0 : index
    %644 = vector.load %arg8[%c128_541, %c0_542] : memref<1152x128xbf16, #tpu.memory_space<vmem>>, vector<128x128xbf16>
    %cst_543 = arith.constant dense<0.000000e+00> : vector<2x128xf32>
    %645 = tpu.matmul %643, %644, %cst_543 {dimension_numbers = #tpu.dot_dimension_numbers<[1], [0], [0], [1], [0, 0, 1, 1], [], []>} : vector<2x128xbf16>, vector<128x128xbf16>, vector<2x128xf32> -> vector<2x128xf32>
    %646 = arith.addf %641, %645 : vector<2x128xf32>
    %647 = vector.extract_strided_slice %489 {offsets = [8, 0], sizes = [2, 128], strides = [1, 1]} : vector<12x128xf32> to vector<2x128xf32>
    %648 = arith.truncf %647 : vector<2x128xf32> to vector<2x128xbf16>
    %c256_544 = arith.constant 256 : index
    %c0_545 = arith.constant 0 : index
    %649 = vector.load %arg8[%c256_544, %c0_545] : memref<1152x128xbf16, #tpu.memory_space<vmem>>, vector<128x128xbf16>
    %cst_546 = arith.constant dense<0.000000e+00> : vector<2x128xf32>
    %650 = tpu.matmul %648, %649, %cst_546 {dimension_numbers = #tpu.dot_dimension_numbers<[1], [0], [0], [1], [0, 0, 1, 1], [], []>} : vector<2x128xbf16>, vector<128x128xbf16>, vector<2x128xf32> -> vector<2x128xf32>
    %651 = arith.addf %646, %650 : vector<2x128xf32>
    %652 = vector.extract_strided_slice %493 {offsets = [4, 0], sizes = [2, 128], strides = [1, 1]} : vector<12x128xf32> to vector<2x128xf32>
    %653 = arith.truncf %652 : vector<2x128xf32> to vector<2x128xbf16>
    %c384_547 = arith.constant 384 : index
    %c0_548 = arith.constant 0 : index
    %654 = vector.load %arg8[%c384_547, %c0_548] : memref<1152x128xbf16, #tpu.memory_space<vmem>>, vector<128x128xbf16>
    %cst_549 = arith.constant dense<0.000000e+00> : vector<2x128xf32>
    %655 = tpu.matmul %653, %654, %cst_549 {dimension_numbers = #tpu.dot_dimension_numbers<[1], [0], [0], [1], [0, 0, 1, 1], [], []>} : vector<2x128xbf16>, vector<128x128xbf16>, vector<2x128xf32> -> vector<2x128xf32>
    %656 = arith.addf %651, %655 : vector<2x128xf32>
    %657 = vector.extract_strided_slice %493 {offsets = [6, 0], sizes = [2, 128], strides = [1, 1]} : vector<12x128xf32> to vector<2x128xf32>
    %658 = arith.truncf %657 : vector<2x128xf32> to vector<2x128xbf16>
    %c512_550 = arith.constant 512 : index
    %c0_551 = arith.constant 0 : index
    %659 = vector.load %arg8[%c512_550, %c0_551] : memref<1152x128xbf16, #tpu.memory_space<vmem>>, vector<128x128xbf16>
    %cst_552 = arith.constant dense<0.000000e+00> : vector<2x128xf32>
    %660 = tpu.matmul %658, %659, %cst_552 {dimension_numbers = #tpu.dot_dimension_numbers<[1], [0], [0], [1], [0, 0, 1, 1], [], []>} : vector<2x128xbf16>, vector<128x128xbf16>, vector<2x128xf32> -> vector<2x128xf32>
    %661 = arith.addf %656, %660 : vector<2x128xf32>
    %662 = vector.extract_strided_slice %493 {offsets = [8, 0], sizes = [2, 128], strides = [1, 1]} : vector<12x128xf32> to vector<2x128xf32>
    %663 = arith.truncf %662 : vector<2x128xf32> to vector<2x128xbf16>
    %c640_553 = arith.constant 640 : index
    %c0_554 = arith.constant 0 : index
    %664 = vector.load %arg8[%c640_553, %c0_554] : memref<1152x128xbf16, #tpu.memory_space<vmem>>, vector<128x128xbf16>
    %cst_555 = arith.constant dense<0.000000e+00> : vector<2x128xf32>
    %665 = tpu.matmul %663, %664, %cst_555 {dimension_numbers = #tpu.dot_dimension_numbers<[1], [0], [0], [1], [0, 0, 1, 1], [], []>} : vector<2x128xbf16>, vector<128x128xbf16>, vector<2x128xf32> -> vector<2x128xf32>
    %666 = arith.addf %661, %665 : vector<2x128xf32>
    %667 = vector.extract_strided_slice %497 {offsets = [4, 0], sizes = [2, 128], strides = [1, 1]} : vector<12x128xf32> to vector<2x128xf32>
    %668 = arith.truncf %667 : vector<2x128xf32> to vector<2x128xbf16>
    %c768_556 = arith.constant 768 : index
    %c0_557 = arith.constant 0 : index
    %669 = vector.load %arg8[%c768_556, %c0_557] : memref<1152x128xbf16, #tpu.memory_space<vmem>>, vector<128x128xbf16>
    %cst_558 = arith.constant dense<0.000000e+00> : vector<2x128xf32>
    %670 = tpu.matmul %668, %669, %cst_558 {dimension_numbers = #tpu.dot_dimension_numbers<[1], [0], [0], [1], [0, 0, 1, 1], [], []>} : vector<2x128xbf16>, vector<128x128xbf16>, vector<2x128xf32> -> vector<2x128xf32>
    %671 = arith.addf %666, %670 : vector<2x128xf32>
    %672 = vector.extract_strided_slice %497 {offsets = [6, 0], sizes = [2, 128], strides = [1, 1]} : vector<12x128xf32> to vector<2x128xf32>
    %673 = arith.truncf %672 : vector<2x128xf32> to vector<2x128xbf16>
    %c896_559 = arith.constant 896 : index
    %c0_560 = arith.constant 0 : index
    %674 = vector.load %arg8[%c896_559, %c0_560] : memref<1152x128xbf16, #tpu.memory_space<vmem>>, vector<128x128xbf16>
    %cst_561 = arith.constant dense<0.000000e+00> : vector<2x128xf32>
    %675 = tpu.matmul %673, %674, %cst_561 {dimension_numbers = #tpu.dot_dimension_numbers<[1], [0], [0], [1], [0, 0, 1, 1], [], []>} : vector<2x128xbf16>, vector<128x128xbf16>, vector<2x128xf32> -> vector<2x128xf32>
    %676 = arith.addf %671, %675 : vector<2x128xf32>
    %677 = vector.extract_strided_slice %497 {offsets = [8, 0], sizes = [2, 128], strides = [1, 1]} : vector<12x128xf32> to vector<2x128xf32>
    %678 = arith.truncf %677 : vector<2x128xf32> to vector<2x128xbf16>
    %c1024_562 = arith.constant 1024 : index
    %c0_563 = arith.constant 0 : index
    %679 = vector.load %arg8[%c1024_562, %c0_563] : memref<1152x128xbf16, #tpu.memory_space<vmem>>, vector<128x128xbf16>
    %cst_564 = arith.constant dense<0.000000e+00> : vector<2x128xf32>
    %680 = tpu.matmul %678, %679, %cst_564 {dimension_numbers = #tpu.dot_dimension_numbers<[1], [0], [0], [1], [0, 0, 1, 1], [], []>} : vector<2x128xbf16>, vector<128x128xbf16>, vector<2x128xf32> -> vector<2x128xf32>
    %681 = arith.addf %676, %680 : vector<2x128xf32>
    %cst_565 = arith.constant dense<0.000000e+00> : vector<128xf32>
    %682 = vector.multi_reduction <add>, %543, %cst_565 [0] : vector<2x128xf32> to vector<128xf32>
    %683 = vector.shape_cast %682 : vector<128xf32> to vector<1x128xf32>
    %cst_566 = arith.constant 0.000000e+00 : f32
    %684 = vector.broadcast %cst_566 : f32 to vector<1x128xf32>
    %685 = arith.addf %684, %683 : vector<1x128xf32>
    %cst_567 = arith.constant dense<0.000000e+00> : vector<128xf32>
    %686 = vector.multi_reduction <add>, %589, %cst_567 [0] : vector<2x128xf32> to vector<128xf32>
    %687 = vector.shape_cast %686 : vector<128xf32> to vector<1x128xf32>
    %688 = arith.addf %685, %687 : vector<1x128xf32>
    %cst_568 = arith.constant dense<0.000000e+00> : vector<128xf32>
    %689 = vector.multi_reduction <add>, %635, %cst_568 [0] : vector<2x128xf32> to vector<128xf32>
    %690 = vector.shape_cast %689 : vector<128xf32> to vector<1x128xf32>
    %691 = arith.addf %688, %690 : vector<1x128xf32>
    %cst_569 = arith.constant dense<0.000000e+00> : vector<128xf32>
    %692 = vector.multi_reduction <add>, %681, %cst_569 [0] : vector<2x128xf32> to vector<128xf32>
    %693 = vector.shape_cast %692 : vector<128xf32> to vector<1x128xf32>
    %694 = arith.addf %691, %693 : vector<1x128xf32>
    %695 = arith.mulf %543, %543 : vector<2x128xf32>
    %cst_570 = arith.constant dense<0.000000e+00> : vector<128xf32>
    %696 = vector.multi_reduction <add>, %695, %cst_570 [0] : vector<2x128xf32> to vector<128xf32>
    %697 = vector.shape_cast %696 : vector<128xf32> to vector<1x128xf32>
    %cst_571 = arith.constant 0.000000e+00 : f32
    %698 = vector.broadcast %cst_571 : f32 to vector<1x128xf32>
    %699 = arith.addf %698, %697 : vector<1x128xf32>
    %700 = arith.mulf %589, %589 : vector<2x128xf32>
    %cst_572 = arith.constant dense<0.000000e+00> : vector<128xf32>
    %701 = vector.multi_reduction <add>, %700, %cst_572 [0] : vector<2x128xf32> to vector<128xf32>
    %702 = vector.shape_cast %701 : vector<128xf32> to vector<1x128xf32>
    %703 = arith.addf %699, %702 : vector<1x128xf32>
    %704 = arith.mulf %635, %635 : vector<2x128xf32>
    %cst_573 = arith.constant dense<0.000000e+00> : vector<128xf32>
    %705 = vector.multi_reduction <add>, %704, %cst_573 [0] : vector<2x128xf32> to vector<128xf32>
    %706 = vector.shape_cast %705 : vector<128xf32> to vector<1x128xf32>
    %707 = arith.addf %703, %706 : vector<1x128xf32>
    %708 = arith.mulf %681, %681 : vector<2x128xf32>
    %cst_574 = arith.constant dense<0.000000e+00> : vector<128xf32>
    %709 = vector.multi_reduction <add>, %708, %cst_574 [0] : vector<2x128xf32> to vector<128xf32>
    %710 = vector.shape_cast %709 : vector<128xf32> to vector<1x128xf32>
    %711 = arith.addf %707, %710 : vector<1x128xf32>
    %c0_575 = arith.constant 0 : index
    %c0_576 = arith.constant 0 : index
    %712 = vector.load %arg9[%c0_575, %c0_576] : memref<1x128xf32, #tpu.memory_space<vmem>>, vector<1x128xf32>
    %c0_577 = arith.constant 0 : index
    %c0_578 = arith.constant 0 : index
    %713 = vector.load %arg10[%c0_577, %c0_578] : memref<1x128xf32, #tpu.memory_space<vmem>>, vector<1x128xf32>
    %cst_579 = arith.constant 8.000000e+00 : f32
    %714 = vector.broadcast %cst_579 : f32 to vector<1x128xf32>
    %715 = arith.divf %694, %714 : vector<1x128xf32>
    %cst_580 = arith.constant 8.000000e+00 : f32
    %716 = vector.broadcast %cst_580 : f32 to vector<1x128xf32>
    %717 = arith.divf %711, %716 : vector<1x128xf32>
    %718 = arith.mulf %715, %715 : vector<1x128xf32>
    %719 = arith.subf %717, %718 : vector<1x128xf32>
    %cst_581 = arith.constant 9.99999974E-6 : f32
    %720 = vector.broadcast %cst_581 : f32 to vector<1x128xf32>
    %721 = arith.addf %719, %720 : vector<1x128xf32>
    %722 = math.rsqrt %721 : vector<1x128xf32>
    %723 = arith.mulf %712, %722 : vector<1x128xf32>
    %724 = arith.mulf %715, %723 : vector<1x128xf32>
    %725 = arith.subf %713, %724 : vector<1x128xf32>
    %726 = vector.broadcast %723 : vector<1x128xf32> to vector<2x128xf32>
    %727 = arith.mulf %543, %726 : vector<2x128xf32>
    %728 = vector.broadcast %725 : vector<1x128xf32> to vector<2x128xf32>
    %729 = arith.addf %727, %728 : vector<2x128xf32>
    %cst_582 = arith.constant 0.000000e+00 : f32
    %730 = vector.broadcast %cst_582 : f32 to vector<2x128xf32>
    %731 = arith.maximumf %729, %730 : vector<2x128xf32>
    %732 = vector.broadcast %723 : vector<1x128xf32> to vector<2x128xf32>
    %733 = arith.mulf %589, %732 : vector<2x128xf32>
    %734 = vector.broadcast %725 : vector<1x128xf32> to vector<2x128xf32>
    %735 = arith.addf %733, %734 : vector<2x128xf32>
    %cst_583 = arith.constant 0.000000e+00 : f32
    %736 = vector.broadcast %cst_583 : f32 to vector<2x128xf32>
    %737 = arith.maximumf %735, %736 : vector<2x128xf32>
    %738 = vector.broadcast %723 : vector<1x128xf32> to vector<2x128xf32>
    %739 = arith.mulf %635, %738 : vector<2x128xf32>
    %740 = vector.broadcast %725 : vector<1x128xf32> to vector<2x128xf32>
    %741 = arith.addf %739, %740 : vector<2x128xf32>
    %cst_584 = arith.constant 0.000000e+00 : f32
    %742 = vector.broadcast %cst_584 : f32 to vector<2x128xf32>
    %743 = arith.maximumf %741, %742 : vector<2x128xf32>
    %744 = vector.broadcast %723 : vector<1x128xf32> to vector<2x128xf32>
    %745 = arith.mulf %681, %744 : vector<2x128xf32>
    %746 = vector.broadcast %725 : vector<1x128xf32> to vector<2x128xf32>
    %747 = arith.addf %745, %746 : vector<2x128xf32>
    %cst_585 = arith.constant 0.000000e+00 : f32
    %748 = vector.broadcast %cst_585 : f32 to vector<2x128xf32>
    %749 = arith.maximumf %747, %748 : vector<2x128xf32>
    %cst_586 = arith.constant 0.000000e+00 : f32
    %750 = vector.broadcast %cst_586 : f32 to vector<2x512xf32>
    %751 = arith.truncf %731 : vector<2x128xf32> to vector<2x128xbf16>
    %c0_587 = arith.constant 0 : index
    %c0_588 = arith.constant 0 : index
    %752 = vector.load %arg11[%c0_587, %c0_588] : memref<512x512xbf16, #tpu.memory_space<vmem>>, vector<128x512xbf16>
    %cst_589 = arith.constant dense<0.000000e+00> : vector<2x512xf32>
    %753 = tpu.matmul %751, %752, %cst_589 {dimension_numbers = #tpu.dot_dimension_numbers<[1], [0], [0], [1], [0, 0, 1, 1], [], []>} : vector<2x128xbf16>, vector<128x512xbf16>, vector<2x512xf32> -> vector<2x512xf32>
    %754 = arith.addf %750, %753 : vector<2x512xf32>
    %755 = arith.truncf %737 : vector<2x128xf32> to vector<2x128xbf16>
    %c128_590 = arith.constant 128 : index
    %c0_591 = arith.constant 0 : index
    %756 = vector.load %arg11[%c128_590, %c0_591] : memref<512x512xbf16, #tpu.memory_space<vmem>>, vector<128x512xbf16>
    %cst_592 = arith.constant dense<0.000000e+00> : vector<2x512xf32>
    %757 = tpu.matmul %755, %756, %cst_592 {dimension_numbers = #tpu.dot_dimension_numbers<[1], [0], [0], [1], [0, 0, 1, 1], [], []>} : vector<2x128xbf16>, vector<128x512xbf16>, vector<2x512xf32> -> vector<2x512xf32>
    %758 = arith.addf %754, %757 : vector<2x512xf32>
    %759 = arith.truncf %743 : vector<2x128xf32> to vector<2x128xbf16>
    %c256_593 = arith.constant 256 : index
    %c0_594 = arith.constant 0 : index
    %760 = vector.load %arg11[%c256_593, %c0_594] : memref<512x512xbf16, #tpu.memory_space<vmem>>, vector<128x512xbf16>
    %cst_595 = arith.constant dense<0.000000e+00> : vector<2x512xf32>
    %761 = tpu.matmul %759, %760, %cst_595 {dimension_numbers = #tpu.dot_dimension_numbers<[1], [0], [0], [1], [0, 0, 1, 1], [], []>} : vector<2x128xbf16>, vector<128x512xbf16>, vector<2x512xf32> -> vector<2x512xf32>
    %762 = arith.addf %758, %761 : vector<2x512xf32>
    %763 = arith.truncf %749 : vector<2x128xf32> to vector<2x128xbf16>
    %c384_596 = arith.constant 384 : index
    %c0_597 = arith.constant 0 : index
    %764 = vector.load %arg11[%c384_596, %c0_597] : memref<512x512xbf16, #tpu.memory_space<vmem>>, vector<128x512xbf16>
    %cst_598 = arith.constant dense<0.000000e+00> : vector<2x512xf32>
    %765 = tpu.matmul %763, %764, %cst_598 {dimension_numbers = #tpu.dot_dimension_numbers<[1], [0], [0], [1], [0, 0, 1, 1], [], []>} : vector<2x128xbf16>, vector<128x512xbf16>, vector<2x512xf32> -> vector<2x512xf32>
    %766 = arith.addf %762, %765 : vector<2x512xf32>
    %c0_599 = arith.constant 0 : index
    %c0_600 = arith.constant 0 : index
    %767 = vector.load %arg12[%c0_599, %c0_600] : memref<1x512xf32, #tpu.memory_space<vmem>>, vector<1x512xf32>
    %768 = vector.broadcast %767 : vector<1x512xf32> to vector<2x512xf32>
    %769 = arith.addf %766, %768 : vector<2x512xf32>
    %cst_601 = arith.constant 0.000000e+00 : f32
    %770 = vector.broadcast %cst_601 : f32 to vector<2x512xf32>
    %771 = arith.maximumf %769, %770 : vector<2x512xf32>
    %772 = arith.truncf %771 : vector<2x512xf32> to vector<2x512xbf16>
    %c0_602 = arith.constant 0 : index
    %c0_603 = arith.constant 0 : index
    %773 = vector.load %arg13[%c0_602, %c0_603] : memref<512x128xbf16, #tpu.memory_space<vmem>>, vector<512x128xbf16>
    %cst_604 = arith.constant dense<0.000000e+00> : vector<2x128xf32>
    %774 = tpu.matmul %772, %773, %cst_604 {dimension_numbers = #tpu.dot_dimension_numbers<[1], [0], [0], [1], [0, 0, 1, 1], [], []>} : vector<2x512xbf16>, vector<512x128xbf16>, vector<2x128xf32> -> vector<2x128xf32>
    %c0_605 = arith.constant 0 : index
    %c0_606 = arith.constant 0 : index
    %775 = vector.load %arg14[%c0_605, %c0_606] : memref<1x128xf32, #tpu.memory_space<vmem>>, vector<1x128xf32>
    %776 = vector.broadcast %775 : vector<1x128xf32> to vector<2x128xf32>
    %777 = arith.addf %774, %776 : vector<2x128xf32>
    %c0_607 = arith.constant 0 : index
    %c0_608 = arith.constant 0 : index
    %778 = vector.load %arg15[%c0_607, %c0_608] : memref<2x128xf32, #tpu.memory_space<vmem>>, vector<2x128xf32>
    tpu.vector_store %arg15[%c0_607, %c0_608], %777 {strides = array<i32>} : memref<2x128xf32, #tpu.memory_space<vmem>>, vector<2x128xf32>,
    return
  }
  func.func @transform_0(%arg0: i32) -> (i32, i32) {
    %c0_i32 = arith.constant 0 : i32
    %c0_i32_0 = arith.constant 0 : i32
    %c0_i32_1 = arith.constant 0 : i32
    return %c0_i32, %c0_i32_0 : i32, i32
  }
  func.func @transform_1(%arg0: i32) -> (i32, i32) {
    %c0_i32 = arith.constant 0 : i32
    %c0_i32_0 = arith.constant 0 : i32
    %c0_i32_1 = arith.constant 0 : i32
    return %c0_i32, %c0_i32_0 : i32, i32
  }
  func.func @transform_2(%arg0: i32) -> (i32, i32) {
    %c0_i32 = arith.constant 0 : i32
    %c0_i32_0 = arith.constant 0 : i32
    %c0_i32_1 = arith.constant 0 : i32
    return %c0_i32, %c0_i32_0 : i32, i32
  }
  func.func @transform_3(%arg0: i32) -> (i32, i32) {
    %c0_i32 = arith.constant 0 : i32
    %c0_i32_0 = arith.constant 0 : i32
    %c0_i32_1 = arith.constant 0 : i32
    return %c0_i32, %c0_i32_0 : i32, i32
  }
  func.func @transform_4(%arg0: i32) -> (i32, i32) {
    %c0_i32 = arith.constant 0 : i32
    %c0_i32_0 = arith.constant 0 : i32
    %c0_i32_1 = arith.constant 0 : i32
    return %c0_i32, %c0_i32_0 : i32, i32
  }
  func.func @transform_5(%arg0: i32) -> (i32, i32) {
    %c0_i32 = arith.constant 0 : i32
    %c0_i32_0 = arith.constant 0 : i32
    %c0_i32_1 = arith.constant 0 : i32
    return %c0_i32, %c0_i32_0 : i32, i32
  }
  func.func @transform_6(%arg0: i32) -> (i32, i32) {
    %c0_i32 = arith.constant 0 : i32
    %c0_i32_0 = arith.constant 0 : i32
    %c0_i32_1 = arith.constant 0 : i32
    return %c0_i32, %c0_i32_0 : i32, i32
  }
  func.func @transform_7(%arg0: i32) -> (i32, i32) {
    %c0_i32 = arith.constant 0 : i32
    %c0_i32_0 = arith.constant 0 : i32
    %c0_i32_1 = arith.constant 0 : i32
    return %c0_i32, %c0_i32_0 : i32, i32
  }
  func.func @transform_8(%arg0: i32) -> (i32, i32) {
    %c0_i32 = arith.constant 0 : i32
    %c0_i32_0 = arith.constant 0 : i32
    %c0_i32_1 = arith.constant 0 : i32
    return %c0_i32, %c0_i32_0 : i32, i32
  }
  func.func @transform_9(%arg0: i32) -> (i32, i32) {
    %c0_i32 = arith.constant 0 : i32
    %c0_i32_0 = arith.constant 0 : i32
    %c0_i32_1 = arith.constant 0 : i32
    return %c0_i32, %c0_i32_0 : i32, i32
  }
  func.func @transform_10(%arg0: i32) -> (i32, i32) {
    %c0_i32 = arith.constant 0 : i32
    %c0_i32_0 = arith.constant 0 : i32
    %c0_i32_1 = arith.constant 0 : i32
    return %c0_i32, %c0_i32_0 : i32, i32
  }
  func.func @transform_11(%arg0: i32) -> (i32, i32) {
    %c0_i32 = arith.constant 0 : i32
    %c0_i32_0 = arith.constant 0 : i32
    %c0_i32_1 = arith.constant 0 : i32
    return %c0_i32, %c0_i32_0 : i32, i32
  }
  func.func @transform_12(%arg0: i32) -> (i32, i32) {
    %c0_i32 = arith.constant 0 : i32
    %c0_i32_0 = arith.constant 0 : i32
    %c0_i32_1 = arith.constant 0 : i32
    return %c0_i32, %c0_i32_0 : i32, i32
  }
  func.func @transform_13(%arg0: i32) -> (i32, i32) {
    %c0_i32 = arith.constant 0 : i32
    %c0_i32_0 = arith.constant 0 : i32
    %c0_i32_1 = arith.constant 0 : i32
    return %c0_i32, %c0_i32_0 : i32, i32
  }
  func.func @transform_14(%arg0: i32) -> (i32, i32) {
    %c0_i32 = arith.constant 0 : i32
    %c0_i32_0 = arith.constant 0 : i32
    %c0_i32_1 = arith.constant 0 : i32
    return %c0_i32, %c0_i32_0 : i32, i32
  }
}

</mosaic_0001>

<bundles_post_ra>
// kernel: fused_cnn_forward.1
= control target key start
LH: loop header
LB: loop body
LE: loop exit
PB: predicated region body
PF: predicated region fallthrough
CT: control target
= control target key end

     0   :  { %s15292_s0 = inlined_call_operand.vmem [shape: bf16[392,256], index: 0, kind: input, shape index: {}]   ;;  %s15293_s1 = inlined_call_operand.vmem [shape: bf16[256,128], index: 1, kind: input, shape index: {}]   ;;  %s15294_s2 = inlined_call_operand.vmem [shape: f32[1,128], index: 2, kind: input, shape index: {}]   ;;  %s15295_s3 = inlined_call_operand.vmem [shape: f32[1,128], index: 3, kind: input, shape index: {}]   ;;  %s15296_s4 = inlined_call_operand.vmem [shape: bf16[2048,128], index: 4, kind: input, shape index: {}]   ;;  %s15297_s5 = inlined_call_operand.vmem [shape: f32[1,128], index: 5, kind: input, shape index: {}]   ;;  %s15298_s6 = inlined_call_operand.vmem [shape: f32[1,128], index: 6, kind: input, shape index: {}]   ;;  %s15299_s7 = inlined_call_operand.vmem [shape: bf16[1152,128], index: 7, kind: input, shape index: {}]   ;;  %s15300_s8 = inlined_call_operand.vmem [shape: f32[1,128], index: 8, kind: input, shape index: {}]   ;;  %s15301_s9 = inlined_call_operand.vmem [shape: f32[1,128], index: 9, kind: input, shape index: {}]   ;;  %s15302_s10 = inlined_call_operand.vmem [shape: bf16[512,512], index: 10, kind: input, shape index: {}]   ;;  %s15303_s11 = inlined_call_operand.vmem [shape: f32[1,512], index: 11, kind: input, shape index: {}]   ;;  %s15304_s12 = inlined_call_operand.vmem [shape: bf16[512,128], index: 12, kind: input, shape index: {}]   ;;  %s15305_s13 = inlined_call_operand.vmem [shape: f32[1,128], index: 13, kind: input, shape index: {}]   ;;  %s15306_s14 = inlined_call_operand.hbm [shape: f32[2,128], index: 14, kind: output, shape index: {}]  }
   0x1   :  { %v8926_v0 = vld [vmem:[%s15293_s1 + $0x38] sm:$0xff]  ;;  %v8925_v2 = vld [vmem:[%s15293_s1 + $0x30] sm:$0xff]  ;;  %v8924_v4 = vld [vmem:[%s15293_s1 + $0x28] sm:$0xff] }
   0x2   :  { %v8934_v1 = vld [vmem:[%s15293_s1 + $0x78] sm:$0xff]  ;;  %472 = vmatpush.bf16.msra.mxu0 %v8926_v0  ;;  %v8933_v3 = vld [vmem:[%s15293_s1 + $0x70] sm:$0xff]  ;;  %v8932_v5 = vld [vmem:[%s15293_s1 + $0x68] sm:$0xff] }
   0x3   :  { %605 = vmatpush.bf16.msra.mxu1 %v8934_v1 }
   0x6   :  { %473 = vmatpush.bf16.msra.mxu0 %v8925_v2 }
   0x7   :  { %606 = vmatpush.bf16.msra.mxu1 %v8933_v3 }
   0x8   :  { %19 = vsyncpa [#allocation4], 0  ;;  %v8923_v6 = vld [vmem:[%s15293_s1 + $0x20] sm:$0xff]  ;;  %v8922_v8 = vld [vmem:[%s15293_s1 + $0x18] sm:$0xff]  ;;  %vm1218_vm4 = vcmask 1044480   ;;  %vm4263_vm5 = vcmask 1043456  }
   0x9   :  { %v8931_v7 = vld [vmem:[%s15293_s1 + $0x60] sm:$0xff]  ;;  %v8930_v9 = vld [vmem:[%s15293_s1 + $0x58] sm:$0xff]  ;;  %v8921_v10 = vld [vmem:[%s15293_s1 + $0x10] sm:$0xff]  ;;  %vm5554_vm10 = vcmask 1041408   ;;  %s9718_s19 = smov [#allocation3]   ;;  %s6998_s20 = sshll.u32 %s15306_s14, 4  ;;  %s6999_s20 = int_to_ptr.hbm [resolvable:$true] %s6998_s20 }
   0xa   :  { %474 = vmatpush.bf16.msra.mxu0 %v8924_v4  ;;  %v8929_v11 = vld [vmem:[%s15293_s1 + $0x50] sm:$0xff]  ;;  %v8920_v12 = vld [vmem:[%s15293_s1 + $0x8] sm:$0xff]  ;;  %v8919_v14 = vld [vmem:[%s15293_s1] sm:$0xff] }
   0xb   :  { %607 = vmatpush.bf16.msra.mxu1 %v8932_v5  ;;  %v8928_v13 = vld [vmem:[%s15293_s1 + $0x48] sm:$0xff]  ;;  %v8927_v15 = vld [vmem:[%s15293_s1 + $0x40] sm:$0xff]  ;;  %v7017_v22 = vld [vmem:[%s15292_s0 + $0x10] sm:$0xf] }
   0xc   :  { %v7009_v16 = vld [vmem:[%s15292_s0] sm:$0xf]  ;;  %v8872_v17 = vld [vmem:[%s15292_s0 + $0x4] sm:$0xf0]  ;;  %v8871_v18 = vld [vmem:[%s15292_s0 + $0x4] sm:$0xf] }
   0xd   :  { %v7011_v19 = vld [vmem:[%s15292_s0 + $0x8] sm:$0xf0]  ;;  %v7010_v20 = vor.u32 %v8872_v17, %v7009_v16  ;;  %v8874_v23 = vld [vmem:[%s15292_s0 + $0x14] sm:$0xf0]  ;;  %v8873_v24 = vld [vmem:[%s15292_s0 + $0x14] sm:$0xf] }
   0xe   :  { %475 = vmatpush.bf16.msra.mxu0 %v8923_v6  ;;  %v7014_v21 = vor.u32 %v8871_v18, %v7011_v19  ;;  %v7019_v25 = vld [vmem:[%s15292_s0 + $0x18] sm:$0xf0]  ;;  %v7018_v26 = vor.u32 %v8874_v23, %v7017_v22  ;;  %v7025_v28 = vld [vmem:[%s15292_s0 + $0x20] sm:$0xf]  ;;  %v8876_v29 = vld [vmem:[%s15292_s0 + $0x24] sm:$0xf0] }
   0xf   :  { %608 = vmatpush.bf16.msra.mxu1 %v8931_v7  ;;  %v7022_v27 = vor.u32 %v8873_v24, %v7019_v25  ;;  %v8875_v30 = vld [vmem:[%s15292_s0 + $0x24] sm:$0xf]  ;;  %v7027_v31 = vld [vmem:[%s15292_s0 + $0x28] sm:$0xf0]  ;;  %v7026_v32 = vor.u32 %v8876_v29, %v7025_v28  ;;  %v7033_v34 = vld [vmem:[%s15292_s0 + $0x30] sm:$0xf] }
  0x10   :  { %v7030_v33 = vor.u32 %v8875_v30, %v7027_v31  ;;  %v8878_v35 = vld [vmem:[%s15292_s0 + $0x34] sm:$0xf0]  ;;  %v8877_v36 = vld [vmem:[%s15292_s0 + $0x34] sm:$0xf]  ;;  %v7035_v37 = vld [vmem:[%s15292_s0 + $0x38] sm:$0xf0] }
  0x11   :  { %v7034_v38 = vor.u32 %v8878_v35, %v7033_v34  ;;  %v7038_v39 = vor.u32 %v8877_v36, %v7035_v37  ;;  %v7041_v40 = vld [vmem:[%s15292_s0 + $0x40] sm:$0xf]  ;;  %v8880_v41 = vld [vmem:[%s15292_s0 + $0x44] sm:$0xf0]  ;;  %v8879_v42 = vld [vmem:[%s15292_s0 + $0x44] sm:$0xf] }
  0x12   :  { %476 = vmatpush.bf16.msra.mxu0 %v8922_v8  ;;  %v7043_v43 = vld [vmem:[%s15292_s0 + $0x48] sm:$0xf0]  ;;  %v7042_v44 = vor.u32 %v8880_v41, %v7041_v40  ;;  %v7049_v46 = vld [vmem:[%s15292_s0 + $0x50] sm:$0xf]  ;;  %v8882_v47 = vld [vmem:[%s15292_s0 + $0x54] sm:$0xf0] }
  0x13   :  { %609 = vmatpush.bf16.msra.mxu1 %v8930_v9  ;;  %v7046_v45 = vor.u32 %v8879_v42, %v7043_v43  ;;  %v8881_v48 = vld [vmem:[%s15292_s0 + $0x54] sm:$0xf]  ;;  %v7051_v49 = vld [vmem:[%s15292_s0 + $0x58] sm:$0xf0]  ;;  %v7050_v50 = vor.u32 %v8882_v47, %v7049_v46  ;;  %v7057_v52 = vld [vmem:[%s15292_s0 + $0x60] sm:$0xf] }
  0x14   :  { %v7054_v51 = vor.u32 %v8881_v48, %v7051_v49  ;;  %v8884_v53 = vld [vmem:[%s15292_s0 + $0x64] sm:$0xf0]  ;;  %v8883_v54 = vld [vmem:[%s15292_s0 + $0x64] sm:$0xf]  ;;  %v7059_v55 = vld [vmem:[%s15292_s0 + $0x68] sm:$0xf0] }
  0x15   :  { %v7058_v56 = vor.u32 %v8884_v53, %v7057_v52  ;;  %v7062_v57 = vor.u32 %v8883_v54, %v7059_v55  ;;  %v7065_v58 = vld [vmem:[%s15292_s0 + $0x70] sm:$0xf]  ;;  %v8886_v59 = vld [vmem:[%s15292_s0 + $0x74] sm:$0xf0]  ;;  %v8885_v60 = vld [vmem:[%s15292_s0 + $0x74] sm:$0xf] }
  0x16   :  { %477 = vmatpush.bf16.msra.mxu0 %v8921_v10  ;;  %v7067_v61 = vld [vmem:[%s15292_s0 + $0x78] sm:$0xf0]  ;;  %v7066_v62 = vor.u32 %v8886_v59, %v7065_v58  ;;  %v7073_v0 = vld [vmem:[%s15292_s0 + $0x80] sm:$0xf]  ;;  %v8888_v1 = vld [vmem:[%s15292_s0 + $0x84] sm:$0xf0] }
  0x17   :  { %610 = vmatpush.bf16.msra.mxu1 %v8929_v11  ;;  %v7070_v63 = vor.u32 %v8885_v60, %v7067_v61  ;;  %v8887_v2 = vld [vmem:[%s15292_s0 + $0x84] sm:$0xf]  ;;  %v7075_v3 = vld [vmem:[%s15292_s0 + $0x88] sm:$0xf0]  ;;  %v7074_v4 = vor.u32 %v8888_v1, %v7073_v0  ;;  %v7089_v24 = vld [vmem:[%s15292_s0 + $0xa0] sm:$0xf] }
  0x18   :  { %v7078_v5 = vor.u32 %v8887_v2, %v7075_v3  ;;  %v8892_v25 = vld [vmem:[%s15292_s0 + $0xa4] sm:$0xf0]  ;;  %v7097_v36 = vld [vmem:[%s15292_s0 + $0xb0] sm:$0xf]  ;;  %v8894_v37 = vld [vmem:[%s15292_s0 + $0xb4] sm:$0xf0] }
  0x19   :  { %v7090_v28 = vor.u32 %v8892_v25, %v7089_v24  ;;  %v7098_v40 = vor.u32 %v8894_v37, %v7097_v36  ;;  %v7105_v48 = vld [vmem:[%s15292_s0 + $0xc0] sm:$0xf]  ;;  %v8896_v49 = vld [vmem:[%s15292_s0 + $0xc4] sm:$0xf0]  ;;  %v7113_v60 = vld [vmem:[%s15292_s0 + $0xd0] sm:$0xf] }
  0x1a   :  { %478 = vmatpush.bf16.msra.mxu0 %v8920_v12  ;;  %v7081_v12 = vld [vmem:[%s15292_s0 + $0x90] sm:$0xf]  ;;  %v7106_v52 = vor.u32 %v8896_v49, %v7105_v48  ;;  %v8898_v61 = vld [vmem:[%s15292_s0 + $0xd4] sm:$0xf0] }
  0x1b   :  { %611 = vmatpush.bf16.msra.mxu1 %v8928_v13  ;;  %v8890_v13 = vld [vmem:[%s15292_s0 + $0x94] sm:$0xf0]  ;;  %v7114_v0 = vor.u32 %v8898_v61, %v7113_v60  ;;  %v7129_v24 = vld [vmem:[%s15292_s0 + $0xf0] sm:$0xf] }
  0x1c   :  { %v7082_v16 = vor.u32 %v8890_v13, %v7081_v12  ;;  %v8899_v12 = vld [vmem:[%s15292_s0 + $0xe4] sm:$0xf]  ;;  %v7123_v13 = vld [vmem:[%s15292_s0 + $0xe8] sm:$0xf0]  ;;  %v8902_v25 = vld [vmem:[%s15292_s0 + $0xf4] sm:$0xf0] }
  0x1e   :  { %479 = vmatpush.bf16.msra.mxu0 %v8919_v14  ;;  %v8889_v14 = vld [vmem:[%s15292_s0 + $0x94] sm:$0xf] }
  0x1f   :  { %612 = vmatpush.bf16.msra.mxu1 %v8927_v15  ;;  %v7083_v15 = vld [vmem:[%s15292_s0 + $0x98] sm:$0xf0] }
  0x20   :  { %v7086_v17 = vor.u32 %v8889_v14, %v7083_v15  ;;  %v7126_v15 = vor.u32 %v8899_v12, %v7123_v13 }
  0x21   :  { %480 = vmatmul.bf16.vlgmr.msra.gmra.mxu0 %v7010_v20 }
  0x22   :  { %613 = vmatmul.bf16.vlgmr.msra.gmra.mxu1 %v7014_v21 }
  0x31   :  { %485 = vmatmul.bf16.gmra.mxu0 %v7018_v26  ;;  %v8891_v26 = vld [vmem:[%s15292_s0 + $0xa4] sm:$0xf] }
  0x32   :  { %618 = vmatmul.bf16.gmra.mxu1 %v7022_v27  ;;  %v7091_v27 = vld [vmem:[%s15292_s0 + $0xa8] sm:$0xf0] }
  0x33   :  { %v7094_v29 = vor.u32 %v8891_v26, %v7091_v27  ;;  %v8901_v26 = vld [vmem:[%s15292_s0 + $0xf4] sm:$0xf]  ;;  %v7131_v27 = vld [vmem:[%s15292_s0 + $0xf8] sm:$0xf0] }
  0x41   :  { %490 = vmatmul.bf16.gmra.mxu0 %v7026_v32 }
  0x42   :  { %623 = vmatmul.bf16.gmra.mxu1 %v7030_v33 }
  0x51   :  { %495 = vmatmul.bf16.gmra.mxu0 %v7034_v38  ;;  %v8893_v38 = vld [vmem:[%s15292_s0 + $0xb4] sm:$0xf] }
  0x52   :  { %628 = vmatmul.bf16.gmra.mxu1 %v7038_v39  ;;  %v7099_v39 = vld [vmem:[%s15292_s0 + $0xb8] sm:$0xf0] }
  0x53   :  { %v7102_v41 = vor.u32 %v8893_v38, %v7099_v39  ;;  %v7137_v38 = vld [vmem:[%s15292_s0 + $0x100] sm:$0xf]  ;;  %v8904_v39 = vld [vmem:[%s15292_s0 + $0x104] sm:$0xf0] }
  0x61   :  { %500 = vmatmul.bf16.gmra.mxu0 %v7042_v44 }
  0x62   :  { %633 = vmatmul.bf16.gmra.mxu1 %v7046_v45 }
  0x71   :  { %505 = vmatmul.bf16.gmra.mxu0 %v7050_v50  ;;  %v8895_v50 = vld [vmem:[%s15292_s0 + $0xc4] sm:$0xf] }
  0x72   :  { %638 = vmatmul.bf16.gmra.mxu1 %v7054_v51  ;;  %v7107_v51 = vld [vmem:[%s15292_s0 + $0xc8] sm:$0xf0] }
  0x73   :  { %v7110_v53 = vor.u32 %v8895_v50, %v7107_v51 }
  0x81   :  { %510 = vmatmul.bf16.gmra.mxu0 %v7058_v56 }
  0x82   :  { %643 = vmatmul.bf16.gmra.mxu1 %v7062_v57 }
  0x91   :  { %515 = vmatmul.bf16.gmra.mxu0 %v7066_v62  ;;  %v8897_v62 = vld [vmem:[%s15292_s0 + $0xd4] sm:$0xf] }
  0x92   :  { %648 = vmatmul.bf16.gmra.mxu1 %v7070_v63  ;;  %v7115_v63 = vld [vmem:[%s15292_s0 + $0xd8] sm:$0xf0] }
  0x93   :  { %v7118_v1 = vor.u32 %v8897_v62, %v7115_v63 }
  0x9e   :  { %v481_v6 = vpop.f32.mrf.mxu0 }
  0x9f   :  { %v614_v7 = vpop.f32.mrf.mxu1 }
  0xa0   :  { %v9950_v8 = vadd.f32 %v614_v7, %v481_v6 }
  0xa1   :  { %520 = vmatmul.bf16.gmra.mxu0 %v7074_v4 }
  0xa2   :  { %653 = vmatmul.bf16.gmra.mxu1 %v7078_v5 }
  0xa6   :  { %v483_v9 = vpop.f32.mrf.mxu0 }
  0xa7   :  { %v616_v10 = vpop.f32.mrf.mxu1 }
  0xa8   :  { %v9952_v11 = vadd.f32 %v616_v10, %v483_v9  ;;  %v7121_v9 = vld [vmem:[%s15292_s0 + $0xe0] sm:$0xf]  ;;  %v8900_v10 = vld [vmem:[%s15292_s0 + $0xe4] sm:$0xf0] }
  0xa9   :  { %v7122_v14 = vor.u32 %v8900_v10, %v7121_v9 }
  0xae   :  { %v486_v18 = vpop.f32.mrf.mxu0 }
  0xaf   :  { %v619_v19 = vpop.f32.mrf.mxu1 }
  0xb0   :  { %v9966_v20 = vadd.f32 %v619_v19, %v486_v18 }
  0xb1   :  { %525 = vmatmul.bf16.gmra.mxu0 %v7082_v16 }
  0xb2   :  { %658 = vmatmul.bf16.gmra.mxu1 %v7086_v17 }
  0xb6   :  { %v488_v21 = vpop.f32.mrf.mxu0 }
  0xb7   :  { %v621_v22 = vpop.f32.mrf.mxu1 }
  0xb8   :  { %v9968_v23 = vadd.f32 %v621_v22, %v488_v21 }
  0xbe   :  { %v491_v30 = vpop.f32.mrf.mxu0 }
  0xbf   :  { %v624_v31 = vpop.f32.mrf.mxu1 }
  0xc0   :  { %v9982_v32 = vadd.f32 %v624_v31, %v491_v30 }
  0xc1   :  { %530 = vmatmul.bf16.gmra.mxu0 %v7090_v28  ;;  %v7130_v28 = vor.u32 %v8902_v25, %v7129_v24  ;;  %v8909_v24 = vld [vmem:[%s15292_s0 + $0x134] sm:$0xf]  ;;  %v7163_v25 = vld [vmem:[%s15292_s0 + $0x138] sm:$0xf0] }
  0xc2   :  { %663 = vmatmul.bf16.gmra.mxu1 %v7094_v29  ;;  %v7134_v29 = vor.u32 %v8901_v26, %v7131_v27  ;;  %v7166_v27 = vor.u32 %v8909_v24, %v7163_v25 }
  0xc6   :  { %v493_v33 = vpop.f32.mrf.mxu0 }
  0xc7   :  { %v626_v34 = vpop.f32.mrf.mxu1 }
  0xc8   :  { %v9984_v35 = vadd.f32 %v626_v34, %v493_v33 }
  0xce   :  { %v496_v42 = vpop.f32.mrf.mxu0 }
  0xcf   :  { %v629_v43 = vpop.f32.mrf.mxu1 }
  0xd0   :  { %v9998_v44 = vadd.f32 %v629_v43, %v496_v42  ;;  %v7138_v42 = vor.u32 %v8904_v39, %v7137_v38  ;;  %v7169_v38 = vld [vmem:[%s15292_s0 + $0x140] sm:$0xf]  ;;  %v8912_v39 = vld [vmem:[%s15292_s0 + $0x144] sm:$0xf0] }
  0xd1   :  { %535 = vmatmul.bf16.gmra.mxu0 %v7098_v40  ;;  %v8903_v40 = vld [vmem:[%s15292_s0 + $0x104] sm:$0xf] }
  0xd2   :  { %668 = vmatmul.bf16.gmra.mxu1 %v7102_v41  ;;  %v7139_v41 = vld [vmem:[%s15292_s0 + $0x108] sm:$0xf0] }
  0xd3   :  { %v7142_v43 = vor.u32 %v8903_v40, %v7139_v41  ;;  %v8911_v40 = vld [vmem:[%s15292_s0 + $0x144] sm:$0xf]  ;;  %v7171_v41 = vld [vmem:[%s15292_s0 + $0x148] sm:$0xf0] }
  0xd6   :  { %v498_v45 = vpop.f32.mrf.mxu0 }
  0xd7   :  { %v631_v46 = vpop.f32.mrf.mxu1 }
  0xd8   :  { %v10000_v47 = vadd.f32 %v631_v46, %v498_v45 }
  0xde   :  { %v501_v54 = vpop.f32.mrf.mxu0 }
  0xdf   :  { %v634_v55 = vpop.f32.mrf.mxu1 }
  0xe0   :  { %v10014_v56 = vadd.f32 %v634_v55, %v501_v54  ;;  %v8905_v54 = vld [vmem:[%s15292_s0 + $0x114] sm:$0xf]  ;;  %v7147_v55 = vld [vmem:[%s15292_s0 + $0x118] sm:$0xf0] }
  0xe1   :  { %540 = vmatmul.bf16.gmra.mxu0 %v7106_v52  ;;  %v7145_v52 = vld [vmem:[%s15292_s0 + $0x110] sm:$0xf] }
  0xe2   :  { %673 = vmatmul.bf16.gmra.mxu1 %v7110_v53  ;;  %v8906_v53 = vld [vmem:[%s15292_s0 + $0x114] sm:$0xf0] }
  0xe6   :  { %v503_v57 = vpop.f32.mrf.mxu0 }
  0xe7   :  { %v636_v58 = vpop.f32.mrf.mxu1 }
  0xe8   :  { %v10016_v59 = vadd.f32 %v636_v58, %v503_v57  ;;  %v7146_v57 = vor.u32 %v8906_v53, %v7145_v52  ;;  %v7150_v58 = vor.u32 %v8905_v54, %v7147_v55  ;;  %v7177_v54 = vld [vmem:[%s15292_s0 + $0x150] sm:$0xf]  ;;  %v8914_v55 = vld [vmem:[%s15292_s0 + $0x154] sm:$0xf0] }
  0xee   :  { %v506_v2 = vpop.f32.mrf.mxu0 }
  0xef   :  { %v639_v3 = vpop.f32.mrf.mxu1 }
  0xf0   :  { %v10030_v4 = vadd.f32 %v639_v3, %v506_v2  ;;  %v7153_v2 = vld [vmem:[%s15292_s0 + $0x120] sm:$0xf]  ;;  %v8908_v3 = vld [vmem:[%s15292_s0 + $0x124] sm:$0xf0] }
  0xf1   :  { %545 = vmatmul.bf16.gmra.mxu0 %v7114_v0  ;;  %v7154_v9 = vor.u32 %v8908_v3, %v7153_v2 }
  0xf2   :  { %678 = vmatmul.bf16.gmra.mxu1 %v7118_v1 }
  0xf6   :  { %v508_v5 = vpop.f32.mrf.mxu0 }
  0xf7   :  { %v641_v6 = vpop.f32.mrf.mxu1 }
  0xf8   :  { %v10032_v7 = vadd.f32 %v641_v6, %v508_v5  ;;  %v8907_v5 = vld [vmem:[%s15292_s0 + $0x124] sm:$0xf]  ;;  %v7155_v6 = vld [vmem:[%s15292_s0 + $0x128] sm:$0xf0] }
  0xf9   :  { %v7158_v10 = vor.u32 %v8907_v5, %v7155_v6  ;;  %v7185_v6 = vld [vmem:[%s15292_s0 + $0x160] sm:$0xf] }
  0xfe   :  { %v511_v16 = vpop.f32.mrf.mxu0 }
  0xff   :  { %v644_v17 = vpop.f32.mrf.mxu1 }
 0x100   :  { %v10046_v18 = vadd.f32 %v644_v17, %v511_v16 }
 0x101   :  { %550 = vmatmul.bf16.gmra.mxu0 %v7122_v14 }
 0x102   :  { %683 = vmatmul.bf16.gmra.mxu1 %v7126_v15 }
 0x106   :  { %v513_v19 = vpop.f32.mrf.mxu0 }
 0x107   :  { %v646_v21 = vpop.f32.mrf.mxu1 }
 0x108   :  { %v10048_v22 = vadd.f32 %v646_v21, %v513_v19  ;;  %v7161_v19 = vld [vmem:[%s15292_s0 + $0x130] sm:$0xf]  ;;  %v8910_v21 = vld [vmem:[%s15292_s0 + $0x134] sm:$0xf0] }
 0x109   :  { %v7162_v26 = vor.u32 %v8910_v21, %v7161_v19 }
 0x10e   :  { %v516_v30 = vpop.f32.mrf.mxu0 }
 0x10f   :  { %v649_v31 = vpop.f32.mrf.mxu1 }
 0x110   :  { %v10062_v33 = vadd.f32 %v649_v31, %v516_v30 }
 0x111   :  { %555 = vmatmul.bf16.gmra.mxu0 %v7130_v28 }
 0x112   :  { %15580 = vst [vmem:[#allocation6_spill] sm:$0xff] %v10062_v33  ;;  %688 = vmatmul.bf16.gmra.mxu1 %v7134_v29 }
 0x116   :  { %v518_v34 = vpop.f32.mrf.mxu0 }
 0x117   :  { %v651_v36 = vpop.f32.mrf.mxu1 }
 0x118   :  { %v10064_v37 = vadd.f32 %v651_v36, %v518_v34 }
 0x11e   :  { %v521_v45 = vpop.f32.mrf.mxu0 }
 0x11f   :  { %v654_v46 = vpop.f32.mrf.mxu1 }
 0x120   :  { %v10078_v48 = vadd.f32 %v654_v46, %v521_v45 }
 0x121   :  { %560 = vmatmul.bf16.gmra.mxu0 %v7138_v42  ;;  %v7170_v42 = vor.u32 %v8912_v39, %v7169_v38 }
 0x122   :  { %693 = vmatmul.bf16.gmra.mxu1 %v7142_v43  ;;  %v7174_v43 = vor.u32 %v8911_v40, %v7171_v41 }
 0x126   :  { %v523_v49 = vpop.f32.mrf.mxu0 }
 0x127   :  { %v656_v50 = vpop.f32.mrf.mxu1 }
 0x128   :  { %v10080_v51 = vadd.f32 %v656_v50, %v523_v49 }
 0x12a   :  { %15581 = vst [vmem:[#allocation7_spill] sm:$0xff] %v10080_v51 }
 0x12e   :  { %v526_v60 = vpop.f32.mrf.mxu0 }
 0x12f   :  { %v659_v61 = vpop.f32.mrf.mxu1 }
 0x130   :  { %v10094_v62 = vadd.f32 %v659_v61, %v526_v60  ;;  %v7178_v60 = vor.u32 %v8914_v55, %v7177_v54 }
 0x131   :  { %565 = vmatmul.bf16.gmra.mxu0 %v7146_v57  ;;  %v8913_v57 = vld [vmem:[%s15292_s0 + $0x154] sm:$0xf] }
 0x132   :  { %15582 = vst [vmem:[#allocation8_spill] sm:$0xff] %v10094_v62  ;;  %698 = vmatmul.bf16.gmra.mxu1 %v7150_v58  ;;  %v7179_v58 = vld [vmem:[%s15292_s0 + $0x158] sm:$0xf0] }
 0x133   :  { %v7182_v61 = vor.u32 %v8913_v57, %v7179_v58 }
 0x136   :  { %v528_v63 = vpop.f32.mrf.mxu0 }
 0x137   :  { %v661_v0 = vpop.f32.mrf.mxu1 }
 0x138   :  { %v10096_v1 = vadd.f32 %v661_v0, %v528_v63 }
 0x13e   :  { %v531_v12 = vpop.f32.mrf.mxu0 }
 0x13f   :  { %v664_v13 = vpop.f32.mrf.mxu1 }
 0x140   :  { %v10110_v14 = vadd.f32 %v664_v13, %v531_v12  ;;  %v7187_v12 = vld [vmem:[%s15292_s0 + $0x168] sm:$0xf0] }
 0x141   :  { %570 = vmatmul.bf16.gmra.mxu0 %v7154_v9  ;;  %v8916_v9 = vld [vmem:[%s15292_s0 + $0x164] sm:$0xf0] }
 0x142   :  { %703 = vmatmul.bf16.gmra.mxu1 %v7158_v10  ;;  %v8915_v10 = vld [vmem:[%s15292_s0 + $0x164] sm:$0xf]  ;;  %v7186_v13 = vor.u32 %v8916_v9, %v7185_v6 }
 0x146   :  { %v533_v15 = vpop.f32.mrf.mxu0 }
 0x147   :  { %v666_v16 = vpop.f32.mrf.mxu1 }
 0x148   :  { %v10112_v17 = vadd.f32 %v666_v16, %v533_v15  ;;  %v7190_v15 = vor.u32 %v8915_v10, %v7187_v12 }
 0x14e   :  { %v536_v28 = vpop.f32.mrf.mxu0 }
 0x14f   :  { %v669_v29 = vpop.f32.mrf.mxu1 }
 0x150   :  { %v10126_v30 = vadd.f32 %v669_v29, %v536_v28  ;;  %v8917_v28 = vld [vmem:[%s15292_s0 + $0x174] sm:$0xf]  ;;  %v7195_v29 = vld [vmem:[%s15292_s0 + $0x178] sm:$0xf0] }
 0x151   :  { %575 = vmatmul.bf16.gmra.mxu0 %v7162_v26  ;;  %v7193_v26 = vld [vmem:[%s15292_s0 + $0x170] sm:$0xf] }
 0x152   :  { %708 = vmatmul.bf16.gmra.mxu1 %v7166_v27  ;;  %v8918_v27 = vld [vmem:[%s15292_s0 + $0x174] sm:$0xf0] }
 0x156   :  { %v538_v31 = vpop.f32.mrf.mxu0 }
 0x157   :  { %v671_v34 = vpop.f32.mrf.mxu1 }
 0x158   :  { %v10128_v36 = vadd.f32 %v671_v34, %v538_v31  ;;  %v7194_v31 = vor.u32 %v8918_v27, %v7193_v26  ;;  %v7198_v34 = vor.u32 %v8917_v28, %v7195_v29  ;;  %v738_v26 = vadd.f32 %v9952_v11, %v9950_v8 }
 0x159   :  { %v795_v28 = vmul.f32 %v9968_v23, %v9968_v23 }
 0x15a   :  { %v739_v29 = vadd.f32 %v738_v26, %v9966_v20 }
 0x15e   :  { %v541_v45 = vpop.f32.mrf.mxu0 }
 0x15f   :  { %v674_v46 = vpop.f32.mrf.mxu1 }
 0x160   :  { %v10142_v49 = vadd.f32 %v674_v46, %v541_v45 }
 0x161   :  { %580 = vmatmul.bf16.gmra.mxu0 %v7170_v42 }
 0x162   :  { %15583 = vst [vmem:[#allocation9_spill] sm:$0xff] %v10142_v49  ;;  %713 = vmatmul.bf16.gmra.mxu1 %v7174_v43  ;;  %v96_v43 = vld [vmem:[%s15292_s0 + $0x180] sm:$0xff] }
 0x163   :  { %v274_v45 = vunpack.c.l.b16 %v96_v43  ;;  %v275_v46 = vunpack.c.h.b16 %v96_v43  ;;  %v740_v43 = vadd.f32 %v739_v29, %v9968_v23 }
 0x166   :  { %v543_v50 = vpop.f32.mrf.mxu0 }
 0x167   :  { %v676_v52 = vpop.f32.mrf.mxu1 }
 0x168   :  { %v10144_v53 = vadd.f32 %v676_v52, %v543_v50  ;;  %v324_v50 = vpack.c.b16 %v274_v45, %v274_v45  ;;  %v325_v52 = vpack.c.b16 %v275_v46, %v275_v46  ;;  %v797_v46 = vmul.f32 %v9984_v35, %v9984_v35 }
 0x16e   :  { %v546_v63 = vpop.f32.mrf.mxu0 }
 0x16f   :  { %v679_v0 = vpop.f32.mrf.mxu1 }
 0x170   :  { %v10158_v2 = vadd.f32 %v679_v0, %v546_v63 }
 0x171   :  { %585 = vmatmul.bf16.gmra.mxu0 %v7178_v60 }
 0x172   :  { %718 = vmatmul.bf16.gmra.mxu1 %v7182_v61 }
 0x176   :  { %v10160_v3 = vpop.f32.mrf.mxu0 }
 0x177   :  { %v10162_v5 = vpop.f32.mrf.mxu1 }
 0x17e   :  { %v551_v16 = vpop.f32.mrf.mxu0 }
 0x17f   :  { %v684_v19 = vpop.f32.mrf.mxu1 }
 0x180   :  { %v10176_v21 = vadd.f32 %v684_v19, %v551_v16  ;;  %v792_v16 = vmul.f32 %v9950_v8, %v9950_v8  ;;  %v794_v19 = vmul.f32 %v9966_v20, %v9966_v20 }
 0x181   :  { %590 = vmatmul.bf16.gmra.mxu0 %v7186_v13 }
 0x182   :  { %723 = vmatmul.bf16.gmra.mxu1 %v7190_v15  ;;  %v793_v15 = vmul.f32 %v9952_v11, %v9952_v11 }
 0x184   :  { %v841_v27 = vadd.f32 %v793_v15, %v792_v16  ;;  %v800_v15 = vmul.f32 %v10014_v56, %v10014_v56 }
 0x186   :  { %v10178_v24 = vpop.f32.mrf.mxu0 }
 0x187   :  { %v10180_v25 = vpop.f32.mrf.mxu1 }
 0x18e   :  { %v556_v38 = vpop.f32.mrf.mxu0 }
 0x18f   :  { %v689_v39 = vpop.f32.mrf.mxu1 }
 0x190   :  { %v10194_v40 = vadd.f32 %v689_v39, %v556_v38 }
 0x191   :  { %595 = vmatmul.bf16.gmra.mxu0 %v7194_v31  ;;  %v842_v31 = vadd.f32 %v841_v27, %v794_v19 }
 0x192   :  { %728 = vmatmul.bf16.gmra.mxu1 %v7198_v34  ;;  %v796_v34 = vmul.f32 %v9982_v32, %v9982_v32 }
 0x193   :  { %v843_v45 = vadd.f32 %v842_v31, %v795_v28  ;;  %v801_v28 = vmul.f32 %v10016_v59, %v10016_v59 }
 0x196   :  { %v10196_v41 = vpop.f32.mrf.mxu0 }
 0x197   :  { %v10198_v42 = vpop.f32.mrf.mxu1 }
 0x19e   :  { %v561_v54 = vpop.f32.mrf.mxu0 }
 0x19f   :  { %v694_v55 = vpop.f32.mrf.mxu1 }
 0x1a0   :  { %v10203_v57 = vadd.f32 %v694_v55, %v561_v54  ;;  %v798_v54 = vmul.f32 %v9998_v44, %v9998_v44 }
 0x1a1   :  { %600 = vmatmul.bf16.gmra.mxu0 %v324_v50  ;;  %v741_v50 = vadd.f32 %v740_v43, %v9982_v32 }
 0x1a2   :  { %733 = vmatmul.bf16.gmra.mxu1 %v325_v52  ;;  %v844_v52 = vadd.f32 %v843_v45, %v796_v34  ;;  %v802_v34 = vmul.f32 %v10030_v4, %v10030_v4 }
 0x1a3   :  { %v742_v55 = vadd.f32 %v741_v50, %v9984_v35 }
 0x1a6   :  { %v10205_v58 = vpop.f32.mrf.mxu0 }
 0x1a7   :  { %v10207_v60 = vpop.f32.mrf.mxu1 }
 0x1ae   :  { %v566_v61 = vpop.f32.mrf.mxu0 }
 0x1af   :  { %v699_v63 = vpop.f32.mrf.mxu1 }
 0x1b0   :  { %v10209_v0 = vadd.f32 %v699_v63, %v566_v61  ;;  %v845_v61 = vadd.f32 %v844_v52, %v797_v46  ;;  %v799_v63 = vmul.f32 %v10000_v47, %v10000_v47  ;;  %v803_v46 = vmul.f32 %v10032_v7, %v10032_v7 }
 0x1b6   :  { %v10211_v6 = vpop.f32.mrf.mxu0 }
 0x1b7   :  { %v10213_v9 = vpop.f32.mrf.mxu1 }
 0x1be   :  { %v571_v10 = vpop.f32.mrf.mxu0 }
 0x1bf   :  { %v704_v12 = vpop.f32.mrf.mxu1 }
 0x1c0   :  { %v10215_v13 = vadd.f32 %v704_v12, %v571_v10  ;;  %v743_v10 = vadd.f32 %v742_v55, %v9998_v44  ;;  %v846_v12 = vadd.f32 %v845_v61, %v798_v54  ;;  %v804_v54 = vmul.f32 %v10046_v18, %v10046_v18 }
 0x1c2   :  { %v744_v26 = vadd.f32 %v743_v10, %v10000_v47  ;;  %v847_v27 = vadd.f32 %v846_v12, %v799_v63  ;;  %v805_v12 = vmul.f32 %v10048_v22, %v10048_v22 }
 0x1c4   :  { %v745_v29 = vadd.f32 %v744_v26, %v10014_v56  ;;  %v848_v31 = vadd.f32 %v847_v27, %v800_v15  ;;  %v806_v27 = vmul.f32 %v10062_v33, %v10062_v33 }
 0x1c6   :  { %v10230_v38 = vpop.f32.mrf.mxu0  ;;  %v746_v43 = vadd.f32 %v745_v29, %v10016_v59  ;;  %v849_v45 = vadd.f32 %v848_v31, %v801_v28  ;;  %v807_v31 = vmul.f32 %v10064_v37, %v10064_v37 }
 0x1c7   :  { %v10232_v39 = vpop.f32.mrf.mxu1 }
 0x1c8   :  { %v747_v50 = vadd.f32 %v746_v43, %v10030_v4  ;;  %v850_v52 = vadd.f32 %v849_v45, %v802_v34  ;;  %v808_v45 = vmul.f32 %v10078_v48, %v10078_v48 }
 0x1ca   :  { %v748_v63 = vadd.f32 %v747_v50, %v10032_v7  ;;  %v851_v10 = vadd.f32 %v850_v52, %v803_v46 }
 0x1cc   :  { %v749_v15 = vadd.f32 %v748_v63, %v10046_v18  ;;  %v852_v26 = vadd.f32 %v851_v10, %v804_v54  ;;  %v809_v63 = vmul.f32 %v10080_v51, %v10080_v51 }
 0x1ce   :  { %v10246_v16 = vpop.f32.mrf.mxu0  ;;  %v750_v28 = vadd.f32 %v749_v15, %v10048_v22  ;;  %v853_v29 = vadd.f32 %v852_v26, %v805_v12  ;;  %v810_v15 = vmul.f32 %v10094_v62, %v10094_v62 }
 0x1cf   :  { %v10248_v19 = vpop.f32.mrf.mxu1 }
 0x1d0   :  { %v751_v34 = vadd.f32 %v750_v28, %v10062_v33  ;;  %v854_v43 = vadd.f32 %v853_v29, %v806_v27  ;;  %v811_v28 = vmul.f32 %v10096_v1, %v10096_v1 }
 0x1d2   :  { %v752_v52 = vadd.f32 %v751_v34, %v10064_v37  ;;  %v855_v54 = vadd.f32 %v854_v43, %v807_v31  ;;  %v812_v31 = vmul.f32 %v10110_v14, %v10110_v14 }
 0x1d4   :  { %v753_v10 = vadd.f32 %v752_v52, %v10078_v48  ;;  %v856_v12 = vadd.f32 %v855_v54, %v808_v45  ;;  %v813_v54 = vmul.f32 %v10112_v17, %v10112_v17 }
 0x1d6   :  { %v10262_v55 = vpop.f32.mrf.mxu0  ;;  %v754_v26 = vadd.f32 %v753_v10, %v10080_v51  ;;  %v857_v27 = vadd.f32 %v856_v12, %v809_v63  ;;  %v814_v12 = vmul.f32 %v10126_v30, %v10126_v30 }
 0x1d7   :  { %v10264_v61 = vpop.f32.mrf.mxu1 }
 0x1d8   :  { %v755_v29 = vadd.f32 %v754_v26, %v10094_v62  ;;  %v858_v33 = vadd.f32 %v857_v27, %v810_v15  ;;  %v815_v27 = vmul.f32 %v10128_v36, %v10128_v36 }
 0x1da   :  { %v756_v45 = vadd.f32 %v755_v29, %v10096_v1  ;;  %v859_v52 = vadd.f32 %v858_v33, %v811_v28  ;;  %v816_v33 = vmul.f32 %v10142_v49, %v10142_v49 }
 0x1dc   :  { %v757_v63 = vadd.f32 %v756_v45, %v10110_v14  ;;  %v860_v10 = vadd.f32 %v859_v52, %v812_v31  ;;  %v817_v52 = vmul.f32 %v10144_v53, %v10144_v53 }
 0x1de   :  { %v10278_v46 = vpop.f32.mrf.mxu0  ;;  %v758_v15 = vadd.f32 %v757_v63, %v10112_v17  ;;  %v861_v26 = vadd.f32 %v860_v10, %v813_v54  ;;  %v10319_v54 = vadd.f32 %v10162_v5, %v10160_v3  ;;  %v820_v5 = vmul.f32 %v10176_v21, %v10176_v21 }
 0x1df   :  { %v10280_v50 = vpop.f32.mrf.mxu1 }
 0x1e0   :  { %v759_v62 = vadd.f32 %v758_v15, %v10126_v30  ;;  %v862_v51 = vadd.f32 %v861_v26, %v814_v12  ;;  %v818_v12 = vmul.f32 %v10158_v2, %v10158_v2 }
 0x1e2   :  { %v760_v31 = vadd.f32 %v759_v62, %v10128_v36  ;;  %v863_v45 = vadd.f32 %v862_v51, %v815_v27  ;;  %v819_v62 = vmul.f32 %v10319_v54, %v10319_v54  ;;  %v10329_v51 = vadd.f32 %v10180_v25, %v10178_v24 }
 0x1e4   :  { %v761_v63 = vadd.f32 %v760_v31, %v10142_v49  ;;  %v864_v10 = vadd.f32 %v863_v45, %v816_v33 }
 0x1e6   :  { %v10294_v34 = vpop.f32.mrf.mxu0  ;;  %v762_v15 = vadd.f32 %v761_v63, %v10144_v53  ;;  %v865_v26 = vadd.f32 %v864_v10, %v817_v52  ;;  %v821_v52 = vmul.f32 %v10329_v51, %v10329_v51  ;;  %v10339_v63 = vadd.f32 %v10198_v42, %v10196_v41 }
 0x1e7   :  { %v10296_v43 = vpop.f32.mrf.mxu1  ;;  %v822_v10 = vmul.f32 %v10194_v40, %v10194_v40  ;;  %v824_v42 = vmul.f32 %v10203_v57, %v10203_v57 }
 0x1e8   :  { %v763_v27 = vadd.f32 %v762_v15, %v10158_v2  ;;  %v866_v3 = vadd.f32 %v865_v26, %v818_v12  ;;  %v823_v26 = vmul.f32 %v10339_v63, %v10339_v63 }
 0x1ea   :  { %v764_v45 = vadd.f32 %v763_v27, %v10319_v54  ;;  %v867_v49 = vadd.f32 %v866_v3, %v819_v62  ;;  %v10349_v62 = vadd.f32 %v10207_v60, %v10205_v58 }
 0x1ec   :  { %v765_v24 = vadd.f32 %v764_v45, %v10176_v21  ;;  %v868_v25 = vadd.f32 %v867_v49, %v820_v5 }
 0x1ee   :  { %v10310_v28 = vpop.f32.mrf.mxu0  ;;  %v766_v12 = vadd.f32 %v765_v24, %v10329_v51  ;;  %v869_v15 = vadd.f32 %v868_v25, %v821_v52  ;;  %v825_v52 = vmul.f32 %v10349_v62, %v10349_v62  ;;  %v10359_v24 = vadd.f32 %v10213_v9, %v10211_v6 }
 0x1ef   :  { %v10312_v29 = vpop.f32.mrf.mxu1  ;;  %v826_v25 = vmul.f32 %v10209_v0, %v10209_v0  ;;  %v828_v9 = vmul.f32 %v10215_v13, %v10215_v13 }
 0x1f0   :  { %v767_v27 = vadd.f32 %v766_v12, %v10194_v40  ;;  %v870_v41 = vadd.f32 %v869_v15, %v822_v10  ;;  %v827_v15 = vmul.f32 %v10359_v24, %v10359_v24 }
 0x1f2   :  { %v768_v5 = vadd.f32 %v767_v27, %v10339_v63  ;;  %v871_v45 = vadd.f32 %v870_v41, %v823_v26  ;;  %v10369_v26 = vadd.f32 %v10232_v39, %v10230_v38  ;;  %v10376_v41 = vadd.f32 %v10248_v19, %v10246_v16 }
 0x1f3   :  { %v10383_v38 = vadd.f32 %v10264_v61, %v10262_v55  ;;  %v10390_v16 = vadd.f32 %v10280_v50, %v10278_v46  ;;  %v10398_v55 = vadd.f32 %v10296_v43, %v10294_v34  ;;  %v10405_v50 = vadd.f32 %v10312_v29, %v10310_v28 }
 0x1f4   :  { %v769_v58 = vadd.f32 %v768_v5, %v10203_v57  ;;  %v872_v60 = vadd.f32 %v871_v45, %v824_v42 }
 0x1f6   :  { %v588_v33 = vpop.f32.mrf.mxu0  ;;  %v770_v10 = vadd.f32 %v769_v58, %v10349_v62  ;;  %v873_v12 = vadd.f32 %v872_v60, %v825_v52  ;;  %v829_v58 = vmul.f32 %v10369_v26, %v10369_v26 }
 0x1f7   :  { %v721_v31 = vpop.f32.mrf.mxu1 }
 0x1f8   :  { %v771_v27 = vadd.f32 %v770_v10, %v10209_v0  ;;  %v874_v6 = vadd.f32 %v873_v12, %v826_v25  ;;  %v830_v25 = vmul.f32 %v10376_v41, %v10376_v41  ;;  %v831_v12 = vmul.f32 %v10383_v38, %v10383_v38 }
 0x1f9   :  { %v10410_v34 = vadd.f32 %v721_v31, %v588_v33 }
 0x1fa   :  { %v772_v45 = vadd.f32 %v771_v27, %v10359_v24  ;;  %v875_v52 = vadd.f32 %v874_v6, %v827_v15  ;;  %v832_v27 = vmul.f32 %v10390_v16, %v10390_v16 }
 0x1fc   :  { %v773_v39 = vadd.f32 %v772_v45, %v10215_v13  ;;  %v876_v60 = vadd.f32 %v875_v52, %v828_v9 }
 0x1fe   :  { %v591_v49 = vpop.f32.mrf.mxu0  ;;  %v774_v19 = vadd.f32 %v773_v39, %v10369_v26  ;;  %v877_v10 = vadd.f32 %v876_v60, %v829_v58  ;;  %v833_v58 = vmul.f32 %v10398_v55, %v10398_v55  ;;  %v834_v60 = vmul.f32 %v10405_v50, %v10405_v50 }
 0x1ff   :  { %v724_v3 = vpop.f32.mrf.mxu1 }
 0x200   :  { %v775_v15 = vadd.f32 %v774_v19, %v10376_v41  ;;  %v878_v61 = vadd.f32 %v877_v10, %v830_v25  ;;  %v10415_v25 = vadd.f32 %v724_v3, %v591_v49  ;;  %v9715_v19 = vmov 392.0  }
 0x201   :  { %9485 = vrcp.f32 %v9715_v19  ;;  %v835_v10 = vmul.f32 %v10410_v34, %v10410_v34 }
 0x202   :  { %v776_v46 = vadd.f32 %v775_v15, %v10383_v38  ;;  %v879_v45 = vadd.f32 %v878_v61, %v831_v12 }
 0x204   :  { %v777_v52 = vadd.f32 %v776_v46, %v10390_v16  ;;  %v880_v43 = vadd.f32 %v879_v45, %v832_v27  ;;  %v836_v27 = vmul.f32 %v10415_v25, %v10415_v25 }
 0x206   :  { %v593_v42 = vpop.f32.mrf.mxu0  ;;  %v778_v39 = vadd.f32 %v777_v52, %v10398_v55  ;;  %v881_v28 = vadd.f32 %v880_v43, %v833_v58 }
 0x207   :  { %v726_v5 = vpop.f32.mrf.mxu1  ;;  %v9486_v3 = vpop.eup %9485 }
 0x208   :  { %v779_v29 = vadd.f32 %v778_v39, %v10405_v50  ;;  %v10420_v12 = vadd.f32 %v726_v5, %v593_v42  ;;  %v882_v15 = vadd.f32 %v881_v28, %v834_v60  ;;  %v898_v39 = vmul.f32 392.0, %v9486_v3 }
 0x209   :  { %vm902_vm0 = vweird.f32 %v9486_v3 }
 0x20a   :  { %v780_v61 = vadd.f32 %v779_v29, %v10410_v34  ;;  %v883_v46 = vadd.f32 %v882_v15, %v835_v10  ;;  %v837_v52 = vmul.f32 %v10420_v12, %v10420_v12 }
 0x20c   :  { %v781_v45 = vadd.f32 %v780_v61, %v10415_v25  ;;  %v884_v42 = vadd.f32 %v883_v46, %v836_v27 }
 0x20e   :  { %v596_v6 = vpop.f32.mrf.mxu0  ;;  %v782_v5 = vadd.f32 %v781_v45, %v10420_v12  ;;  %v885_v60 = vadd.f32 %v884_v42, %v837_v52  ;;  %v8943_v42 = vld [vmem:[%s15296_s4 + $0x38] sm:$0xff] }
 0x20f   :  { %v729_v9 = vpop.f32.mrf.mxu1  ;;  %1339 = vmatpush.bf16.msra.mxu3 %v8943_v42 }
 0x210   :  { %v10425_v49 = vadd.f32 %v729_v9, %v596_v6 }
 0x212   :  { %15584 = vst [vmem:[#allocation10_spill] sm:$0xff] %v10425_v49  ;;  %v838_v43 = vmul.f32 %v10425_v49, %v10425_v49  ;;  %v783_v6 = vadd.f32 %v782_v5, %v10425_v49 }
 0x214   :  { %v886_v29 = vadd.f32 %v885_v60, %v838_v43 }
 0x216   :  { %v598_v33 = vpop.f32.mrf.mxu0 }
 0x217   :  { %v731_v31 = vpop.f32.mrf.mxu1 }
 0x218   :  { %v10430_v58 = vadd.f32 %v731_v31, %v598_v33  ;;  %v899_v31 = vsub.f32 1.0, %v898_v39 }
 0x21a   :  { %15585 = vst [vmem:[#allocation11_spill] sm:$0xff] %v10430_v58  ;;  %v839_v9 = vmul.f32 %v10430_v58, %v10430_v58  ;;  %v784_v10 = vadd.f32 %v783_v6, %v10430_v58  ;;  %v900_v52 = vmul.f32 %v9486_v3, %v899_v31 }
 0x21c   :  { %v887_v15 = vadd.f32 %v886_v29, %v839_v9  ;;  %v901_v9 = vadd.f32 %v9486_v3, %v900_v52  ;;  %v9038_v52 = vld [vmem:[%s15296_s4 + $0x2f8] sm:$0xff] }
 0x21d   :  { %2817 = vmatpush.bf16.msrb.mxu1 %v9038_v52  ;;  %v9035_v52 = vld [vmem:[%s15296_s4 + $0x2e0] sm:$0xff] }
 0x21e   :  { %v601_v19 = vpop.f32.mrf.mxu0 }
 0x21f   :  { %v734_v28 = vpop.f32.mrf.mxu1 }
 0x220   :  { %v10439_v33 = vadd.f32 %v734_v28, %v601_v19 }
 0x222   :  { %v785_v61 = vadd.f32 %v784_v10, %v10439_v33  ;;  %v840_v27 = vmul.f32 %v10439_v33, %v10439_v33  ;;  %v9030_v10 = vld [vmem:[%s15296_s4 + $0x2b8] sm:$0xff] }
 0x223   :  { %2796 = vmatpush.bf16.msrb.mxu0 %v9030_v10  ;;  %v9028_v10 = vld [vmem:[%s15296_s4 + $0x2a8] sm:$0xff] }
 0x224   :  { %v786_v46 = vrot.slane %v785_v61, 4  ;;  %v888_v45 = vadd.f32 %v887_v15, %v840_v27  ;;  %v903_v27 = vsel %vm902_vm0, %v9486_v3, %v901_v9  ;;  %v8942_v3 = vld [vmem:[%s15296_s4 + $0x30] sm:$0xff]  ;;  %v8941_v9 = vld [vmem:[%s15296_s4 + $0x28] sm:$0xff] }
 0x225   :  { %1340 = vmatpush.bf16.msra.mxu3 %v8942_v3 }
 0x226   :  { %v787_v5 = vadd.f32 %v786_v46, %v785_v61  ;;  %v889_v43 = vrot.slane %v888_v45, 4  ;;  %v603_v60 = vpop.f32.mrf.mxu0 }
 0x227   :  { %v736_v6 = vpop.f32.mrf.mxu1 }
 0x228   :  { %v788_v19 = vrot.slane %v787_v5, 2  ;;  %v890_v39 = vadd.f32 %v889_v43, %v888_v45 }
 0x229   :  { %1341 = vmatpush.bf16.msra.mxu3 %v8941_v9  ;;  %v9034_v9 = vld [vmem:[%s15296_s4 + $0x2d8] sm:$0xff] }
 0x22a   :  { %v789_v28 = vadd.f32 %v788_v19, %v787_v5  ;;  %v891_v29 = vrot.slane %v890_v39, 2  ;;  %v9037_v19 = vld [vmem:[%s15296_s4 + $0x2f0] sm:$0xff] }
 0x22b   :  { %2818 = vmatpush.bf16.msrb.mxu1 %v9037_v19 }
 0x22c   :  { %v790_v31 = vrot.slane %v789_v28, 1  ;;  %v892_v15 = vadd.f32 %v891_v29, %v890_v39  ;;  %v8950_v29 = vld [vmem:[%s15296_s4 + $0x70] sm:$0xff] }
 0x22e   :  { %v791_v58 = vadd.f32 %v790_v31, %v789_v28  ;;  %v893_v61 = vrot.slane %v892_v15, 1  ;;  %v9036_v31 = vld [vmem:[%s15296_s4 + $0x2e8] sm:$0xff] }
 0x22f   :  { %2819 = vmatpush.bf16.msrb.mxu1 %v9036_v31 }
 0x230   :  { %v894_v46 = vadd.f32 %v893_v61, %v892_v15  ;;  %v904_v60 = vmul.f32 %v903_v27, %v791_v58  ;;  %v8951_v58 = vld [vmem:[%s15296_s4 + $0x78] sm:$0xff]  ;;  %v895_v61 = vld [vmem:[%s15294_s2] sm:$0x1] }
 0x231   :  { %1271 = vmatpush.bf16.msra.mxu2 %v8951_v58  ;;  %v896_v58 = vld [vmem:[%s15295_s3] sm:$0x1] }
 0x232   :  { %v905_v6 = vmul.f32 %v903_v27, %v894_v46  ;;  %v906_v42 = vmul.f32 %v904_v60, %v904_v60  ;;  %v8940_v27 = vld [vmem:[%s15296_s4 + $0x20] sm:$0xff] }
 0x233   :  { %1342 = vmatpush.bf16.msra.mxu3 %v8940_v27  ;;  %2820 = vmatpush.bf16.msrb.mxu1 %v9035_v52  ;;  %v9033_v27 = vld [vmem:[%s15296_s4 + $0x2d0] sm:$0xff]  ;;  %v9032_v52 = vld [vmem:[%s15296_s4 + $0x2c8] sm:$0xff] }
 0x234   :  { %v907_v49 = vsub.f32 %v905_v6, %v906_v42  ;;  %v8949_v6 = vld [vmem:[%s15296_s4 + $0x68] sm:$0xff]  ;;  %v9027_v42 = vld [vmem:[%s15296_s4 + $0x2a0] sm:$0xff] }
 0x235   :  { %1272 = vmatpush.bf16.msra.mxu2 %v8950_v29  ;;  %v8938_v29 = vld [vmem:[%s15296_s4 + $0x10] sm:$0xff] }
 0x236   :  { %v908_v45 = vadd.f32 1e-05, %v907_v49  ;;  %v9029_v49 = vld [vmem:[%s15296_s4 + $0x2b0] sm:$0xff] }
 0x237   :  { %2797 = vmatpush.bf16.msrb.mxu0 %v9029_v49  ;;  %v8948_v49 = vld [vmem:[%s15296_s4 + $0x60] sm:$0xff]  ;;  %2821 = vmatpush.bf16.msrb.mxu1 %v9034_v9 }
 0x238   :  { %9487 = vrsqrt.f32 %v908_v45  ;;  %vm915_vm2 = vweird.f32 %v908_v45  ;;  %v9023_v9 = vld [vmem:[%s15296_s4 + $0x280] sm:$0xff] }
 0x239   :  { %1273 = vmatpush.bf16.msra.mxu2 %v8949_v6 }
 0x23b   :  { %2798 = vmatpush.bf16.msrb.mxu0 %v9028_v10  ;;  %2822 = vmatpush.bf16.msrb.mxu1 %v9033_v27 }
 0x23d   :  { %1274 = vmatpush.bf16.msra.mxu2 %v8948_v49 }
 0x23e   :  { %v9488_v5 = vpop.eup %9487 }
 0x23f   :  { %v910_v43 = vmul.f32 %v9488_v5, %v908_v45  ;;  %vm916_vm1 = vweird.f32 %v9488_v5  ;;  %2799 = vmatpush.bf16.msrb.mxu0 %v9027_v42  ;;  %v8939_v45 = vld [vmem:[%s15296_s4 + $0x18] sm:$0xff]  ;;  %v9024_v42 = vld [vmem:[%s15296_s4 + $0x288] sm:$0xff]  ;;  %2823 = vmatpush.bf16.msrb.mxu1 %v9032_v52  ;;  %v10660_v52 = vld [vmem:[%s15296_s4 + $0xf0] sm:$0xff] }
 0x240   :  { %vm917_vm3 = vmor %vm915_vm2, %vm916_vm1  ;;  %1343 = vmatpush.bf16.msra.mxu3 %v8939_v45  ;;  %v8945_v45 = vld [vmem:[%s15296_s4 + $0x48] sm:$0xff] }
 0x241   :  { %v911_v39 = vmul.f32 %v9488_v5, %v910_v43 }
 0x243   :  { %v912_v28 = vmul.f32 0.5, %v911_v39 }
 0x244   :  { %1344 = vmatpush.bf16.msra.mxu3 %v8938_v29  ;;  %v9031_v29 = vld [vmem:[%s15296_s4 + $0x2c0] sm:$0xff] }
 0x245   :  { %v913_v15 = vsub.f32 1.5, %v912_v28  ;;  %2824 = vmatpush.bf16.msrb.mxu1 %v9031_v29  ;;  %v9073_v29 = vld [vmem:[%s15296_s4 + $0x3f0] sm:$0xff] }
 0x247   :  { %v914_v46 = vmul.f32 %v9488_v5, %v913_v15  ;;  %v9025_v15 = vld [vmem:[%s15296_s4 + $0x290] sm:$0xff] }
 0x249   :  { %v918_v3 = vsel %vm917_vm3, %v9488_v5, %v914_v46  ;;  %v9026_v5 = vld [vmem:[%s15296_s4 + $0x298] sm:$0xff]  ;;  %v8937_v46 = vld [vmem:[%s15296_s4 + $0x8] sm:$0xff] }
 0x24a   :  { %v919_v43 = vmul.f32 %v918_v3, %v895_v61  ;;  %2800 = vmatpush.bf16.msrb.mxu0 %v9026_v5  ;;  %1345 = vmatpush.bf16.msra.mxu3 %v8937_v46 }
 0x24c   :  { %v920_v19 = vmul.f32 %v919_v43, %v904_v60  ;;  %v10501_v39 = vperm.slane %v919_v43, 0  ;;  %v8947_v60 = vld [vmem:[%s15296_s4 + $0x58] sm:$0xff]  ;;  %v8936_v43 = vld [vmem:[%s15296_s4] sm:$0xff] }
 0x24d   :  { %1275 = vmatpush.bf16.msra.mxu2 %v8947_v60  ;;  %v9065_v60 = vld [vmem:[%s15296_s4 + $0x3b8] sm:$0xff] }
 0x24e   :  { %v921_v28 = vsub.f32 %v896_v58, %v920_v19  ;;  %v973_v10 = vmul.f32 %v10501_v39, %v10439_v33  ;;  %2801 = vmatpush.bf16.msrb.mxu0 %v9025_v15  ;;  %v8946_v33 = vld [vmem:[%s15296_s4 + $0x50] sm:$0xff]  ;;  %v10547_v58 = vld [vmem:[%s15296_s4 + $0xf8] sm:$0xff]  ;;  %v10551_v49 = vmul.f32 %v10501_v39, %v9950_v8  ;;  %v10555_v19 = vmul.f32 %v10501_v39, %v9952_v11 }
 0x24f   :  { %v10559_v5 = vmul.f32 %v10501_v39, %v9966_v20  ;;  %v10570_v8 = vmul.f32 %v10501_v39, %v9982_v32  ;;  %v10574_v11 = vmul.f32 %v10501_v39, %v9984_v35  ;;  %v10578_v20 = vmul.f32 %v10501_v39, %v9998_v44  ;;  %1346 = vmatpush.bf16.msra.mxu3 %v8936_v43  ;;  %v9074_v15 = vld [vmem:[%s15296_s4 + $0x3f8] sm:$0xff] }
 0x250   :  { %v10517_v31 = vperm.slane %v921_v28, 0  ;;  %v10566_v28 = vmul.f32 %v10501_v39, %v9968_v23  ;;  %v10585_v23 = vmul.f32 %v10501_v39, %v10000_v47  ;;  %v10589_v32 = vmul.f32 %v10501_v39, %v10014_v56  ;;  %v10681_v43 = vld [vmem:[%s15296_s4 + $0xb8] sm:$0xff]  ;;  %2923 = vmatpush.bf16.msra.mxu1 %v9074_v15 }
 0x251   :  { %1276 = vmatpush.bf16.msra.mxu2 %v8946_v33  ;;  %v10593_v35 = vmul.f32 %v10501_v39, %v10016_v59  ;;  %v10597_v44 = vmul.f32 %v10501_v39, %v10030_v4  ;;  %v10604_v47 = vmul.f32 %v10501_v39, %v10032_v7  ;;  %v10608_v56 = vmul.f32 %v10501_v39, %v10046_v18  ;;  %v8944_v33 = vld [vmem:[%s15296_s4 + $0x40] sm:$0xff] }
 0x252   :  { %v1025_v61 = vadd.f32 %v10517_v31, %v973_v10  ;;  %2802 = vmatpush.bf16.msrb.mxu0 %v9024_v42  ;;  %v10612_v59 = vmul.f32 %v10501_v39, %v10048_v22  ;;  %v15586_v10 = vld [vmem:[#allocation6_spill] sm:$0xff]  ;;  %v10624_v7 = vmul.f32 %v10501_v39, %v10064_v37  ;;  %v10628_v18 = vmul.f32 %v10501_v39, %v10078_v48  ;;  %v15587_v22 = vld [vmem:[#allocation7_spill] sm:$0xff] }
 0x253   :  { %v10616_v4 = vmul.f32 %v10501_v39, %v15586_v10  ;;  %1511 = vmatpush.bf16.msrb.mxu3 %v10547_v58  ;;  %v10632_v27 = vmul.f32 %v10501_v39, %v15587_v22  ;;  %v10643_v37 = vmul.f32 %v10501_v39, %v10096_v1  ;;  %v10647_v48 = vmul.f32 %v10501_v39, %v10110_v14  ;;  %v15590_v14 = vld [vmem:[#allocation9_spill] sm:$0xff]  ;;  %v10763_v10 = vld [vmem:[%s15296_s4 + $0xb0] sm:$0xff]  ;;  %v10784_v22 = vld [vmem:[%s15296_s4 + $0x3a8] sm:$0xff] }
 0x254   :  { %v1074_v6 = vmax.f32 %v1025_v61, 0.0  ;;  %v15588_v61 = vld [vmem:[#allocation8_spill] sm:$0xff]  ;;  %v10655_v42 = vmul.f32 %v10501_v39, %v10126_v30  ;;  %15589 = vst [vmem:[#allocation6_spill] sm:$0xff] %v10660_v52  ;;  %v10664_v1 = vmul.f32 %v10501_v39, %v10128_v36  ;;  %v10676_v30 = vmul.f32 %v10501_v39, %v10158_v2  ;;  %2924 = vmatpush.bf16.msra.mxu1 %v9073_v29  ;;  %v10849_v29 = vld [vmem:[%s15296_s4 + $0xa8] sm:$0xff] }
 0x255   :  { %1277 = vmatpush.bf16.msra.mxu2 %v8945_v45  ;;  %v10636_v46 = vmul.f32 %v10501_v39, %v15588_v61  ;;  %v10685_v36 = vmul.f32 %v10501_v39, %v10319_v54  ;;  %v10689_v45 = vmul.f32 %v10501_v39, %v10176_v21  ;;  %v10697_v2 = vmul.f32 %v10501_v39, %v10194_v40 }
 0x256   :  { %v1123_v3 = vpack.c.bf16 %v1074_v6, %v1074_v6  ;;  %2803 = vmatpush.bf16.msrb.mxu0 %v9023_v9  ;;  %v10651_v6 = vmul.f32 %v10501_v39, %v10112_v17  ;;  %v10672_v17 = vmul.f32 %v10501_v39, %v10144_v53  ;;  %v10693_v53 = vmul.f32 %v10501_v39, %v10329_v51  ;;  %v9064_v9 = vld [vmem:[%s15296_s4 + $0x3b0] sm:$0xff] }
 0x257   :  { %v10704_v54 = vmul.f32 %v10501_v39, %v10339_v63  ;;  %v10708_v21 = vmul.f32 %v10501_v39, %v10203_v57  ;;  %v10712_v51 = vmul.f32 %v10501_v39, %v10349_v62  ;;  %v10716_v40 = vmul.f32 %v10501_v39, %v10209_v0  ;;  %1512 = vmatpush.bf16.msrb.mxu3 %v10660_v52 }
 0x258   :  { %1172 = vst [vmem:[#allocation2 + $0xc0] sm:$0xf] %v1123_v3  ;;  %v10668_v3 = vmul.f32 %v10501_v39, %v15590_v14  ;;  %v10723_v63 = vmul.f32 %v10501_v39, %v10359_v24  ;;  %v10727_v57 = vmul.f32 %v10501_v39, %v10215_v13  ;;  %v10731_v62 = vmul.f32 %v10501_v39, %v10369_v26  ;;  %v10805_v14 = vld [vmem:[%s15296_s4 + $0x3e8] sm:$0xff] }
 0x259   :  { %1278 = vmatpush.bf16.msra.mxu2 %v8944_v33  ;;  %v10735_v0 = vmul.f32 %v10501_v39, %v10376_v41  ;;  %v10745_v24 = vmul.f32 %v10501_v39, %v10383_v38  ;;  %v10749_v13 = vmul.f32 %v10501_v39, %v10390_v16  ;;  %v10753_v26 = vmul.f32 %v10501_v39, %v10398_v55 }
 0x25a   :  { %2898 = vmatpush.bf16.msra.mxu0 %v9065_v60  ;;  %v10741_v60 = vld [vmem:[%s15296_s4 + $0xe8] sm:$0xff]  ;;  %v10757_v41 = vmul.f32 %v10501_v39, %v10405_v50  ;;  %15592 = vst [vmem:[#allocation8_spill] sm:$0xff] %v10763_v10  ;;  %v10767_v38 = vmul.f32 %v10501_v39, %v10410_v34  ;;  %v10771_v16 = vmul.f32 %v10501_v39, %v10415_v25 }
 0x25b   :  { %15591 = vst [vmem:[#allocation7_spill] sm:$0xff] %v10741_v60  ;;  %v10775_v55 = vmul.f32 %v10501_v39, %v10420_v12  ;;  %v15593_v50 = vld [vmem:[#allocation10_spill] sm:$0xff]  ;;  %v15595_v34 = vld [vmem:[#allocation11_spill] sm:$0xff]  ;;  %v10792_v25 = vadd.f32 %v10517_v31, %v10551_v49  ;;  %v10796_v12 = vadd.f32 %v10517_v31, %v10555_v19  ;;  %v10800_v33 = vadd.f32 %v10517_v31, %v10559_v5 }
 0x25c   :  { %v10779_v15 = vmul.f32 %v10501_v39, %v15593_v50  ;;  %15594 = vst [vmem:[#allocation9_spill] sm:$0xff] %v10784_v22  ;;  %v10788_v61 = vmul.f32 %v10501_v39, %v15595_v34  ;;  %v10809_v39 = vadd.f32 %v10517_v31, %v10566_v28  ;;  %v10813_v49 = vadd.f32 %v10517_v31, %v10570_v8  ;;  %v10871_v50 = vld [vmem:[%s15296_s4 + $0x3a0] sm:$0xff] }
 0x25d   :  { %1426 = vmatpush.bf16.msrb.mxu2 %v10681_v43  ;;  %15596 = vst [vmem:[#allocation10_spill] sm:$0xff] %v10805_v14  ;;  %v10817_v19 = vadd.f32 %v10517_v31, %v10574_v11  ;;  %v10821_v5 = vadd.f32 %v10517_v31, %v10578_v20  ;;  %1513 = vmatpush.bf16.msrb.mxu3 %v10741_v60  ;;  %v10893_v34 = vld [vmem:[%s15296_s4 + $0x3e0] sm:$0xff]  ;;  %v1028_v60 = vmax.f32 %v10800_v33, 0.0 }
 0x25e   :  { %2899 = vmatpush.bf16.msra.mxu0 %v9064_v9  ;;  %v10827_v9 = vld [vmem:[%s15296_s4 + $0xe0] sm:$0xff]  ;;  %v10831_v28 = vadd.f32 %v10517_v31, %v10585_v23  ;;  %v10835_v8 = vadd.f32 %v10517_v31, %v10589_v32  ;;  %v10839_v11 = vadd.f32 %v10517_v31, %v10593_v35  ;;  %v10843_v20 = vadd.f32 %v10517_v31, %v10597_v44 }
 0x25f   :  { %15597 = vst [vmem:[#allocation11_spill] sm:$0xff] %v10827_v9  ;;  %v10853_v23 = vadd.f32 %v10517_v31, %v10604_v47  ;;  %v10857_v32 = vadd.f32 %v10517_v31, %v10608_v56  ;;  %v10861_v35 = vadd.f32 %v10517_v31, %v10612_v59  ;;  %v10865_v44 = vadd.f32 %v10517_v31, %v10616_v4 }
 0x260   :  { %15598 = vst [vmem:[#allocation12_spill] sm:$0xff] %v10849_v29  ;;  %v10875_v47 = vadd.f32 %v10517_v31, %v10624_v7  ;;  %v10879_v56 = vadd.f32 %v10517_v31, %v10628_v18  ;;  %v10883_v59 = vadd.f32 %v10517_v31, %v10632_v27  ;;  %v10887_v4 = vadd.f32 %v10517_v31, %v10636_v46 }
 0x261   :  { %1427 = vmatpush.bf16.msrb.mxu2 %v10763_v10  ;;  %15599 = vst [vmem:[#allocation13_spill] sm:$0xff] %v10871_v50  ;;  %2925 = vmatpush.bf16.msra.mxu1 %v10805_v14  ;;  %v10897_v7 = vadd.f32 %v10517_v31, %v10643_v37  ;;  %v10901_v18 = vadd.f32 %v10517_v31, %v10647_v48  ;;  %v10915_v14 = vld [vmem:[%s15296_s4 + $0xd8] sm:$0xff]  ;;  %v1032_v52 = vmax.f32 %v10821_v5, 0.0  ;;  %v1036_v5 = vmax.f32 %v10843_v20, 0.0 }
 0x262   :  { %2900 = vmatpush.bf16.msra.mxu0 %v10784_v22  ;;  %15600 = vst [vmem:[#allocation14_spill] sm:$0xff] %v10893_v34  ;;  %v10905_v27 = vadd.f32 %v10517_v31, %v10651_v6  ;;  %v10909_v46 = vadd.f32 %v10517_v31, %v10655_v42  ;;  %1514 = vmatpush.bf16.msrb.mxu3 %v10827_v9  ;;  %v10937_v22 = vld [vmem:[%s15296_s4 + $0xa0] sm:$0xff]  ;;  %v10959_v9 = vld [vmem:[%s15296_s4 + $0x398] sm:$0xff]  ;;  %v1043_v20 = vmax.f32 %v10883_v59, 0.0  ;;  %v11093_v59 = vld [vmem:[%s15296_s4 + $0x3c8] sm:$0xff] }
 0x263   :  { %15601 = vst [vmem:[#allocation15_spill] sm:$0xff] %v10915_v14  ;;  %v10919_v37 = vadd.f32 %v10517_v31, %v10664_v1  ;;  %v10923_v48 = vadd.f32 %v10517_v31, %v10668_v3  ;;  %v10927_v6 = vadd.f32 %v10517_v31, %v10672_v17  ;;  %v10931_v42 = vadd.f32 %v10517_v31, %v10676_v30 }
 0x264   :  { %15602 = vst [vmem:[#allocation16_spill] sm:$0xff] %v10937_v22  ;;  %v10941_v1 = vadd.f32 %v10517_v31, %v10685_v36  ;;  %v10945_v3 = vadd.f32 %v10517_v31, %v10689_v45  ;;  %v10949_v17 = vadd.f32 %v10517_v31, %v10693_v53  ;;  %v10953_v30 = vadd.f32 %v10517_v31, %v10697_v2 }
 0x265   :  { %1428 = vmatpush.bf16.msrb.mxu2 %v10849_v29  ;;  %15603 = vst [vmem:[#allocation17_spill] sm:$0xff] %v10959_v9  ;;  %v10963_v36 = vadd.f32 %v10517_v31, %v10704_v54  ;;  %v10967_v45 = vadd.f32 %v10517_v31, %v10708_v21  ;;  %v10971_v53 = vadd.f32 %v10517_v31, %v10712_v51  ;;  %v1031_v29 = vmax.f32 %v10817_v19, 0.0 }
 0x266   :  { %2901 = vmatpush.bf16.msra.mxu0 %v10871_v50  ;;  %v10975_v2 = vadd.f32 %v10517_v31, %v10716_v40  ;;  %2926 = vmatpush.bf16.msra.mxu1 %v10893_v34  ;;  %v10981_v50 = vld [vmem:[%s15296_s4 + $0x3d8] sm:$0xff]  ;;  %v10985_v54 = vadd.f32 %v10517_v31, %v10723_v63  ;;  %v10989_v21 = vadd.f32 %v10517_v31, %v10727_v57  ;;  %v11003_v34 = vld [vmem:[%s15296_s4 + $0xd0] sm:$0xff]  ;;  %v1035_v19 = vmax.f32 %v10839_v11, 0.0 }
 0x267   :  { %15604 = vst [vmem:[#allocation18_spill] sm:$0xff] %v10981_v50  ;;  %v10993_v51 = vadd.f32 %v10517_v31, %v10731_v62  ;;  %v10997_v40 = vadd.f32 %v10517_v31, %v10735_v0  ;;  %1515 = vmatpush.bf16.msrb.mxu3 %v10915_v14  ;;  %v11007_v63 = vadd.f32 %v10517_v31, %v10745_v24  ;;  %v11025_v14 = vld [vmem:[%s15296_s4 + $0x98] sm:$0xff]  ;;  %v1026_v24 = vmax.f32 %v10792_v25, 0.0 }
 0x268   :  { %15605 = vst [vmem:[#allocation19_spill] sm:$0xff] %v11003_v34  ;;  %v11011_v57 = vadd.f32 %v10517_v31, %v10749_v13  ;;  %v11015_v62 = vadd.f32 %v10517_v31, %v10753_v26  ;;  %v11019_v0 = vadd.f32 %v10517_v31, %v10757_v41  ;;  %v1027_v13 = vmax.f32 %v10796_v12, 0.0  ;;  %v11035_v41 = vld [vmem:[%s15296_s4 + $0x390] sm:$0xff] }
 0x269   :  { %1429 = vmatpush.bf16.msrb.mxu2 %v10937_v22  ;;  %15606 = vst [vmem:[#allocation20_spill] sm:$0xff] %v11025_v14  ;;  %v1029_v26 = vmax.f32 %v10809_v39, 0.0  ;;  %v1030_v22 = vmax.f32 %v10813_v49, 0.0  ;;  %v1033_v25 = vmax.f32 %v10831_v28, 0.0  ;;  %v11045_v12 = vld [vmem:[%s15296_s4 + $0x3d0] sm:$0xff]  ;;  %v11049_v33 = vadd.f32 %v10517_v31, %v10767_v38 }
 0x26a   :  { %2902 = vmatpush.bf16.msra.mxu0 %v10959_v9  ;;  %2927 = vmatpush.bf16.msra.mxu1 %v10981_v50  ;;  %v11053_v39 = vadd.f32 %v10517_v31, %v10771_v16  ;;  %v1034_v49 = vmax.f32 %v10835_v8, 0.0  ;;  %v1037_v28 = vmax.f32 %v10853_v23, 0.0  ;;  %v1038_v50 = vmax.f32 %v10857_v32, 0.0 }
 0x26b   :  { %1516 = vmatpush.bf16.msrb.mxu3 %v11003_v34  ;;  %v1039_v9 = vmax.f32 %v10861_v35, 0.0  ;;  %v1040_v38 = vmax.f32 %v10865_v44, 0.0  ;;  %v1041_v16 = vmax.f32 %v10875_v47, 0.0  ;;  %v9340_v10 = vpack.c.bf16 %v1027_v13, %v1026_v24 }
 0x26c   :  { %v9345_v8 = vpack.c.bf16 %v1029_v26, %v1028_v60  ;;  %v1042_v11 = vmax.f32 %v10879_v56, 0.0  ;;  %v9350_v34 = vpack.c.bf16 %v1031_v29, %v1030_v22  ;;  %v9355_v23 = vpack.c.bf16 %v1033_v25, %v1032_v52  ;;  %v11075_v60 = vld [vmem:[%s15296_s4 + $0xc8] sm:$0xff]  ;;  %v11080_v22 = vld [vmem:[%s15296_s4 + $0x90] sm:$0xff] }
 0x26d   :  { %1430 = vmatpush.bf16.msrb.mxu2 %v11025_v14  ;;  %v1044_v32 = vmax.f32 %v10887_v4, 0.0  ;;  %v1045_v35 = vmax.f32 %v10897_v7, 0.0  ;;  %v1046_v44 = vmax.f32 %v10901_v18, 0.0  ;;  %v9360_v14 = vpack.c.bf16 %v1035_v19, %v1034_v49  ;;  %9341 = vst [vmem:[#allocation2] sm:$0xff] %v9340_v10   ;;  %v11088_v10 = vld [vmem:[%s15296_s4 + $0x388] sm:$0xff] }
 0x26e   :  { %2903 = vmatpush.bf16.msra.mxu0 %v11035_v41  ;;  %2928 = vmatpush.bf16.msra.mxu1 %v11045_v12  ;;  %v1047_v52 = vmax.f32 %v10905_v27, 0.0  ;;  %v1048_v29 = vmax.f32 %v10909_v46, 0.0  ;;  %v1049_v47 = vmax.f32 %v10919_v37, 0.0  ;;  %v9365_v56 = vpack.c.bf16 %v1037_v28, %v1036_v5  ;;  %9457 = vst [vmem:[#allocation2 + $0x8] sm:$0xff] %v9345_v8  }
 0x26f   :  { %v1050_v4 = vmax.f32 %v10923_v48, 0.0  ;;  %v1051_v7 = vmax.f32 %v10927_v6, 0.0  ;;  %v1052_v18 = vmax.f32 %v10931_v42, 0.0  ;;  %v9370_v27 = vpack.c.bf16 %v1039_v9, %v1038_v50  ;;  %9458 = vst [vmem:[#allocation2 + $0x10] sm:$0xff] %v9350_v34   ;;  %1517 = vmatpush.bf16.msrb.mxu3 %v11075_v60  ;;  %v11109_v9 = vld [vmem:[%s15296_s4 + $0xc0] sm:$0xff]  ;;  %v11114_v50 = vld [vmem:[%s15296_s4 + $0x88] sm:$0xff] }
 0x270   :  { %v1053_v46 = vmax.f32 %v10941_v1, 0.0  ;;  %v1054_v37 = vmax.f32 %v10945_v3, 0.0  ;;  %v1055_v24 = vmax.f32 %v10949_v17, 0.0  ;;  %v9375_v13 = vpack.c.bf16 %v1041_v16, %v1040_v38  ;;  %9459 = vst [vmem:[#allocation2 + $0x18] sm:$0xff] %v9355_v23   ;;  %v11124_v1 = vld [vmem:[%s15296_s4 + $0x380] sm:$0xff] }
 0x271   :  { %v1056_v26 = vmax.f32 %v10953_v30, 0.0  ;;  %v1057_v25 = vmax.f32 %v10963_v36, 0.0  ;;  %v1058_v48 = vmax.f32 %v10967_v45, 0.0  ;;  %v9380_v49 = vpack.c.bf16 %v1043_v20, %v1042_v11  ;;  %9460 = vst [vmem:[#allocation2 + $0x20] sm:$0xff] %v9360_v14   ;;  %1431 = vmatpush.bf16.msrb.mxu2 %v11080_v22  ;;  %v11129_v3 = vld [vmem:[%s15296_s4 + $0x3c0] sm:$0xff] }
 0x272   :  { %v1059_v34 = vmax.f32 %v10971_v53, 0.0  ;;  %v1060_v6 = vmax.f32 %v10975_v2, 0.0  ;;  %v1061_v14 = vmax.f32 %v10985_v54, 0.0  ;;  %v9385_v42 = vpack.c.bf16 %v1045_v35, %v1044_v32  ;;  %9461 = vst [vmem:[#allocation2 + $0x28] sm:$0xff] %v9365_v56   ;;  %2904 = vmatpush.bf16.msra.mxu0 %v11088_v10  ;;  %2929 = vmatpush.bf16.msra.mxu1 %v11093_v59  ;;  %v8986_v53 = vld [vmem:[%s15296_s4 + $0x178] sm:$0xff] }
 0x273   :  { %v1062_v17 = vmax.f32 %v10989_v21, 0.0  ;;  %v1063_v30 = vmax.f32 %v10993_v51, 0.0  ;;  %v1064_v36 = vmax.f32 %v10997_v40, 0.0  ;;  %v9390_v45 = vpack.c.bf16 %v1047_v52, %v1046_v44  ;;  %9462 = vst [vmem:[#allocation2 + $0x30] sm:$0xff] %v9370_v27   ;;  %1518 = vmatpush.bf16.msrb.mxu3 %v11109_v9 }
 0x274   :  { %v11139_v2 = vadd.f32 %v10517_v31, %v10775_v55  ;;  %v11143_v54 = vadd.f32 %v10517_v31, %v10779_v15  ;;  %v1065_v21 = vmax.f32 %v11007_v63, 0.0  ;;  %v9395_v19 = vpack.c.bf16 %v1049_v47, %v1048_v29  ;;  %9463 = vst [vmem:[#allocation2 + $0x38] sm:$0xff] %v9375_v13   ;;  %v7297_v51 = vld [vmem:[#allocation2] sm:$0xf]  ;;  %v8935_v40 = vld [vmem:[#allocation2] sm:$0x30] }
 0x275   :  { %v11148_v5 = vadd.f32 %v10517_v31, %v10788_v61  ;;  %v9400_v28 = vpack.c.bf16 %v1051_v7, %v1050_v4  ;;  %9464 = vst [vmem:[#allocation2 + $0x40] sm:$0xff] %v9380_v49   ;;  %v7298_v55 = vor.u32 %v8935_v40, %v7297_v51  ;;  %1432 = vmatpush.bf16.msrb.mxu2 %v11114_v50  ;;  %v11155_v15 = vld [vmem:[%s15296_s4 + $0x80] sm:$0xff]  ;;  %v11157_v38 = vld [vmem:[#allocation2 + $0x8] sm:$0xf]  ;;  %v1066_v16 = vmax.f32 %v11011_v57, 0.0  ;;  %v8985_v29 = vld [vmem:[%s15296_s4 + $0x170] sm:$0xff] }
 0x276   :  { %v1191_v63 = vld [vmem:[#allocation2 + $0x4] sm:$0x8]  ;;  %v9405_v8 = vpack.c.bf16 %v1053_v46, %v1052_v18  ;;  %9465 = vst [vmem:[#allocation2 + $0x48] sm:$0xff] %v9385_v42   ;;  %2905 = vmatpush.bf16.msra.mxu0 %v11124_v1  ;;  %2930 = vmatpush.bf16.msra.mxu1 %v11129_v3  ;;  %v1193_v31 = vld [vmem:[#allocation2 + $0xc] sm:$0x1]  ;;  %v1214_v11 = vunpack.c.l.b16 %v11157_v38  ;;  %v1067_v20 = vmax.f32 %v11015_v62, 0.0  ;;  %v9410_v32 = vpack.c.bf16 %v1055_v24, %v1054_v37 }
 0x277   :  { %v1213_v61 = vunpack.c.l.b16 %v1191_v63  ;;  %v1068_v23 = vmax.f32 %v11019_v0, 0.0  ;;  %9466 = vst [vmem:[#allocation2 + $0x50] sm:$0xff] %v9390_v45   ;;  %1347 = vmatmul.bf16.vlgmr.msra.gmra.mxu3 %v7298_v55  ;;  %v1215_v35 = vunpack.c.l.b16 %v1193_v31  ;;  %v1069_v57 = vmax.f32 %v11049_v33, 0.0  ;;  %v8977_v18 = vld [vmem:[%s15296_s4 + $0x138] sm:$0xff]  ;;  %v8984_v49 = vld [vmem:[%s15296_s4 + $0x168] sm:$0xff]  ;;  %v8981_v38 = vld [vmem:[%s15296_s4 + $0x150] sm:$0xff] }
 0x278   :  { %v1070_v44 = vmax.f32 %v11053_v39, 0.0  ;;  %v9415_v52 = vpack.c.bf16 %v1057_v25, %v1056_v26  ;;  %9467 = vst [vmem:[#allocation2 + $0x58] sm:$0xff] %v9395_v19   ;;  %1689 = vmatpush.bf16.msra.mxu3 %v8986_v53  ;;  %v1071_v0 = vmax.f32 %v11139_v2, 0.0  ;;  %v1072_v47 = vmax.f32 %v11143_v54, 0.0  ;;  %v8976_v2 = vld [vmem:[%s15296_s4 + $0x130] sm:$0xff]  ;;  %v8975_v40 = vld [vmem:[%s15296_s4 + $0x128] sm:$0xff] }
 0x279   :  { %v1216_v62 = vpack.c.b16 %v1214_v11, %v1213_v61  ;;  %v9420_v56 = vpack.c.bf16 %v1059_v34, %v1058_v48  ;;  %9468 = vst [vmem:[#allocation2 + $0x60] sm:$0xff] %v9400_v28   ;;  %1433 = vmatpush.bf16.msrb.mxu2 %v11155_v15  ;;  %v1217_v33 = vpack.c.b16 %v1215_v35, %v1215_v35  ;;  %v1073_v39 = vmax.f32 %v11148_v5, 0.0  ;;  %v8982_v28 = vld [vmem:[%s15296_s4 + $0x158] sm:$0xff]  ;;  %v7333_v63 = vld [vmem:[#allocation2] sm:$0xe] }
 0x27a   :  { %v9425_v4 = vpack.c.bf16 %v1061_v14, %v1060_v6  ;;  %9469 = vst [vmem:[#allocation2 + $0x68] sm:$0xff] %v9405_v8   ;;  %v9430_v27 = vpack.c.bf16 %v1063_v30, %v1062_v17  ;;  %v9435_v13 = vpack.c.bf16 %v1065_v21, %v1064_v36  ;;  %v9440_v34 = vpack.c.bf16 %v1067_v20, %v1066_v16  ;;  %v1442_v36 = vld [vmem:[#allocation2 + $0xc] sm:$0x3]  ;;  %v8983_v21 = vld [vmem:[%s15296_s4 + $0x160] sm:$0xff]  ;;  %v15607_v55 = vld [vmem:[#allocation8_spill] sm:$0xff] }
 0x27b   :  { %v1219_v7 = vrot.slane %v1216_v62, 3  ;;  %9470 = vst [vmem:[#allocation2 + $0x70] sm:$0xff] %v9410_v32   ;;  %v7829_v46 = vld [vmem:[#allocation2 + $0x38] sm:$0xe]  ;;  %v9076_v37 = vld [vmem:[#allocation2 + $0x38] sm:$0x70]  ;;  %v9445_v17 = vpack.c.bf16 %v1069_v57, %v1068_v23  ;;  %v9450_v45 = vpack.c.bf16 %v1071_v0, %v1070_v44  ;;  %v9455_v54 = vpack.c.bf16 %v1073_v39, %v1072_v47 }
 0x27c   :  { %v1220_v24 = vrot.slane %v1217_v33, 3  ;;  %9471 = vst [vmem:[#allocation2 + $0x78] sm:$0xff] %v9415_v52   ;;  %v7830_v26 = vor.u32 %v9076_v37, %v7829_v46  ;;  %v11179_v25 = vld [vmem:[#allocation2 + $0x40] sm:$0xf]  ;;  %v2812_v48 = vld [vmem:[#allocation2 + $0x44] sm:$0x3]  ;;  %1690 = vmatpush.bf16.msra.mxu3 %v8985_v29  ;;  %v1460_v51 = vunpack.c.l.b16 %v1442_v36 }
 0x27d   :  { %9472 = vst [vmem:[#allocation2 + $0x80] sm:$0xff] %v9420_v56   ;;  %v2763_v6 = vunpack.c.l.b16 %v11179_v25  ;;  %v2814_v14 = vunpack.c.l.b16 %v2812_v48  ;;  %v2885_v19 = vld [vmem:[#allocation2 + $0x4c] sm:$0x1]  ;;  %v7841_v8 = vld [vmem:[#allocation2 + $0x44] sm:$0x8]  ;;  %v15609_v35 = vld [vmem:[#allocation12_spill] sm:$0xff] }
 0x27e   :  { %v1221_v42 = vsel %vm1218_vm4, %v1219_v7, %v1220_v24  ;;  %9473 = vst [vmem:[#allocation2 + $0x88] sm:$0xff] %v9425_v4   ;;  %v11186_v30 = vrot.slane %v7830_v26, 1  ;;  %v2891_v5 = vunpack.c.l.b16 %v2885_v19  ;;  %v15608_v16 = vld [vmem:[#allocation6_spill] sm:$0xff]  ;;  %v7845_v23 = vld [vmem:[#allocation2 + $0x4c] sm:$0xc]  ;;  %v8973_v62 = vld [vmem:[%s15296_s4 + $0x118] sm:$0xff] }
 0x27f   :  { %1279 = vmatmul.bf16.vlgmr.msra.gmra.mxu2 %v1221_v42  ;;  %9474 = vst [vmem:[#allocation2 + $0x90] sm:$0xff] %v9430_v27   ;;  %v11190_v53 = vpack.c.b16 %v2814_v14, %v2763_v6  ;;  %v9079_v31 = vld [vmem:[#allocation2 + $0x44] sm:$0xf0]  ;;  %v8974_v61 = vld [vmem:[%s15296_s4 + $0x120] sm:$0xff]  ;;  %v9080_v32 = vld [vmem:[#allocation2 + $0x4c] sm:$0xf0] }
 0x280   :  { %1600 = vmatpush.bf16.msra.mxu2 %v8977_v18  ;;  %9475 = vst [vmem:[#allocation2 + $0x98] sm:$0xff] %v9435_v13   ;;  %2804 = vmatmul.bf16.vlgmr.msrb.gmra.mxu0 %v11186_v30  ;;  %v2893_v20 = vpack.c.b16 %v2891_v5, %v2891_v5  ;;  %v7842_v57 = vor.u32 %v9079_v31, %v7841_v8  ;;  %v15610_v44 = vld [vmem:[#allocation7_spill] sm:$0xff]  ;;  %v15611_v56 = vld [vmem:[#allocation16_spill] sm:$0xff]  ;;  %v8979_v37 = vld [vmem:[%s15296_s4 + $0x140] sm:$0xff] }
 0x281   :  { %1691 = vmatpush.bf16.msra.mxu3 %v8984_v49  ;;  %9476 = vst [vmem:[#allocation2 + $0xa0] sm:$0xff] %v9440_v34   ;;  %2825 = vmatmul.bf16.vlgmr.msrb.gmra.mxu1 %v11190_v53  ;;  %v7846_v29 = vor.u32 %v9080_v32, %v7845_v23  ;;  %v8980_v47 = vld [vmem:[%s15296_s4 + $0x148] sm:$0xff]  ;;  %v7437_v4 = vld [vmem:[#allocation2 + $0x14] sm:$0xe]  ;;  %v8978_v7 = vld [vmem:[#allocation2 + $0x14] sm:$0x70] }
 0x282   :  { %2967 = vmatpush.bf16.msrb.mxu0 %v10681_v43  ;;  %9477 = vst [vmem:[#allocation2 + $0xa8] sm:$0xff] %v9445_v17   ;;  %2983 = vmatpush.bf16.msrb.mxu1 %v10547_v58  ;;  %v1461_v43 = vpack.c.b16 %v1460_v51, %v1214_v11  ;;  %v8952_v58 = vld [vmem:[#allocation2] sm:$0x70]  ;;  %v2895_v52 = vrot.slane %v2893_v20, 3  ;;  %v2894_v33 = vrot.slane %v7842_v57, 3  ;;  %v15612_v39 = vld [vmem:[#allocation11_spill] sm:$0xff]  ;;  %v7438_v26 = vor.u32 %v8978_v7, %v7437_v4 }
 0x283   :  { %9478 = vst [vmem:[#allocation2 + $0xb0] sm:$0xff] %v9450_v45   ;;  %v7334_v11 = vor.u32 %v8952_v58, %v7333_v63  ;;  %v11231_v27 = vrot.slane %v7846_v29, 2  ;;  %v8972_v46 = vld [vmem:[%s15296_s4 + $0x110] sm:$0xff]  ;;  %v11245_v13 = vld [vmem:[%s15296_s4 + $0x1f8] sm:$0xff]  ;;  %v8971_v49 = vld [vmem:[%s15296_s4 + $0x108] sm:$0xff] }
 0x284   :  { %1601 = vmatpush.bf16.msra.mxu2 %v8976_v2  ;;  %9479 = vst [vmem:[#allocation2 + $0xb8] sm:$0xff] %v9455_v54   ;;  %v11229_v18 = vsel %vm1218_vm4, %v2894_v33, %v2895_v52  ;;  %v15613_v24 = vld [vmem:[#allocation20_spill] sm:$0xff]  ;;  %v15614_v48 = vld [vmem:[#allocation15_spill] sm:$0xff]  ;;  %v1639_v34 = vrot.slane %v7438_v26, 1  ;;  %v2756_v45 = vld [vmem:[#allocation2 + $0x3c] sm:$0x8] }
 0x285   :  { %1692 = vmatpush.bf16.msra.mxu3 %v8983_v21  ;;  %v1376_v0 = vrot.slane %v7334_v11, 1  ;;  %v11256_v14 = vld [vmem:[%s15296_s4 + $0x1f0] sm:$0xff]  ;;  %v7401_v42 = vld [vmem:[#allocation2 + $0xc] sm:$0xc]  ;;  %v2758_v2 = vld [vmem:[#allocation2 + $0x44] sm:$0x1]  ;;  %v2762_v21 = vunpack.c.l.b16 %v2756_v45 }
 0x286   :  { %2968 = vmatpush.bf16.msrb.mxu0 %v15607_v55  ;;  %2984 = vmatpush.bf16.msrb.mxu1 %v15608_v16  ;;  %v15615_v17 = vld [vmem:[#allocation19_spill] sm:$0xff]  ;;  %v8970_v54 = vld [vmem:[%s15296_s4 + $0x100] sm:$0xff]  ;;  %v2764_v19 = vunpack.c.l.b16 %v2758_v2  ;;  %v11275_v55 = vld [vmem:[%s15296_s4 + $0x1b8] sm:$0xff] }
 0x287   :  { %1519 = vmatmul.bf16.vlgmr.msrb.gmra.mxu3 %v1461_v43  ;;  %v8969_v36 = vld [vmem:[#allocation2 + $0xc] sm:$0xf0]  ;;  %v2765_v5 = vpack.c.b16 %v2763_v6, %v2762_v21  ;;  %v11277_v43 = vld [vmem:[#allocation2 + $0x5c] sm:$0xf]  ;;  %v11285_v25 = vld [vmem:[%s15296_s4 + $0x1e0] sm:$0xff] }
 0x288   :  { %1602 = vmatpush.bf16.msra.mxu2 %v8975_v40  ;;  %v7402_v51 = vor.u32 %v8969_v36, %v7401_v42  ;;  %v11267_v40 = vld [vmem:[%s15296_s4 + $0x1e8] sm:$0xff]  ;;  %v11295_v8 = vld [vmem:[%s15296_s4 + $0x1b0] sm:$0xff]  ;;  %v15331_v31 = vunpack.c.l.b16 %v11277_v43  ;;  %v3089_v20 = vld [vmem:[#allocation2 + $0x60] sm:$0x1] }
 0x289   :  { %1693 = vmatpush.bf16.msra.mxu3 %v8982_v28  ;;  %v2766_v28 = vpack.c.b16 %v2764_v19, %v2764_v19  ;;  %v2767_v63 = vrot.slane %v2765_v5, 3  ;;  %v3095_v32 = vunpack.c.l.b16 %v3089_v20  ;;  %v11312_v11 = vld [vmem:[%s15296_s4 + $0x1a8] sm:$0xff]  ;;  %v11324_v52 = vld [vmem:[%s15296_s4 + $0x1d0] sm:$0xff]  ;;  %v11330_v29 = vld [vmem:[%s15296_s4 + $0x1a0] sm:$0xff] }
 0x28a   :  { %2969 = vmatpush.bf16.msrb.mxu0 %v15609_v35  ;;  %2985 = vmatpush.bf16.msrb.mxu1 %v15610_v44  ;;  %v1550_v16 = vrot.slane %v7402_v51, 2  ;;  %15617 = vst [vmem:[#allocation6_spill] sm:$0xff] %v11312_v11  ;;  %v3420_v33 = vld [vmem:[#allocation2 + $0x7c] sm:$0x1]  ;;  %v11344_v4 = vld [vmem:[%s15296_s4 + $0x1c8] sm:$0xff]  ;;  %v11369_v51 = vld [vmem:[%s15296_s4 + $0x190] sm:$0xff] }
 0x28b   :  { %v2768_v58 = vrot.slane %v2766_v28, 3  ;;  %v3097_v35 = vpack.c.b16 %v3095_v32, %v3095_v32  ;;  %15618 = vst [vmem:[#allocation12_spill] sm:$0xff] %v11330_v29  ;;  %v3426_v7 = vunpack.c.l.b16 %v3420_v33  ;;  %v3749_v42 = vld [vmem:[#allocation2 + $0x90] sm:$0x8]  ;;  %v3751_v45 = vld [vmem:[#allocation2 + $0x98] sm:$0x1] }
 0x28c   :  { %1603 = vmatpush.bf16.msra.mxu2 %v8974_v61  ;;  %v3087_v61 = vld [vmem:[#allocation2 + $0x58] sm:$0x8]  ;;  %v3755_v2 = vunpack.c.l.b16 %v3749_v42  ;;  %v3757_v19 = vunpack.c.l.b16 %v3751_v45  ;;  %v11389_v33 = vld [vmem:[%s15296_s4 + $0x188] sm:$0xff] }
 0x28d   :  { %1694 = vmatpush.bf16.msra.mxu3 %v8981_v38  ;;  %v11288_v6 = vsel %vm1218_vm4, %v2767_v63, %v2768_v58  ;;  %v3093_v23 = vunpack.c.l.b16 %v3087_v61  ;;  %v11306_v38 = vld [vmem:[%s15296_s4 + $0x1d8] sm:$0xff]  ;;  %v3099_v44 = vrot.slane %v3097_v35, 3 }
 0x28e   :  { %2970 = vmatpush.bf16.msrb.mxu0 %v15611_v56  ;;  %2986 = vmatpush.bf16.msrb.mxu1 %v15612_v39  ;;  %15616 = vst [vmem:[#allocation8_spill] sm:$0xff] %v11288_v6  ;;  %v3418_v56 = vld [vmem:[#allocation2 + $0x74] sm:$0x8]  ;;  %v11374_v5 = vld [vmem:[%s15296_s4 + $0x278] sm:$0xff]  ;;  %v3759_v20 = vpack.c.b16 %v3757_v19, %v3757_v19  ;;  %v11419_v19 = vld [vmem:[%s15296_s4 + $0x268] sm:$0xff] }
 0x28f   :  { %1434 = vmatmul.bf16.vlgmr.msrb.gmra.mxu2 %v1376_v0  ;;  %v3424_v39 = vunpack.c.l.b16 %v3418_v56  ;;  %15623 = vst [vmem:[#allocation15_spill] sm:$0xff] %v11374_v5  ;;  %v3143_v6 = vld [vmem:[#allocation2 + $0x60] sm:$0x3] }
 0x290   :  { %1604 = vmatpush.bf16.msra.mxu2 %v8973_v62  ;;  %2906 = vmatmul.bf16.vlgmr.msra.gmra.mxu0 %v11229_v18  ;;  %15628 = vst [vmem:[#allocation24_spill] sm:$0xff] %v11419_v19 }
 0x291   :  { %1695 = vmatpush.bf16.msra.mxu3 %v8980_v47  ;;  %2931 = vmatmul.bf16.vlgmr.msra.gmra.mxu1 %v11231_v27  ;;  %v11337_v47 = vld [vmem:[#allocation2 + $0x94] sm:$0xf] }
 0x292   :  { %2971 = vmatpush.bf16.msrb.mxu0 %v15613_v24  ;;  %2987 = vmatpush.bf16.msrb.mxu1 %v15614_v48  ;;  %15620 = vst [vmem:[#allocation16_spill] sm:$0xff] %v11337_v47  ;;  %v15329_v24 = vunpack.c.l.b16 %v11337_v47  ;;  %v8996_v48 = vld [vmem:[#allocation2 + $0x14] sm:$0xf0] }
 0x293   :  { %v9082_v47 = vld [vmem:[#allocation2 + $0x54] sm:$0x70] }
 0x294   :  { %1605 = vmatpush.bf16.msra.mxu2 %v8972_v46  ;;  %v11350_v46 = vld [vmem:[%s15296_s4 + $0x198] sm:$0xff]  ;;  %v3758_v58 = vpack.c.b16 %v15329_v24, %v3755_v2 }
 0x295   :  { %1696 = vmatpush.bf16.msra.mxu3 %v8979_v37  ;;  %15621 = vst [vmem:[#allocation11_spill] sm:$0xff] %v11350_v46  ;;  %v7509_v37 = vld [vmem:[#allocation2 + $0x14] sm:$0xc] }
 0x296   :  { %2972 = vmatpush.bf16.msrb.mxu0 %v11080_v22  ;;  %2988 = vmatpush.bf16.msrb.mxu1 %v15615_v17  ;;  %v1707_v17 = vld [vmem:[#allocation2 + $0x14] sm:$0x1]  ;;  %v7510_v28 = vor.u32 %v8996_v48, %v7509_v37  ;;  %v3760_v32 = vrot.slane %v3758_v58, 3  ;;  %v8987_v37 = vld [vmem:[#allocation2 + $0xc] sm:$0xf0] }
 0x298   :  { %1606 = vmatpush.bf16.msra.mxu2 %v8971_v49  ;;  %1697 = vmatmul.bf16.vlgmr.msra.gmra.mxu3 %v1639_v34  ;;  %v11356_v49 = vld [vmem:[#allocation2 + $0xb0] sm:$0xf]  ;;  %v3428_v34 = vpack.c.b16 %v3426_v7, %v3426_v7 }
 0x299   :  { %1873 = vmatpush.bf16.msrb.mxu3 %v11245_v13  ;;  %15622 = vst [vmem:[#allocation20_spill] sm:$0xff] %v11356_v49  ;;  %v15328_v63 = vunpack.c.l.b16 %v11356_v49  ;;  %v11395_v7 = vld [vmem:[%s15296_s4 + $0x270] sm:$0xff]  ;;  %v11584_v49 = vld [vmem:[%s15296_s4 + $0x200] sm:$0xff] }
 0x29a   :  { %2973 = vmatpush.bf16.msrb.mxu0 %v11114_v50  ;;  %2989 = vmatpush.bf16.msrb.mxu1 %v11075_v60  ;;  %v3430_v21 = vrot.slane %v3428_v34, 3  ;;  %15625 = vst [vmem:[#allocation21_spill] sm:$0xff] %v11395_v7 }
 0x29b   :  { %15641 = vst [vmem:[#allocation37_spill] sm:$0xff] %v11584_v49 }
 0x29c   :  { %1607 = vmatpush.bf16.msra.mxu2 %v8970_v54  ;;  %v11363_v54 = vld [vmem:[%s15296_s4 + $0x1c0] sm:$0xff] }
 0x29d   :  { %1874 = vmatpush.bf16.msrb.mxu3 %v11256_v14 }
 0x29e   :  { %2974 = vmatpush.bf16.msrb.mxu0 %v11155_v15  ;;  %2990 = vmatpush.bf16.msrb.mxu1 %v11109_v9 }
 0x29f   :  { %1608 = vmatmul.bf16.vlgmr.msra.gmra.mxu2 %v1550_v16  ;;  %v1729_v16 = vunpack.c.l.b16 %v1707_v17 }
 0x2a0   :  { %1784 = vmatpush.bf16.msrb.mxu2 %v11275_v55 }
 0x2a1   :  { %1875 = vmatpush.bf16.msrb.mxu3 %v11267_v40  ;;  %2975 = vmatmul.bf16.vlgmr.msrb.gmra.mxu0 %v11186_v30  ;;  %v3096_v30 = vpack.c.b16 %v15331_v31, %v3093_v23  ;;  %v4080_v23 = vld [vmem:[#allocation2 + $0xac] sm:$0x8]  ;;  %v1731_v48 = vpack.c.b16 %v1729_v16, %v1729_v16  ;;  %v11542_v31 = vld [vmem:[%s15296_s4 + $0x240] sm:$0xff] }
 0x2a2   :  { %3031 = vmatpush.bf16.msra.mxu0 %v11275_v55  ;;  %3047 = vmatpush.bf16.msra.mxu1 %v11245_v13  ;;  %v4086_v35 = vunpack.c.l.b16 %v4080_v23  ;;  %v11437_v23 = vld [vmem:[%s15296_s4 + $0x260] sm:$0xff]  ;;  %15639 = vst [vmem:[#allocation35_spill] sm:$0xff] %v11542_v31 }
 0x2a3   :  { %2991 = vmatmul.bf16.vlgmr.msrb.gmra.mxu1 %v11190_v53  ;;  %v11317_v53 = vld [vmem:[#allocation2 + $0x78] sm:$0xf]  ;;  %v3098_v57 = vrot.slane %v3096_v30, 3  ;;  %v4082_v30 = vld [vmem:[#allocation2 + $0xb4] sm:$0x1]  ;;  %15631 = vst [vmem:[#allocation27_spill] sm:$0xff] %v11437_v23 }
 0x2a4   :  { %1785 = vmatpush.bf16.msrb.mxu2 %v11295_v8  ;;  %v15330_v62 = vunpack.c.l.b16 %v11317_v53  ;;  %v4088_v56 = vunpack.c.l.b16 %v4082_v30 }
 0x2a5   :  { %1876 = vmatpush.bf16.msrb.mxu3 %v11285_v25  ;;  %v11334_v0 = vsel %vm1218_vm4, %v3098_v57, %v3099_v44  ;;  %v7473_v57 = vld [vmem:[#allocation2 + $0xc] sm:$0x8]  ;;  %v3761_v44 = vrot.slane %v3759_v20, 3  ;;  %v11430_v20 = vld [vmem:[%s15296_s4 + $0x230] sm:$0xff] }
 0x2a6   :  { %3032 = vmatpush.bf16.msra.mxu0 %v11295_v8  ;;  %3048 = vmatpush.bf16.msra.mxu1 %v11256_v14  ;;  %15619 = vst [vmem:[#allocation7_spill] sm:$0xff] %v11334_v0  ;;  %v3427_v26 = vpack.c.b16 %v15330_v62, %v3424_v39  ;;  %v1823_v39 = vrot.slane %v7510_v28, 2  ;;  %v4090_v42 = vpack.c.b16 %v4088_v56, %v4088_v56  ;;  %v1733_v28 = vrot.slane %v1731_v48, 3  ;;  %v11476_v56 = vld [vmem:[%s15296_s4 + $0x2f0] sm:$0xff] }
 0x2a7   :  { %v11401_v34 = vsel %vm1218_vm4, %v3760_v32, %v3761_v44  ;;  %v7474_v45 = vor.u32 %v8987_v37, %v7473_v57  ;;  %15630 = vst [vmem:[#allocation26_spill] sm:$0xff] %v11430_v20  ;;  %v11443_v32 = vld [vmem:[%s15296_s4 + $0x2b8] sm:$0xff]  ;;  %v11458_v57 = vld [vmem:[%s15296_s4 + $0x228] sm:$0xff]  ;;  %v11485_v37 = vld [vmem:[#allocation2 + $0x24] sm:$0xf] }
 0x2a8   :  { %1786 = vmatpush.bf16.msrb.mxu2 %v11312_v11  ;;  %v3429_v36 = vrot.slane %v3427_v26, 3  ;;  %v4089_v26 = vpack.c.b16 %v15328_v63, %v4086_v35  ;;  %15626 = vst [vmem:[#allocation22_spill] sm:$0xff] %v11401_v34  ;;  %v4092_v2 = vrot.slane %v4090_v42, 3  ;;  %v11450_v35 = vld [vmem:[%s15296_s4 + $0x2f8] sm:$0xff]  ;;  %v11491_v48 = vld [vmem:[%s15296_s4 + $0x250] sm:$0xff]  ;;  %v11496_v42 = vld [vmem:[%s15296_s4 + $0x2a8] sm:$0xff] }
 0x2a9   :  { %1877 = vmatpush.bf16.msrb.mxu3 %v11306_v38  ;;  %v1732_v16 = vrot.slane %v7474_v45, 3  ;;  %15632 = vst [vmem:[#allocation28_spill] sm:$0xff] %v11458_v57  ;;  %v11465_v44 = vld [vmem:[%s15296_s4 + $0x258] sm:$0xff]  ;;  %v11536_v62 = vld [vmem:[%s15296_s4 + $0x210] sm:$0xff]  ;;  %v11560_v34 = vld [vmem:[%s15296_s4 + $0x208] sm:$0xff] }
 0x2aa   :  { %3033 = vmatpush.bf16.msra.mxu0 %v11312_v11  ;;  %3049 = vmatpush.bf16.msra.mxu1 %v11267_v40  ;;  %v11381_v61 = vsel %vm1218_vm4, %v3429_v36, %v3430_v21  ;;  %v4091_v17 = vrot.slane %v4089_v26, 3  ;;  %v11407_v36 = vld [vmem:[%s15296_s4 + $0x238] sm:$0xff]  ;;  %v11413_v21 = vld [vmem:[%s15296_s4 + $0x180] sm:$0xff]  ;;  %15633 = vst [vmem:[#allocation29_spill] sm:$0xff] %v11465_v44  ;;  %v1979_v26 = vld [vmem:[#allocation2 + $0x28] sm:$0x1] }
 0x2ab   :  { %15624 = vst [vmem:[#allocation19_spill] sm:$0xff] %v11381_v61  ;;  %v1734_v30 = vsel %vm1218_vm4, %v1732_v16, %v1733_v28  ;;  %v2001_v28 = vunpack.c.l.b16 %v1979_v26  ;;  %v11510_v16 = vld [vmem:[%s15296_s4 + $0x218] sm:$0xff]  ;;  %v11527_v26 = vld [vmem:[%s15296_s4 + $0x2e0] sm:$0xff]  ;;  %v11566_v61 = vld [vmem:[%s15296_s4 + $0x290] sm:$0xff] }
 0x2ac   :  { %1787 = vmatpush.bf16.msrb.mxu2 %v11330_v29  ;;  %15627 = vst [vmem:[#allocation23_spill] sm:$0xff] %v11407_v36  ;;  %v11423_v58 = vsel %vm1218_vm4, %v4091_v17, %v4092_v2  ;;  %v11502_v17 = vld [vmem:[%s15296_s4 + $0x2e8] sm:$0xff]  ;;  %v15332_v2 = vunpack.c.l.b16 %v11485_v37  ;;  %v7853_v0 = vld [vmem:[#allocation2 + $0x54] sm:$0xe] }
 0x2ad   :  { %1878 = vmatpush.bf16.msrb.mxu3 %v11324_v52  ;;  %15629 = vst [vmem:[#allocation25_spill] sm:$0xff] %v11423_v58  ;;  %v2003_v24 = vpack.c.b16 %v2001_v28, %v2001_v28  ;;  %v11547_v58 = vld [vmem:[%s15296_s4 + $0x298] sm:$0xff] }
 0x2ae   :  { %3034 = vmatpush.bf16.msra.mxu0 %v11330_v29  ;;  %3050 = vmatpush.bf16.msra.mxu1 %v11285_v25  ;;  %15635 = vst [vmem:[#allocation31_spill] sm:$0xff] %v11491_v48 }
 0x2af   :  { %15636 = vst [vmem:[#allocation32_spill] sm:$0xff] %v11510_v16 }
 0x2b0   :  { %1788 = vmatpush.bf16.msrb.mxu2 %v11350_v46  ;;  %15638 = vst [vmem:[#allocation34_spill] sm:$0xff] %v11536_v62 }
 0x2b1   :  { %1879 = vmatpush.bf16.msrb.mxu3 %v11344_v4  ;;  %15640 = vst [vmem:[#allocation36_spill] sm:$0xff] %v11560_v34 }
 0x2b2   :  { %3035 = vmatpush.bf16.msra.mxu0 %v11350_v46  ;;  %3051 = vmatpush.bf16.msra.mxu1 %v11306_v38 }
 0x2b4   :  { %1789 = vmatpush.bf16.msrb.mxu2 %v11369_v51 }
 0x2b5   :  { %1880 = vmatpush.bf16.msrb.mxu3 %v11363_v54 }
 0x2b6   :  { %3036 = vmatpush.bf16.msra.mxu0 %v11369_v51  ;;  %3052 = vmatpush.bf16.msra.mxu1 %v11324_v52 }
 0x2b8   :  { %1790 = vmatpush.bf16.msrb.mxu2 %v11389_v33  ;;  %1881 = vmatmul.bf16.vlgmr.msrb.gmra.mxu3 %v1823_v39  ;;  %v11483_v39 = vld [vmem:[%s15296_s4 + $0x220] sm:$0xff] }
 0x2b9   :  { %2056 = vmatpush.bf16.msra.mxu3 %v11374_v5  ;;  %15634 = vst [vmem:[#allocation30_spill] sm:$0xff] %v11483_v39  ;;  %v11694_v5 = vld [vmem:[%s15296_s4 + $0x368] sm:$0xff] }
 0x2ba   :  { %3037 = vmatpush.bf16.msra.mxu0 %v11389_v33  ;;  %3053 = vmatpush.bf16.msra.mxu1 %v11344_v4 }
 0x2bc   :  { %1791 = vmatpush.bf16.msrb.mxu2 %v11413_v21 }
 0x2bd   :  { %2057 = vmatpush.bf16.msra.mxu3 %v11395_v7  ;;  %v9022_v7 = vld [vmem:[#allocation2 + $0x1c] sm:$0x70] }
 0x2be   :  { %3038 = vmatpush.bf16.msra.mxu0 %v11413_v21  ;;  %3054 = vmatpush.bf16.msra.mxu1 %v11363_v54 }
 0x2bf   :  { %1792 = vmatmul.bf16.vlgmr.msrb.gmra.mxu2 %v1734_v30  ;;  %v11516_v30 = vld [vmem:[%s15296_s4 + $0x248] sm:$0xff] }
 0x2c0   :  { %1961 = vmatpush.bf16.msra.mxu2 %v11407_v36  ;;  %15637 = vst [vmem:[#allocation33_spill] sm:$0xff] %v11516_v30  ;;  %v11679_v36 = vld [vmem:[%s15296_s4 + $0x370] sm:$0xff] }
 0x2c1   :  { %2058 = vmatpush.bf16.msra.mxu3 %v11419_v19  ;;  %3039 = vmatmul.bf16.vlgmr.msra.gmra.mxu0 %v11229_v18  ;;  %v11470_v18 = vld [vmem:[%s15296_s4 + $0x2b0] sm:$0xff]  ;;  %v15650_v19 = vld [vmem:[#allocation18_spill] sm:$0xff] }
 0x2c2   :  { %3127 = vmatpush.bf16.msrb.mxu0 %v11443_v32  ;;  %3148 = vmatpush.bf16.msrb.mxu1 %v11450_v35 }
 0x2c3   :  { %3055 = vmatmul.bf16.vlgmr.msra.gmra.mxu1 %v11231_v27  ;;  %v1977_v27 = vld [vmem:[#allocation2 + $0x20] sm:$0x8] }
 0x2c4   :  { %1962 = vmatpush.bf16.msra.mxu2 %v11430_v20  ;;  %v1999_v45 = vunpack.c.l.b16 %v1977_v27  ;;  %v11521_v27 = vld [vmem:[%s15296_s4 + $0x2a0] sm:$0xff] }
 0x2c5   :  { %2059 = vmatpush.bf16.msra.mxu3 %v11437_v23  ;;  %v3216_v23 = vld [vmem:[#allocation2 + $0x68] sm:$0x1]  ;;  %v15648_v20 = vld [vmem:[#allocation17_spill] sm:$0xff] }
 0x2c6   :  { %3128 = vmatpush.bf16.msrb.mxu0 %v11470_v18  ;;  %3149 = vmatpush.bf16.msrb.mxu1 %v11476_v56  ;;  %v2002_v63 = vpack.c.b16 %v15332_v2, %v1999_v45  ;;  %v11553_v45 = vld [vmem:[%s15296_s4 + $0x2d8] sm:$0xff]  ;;  %v2005_v2 = vrot.slane %v2003_v24, 3  ;;  %v11573_v24 = vld [vmem:[%s15296_s4 + $0x2d0] sm:$0xff]  ;;  %15655 = vst [vmem:[#allocation17_spill] sm:$0xff] %v11694_v5 }
 0x2c8   :  { %1963 = vmatpush.bf16.msra.mxu2 %v11458_v57  ;;  %v2004_v28 = vrot.slane %v2002_v63, 3  ;;  %v2161_v57 = vld [vmem:[#allocation2 + $0x28] sm:$0x3] }
 0x2c9   :  { %2060 = vmatpush.bf16.msra.mxu3 %v11465_v44  ;;  %v15647_v44 = vld [vmem:[#allocation14_spill] sm:$0xff] }
 0x2ca   :  { %3129 = vmatpush.bf16.msrb.mxu0 %v11496_v42  ;;  %3150 = vmatpush.bf16.msrb.mxu1 %v11502_v17  ;;  %v11577_v63 = vsel %vm1218_vm4, %v2004_v28, %v2005_v2  ;;  %v11596_v2 = vld [vmem:[%s15296_s4 + $0x2c8] sm:$0xff]  ;;  %v7854_v28 = vor.u32 %v9082_v47, %v7853_v0  ;;  %v11613_v0 = vld [vmem:[%s15296_s4 + $0x2c0] sm:$0xff] }
 0x2cc   :  { %1964 = vmatpush.bf16.msra.mxu2 %v11483_v39  ;;  %v11622_v47 = vrot.slane %v7854_v28, 1  ;;  %v11642_v28 = vld [vmem:[%s15296_s4 + $0x3b0] sm:$0xff]  ;;  %v15646_v39 = vld [vmem:[#allocation13_spill] sm:$0xff] }
 0x2cd   :  { %2061 = vmatpush.bf16.msra.mxu3 %v11491_v48  ;;  %15653 = vst [vmem:[#allocation13_spill] sm:$0xff] %v11679_v36 }
 0x2ce   :  { %3130 = vmatpush.bf16.msrb.mxu0 %v11521_v27  ;;  %3151 = vmatpush.bf16.msrb.mxu1 %v11527_v26 }
 0x2d0   :  { %1965 = vmatpush.bf16.msra.mxu2 %v11510_v16  ;;  %v11604_v16 = vld [vmem:[%s15296_s4 + $0x280] sm:$0xff] }
 0x2d1   :  { %2062 = vmatpush.bf16.msra.mxu3 %v11516_v30  ;;  %v3145_v30 = vunpack.c.l.b16 %v3143_v6  ;;  %v11619_v6 = vld [vmem:[%s15296_s4 + $0x3b8] sm:$0xff] }
 0x2d2   :  { %3131 = vmatpush.bf16.msrb.mxu0 %v11547_v58  ;;  %3152 = vmatpush.bf16.msrb.mxu1 %v11553_v45 }
 0x2d4   :  { %1966 = vmatpush.bf16.msra.mxu2 %v11536_v62  ;;  %v9005_v62 = vld [vmem:[#allocation2 + $0x1c] sm:$0x30] }
 0x2d5   :  { %2063 = vmatpush.bf16.msra.mxu3 %v11542_v31  ;;  %v11589_v31 = vld [vmem:[%s15296_s4 + $0x288] sm:$0xff] }
 0x2d6   :  { %3132 = vmatpush.bf16.msrb.mxu0 %v11566_v61  ;;  %3153 = vmatpush.bf16.msrb.mxu1 %v11573_v24 }
 0x2d8   :  { %1967 = vmatpush.bf16.msra.mxu2 %v11560_v34  ;;  %2064 = vmatmul.bf16.vlgmr.msra.gmra.mxu3 %v11577_v63  ;;  %v7545_v34 = vld [vmem:[#allocation2 + $0x1c] sm:$0xf] }
 0x2d9   :  { %2230 = vmatpush.bf16.msrb.mxu3 %v11450_v35  ;;  %v11607_v48 = vor.u32 %v9005_v62, %v7545_v34  ;;  %v11627_v62 = vld [vmem:[%s15296_s4 + $0x3f8] sm:$0xff]  ;;  %v15642_v34 = vunpack.c.l.b16 %v11277_v43  ;;  %v11648_v43 = vld [vmem:[%s15296_s4 + $0x3f0] sm:$0xff] }
 0x2da   :  { %3133 = vmatpush.bf16.msrb.mxu0 %v11589_v31  ;;  %3154 = vmatpush.bf16.msrb.mxu1 %v11596_v2  ;;  %15643 = vst [vmem:[#allocation38_spill] sm:$0xff] %v11648_v43 }
 0x2dc   :  { %1968 = vmatpush.bf16.msra.mxu2 %v11584_v49  ;;  %v11632_v49 = vpack.c.b16 %v3145_v30, %v15642_v34  ;;  %v15644_v30 = vld [vmem:[#allocation9_spill] sm:$0xff]  ;;  %v15645_v34 = vld [vmem:[#allocation10_spill] sm:$0xff] }
 0x2dd   :  { %2231 = vmatpush.bf16.msrb.mxu3 %v11476_v56 }
 0x2de   :  { %3134 = vmatpush.bf16.msrb.mxu0 %v11604_v16  ;;  %3155 = vmatpush.bf16.msrb.mxu1 %v11613_v0 }
 0x2df   :  { %1969 = vmatmul.bf16.vlgmr.msra.gmra.mxu2 %v11607_v48 }
 0x2e0   :  { %2145 = vmatpush.bf16.msrb.mxu2 %v11443_v32 }
 0x2e1   :  { %2232 = vmatpush.bf16.msrb.mxu3 %v11502_v17  ;;  %3135 = vmatmul.bf16.vlgmr.msrb.gmra.mxu0 %v11622_v47 }
 0x2e2   :  { %3229 = vmatpush.bf16.msra.mxu0 %v11619_v6  ;;  %3254 = vmatpush.bf16.msra.mxu1 %v11627_v62 }
 0x2e3   :  { %3156 = vmatmul.bf16.vlgmr.msrb.gmra.mxu1 %v11632_v49 }
 0x2e4   :  { %2146 = vmatpush.bf16.msrb.mxu2 %v11470_v18 }
 0x2e5   :  { %2233 = vmatpush.bf16.msrb.mxu3 %v11527_v26 }
 0x2e6   :  { %3230 = vmatpush.bf16.msra.mxu0 %v11642_v28  ;;  %3255 = vmatpush.bf16.msra.mxu1 %v11648_v43 }
 0x2e8   :  { %2147 = vmatpush.bf16.msrb.mxu2 %v11496_v42 }
 0x2e9   :  { %2234 = vmatpush.bf16.msrb.mxu3 %v11553_v45 }
 0x2ea   :  { %3231 = vmatpush.bf16.msra.mxu0 %v15644_v30  ;;  %3256 = vmatpush.bf16.msra.mxu1 %v15645_v34  ;;  %v11665_v30 = vld [vmem:[%s15296_s4 + $0x378] sm:$0xff]  ;;  %v2179_v34 = vunpack.c.l.b16 %v2161_v57  ;;  %v7865_v57 = vld [vmem:[#allocation2 + $0x60] sm:$0x8] }
 0x2eb   :  { %15649 = vst [vmem:[#allocation9_spill] sm:$0xff] %v11665_v30 }
 0x2ec   :  { %2148 = vmatpush.bf16.msrb.mxu2 %v11521_v27 }
 0x2ed   :  { %2235 = vmatpush.bf16.msrb.mxu3 %v11573_v24 }
 0x2ee   :  { %3232 = vmatpush.bf16.msra.mxu0 %v15646_v39  ;;  %3257 = vmatpush.bf16.msra.mxu1 %v15647_v44  ;;  %v3222_v39 = vunpack.c.l.b16 %v3216_v23  ;;  %v15651_v44 = vunpack.c.l.b16 %v11485_v37  ;;  %v7613_v23 = vld [vmem:[#allocation2 + $0x1c] sm:$0xe]  ;;  %v9086_v37 = vld [vmem:[#allocation2 + $0x68] sm:$0xf0] }
 0x2f0   :  { %2149 = vmatpush.bf16.msrb.mxu2 %v11547_v58 }
 0x2f1   :  { %2236 = vmatpush.bf16.msrb.mxu3 %v11596_v2 }
 0x2f2   :  { %3233 = vmatpush.bf16.msra.mxu0 %v15648_v20  ;;  %3258 = vmatpush.bf16.msra.mxu1 %v15650_v19  ;;  %v11674_v20 = vpack.c.b16 %v2179_v34, %v15651_v44  ;;  %v9085_v19 = vld [vmem:[#allocation2 + $0x60] sm:$0xf0]  ;;  %v11687_v34 = vld [vmem:[%s15296_s4 + $0x338] sm:$0xff]  ;;  %v7614_v44 = vor.u32 %v9022_v7, %v7613_v23 }
 0x2f3   :  { %15654 = vst [vmem:[#allocation14_spill] sm:$0xff] %v11687_v34 }
 0x2f4   :  { %2150 = vmatpush.bf16.msrb.mxu2 %v11566_v61  ;;  %15652 = vst [vmem:[#allocation10_spill] sm:$0xff] %v11674_v20 }
 0x2f5   :  { %2237 = vmatpush.bf16.msrb.mxu3 %v11613_v0 }
 0x2f6   :  { %3234 = vmatpush.bf16.msra.mxu0 %v11035_v41  ;;  %3259 = vmatpush.bf16.msra.mxu1 %v11045_v12  ;;  %v3224_v41 = vpack.c.b16 %v3222_v39, %v3222_v39  ;;  %v7866_v12 = vor.u32 %v9085_v19, %v7865_v57  ;;  %v11705_v57 = vrot.slane %v7614_v44, 1 }
 0x2f8   :  { %2151 = vmatpush.bf16.msrb.mxu2 %v11589_v31  ;;  %2238 = vmatmul.bf16.vlgmr.msrb.gmra.mxu3 %v11674_v20  ;;  %v3226_v39 = vrot.slane %v3224_v41, 3  ;;  %v3225_v7 = vrot.slane %v7866_v12, 3  ;;  %15657 = vst [vmem:[#allocation39_spill] sm:$0xff] %v11705_v57  ;;  %v11749_v41 = vld [vmem:[%s15296_s4 + $0xb0] sm:$0xff]  ;;  %v11762_v12 = vld [vmem:[%s15296_s4 + $0x320] sm:$0xff] }
 0x2f9   :  { %2408 = vmatpush.bf16.msra.mxu3 %v11665_v30  ;;  %v7869_v30 = vld [vmem:[#allocation2 + $0x68] sm:$0xc]  ;;  %15661 = vst [vmem:[#allocation43_spill] sm:$0xff] %v11762_v12 }
 0x2fa   :  { %3235 = vmatpush.bf16.msra.mxu0 %v11088_v10  ;;  %3260 = vmatpush.bf16.msra.mxu1 %v11093_v59  ;;  %v7870_v20 = vor.u32 %v9086_v37, %v7869_v30  ;;  %v11702_v10 = vld [vmem:[%s15296_s4 + $0x330] sm:$0xff]  ;;  %v11711_v59 = vld [vmem:[%s15296_s4 + $0x360] sm:$0xff]  ;;  %v11717_v30 = vld [vmem:[%s15296_s4 + $0xb8] sm:$0xff]  ;;  %v11727_v19 = vsel %vm1218_vm4, %v3225_v7, %v3226_v39  ;;  %v1348_v44 = vpop.f32.mrf.mxu3 }
 0x2fb   :  { %15656 = vst [vmem:[#allocation18_spill] sm:$0xff] %v11702_v10  ;;  %v11755_v37 = vld [vmem:[%s15296_s4 + $0xf0] sm:$0xff]  ;;  %v11773_v7 = vld [vmem:[%s15296_s4 + $0xa8] sm:$0xff] }
 0x2fc   :  { %2152 = vmatpush.bf16.msrb.mxu2 %v11604_v16  ;;  %15658 = vst [vmem:[#allocation40_spill] sm:$0xff] %v11711_v59  ;;  %v11729_v23 = vrot.slane %v7870_v20, 2  ;;  %v11744_v20 = vld [vmem:[%s15296_s4 + $0x358] sm:$0xff]  ;;  %v11768_v39 = vld [vmem:[%s15296_s4 + $0x350] sm:$0xff] }
 0x2fd   :  { %2409 = vmatpush.bf16.msra.mxu3 %v11679_v36  ;;  %15660 = vst [vmem:[#allocation42_spill] sm:$0xff] %v11744_v20  ;;  %v9048_v36 = vld [vmem:[#allocation2 + $0x30] sm:$0x70] }
 0x2fe   :  { %3236 = vmatpush.bf16.msra.mxu0 %v11124_v1  ;;  %3261 = vmatpush.bf16.msra.mxu1 %v11129_v3  ;;  %v11723_v1 = vld [vmem:[%s15296_s4 + $0xf8] sm:$0xff]  ;;  %v11737_v3 = vld [vmem:[%s15296_s4 + $0x328] sm:$0xff]  ;;  %15662 = vst [vmem:[#allocation44_spill] sm:$0xff] %v11768_v39 }
 0x2ff   :  { %2153 = vmatmul.bf16.vlgmr.msrb.gmra.mxu2 %v11705_v57  ;;  %15659 = vst [vmem:[#allocation41_spill] sm:$0xff] %v11737_v3  ;;  %v11810_v57 = vld [vmem:[%s15296_s4 + $0x310] sm:$0xff] }
 0x300   :  { %2319 = vmatpush.bf16.msra.mxu2 %v11687_v34  ;;  %15663 = vst [vmem:[#allocation45_spill] sm:$0xff] %v11773_v7  ;;  %v7717_v34 = vld [vmem:[#allocation2 + $0x30] sm:$0xe] }
 0x301   :  { %2410 = vmatpush.bf16.msra.mxu3 %v11694_v5  ;;  %3237 = vmatmul.bf16.vlgmr.msra.gmra.mxu0 %v11727_v19  ;;  %v11803_v5 = vld [vmem:[%s15296_s4 + $0xe0] sm:$0xff]  ;;  %15667 = vst [vmem:[#allocation49_spill] sm:$0xff] %v11810_v57 }
 0x302   :  { %3298 = vmatpush.bf16.msrb.mxu0 %v11717_v30  ;;  %3314 = vmatpush.bf16.msrb.mxu1 %v11723_v1 }
 0x303   :  { %3262 = vmatmul.bf16.vlgmr.msra.gmra.mxu1 %v11729_v23 }
 0x304   :  { %2320 = vmatpush.bf16.msra.mxu2 %v11702_v10  ;;  %v11797_v10 = vld [vmem:[%s15296_s4 + $0xa0] sm:$0xff] }
 0x305   :  { %2411 = vmatpush.bf16.msra.mxu3 %v11711_v59  ;;  %v11792_v59 = vld [vmem:[%s15296_s4 + $0x348] sm:$0xff]  ;;  %15666 = vst [vmem:[#allocation48_spill] sm:$0xff] %v11797_v10 }
 0x306   :  { %3299 = vmatpush.bf16.msrb.mxu0 %v11749_v41  ;;  %3315 = vmatpush.bf16.msrb.mxu1 %v11755_v37  ;;  %15665 = vst [vmem:[#allocation47_spill] sm:$0xff] %v11792_v59 }
 0x308   :  { %2321 = vmatpush.bf16.msra.mxu2 %v11737_v3  ;;  %v11779_v3 = vld [vmem:[%s15296_s4 + $0xe8] sm:$0xff] }
 0x309   :  { %2412 = vmatpush.bf16.msra.mxu3 %v11744_v20  ;;  %v11786_v20 = vld [vmem:[%s15296_s4 + $0x318] sm:$0xff] }
 0x30a   :  { %3300 = vmatpush.bf16.msrb.mxu0 %v11773_v7  ;;  %3316 = vmatpush.bf16.msrb.mxu1 %v11779_v3  ;;  %15664 = vst [vmem:[#allocation46_spill] sm:$0xff] %v11786_v20  ;;  %v11836_v7 = vld [vmem:[%s15296_s4 + $0x308] sm:$0xff] }
 0x30b   :  { %15671 = vst [vmem:[#allocation53_spill] sm:$0xff] %v11836_v7 }
 0x30c   :  { %2322 = vmatpush.bf16.msra.mxu2 %v11762_v12  ;;  %v1280_v12 = vpop.f32.mrf.mxu2 }
 0x30d   :  { %2413 = vmatpush.bf16.msra.mxu3 %v11768_v39  ;;  %v1349_v39 = vadd.f32 %v1348_v44, %v1280_v12  ;;  %v11821_v12 = vld [vmem:[%s15296_s4 + $0x98] sm:$0xff]  ;;  %v7718_v44 = vor.u32 %v9048_v36, %v7717_v34 }
 0x30e   :  { %3301 = vmatpush.bf16.msrb.mxu0 %v11797_v10  ;;  %3317 = vmatpush.bf16.msrb.mxu1 %v11803_v5  ;;  %v11816_v10 = vld [vmem:[%s15296_s4 + $0x340] sm:$0xff]  ;;  %15669 = vst [vmem:[#allocation51_spill] sm:$0xff] %v11821_v12 }
 0x30f   :  { %15668 = vst [vmem:[#allocation50_spill] sm:$0xff] %v11816_v10  ;;  %v11843_v34 = vrot.slane %v7718_v44, 1 }
 0x310   :  { %2323 = vmatpush.bf16.msra.mxu2 %v11786_v20  ;;  %v11827_v20 = vld [vmem:[%s15296_s4 + $0xd8] sm:$0xff] }
 0x311   :  { %2414 = vmatpush.bf16.msra.mxu3 %v11792_v59  ;;  %v11830_v59 = vpop.f32.mrf.mxu3  ;;  %15673 = vst [vmem:[#allocation55_spill] sm:$0xff] %v11843_v34 }
 0x312   :  { %3302 = vmatpush.bf16.msrb.mxu0 %v11821_v12  ;;  %3318 = vmatpush.bf16.msrb.mxu1 %v11827_v20  ;;  %15670 = vst [vmem:[#allocation52_spill] sm:$0xff] %v11830_v59  ;;  %v11848_v59 = vld [vmem:[%s15296_s4 + $0xd0] sm:$0xff]  ;;  %v9039_v12 = vld [vmem:[#allocation2 + $0x28] sm:$0xf0] }
 0x314   :  { %2324 = vmatpush.bf16.msra.mxu2 %v11810_v57  ;;  %v11840_v36 = vpop.f32.mrf.mxu2  ;;  %v7681_v57 = vld [vmem:[#allocation2 + $0x28] sm:$0xc] }
 0x315   :  { %2415 = vmatpush.bf16.msra.mxu3 %v11816_v10  ;;  %15672 = vst [vmem:[#allocation54_spill] sm:$0xff] %v11840_v36  ;;  %v7682_v44 = vor.u32 %v9039_v12, %v7681_v57  ;;  %v11914_v57 = vld [vmem:[%s15296_s4 + $0x3d0] sm:$0xff] }
 0x316   :  { %3303 = vmatpush.bf16.msrb.mxu0 %v11080_v22  ;;  %3319 = vmatpush.bf16.msrb.mxu1 %v11848_v59  ;;  %v11856_v22 = vld [vmem:[%s15296_s4 + $0x300] sm:$0xff]  ;;  %15682 = vst [vmem:[#allocation64_spill] sm:$0xff] %v11914_v57  ;;  %v2426_v12 = vld [vmem:[#allocation2 + $0x30] sm:$0x1] }
 0x317   :  { %15674 = vst [vmem:[#allocation56_spill] sm:$0xff] %v11856_v22  ;;  %v11864_v10 = vrot.slane %v7682_v44, 2 }
 0x318   :  { %2325 = vmatpush.bf16.msra.mxu2 %v11836_v7  ;;  %2416 = vmatmul.bf16.vlgmr.msra.gmra.mxu3 %v11843_v34  ;;  %v11869_v34 = vld [vmem:[%s15296_s4 + $0x3e8] sm:$0xff] }
 0x319   :  { %2592 = vmatpush.bf16.msrb.mxu3 %v11627_v62  ;;  %v1520_v36 = vpop.f32.mrf.mxu3  ;;  %15675 = vst [vmem:[#allocation57_spill] sm:$0xff] %v11869_v34 }
 0x31a   :  { %3304 = vmatpush.bf16.msrb.mxu0 %v11114_v50  ;;  %3320 = vmatpush.bf16.msrb.mxu1 %v11075_v60 }
 0x31c   :  { %2326 = vmatpush.bf16.msra.mxu2 %v11856_v22  ;;  %v1435_v7 = vpop.f32.mrf.mxu2 }
 0x31d   :  { %2593 = vmatpush.bf16.msrb.mxu3 %v11648_v43  ;;  %v1440_v60 = vadd.f32 %v1435_v7, %v1349_v39  ;;  %v7789_v39 = vld [vmem:[#allocation2 + $0x30] sm:$0xc]  ;;  %v11922_v7 = vld [vmem:[%s15296_s4 + $0x398] sm:$0xff] }
 0x31e   :  { %3305 = vmatpush.bf16.msrb.mxu0 %v11155_v15  ;;  %3321 = vmatpush.bf16.msrb.mxu1 %v11109_v9  ;;  %v11882_v15 = vld [vmem:[%s15296_s4 + $0x3e0] sm:$0xff]  ;;  %v11890_v9 = vld [vmem:[%s15296_s4 + $0x3a8] sm:$0xff]  ;;  %15683 = vst [vmem:[#allocation65_spill] sm:$0xff] %v11922_v7 }
 0x31f   :  { %2327 = vmatmul.bf16.vlgmr.msra.gmra.mxu2 %v11864_v10  ;;  %v1525_v50 = vadd.f32 %v1520_v36, %v1440_v60  ;;  %15676 = vst [vmem:[#allocation58_spill] sm:$0xff] %v11882_v15  ;;  %v11928_v36 = vld [vmem:[%s15296_s4 + $0x3c8] sm:$0xff] }
 0x320   :  { %2503 = vmatpush.bf16.msrb.mxu2 %v11619_v6  ;;  %15677 = vst [vmem:[#allocation59_spill] sm:$0xff] %v11890_v9 }
 0x321   :  { %2594 = vmatpush.bf16.msrb.mxu3 %v11869_v34  ;;  %3306 = vmatmul.bf16.vlgmr.msrb.gmra.mxu0 %v11622_v47  ;;  %v11901_v47 = vpop.f32.mrf.mxu3 }
 0x322   :  { %3362 = vmatpush.bf16.msra.mxu0 %v11275_v55  ;;  %3378 = vmatpush.bf16.msra.mxu1 %v11245_v13  ;;  %15680 = vst [vmem:[#allocation62_spill] sm:$0xff] %v11901_v47 }
 0x323   :  { %3322 = vmatmul.bf16.vlgmr.msrb.gmra.mxu1 %v11632_v49  ;;  %v11898_v49 = vld [vmem:[%s15296_s4 + $0x3d8] sm:$0xff] }
 0x324   :  { %2504 = vmatpush.bf16.msrb.mxu2 %v11642_v28  ;;  %v11893_v13 = vpop.f32.mrf.mxu2  ;;  %15679 = vst [vmem:[#allocation61_spill] sm:$0xff] %v11898_v49 }
 0x325   :  { %2595 = vmatpush.bf16.msrb.mxu3 %v11882_v15  ;;  %15678 = vst [vmem:[#allocation60_spill] sm:$0xff] %v11893_v13  ;;  %v2448_v13 = vunpack.c.l.b16 %v2426_v12  ;;  %v7753_v12 = vld [vmem:[#allocation2 + $0x28] sm:$0x8] }
 0x326   :  { %3363 = vmatpush.bf16.msra.mxu0 %v11295_v8  ;;  %3379 = vmatpush.bf16.msra.mxu1 %v11256_v14  ;;  %v11908_v14 = vld [vmem:[%s15296_s4 + $0x3a0] sm:$0xff] }
 0x327   :  { %15681 = vst [vmem:[#allocation63_spill] sm:$0xff] %v11908_v14 }
 0x328   :  { %2505 = vmatpush.bf16.msrb.mxu2 %v11890_v9 }
 0x329   :  { %2596 = vmatpush.bf16.msrb.mxu3 %v11898_v49  ;;  %v1698_v22 = vpop.f32.mrf.mxu3 }
 0x32a   :  { %3364 = vmatpush.bf16.msra.mxu0 %v11312_v11  ;;  %3380 = vmatpush.bf16.msra.mxu1 %v11267_v40  ;;  %v9066_v40 = vld [vmem:[#allocation2 + $0x30] sm:$0xf0]  ;;  %v11942_v11 = vld [vmem:[%s15296_s4 + $0x3c0] sm:$0xff] }
 0x32b   :  { %v7790_v60 = vor.u32 %v9066_v40, %v7789_v39 }
 0x32c   :  { %2506 = vmatpush.bf16.msrb.mxu2 %v11908_v14  ;;  %v1609_v44 = vpop.f32.mrf.mxu2 }
 0x32d   :  { %2597 = vmatpush.bf16.msrb.mxu3 %v11914_v57  ;;  %v1614_v47 = vadd.f32 %v1609_v44, %v1525_v50  ;;  %v11949_v50 = vld [vmem:[%s15296_s4 + $0x38] sm:$0xff]  ;;  %v11952_v40 = vrot.slane %v7790_v60, 2  ;;  %v9057_v44 = vld [vmem:[#allocation2 + $0x28] sm:$0xf0]  ;;  %v11966_v60 = vld [vmem:[%s15296_s4 + $0x30] sm:$0xff] }
 0x32e   :  { %3365 = vmatpush.bf16.msra.mxu0 %v11330_v29  ;;  %3381 = vmatpush.bf16.msra.mxu1 %v11285_v25  ;;  %v11936_v29 = vld [vmem:[%s15296_s4 + $0x390] sm:$0xff]  ;;  %15685 = vst [vmem:[#allocation67_spill] sm:$0xff] %v11949_v50 }
 0x32f   :  { %15684 = vst [vmem:[#allocation66_spill] sm:$0xff] %v11936_v29  ;;  %v1703_v39 = vadd.f32 %v1698_v22, %v1614_v47  ;;  %v11958_v22 = vld [vmem:[%s15296_s4 + $0x388] sm:$0xff]  ;;  %v7754_v47 = vor.u32 %v9057_v44, %v7753_v12  ;;  %v11979_v12 = vld [vmem:[%s15296_s4 + $0x78] sm:$0xff] }
 0x330   :  { %2507 = vmatpush.bf16.msrb.mxu2 %v11922_v7  ;;  %15686 = vst [vmem:[#allocation68_spill] sm:$0xff] %v11958_v22 }
 0x331   :  { %2598 = vmatpush.bf16.msrb.mxu3 %v11928_v36  ;;  %15687 = vst [vmem:[#allocation69_spill] sm:$0xff] %v11966_v60  ;;  %v2451_v44 = vrot.slane %v7754_v47, 3  ;;  %v12000_v47 = vld [vmem:[%s15296_s4 + $0x70] sm:$0xff] }
 0x332   :  { %3366 = vmatpush.bf16.msra.mxu0 %v11350_v46  ;;  %3382 = vmatpush.bf16.msra.mxu1 %v11306_v38  ;;  %v2450_v46 = vpack.c.b16 %v2448_v13, %v2448_v13  ;;  %15688 = vst [vmem:[#allocation70_spill] sm:$0xff] %v11979_v12 }
 0x333   :  { %15690 = vst [vmem:[#allocation72_spill] sm:$0xff] %v12000_v47 }
 0x334   :  { %2508 = vmatpush.bf16.msrb.mxu2 %v11936_v29  ;;  %v2452_v13 = vrot.slane %v2450_v46, 3  ;;  %v11986_v46 = vld [vmem:[%s15296_s4 + $0x28] sm:$0xff] }
 0x335   :  { %2599 = vmatpush.bf16.msrb.mxu3 %v11942_v11  ;;  %15689 = vst [vmem:[#allocation71_spill] sm:$0xff] %v11986_v46 }
 0x336   :  { %3367 = vmatpush.bf16.msra.mxu0 %v11369_v51  ;;  %3383 = vmatpush.bf16.msra.mxu1 %v11324_v52 }
 0x338   :  { %2509 = vmatpush.bf16.msrb.mxu2 %v11958_v22  ;;  %2600 = vmatmul.bf16.vlgmr.msrb.gmra.mxu3 %v11952_v40 }
 0x339   :  { %2622 = vmatpush.bf16.msra.mxu3 %v11949_v50  ;;  %v11973_v50 = vld [vmem:[%s15296_s4 + $0x380] sm:$0xff] }
 0x33a   :  { %3368 = vmatpush.bf16.msra.mxu0 %v11389_v33  ;;  %3384 = vmatpush.bf16.msra.mxu1 %v11344_v4 }
 0x33c   :  { %2510 = vmatpush.bf16.msrb.mxu2 %v11973_v50 }
 0x33d   :  { %2623 = vmatpush.bf16.msra.mxu3 %v11966_v60  ;;  %v11992_v60 = vsel %vm1218_vm4, %v2451_v44, %v2452_v13  ;;  %v12007_v13 = vld [vmem:[%s15296_s4 + $0x20] sm:$0xff]  ;;  %v12024_v44 = vpop.f32.mrf.mxu2 }
 0x33e   :  { %3369 = vmatpush.bf16.msra.mxu0 %v11413_v21  ;;  %3385 = vmatpush.bf16.msra.mxu1 %v11363_v54  ;;  %15691 = vst [vmem:[#allocation73_spill] sm:$0xff] %v12007_v13 }
 0x33f   :  { %2511 = vmatmul.bf16.vlgmr.msrb.gmra.mxu2 %v11992_v60  ;;  %15694 = vst [vmem:[#allocation76_spill] sm:$0xff] %v12024_v44  ;;  %v12053_v44 = vld [vmem:[%s15296_s4 + $0x8] sm:$0xff] }
 0x340   :  { %2608 = vmatpush.bf16.msra.mxu2 %v11979_v12  ;;  %15699 = vst [vmem:[#allocation81_spill] sm:$0xff] %v12053_v44  ;;  %v3474_v12 = vld [vmem:[#allocation2 + $0x7c] sm:$0x3] }
 0x341   :  { %2624 = vmatpush.bf16.msra.mxu3 %v11986_v46  ;;  %3370 = vmatmul.bf16.vlgmr.msra.gmra.mxu0 %v11727_v19  ;;  %v12015_v19 = vld [vmem:[%s15296_s4 + $0x68] sm:$0xff]  ;;  %v12061_v46 = vld [vmem:[%s15296_s4 + $0x50] sm:$0xff] }
 0x342   :  { %3458 = vmatpush.bf16.msrb.mxu0 %v11443_v32  ;;  %3479 = vmatpush.bf16.msrb.mxu1 %v11450_v35  ;;  %15692 = vst [vmem:[#allocation74_spill] sm:$0xff] %v12015_v19 }
 0x343   :  { %3386 = vmatmul.bf16.vlgmr.msra.gmra.mxu1 %v11729_v23  ;;  %v12021_v23 = vld [vmem:[%s15296_s4 + $0x18] sm:$0xff]  ;;  %15700 = vst [vmem:[#allocation82_spill] sm:$0xff] %v12061_v46 }
 0x344   :  { %2609 = vmatpush.bf16.msra.mxu2 %v12000_v47  ;;  %15693 = vst [vmem:[#allocation75_spill] sm:$0xff] %v12021_v23  ;;  %v12033_v47 = vld [vmem:[%s15296_s4 + $0x60] sm:$0xff] }
 0x345   :  { %2625 = vmatpush.bf16.msra.mxu3 %v12007_v13  ;;  %v12028_v13 = vpop.f32.mrf.mxu3  ;;  %15696 = vst [vmem:[#allocation78_spill] sm:$0xff] %v12033_v47 }
 0x346   :  { %3459 = vmatpush.bf16.msrb.mxu0 %v11470_v18  ;;  %3480 = vmatpush.bf16.msrb.mxu1 %v11476_v56  ;;  %15695 = vst [vmem:[#allocation77_spill] sm:$0xff] %v12028_v13  ;;  %v12047_v13 = vld [vmem:[%s15296_s4 + $0x58] sm:$0xff] }
 0x347   :  { %15698 = vst [vmem:[#allocation80_spill] sm:$0xff] %v12047_v13 }
 0x348   :  { %2610 = vmatpush.bf16.msra.mxu2 %v12015_v19  ;;  %v12039_v19 = vld [vmem:[%s15296_s4 + $0x10] sm:$0xff] }
 0x349   :  { %2626 = vmatpush.bf16.msra.mxu3 %v12021_v23  ;;  %15697 = vst [vmem:[#allocation79_spill] sm:$0xff] %v12039_v19 }
 0x34a   :  { %3460 = vmatpush.bf16.msrb.mxu0 %v11496_v42  ;;  %3481 = vmatpush.bf16.msrb.mxu1 %v11502_v17 }
 0x34c   :  { %2611 = vmatpush.bf16.msra.mxu2 %v12033_v47 }
 0x34d   :  { %2627 = vmatpush.bf16.msra.mxu3 %v12039_v19  ;;  %v1793_v19 = vpop.f32.mrf.mxu2  ;;  %v1882_v23 = vpop.f32.mrf.mxu3 }
 0x34e   :  { %3461 = vmatpush.bf16.msrb.mxu0 %v11521_v27  ;;  %3482 = vmatpush.bf16.msrb.mxu1 %v11527_v26  ;;  %v1798_v47 = vadd.f32 %v1793_v19, %v1703_v39  ;;  %v12076_v39 = vld [vmem:[%s15296_s4 + $0x48] sm:$0xff]  ;;  %v7877_v19 = vld [vmem:[#allocation2 + $0x70] sm:$0xe] }
 0x34f   :  { %15702 = vst [vmem:[#allocation84_spill] sm:$0xff] %v12076_v39 }
 0x350   :  { %2612 = vmatpush.bf16.msra.mxu2 %v12047_v13  ;;  %v12067_v13 = vld [vmem:[%s15296_s4] sm:$0xff] }
 0x351   :  { %2628 = vmatpush.bf16.msra.mxu3 %v12053_v44  ;;  %15701 = vst [vmem:[#allocation83_spill] sm:$0xff] %v12067_v13  ;;  %v1887_v44 = vadd.f32 %v1882_v23, %v1798_v47  ;;  %v12086_v23 = vld [vmem:[%s15296_s4 + $0x40] sm:$0xff] }
 0x352   :  { %3462 = vmatpush.bf16.msrb.mxu0 %v11547_v58  ;;  %3483 = vmatpush.bf16.msrb.mxu1 %v11553_v45  ;;  %15703 = vst [vmem:[#allocation85_spill] sm:$0xff] %v12086_v23 }
 0x354   :  { %2613 = vmatpush.bf16.msra.mxu2 %v12061_v46  ;;  %v9088_v46 = vld [vmem:[#allocation2 + $0x70] sm:$0x70] }
 0x355   :  { %2629 = vmatpush.bf16.msra.mxu3 %v12067_v13  ;;  %v7878_v47 = vor.u32 %v9088_v46, %v7877_v19  ;;  %v15704_v46 = vunpack.c.l.b16 %v11317_v53  ;;  %v12110_v53 = vpop.f32.mrf.mxu2 }
 0x356   :  { %3463 = vmatpush.bf16.msrb.mxu0 %v11566_v61  ;;  %3484 = vmatpush.bf16.msrb.mxu1 %v11573_v24 }
 0x358   :  { %2614 = vmatpush.bf16.msra.mxu2 %v12076_v39  ;;  %2630 = vmatmul.bf16.vlgmr.msra.gmra.mxu3 %v11607_v48  ;;  %v3476_v39 = vunpack.c.l.b16 %v3474_v12  ;;  %v12094_v48 = vrot.slane %v7878_v47, 1  ;;  %v15705_v12 = vld [vmem:[#allocation45_spill] sm:$0xff]  ;;  %v15709_v47 = vld [vmem:[#allocation51_spill] sm:$0xff] }
 0x359   :  { %2652 = vmatpush.bf16.msrb.mxu3 %v11723_v1  ;;  %15706 = vst [vmem:[#allocation45_spill] sm:$0xff] %v12110_v53  ;;  %v3547_v53 = vld [vmem:[#allocation2 + $0x84] sm:$0x1] }
 0x35a   :  { %3464 = vmatpush.bf16.msrb.mxu0 %v11589_v31  ;;  %3485 = vmatpush.bf16.msrb.mxu1 %v11596_v2  ;;  %v12099_v19 = vpack.c.b16 %v3476_v39, %v15704_v46  ;;  %v15708_v39 = vld [vmem:[#allocation48_spill] sm:$0xff]  ;;  %v12124_v46 = vld [vmem:[%s15296_s4 + $0xc8] sm:$0xff] }
 0x35c   :  { %2615 = vmatpush.bf16.msra.mxu2 %v12086_v23 }
 0x35d   :  { %2653 = vmatpush.bf16.msrb.mxu3 %v11755_v37 }
 0x35e   :  { %3465 = vmatpush.bf16.msrb.mxu0 %v11604_v16  ;;  %3486 = vmatpush.bf16.msrb.mxu1 %v11613_v0 }
 0x35f   :  { %2616 = vmatmul.bf16.vlgmr.msra.gmra.mxu2 %v11577_v63  ;;  %v12114_v63 = vpop.f32.mrf.mxu3 }
 0x360   :  { %2636 = vmatpush.bf16.msrb.mxu2 %v11717_v30  ;;  %15707 = vst [vmem:[#allocation86_spill] sm:$0xff] %v12114_v63 }
 0x361   :  { %2654 = vmatpush.bf16.msrb.mxu3 %v11779_v3  ;;  %3466 = vmatmul.bf16.vlgmr.msrb.gmra.mxu0 %v12094_v48 }
 0x362   :  { %3560 = vmatpush.bf16.msra.mxu0 %v11619_v6  ;;  %3585 = vmatpush.bf16.msra.mxu1 %v11627_v62  ;;  %v1970_v63 = vpop.f32.mrf.mxu2 }
 0x363   :  { %3487 = vmatmul.bf16.vlgmr.msrb.gmra.mxu1 %v12099_v19  ;;  %v1975_v23 = vadd.f32 %v1970_v63, %v1887_v44  ;;  %v12147_v44 = vld [vmem:[%s15296_s4 + $0x178] sm:$0xff]  ;;  %v9091_v63 = vld [vmem:[#allocation2 + $0x7c] sm:$0xf0] }
 0x364   :  { %2637 = vmatpush.bf16.msrb.mxu2 %v11749_v41  ;;  %15710 = vst [vmem:[#allocation48_spill] sm:$0xff] %v12147_v44 }
 0x365   :  { %2655 = vmatpush.bf16.msrb.mxu3 %v11803_v5 }
 0x366   :  { %3561 = vmatpush.bf16.msra.mxu0 %v11642_v28  ;;  %3586 = vmatpush.bf16.msra.mxu1 %v11648_v43  ;;  %v12169_v43 = vld [vmem:[%s15296_s4 + $0x80] sm:$0xff] }
 0x367   :  { %v2065_v13 = vpop.f32.mrf.mxu3 }
 0x368   :  { %2638 = vmatpush.bf16.msrb.mxu2 %v15705_v12 }
 0x369   :  { %2656 = vmatpush.bf16.msrb.mxu3 %v11827_v20 }
 0x36a   :  { %3562 = vmatpush.bf16.msra.mxu0 %v11890_v9  ;;  %3587 = vmatpush.bf16.msra.mxu1 %v11869_v34  ;;  %v12138_v34 = vld [vmem:[%s15296_s4 + $0xc0] sm:$0xff]  ;;  %v9092_v9 = vld [vmem:[#allocation2 + $0x84] sm:$0xf0] }
 0x36c   :  { %2639 = vmatpush.bf16.msrb.mxu2 %v15708_v39 }
 0x36d   :  { %2657 = vmatpush.bf16.msrb.mxu3 %v11848_v59 }
 0x36e   :  { %3563 = vmatpush.bf16.msra.mxu0 %v11908_v14  ;;  %3588 = vmatpush.bf16.msra.mxu1 %v11882_v15  ;;  %v12132_v15 = vld [vmem:[%s15296_s4 + $0x90] sm:$0xff]  ;;  %v3553_v14 = vunpack.c.l.b16 %v3547_v53  ;;  %v7889_v53 = vld [vmem:[#allocation2 + $0x7c] sm:$0x8] }
 0x370   :  { %2640 = vmatpush.bf16.msrb.mxu2 %v15709_v47 }
 0x371   :  { %2658 = vmatpush.bf16.msrb.mxu3 %v12124_v46 }
 0x372   :  { %3564 = vmatpush.bf16.msra.mxu0 %v11922_v7  ;;  %3589 = vmatpush.bf16.msra.mxu1 %v11898_v49  ;;  %v12141_v7 = vadd.f32 %v2065_v13, %v1975_v23  ;;  %v12154_v49 = vld [vmem:[%s15296_s4 + $0x88] sm:$0xff]  ;;  %v3555_v23 = vpack.c.b16 %v3553_v14, %v3553_v14 }
 0x373   :  { %v15711_v13 = vld [vmem:[#allocation10_spill] sm:$0xff] }
 0x374   :  { %2641 = vmatpush.bf16.msrb.mxu2 %v12132_v15  ;;  %v3557_v14 = vrot.slane %v3555_v23, 3  ;;  %v15713_v23 = vld [vmem:[#allocation39_spill] sm:$0xff] }
 0x375   :  { %2659 = vmatpush.bf16.msrb.mxu3 %v12138_v34 }
 0x376   :  { %3565 = vmatpush.bf16.msra.mxu0 %v11936_v29  ;;  %3590 = vmatpush.bf16.msra.mxu1 %v11914_v57  ;;  %v7893_v29 = vld [vmem:[#allocation2 + $0x84] sm:$0xc]  ;;  %v7890_v57 = vor.u32 %v9091_v63, %v7889_v53  ;;  %v12182_v63 = vld [vmem:[%s15296_s4 + $0x168] sm:$0xff] }
 0x377   :  { %15712 = vst [vmem:[#allocation51_spill] sm:$0xff] %v12182_v63 }
 0x378   :  { %2642 = vmatpush.bf16.msrb.mxu2 %v12154_v49  ;;  %2660 = vmatmul.bf16.vlgmr.msrb.gmra.mxu3 %v15711_v13  ;;  %v7894_v13 = vor.u32 %v9092_v9, %v7893_v29  ;;  %v3556_v53 = vrot.slane %v7890_v57, 3  ;;  %v12198_v57 = vld [vmem:[%s15296_s4 + $0x130] sm:$0xff] }
 0x379   :  { %2684 = vmatpush.bf16.msra.mxu3 %v12147_v44  ;;  %v12162_v44 = vld [vmem:[%s15296_s4 + $0x170] sm:$0xff]  ;;  %15714 = vst [vmem:[#allocation10_spill] sm:$0xff] %v12198_v57 }
 0x37a   :  { %3566 = vmatpush.bf16.msra.mxu0 %v11958_v22  ;;  %3591 = vmatpush.bf16.msra.mxu1 %v11928_v36  ;;  %v12175_v22 = vld [vmem:[%s15296_s4 + $0x138] sm:$0xff]  ;;  %v12189_v29 = vsel %vm1218_vm4, %v3556_v53, %v3557_v14  ;;  %v12191_v9 = vrot.slane %v7894_v13, 2  ;;  %v12205_v14 = vld [vmem:[%s15296_s4 + $0x160] sm:$0xff]  ;;  %v12213_v13 = vld [vmem:[%s15296_s4 + $0x128] sm:$0xff] }
 0x37b   :  { %15715 = vst [vmem:[#allocation39_spill] sm:$0xff] %v12205_v14  ;;  %v12219_v53 = vld [vmem:[%s15296_s4 + $0x158] sm:$0xff] }
 0x37c   :  { %2643 = vmatpush.bf16.msrb.mxu2 %v12169_v43  ;;  %15716 = vst [vmem:[#allocation87_spill] sm:$0xff] %v12213_v13 }
 0x37d   :  { %2685 = vmatpush.bf16.msra.mxu3 %v12162_v44  ;;  %15717 = vst [vmem:[#allocation88_spill] sm:$0xff] %v12219_v53 }
 0x37e   :  { %3567 = vmatpush.bf16.msra.mxu0 %v11973_v50  ;;  %3592 = vmatpush.bf16.msra.mxu1 %v11942_v11 }
 0x37f   :  { %2644 = vmatmul.bf16.vlgmr.msrb.gmra.mxu2 %v15713_v23  ;;  %v12222_v23 = vpop.f32.mrf.mxu2 }
 0x380   :  { %2668 = vmatpush.bf16.msra.mxu2 %v12175_v22  ;;  %15718 = vst [vmem:[#allocation89_spill] sm:$0xff] %v12222_v23  ;;  %v12251_v23 = vld [vmem:[%s15296_s4 + $0x148] sm:$0xff] }
 0x381   :  { %2686 = vmatpush.bf16.msra.mxu3 %v12182_v63  ;;  %3568 = vmatmul.bf16.vlgmr.msra.gmra.mxu0 %v12189_v29  ;;  %15723 = vst [vmem:[#allocation94_spill] sm:$0xff] %v12251_v23  ;;  %v12260_v63 = vld [vmem:[%s15296_s4 + $0x110] sm:$0xff] }
 0x382   :  { %3629 = vmatpush.bf16.msrb.mxu0 %v11717_v30  ;;  %3645 = vmatpush.bf16.msrb.mxu1 %v11723_v1 }
 0x383   :  { %3593 = vmatmul.bf16.vlgmr.msra.gmra.mxu1 %v12191_v9 }
 0x384   :  { %2669 = vmatpush.bf16.msra.mxu2 %v12198_v57  ;;  %v12231_v57 = vld [vmem:[%s15296_s4 + $0x120] sm:$0xff] }
 0x385   :  { %2687 = vmatpush.bf16.msra.mxu3 %v12205_v14  ;;  %v12226_v14 = vpop.f32.mrf.mxu3  ;;  %15720 = vst [vmem:[#allocation91_spill] sm:$0xff] %v12231_v57 }
 0x386   :  { %3630 = vmatpush.bf16.msrb.mxu0 %v11749_v41  ;;  %3646 = vmatpush.bf16.msrb.mxu1 %v11755_v37  ;;  %15719 = vst [vmem:[#allocation90_spill] sm:$0xff] %v12226_v14  ;;  %v12245_v14 = vld [vmem:[%s15296_s4 + $0x118] sm:$0xff] }
 0x387   :  { %15722 = vst [vmem:[#allocation93_spill] sm:$0xff] %v12245_v14 }
 0x388   :  { %2670 = vmatpush.bf16.msra.mxu2 %v12213_v13  ;;  %v12237_v13 = vld [vmem:[%s15296_s4 + $0x150] sm:$0xff] }
 0x389   :  { %2688 = vmatpush.bf16.msra.mxu3 %v12219_v53  ;;  %15721 = vst [vmem:[#allocation92_spill] sm:$0xff] %v12237_v13 }
 0x38a   :  { %3631 = vmatpush.bf16.msrb.mxu0 %v15705_v12  ;;  %3647 = vmatpush.bf16.msrb.mxu1 %v11779_v3 }
 0x38c   :  { %2671 = vmatpush.bf16.msra.mxu2 %v12231_v57 }
 0x38d   :  { %2689 = vmatpush.bf16.msra.mxu3 %v12237_v13  ;;  %v2154_v13 = vpop.f32.mrf.mxu2  ;;  %v2239_v53 = vpop.f32.mrf.mxu3 }
 0x38e   :  { %3632 = vmatpush.bf16.msrb.mxu0 %v15708_v39  ;;  %3648 = vmatpush.bf16.msrb.mxu1 %v11803_v5  ;;  %v2159_v57 = vadd.f32 %v2154_v13, %v12141_v7  ;;  %v12273_v7 = vld [vmem:[%s15296_s4 + $0x1f8] sm:$0xff]  ;;  %v12280_v13 = vld [vmem:[%s15296_s4 + $0x108] sm:$0xff] }
 0x38f   :  { %15725 = vst [vmem:[#allocation96_spill] sm:$0xff] %v12280_v13 }
 0x390   :  { %2672 = vmatpush.bf16.msra.mxu2 %v12245_v14  ;;  %v12266_v14 = vld [vmem:[%s15296_s4 + $0x140] sm:$0xff] }
 0x391   :  { %2690 = vmatpush.bf16.msra.mxu3 %v12251_v23  ;;  %15724 = vst [vmem:[#allocation95_spill] sm:$0xff] %v12266_v14  ;;  %v2244_v23 = vadd.f32 %v2239_v53, %v2159_v57  ;;  %v12288_v57 = vld [vmem:[%s15296_s4 + $0x1f0] sm:$0xff]  ;;  %v12295_v53 = vld [vmem:[%s15296_s4 + $0x100] sm:$0xff] }
 0x392   :  { %3633 = vmatpush.bf16.msrb.mxu0 %v15709_v47  ;;  %3649 = vmatpush.bf16.msrb.mxu1 %v11827_v20 }
 0x394   :  { %2673 = vmatpush.bf16.msra.mxu2 %v12260_v63 }
 0x395   :  { %2691 = vmatpush.bf16.msra.mxu3 %v12266_v14  ;;  %v15726_v14 = vld [vmem:[#allocation55_spill] sm:$0xff] }
 0x396   :  { %3634 = vmatpush.bf16.msrb.mxu0 %v12132_v15  ;;  %3650 = vmatpush.bf16.msrb.mxu1 %v11848_v59  ;;  %15727 = vst [vmem:[#allocation55_spill] sm:$0xff] %v12295_v53 }
 0x398   :  { %2674 = vmatpush.bf16.msra.mxu2 %v12280_v13  ;;  %2692 = vmatmul.bf16.vlgmr.msra.gmra.mxu3 %v15726_v14  ;;  %v12303_v14 = vld [vmem:[%s15296_s4 + $0x1e8] sm:$0xff]  ;;  %v12310_v13 = vld [vmem:[%s15296_s4 + $0x1b8] sm:$0xff] }
 0x399   :  { %2716 = vmatpush.bf16.msrb.mxu3 %v12273_v7 }
 0x39a   :  { %3635 = vmatpush.bf16.msrb.mxu0 %v12154_v49  ;;  %3651 = vmatpush.bf16.msrb.mxu1 %v12124_v46 }
 0x39c   :  { %2675 = vmatpush.bf16.msra.mxu2 %v12295_v53  ;;  %v12323_v53 = vpop.f32.mrf.mxu2 }
 0x39d   :  { %2717 = vmatpush.bf16.msrb.mxu3 %v12288_v57 }
 0x39e   :  { %3636 = vmatpush.bf16.msrb.mxu0 %v12169_v43  ;;  %3652 = vmatpush.bf16.msrb.mxu1 %v12138_v34 }
 0x39f   :  { %2676 = vmatmul.bf16.vlgmr.msra.gmra.mxu2 %v11864_v10  ;;  %v12327_v10 = vpop.f32.mrf.mxu3 }
 0x3a0   :  { %2700 = vmatpush.bf16.msrb.mxu2 %v11275_v55  ;;  %v15728_v55 = vld [vmem:[#allocation6_spill] sm:$0xff]  ;;  %15730 = vst [vmem:[#allocation97_spill] sm:$0xff] %v12327_v10 }
 0x3a1   :  { %2718 = vmatpush.bf16.msrb.mxu3 %v12303_v14  ;;  %3637 = vmatmul.bf16.vlgmr.msrb.gmra.mxu0 %v12094_v48  ;;  %15729 = vst [vmem:[#allocation6_spill] sm:$0xff] %v12323_v53  ;;  %v15731_v48 = vld [vmem:[#allocation12_spill] sm:$0xff]  ;;  %v15733_v53 = vld [vmem:[#allocation15_spill] sm:$0xff] }
 0x3a2   :  { %3693 = vmatpush.bf16.msra.mxu0 %v12310_v13  ;;  %3709 = vmatpush.bf16.msra.mxu1 %v12273_v7 }
 0x3a3   :  { %3653 = vmatmul.bf16.vlgmr.msrb.gmra.mxu1 %v12099_v19  ;;  %v12344_v19 = vld [vmem:[%s15296_s4 + $0x1d8] sm:$0xff] }
 0x3a4   :  { %2701 = vmatpush.bf16.msrb.mxu2 %v11295_v8 }
 0x3a5   :  { %2719 = vmatpush.bf16.msrb.mxu3 %v11285_v25  ;;  %v12335_v25 = vld [vmem:[%s15296_s4 + $0x1e0] sm:$0xff] }
 0x3a6   :  { %3694 = vmatpush.bf16.msra.mxu0 %v11295_v8  ;;  %3710 = vmatpush.bf16.msra.mxu1 %v12288_v57  ;;  %v15732_v8 = vld [vmem:[#allocation11_spill] sm:$0xff] }
 0x3a8   :  { %2702 = vmatpush.bf16.msrb.mxu2 %v15728_v55 }
 0x3a9   :  { %2720 = vmatpush.bf16.msrb.mxu3 %v11306_v38  ;;  %v2328_v38 = vpop.f32.mrf.mxu2 }
 0x3aa   :  { %3695 = vmatpush.bf16.msra.mxu0 %v15728_v55  ;;  %3711 = vmatpush.bf16.msra.mxu1 %v12303_v14  ;;  %v2333_v55 = vadd.f32 %v2328_v38, %v2244_v23  ;;  %v15735_v23 = vld [vmem:[#allocation23_spill] sm:$0xff]  ;;  %v15749_v38 = vld [vmem:[#allocation36_spill] sm:$0xff] }
 0x3ac   :  { %2703 = vmatpush.bf16.msrb.mxu2 %v15731_v48 }
 0x3ad   :  { %2721 = vmatpush.bf16.msrb.mxu3 %v11324_v52 }
 0x3ae   :  { %3696 = vmatpush.bf16.msra.mxu0 %v15731_v48  ;;  %3712 = vmatpush.bf16.msra.mxu1 %v12335_v25  ;;  %v2417_v48 = vpop.f32.mrf.mxu3 }
 0x3af   :  { %v2422_v10 = vadd.f32 %v2417_v48, %v2333_v55  ;;  %v9094_v55 = vld [vmem:[#allocation2 + $0x8c] sm:$0x70]  ;;  %v3805_v48 = vld [vmem:[#allocation2 + $0x98] sm:$0x3] }
 0x3b0   :  { %2704 = vmatpush.bf16.msrb.mxu2 %v15732_v8 }
 0x3b1   :  { %2722 = vmatpush.bf16.msrb.mxu3 %v11344_v4 }
 0x3b2   :  { %3697 = vmatpush.bf16.msra.mxu0 %v15732_v8  ;;  %3713 = vmatpush.bf16.msra.mxu1 %v12344_v19  ;;  %v15734_v8 = vld [vmem:[#allocation21_spill] sm:$0xff] }
 0x3b4   :  { %2705 = vmatpush.bf16.msrb.mxu2 %v11369_v51 }
 0x3b5   :  { %2723 = vmatpush.bf16.msrb.mxu3 %v11363_v54 }
 0x3b6   :  { %3698 = vmatpush.bf16.msra.mxu0 %v11369_v51  ;;  %3714 = vmatpush.bf16.msra.mxu1 %v11324_v52  ;;  %v15736_v51 = vld [vmem:[#allocation24_spill] sm:$0xff]  ;;  %v15737_v52 = vld [vmem:[#allocation26_spill] sm:$0xff] }
 0x3b8   :  { %2706 = vmatpush.bf16.msrb.mxu2 %v11389_v33  ;;  %2724 = vmatmul.bf16.vlgmr.msrb.gmra.mxu3 %v11952_v40  ;;  %v15742_v40 = vld [vmem:[#allocation31_spill] sm:$0xff] }
 0x3b9   :  { %2771 = vmatpush.bf16.msra.mxu3 %v15733_v53  ;;  %v15747_v53 = vld [vmem:[#allocation35_spill] sm:$0xff] }
 0x3ba   :  { %3699 = vmatpush.bf16.msra.mxu0 %v11389_v33  ;;  %3715 = vmatpush.bf16.msra.mxu1 %v11344_v4  ;;  %v15738_v4 = vld [vmem:[#allocation27_spill] sm:$0xff]  ;;  %v15739_v33 = vld [vmem:[#allocation28_spill] sm:$0xff] }
 0x3bc   :  { %2707 = vmatpush.bf16.msrb.mxu2 %v11413_v21 }
 0x3bd   :  { %2772 = vmatpush.bf16.msra.mxu3 %v15734_v8  ;;  %v15751_v8 = vld [vmem:[#allocation13_spill] sm:$0xff] }
 0x3be   :  { %3700 = vmatpush.bf16.msra.mxu0 %v11413_v21  ;;  %3716 = vmatpush.bf16.msra.mxu1 %v11363_v54  ;;  %v15740_v54 = vld [vmem:[#allocation29_spill] sm:$0xff]  ;;  %v12373_v21 = vpop.f32.mrf.mxu2 }
 0x3bf   :  { %2708 = vmatmul.bf16.vlgmr.msrb.gmra.mxu2 %v11992_v60 }
 0x3c0   :  { %2740 = vmatpush.bf16.msra.mxu2 %v15735_v23  ;;  %v7825_v23 = vld [vmem:[#allocation2 + $0x38] sm:$0xf] }
 0x3c1   :  { %2773 = vmatpush.bf16.msra.mxu3 %v15736_v51  ;;  %3701 = vmatmul.bf16.vlgmr.msra.gmra.mxu0 %v12189_v29  ;;  %v15745_v29 = vld [vmem:[#allocation34_spill] sm:$0xff]  ;;  %v9075_v51 = vld [vmem:[#allocation2 + $0x38] sm:$0x30] }
 0x3c2   :  { %3789 = vmatpush.bf16.msrb.mxu0 %v11443_v32  ;;  %3810 = vmatpush.bf16.msrb.mxu1 %v11450_v35  ;;  %v12377_v32 = vpop.f32.mrf.mxu3  ;;  %v15741_v35 = vld [vmem:[#allocation30_spill] sm:$0xff] }
 0x3c3   :  { %3717 = vmatmul.bf16.vlgmr.msra.gmra.mxu1 %v12191_v9 }
 0x3c4   :  { %2741 = vmatpush.bf16.msra.mxu2 %v15737_v52  ;;  %v15752_v52 = vld [vmem:[#allocation37_spill] sm:$0xff] }
 0x3c5   :  { %2774 = vmatpush.bf16.msra.mxu3 %v15738_v4  ;;  %v15753_v4 = vld [vmem:[#allocation14_spill] sm:$0xff] }
 0x3c6   :  { %3790 = vmatpush.bf16.msrb.mxu0 %v11470_v18  ;;  %3811 = vmatpush.bf16.msrb.mxu1 %v11476_v56  ;;  %v15743_v18 = vld [vmem:[#allocation32_spill] sm:$0xff]  ;;  %v15744_v56 = vld [vmem:[#allocation33_spill] sm:$0xff]  ;;  %v2512_v60 = vpop.f32.mrf.mxu2 }
 0x3c8   :  { %2742 = vmatpush.bf16.msra.mxu2 %v15739_v33  ;;  %v12406_v33 = vor.u32 %v9075_v51, %v7825_v23  ;;  %v3878_v23 = vld [vmem:[#allocation2 + $0xa0] sm:$0x1] }
 0x3c9   :  { %2775 = vmatpush.bf16.msra.mxu3 %v15740_v54  ;;  %v15754_v54 = vld [vmem:[#allocation17_spill] sm:$0xff] }
 0x3ca   :  { %3791 = vmatpush.bf16.msrb.mxu0 %v11496_v42  ;;  %3812 = vmatpush.bf16.msrb.mxu1 %v11502_v17  ;;  %v2517_v42 = vadd.f32 %v2512_v60, %v2422_v10  ;;  %v2601_v17 = vpop.f32.mrf.mxu3  ;;  %v7901_v10 = vld [vmem:[#allocation2 + $0x8c] sm:$0xe] }
 0x3cb   :  { %v15761_v60 = vld [vmem:[#allocation42_spill] sm:$0xff] }
 0x3cc   :  { %2743 = vmatpush.bf16.msra.mxu2 %v15741_v35  ;;  %v12388_v9 = vadd.f32 %v2601_v17, %v2517_v42 }
 0x3cd   :  { %2776 = vmatpush.bf16.msra.mxu3 %v15742_v40 }
 0x3ce   :  { %3792 = vmatpush.bf16.msrb.mxu0 %v11521_v27  ;;  %3813 = vmatpush.bf16.msrb.mxu1 %v11527_v26  ;;  %15746 = vst [vmem:[#allocation12_spill] sm:$0xff] %v12388_v9  ;;  %v15748_v27 = vld [vmem:[#allocation9_spill] sm:$0xff]  ;;  %v12393_v26 = vpop.f32.mrf.mxu0  ;;  %v12433_v17 = vpop.f32.mrf.mxu2 }
 0x3d0   :  { %2744 = vmatpush.bf16.msra.mxu2 %v15743_v18 }
 0x3d1   :  { %2777 = vmatpush.bf16.msra.mxu3 %v15744_v56 }
 0x3d2   :  { %3793 = vmatpush.bf16.msrb.mxu0 %v11547_v58  ;;  %3814 = vmatpush.bf16.msrb.mxu1 %v11553_v45  ;;  %v12396_v58 = vpop.f32.mrf.mxu1  ;;  %v15750_v45 = vld [vmem:[#allocation8_spill] sm:$0xff]  ;;  %v12431_v42 = vpop.f32.mrf.mxu3 }
 0x3d4   :  { %2745 = vmatpush.bf16.msra.mxu2 %v15745_v29  ;;  %v15762_v29 = vld [vmem:[#allocation59_spill] sm:$0xff] }
 0x3d5   :  { %2778 = vmatpush.bf16.msra.mxu3 %v15747_v53  ;;  %v15763_v53 = vld [vmem:[#allocation57_spill] sm:$0xff] }
 0x3d6   :  { %3794 = vmatpush.bf16.msrb.mxu0 %v11566_v61  ;;  %3815 = vmatpush.bf16.msrb.mxu1 %v11573_v24  ;;  %v7902_v61 = vor.u32 %v9094_v55, %v7901_v10  ;;  %v3807_v24 = vunpack.c.l.b16 %v3805_v48  ;;  %v12419_v18 = vpop.f32.mrf.mxu0  ;;  %v15766_v10 = vld [vmem:[#allocation63_spill] sm:$0xff] }
 0x3d7   :  { %v7837_v55 = vld [vmem:[#allocation2 + $0x4c] sm:$0xe]  ;;  %v9078_v48 = vld [vmem:[#allocation2 + $0x4c] sm:$0x70] }
 0x3d8   :  { %2746 = vmatpush.bf16.msra.mxu2 %v15749_v38  ;;  %2779 = vmatmul.bf16.vlgmr.msra.gmra.mxu3 %v15750_v45  ;;  %v15765_v38 = vld [vmem:[#allocation44_spill] sm:$0xff] }
 0x3d9   :  { %2867 = vmatpush.bf16.msrb.mxu3 %v15748_v27  ;;  %v15764_v27 = vld [vmem:[#allocation43_spill] sm:$0xff] }
 0x3da   :  { %3795 = vmatpush.bf16.msrb.mxu0 %v11589_v31  ;;  %3816 = vmatpush.bf16.msrb.mxu1 %v11596_v2  ;;  %v12411_v31 = vrot.slane %v7902_v61, 1  ;;  %v15755_v2 = vld [vmem:[#allocation16_spill] sm:$0xff]  ;;  %v12423_v56 = vpop.f32.mrf.mxu1  ;;  %v15769_v61 = vld [vmem:[#allocation47_spill] sm:$0xff] }
 0x3db   :  { %v15756_v35 = vunpack.c.l.b16 %v15755_v2  ;;  %v2631_v51 = vpop.f32.mrf.mxu3 }
 0x3dc   :  { %2747 = vmatpush.bf16.msra.mxu2 %v15752_v52  ;;  %v15770_v52 = vld [vmem:[#allocation65_spill] sm:$0xff] }
 0x3dd   :  { %2868 = vmatpush.bf16.msrb.mxu3 %v15751_v8  ;;  %v12416_v40 = vpack.c.b16 %v3807_v24, %v15756_v35  ;;  %v15768_v8 = vld [vmem:[#allocation46_spill] sm:$0xff]  ;;  %v15772_v35 = vld [vmem:[#allocation49_spill] sm:$0xff] }
 0x3de   :  { %3796 = vmatpush.bf16.msrb.mxu0 %v11604_v16  ;;  %3817 = vmatpush.bf16.msrb.mxu1 %v11613_v0  ;;  %v15757_v16 = vld [vmem:[#allocation18_spill] sm:$0xff]  ;;  %v15758_v0 = vld [vmem:[#allocation40_spill] sm:$0xff] }
 0x3df   :  { %2748 = vmatmul.bf16.vlgmr.msra.gmra.mxu2 %v12406_v33 }
 0x3e0   :  { %2842 = vmatpush.bf16.msrb.mxu2 %v15753_v4  ;;  %v7838_v4 = vor.u32 %v9078_v48, %v7837_v55  ;;  %v15777_v48 = vld [vmem:[#allocation53_spill] sm:$0xff] }
 0x3e1   :  { %2869 = vmatpush.bf16.msrb.mxu3 %v15754_v54  ;;  %3797 = vmatmul.bf16.vlgmr.msrb.gmra.mxu0 %v12411_v31  ;;  %v15771_v54 = vld [vmem:[#allocation61_spill] sm:$0xff] }
 0x3e2   :  { %3891 = vmatpush.bf16.msra.mxu0 %v11619_v6  ;;  %3916 = vmatpush.bf16.msra.mxu1 %v11627_v62  ;;  %v15759_v6 = vld [vmem:[#allocation38_spill] sm:$0xff]  ;;  %v15760_v62 = vld [vmem:[#allocation41_spill] sm:$0xff]  ;;  %v2617_v24 = vpop.f32.mrf.mxu2  ;;  %v12454_v55 = vpop.f32.mrf.mxu1 }
 0x3e3   :  { %3818 = vmatmul.bf16.vlgmr.msrb.gmra.mxu1 %v12416_v40  ;;  %v2632_v2 = vadd.f32 %v2631_v51, %v2617_v24  ;;  %v15778_v51 = vld [vmem:[#allocation68_spill] sm:$0xff] }
 0x3e4   :  { %2843 = vmatpush.bf16.msrb.mxu2 %v15757_v16  ;;  %v3884_v16 = vunpack.c.l.b16 %v3878_v23  ;;  %v9098_v23 = vld [vmem:[#allocation2 + $0xa0] sm:$0xf0] }
 0x3e5   :  { %2870 = vmatpush.bf16.msrb.mxu3 %v15758_v0  ;;  %v15773_v0 = vld [vmem:[#allocation50_spill] sm:$0xff] }
 0x3e6   :  { %3892 = vmatpush.bf16.msra.mxu0 %v11642_v28  ;;  %3917 = vmatpush.bf16.msra.mxu1 %v15759_v6  ;;  %v15767_v28 = vld [vmem:[#allocation58_spill] sm:$0xff] }
 0x3e7   :  { %v15774_v6 = vld [vmem:[#allocation66_spill] sm:$0xff] }
 0x3e8   :  { %2844 = vmatpush.bf16.msrb.mxu2 %v15760_v62  ;;  %v15775_v62 = vld [vmem:[#allocation67_spill] sm:$0xff] }
 0x3e9   :  { %2871 = vmatpush.bf16.msrb.mxu3 %v15761_v60  ;;  %v12449_v60 = vrot.slane %v7838_v4, 1 }
 0x3ea   :  { %3893 = vmatpush.bf16.msra.mxu0 %v15762_v29  ;;  %3918 = vmatpush.bf16.msra.mxu1 %v15763_v53  ;;  %v7913_v29 = vld [vmem:[#allocation2 + $0x98] sm:$0x8]  ;;  %v12451_v53 = vpop.f32.mrf.mxu0 }
 0x3ec   :  { %2845 = vmatpush.bf16.msrb.mxu2 %v15764_v27  ;;  %v15776_v27 = vld [vmem:[#allocation64_spill] sm:$0xff] }
 0x3ed   :  { %2872 = vmatpush.bf16.msrb.mxu3 %v15765_v38  ;;  %v9097_v38 = vld [vmem:[#allocation2 + $0x98] sm:$0xf0] }
 0x3ee   :  { %3894 = vmatpush.bf16.msra.mxu0 %v15766_v10  ;;  %3919 = vmatpush.bf16.msra.mxu1 %v15767_v28  ;;  %v7833_v10 = vld [vmem:[#allocation2 + $0x44] sm:$0xc]  ;;  %v9077_v28 = vld [vmem:[#allocation2 + $0x44] sm:$0xf0]  ;;  %v7914_v24 = vor.u32 %v9097_v38, %v7913_v29 }
 0x3ef   :  { %v7834_v4 = vor.u32 %v9077_v28, %v7833_v10  ;;  %v12480_v10 = vpop.f32.mrf.mxu1  ;;  %v12488_v28 = vpop.f32.mrf.mxu2 }
 0x3f0   :  { %2846 = vmatpush.bf16.msrb.mxu2 %v15768_v8  ;;  %v3886_v8 = vpack.c.b16 %v3884_v16, %v3884_v16 }
 0x3f1   :  { %2873 = vmatpush.bf16.msrb.mxu3 %v15769_v61  ;;  %v7917_v61 = vld [vmem:[#allocation2 + $0xa0] sm:$0xc]  ;;  %v12464_v16 = vrot.slane %v7834_v4, 2 }
 0x3f2   :  { %3895 = vmatpush.bf16.msra.mxu0 %v15770_v52  ;;  %3920 = vmatpush.bf16.msra.mxu1 %v15771_v54  ;;  %v15779_v52 = vld [vmem:[#allocation69_spill] sm:$0xff]  ;;  %v15780_v54 = vld [vmem:[#allocation56_spill] sm:$0xff]  ;;  %v12476_v38 = vpop.f32.mrf.mxu0 }
 0x3f4   :  { %2847 = vmatpush.bf16.msrb.mxu2 %v15772_v35  ;;  %v3888_v35 = vrot.slane %v3886_v8, 3  ;;  %v15787_v8 = vld [vmem:[#allocation78_spill] sm:$0xff] }
 0x3f5   :  { %2874 = vmatpush.bf16.msrb.mxu3 %v15773_v0  ;;  %v7918_v0 = vor.u32 %v9098_v23, %v7917_v61  ;;  %v15788_v61 = vld [vmem:[#allocation79_spill] sm:$0xff] }
 0x3f6   :  { %3896 = vmatpush.bf16.msra.mxu0 %v15774_v6  ;;  %3921 = vmatpush.bf16.msra.mxu1 %v15776_v27  ;;  %v15781_v6 = vld [vmem:[#allocation70_spill] sm:$0xff]  ;;  %v15782_v27 = vld [vmem:[#allocation71_spill] sm:$0xff] }
 0x3f7   :  { %v12473_v29 = vrot.slane %v7918_v0, 2  ;;  %v12509_v4 = vpop.f32.mrf.mxu1 }
 0x3f8   :  { %2848 = vmatpush.bf16.msrb.mxu2 %v15777_v48  ;;  %2875 = vmatmul.bf16.vlgmr.msrb.gmra.mxu3 %v12449_v60  ;;  %v12492_v48 = vpop.f32.mrf.mxu3  ;;  %15795 = vst [vmem:[#allocation15_spill] sm:$0xff] %v12509_v4 }
 0x3f9   :  { %2953 = vmatpush.bf16.msra.mxu3 %v15775_v62  ;;  %v3887_v62 = vrot.slane %v7914_v24, 3 }
 0x3fa   :  { %3897 = vmatpush.bf16.msra.mxu0 %v15778_v51  ;;  %3922 = vmatpush.bf16.msra.mxu1 %v11928_v36  ;;  %v15791_v51 = vld [vmem:[#allocation82_spill] sm:$0xff] }
 0x3fb   :  { %v12471_v36 = vsel %vm1218_vm4, %v3887_v62, %v3888_v35  ;;  %v15808_v35 = vld [vmem:[#allocation94_spill] sm:$0xff] }
 0x3fc   :  { %2849 = vmatpush.bf16.msrb.mxu2 %v15780_v54  ;;  %v15807_v54 = vld [vmem:[#allocation93_spill] sm:$0xff] }
 0x3fd   :  { %2954 = vmatpush.bf16.msra.mxu3 %v15779_v52  ;;  %v15792_v52 = vld [vmem:[#allocation83_spill] sm:$0xff] }
 0x3fe   :  { %3898 = vmatpush.bf16.msra.mxu0 %v11973_v50  ;;  %3923 = vmatpush.bf16.msra.mxu1 %v11942_v11  ;;  %v15783_v50 = vld [vmem:[#allocation72_spill] sm:$0xff]  ;;  %v15784_v11 = vld [vmem:[#allocation73_spill] sm:$0xff] }
 0x3ff   :  { %2850 = vmatmul.bf16.vlgmr.msrb.gmra.mxu2 %v12464_v16 }
 0x400   :  { %2939 = vmatpush.bf16.msra.mxu2 %v15781_v6 }
 0x401   :  { %2955 = vmatpush.bf16.msra.mxu3 %v15782_v27  ;;  %3899 = vmatmul.bf16.vlgmr.msra.gmra.mxu0 %v12471_v36  ;;  %v15809_v27 = vld [vmem:[#allocation95_spill] sm:$0xff] }
 0x402   :  { %3960 = vmatpush.bf16.msrb.mxu0 %v11717_v30  ;;  %3976 = vmatpush.bf16.msrb.mxu1 %v11723_v1  ;;  %v15785_v30 = vld [vmem:[#allocation74_spill] sm:$0xff]  ;;  %v15786_v1 = vld [vmem:[#allocation75_spill] sm:$0xff]  ;;  %v2645_v23 = vpop.f32.mrf.mxu2 }
 0x403   :  { %3924 = vmatmul.bf16.vlgmr.msra.gmra.mxu1 %v12473_v29 }
 0x404   :  { %2940 = vmatpush.bf16.msra.mxu2 %v15783_v50 }
 0x405   :  { %2956 = vmatpush.bf16.msra.mxu3 %v15784_v11  ;;  %v12568_v11 = vld [vmem:[%s15296_s4 + $0x278] sm:$0xff] }
 0x406   :  { %3961 = vmatpush.bf16.msrb.mxu0 %v11749_v41  ;;  %3977 = vmatpush.bf16.msrb.mxu1 %v11755_v37  ;;  %v15789_v41 = vld [vmem:[#allocation80_spill] sm:$0xff]  ;;  %v15790_v37 = vld [vmem:[#allocation81_spill] sm:$0xff] }
 0x408   :  { %2941 = vmatpush.bf16.msra.mxu2 %v15785_v30  ;;  %v9589_v30 = vld [vmem:[%s15296_s4 + $0x1d0] sm:$0xff] }
 0x409   :  { %2957 = vmatpush.bf16.msra.mxu3 %v15786_v1 }
 0x40a   :  { %3962 = vmatpush.bf16.msrb.mxu0 %v15705_v12  ;;  %3978 = vmatpush.bf16.msrb.mxu1 %v11779_v3  ;;  %v2650_v3 = vadd.f32 %v2645_v23, %v2632_v2  ;;  %v2661_v12 = vpop.f32.mrf.mxu3  ;;  %v15806_v2 = vld [vmem:[#allocation92_spill] sm:$0xff]  ;;  %v15814_v23 = vld [vmem:[#allocation55_spill] sm:$0xff] }
 0x40c   :  { %2942 = vmatpush.bf16.msra.mxu2 %v15787_v8  ;;  %v2666_v24 = vadd.f32 %v2661_v12, %v2650_v3  ;;  %v15812_v8 = vld [vmem:[#allocation96_spill] sm:$0xff]  ;;  %v9594_v3 = vld [vmem:[%s15296_s4 + $0x180] sm:$0xff]  ;;  %v12605_v12 = vld [vmem:[%s15296_s4 + $0x268] sm:$0xff] }
 0x40d   :  { %2958 = vmatpush.bf16.msra.mxu3 %v15788_v61  ;;  %v9590_v61 = vld [vmem:[%s15296_s4 + $0x188] sm:$0xff]  ;;  %15815 = vst [vmem:[#allocation28_spill] sm:$0xff] %v12605_v12 }
 0x40e   :  { %3963 = vmatpush.bf16.msrb.mxu0 %v15708_v39  ;;  %3979 = vmatpush.bf16.msrb.mxu1 %v11803_v5  ;;  %v15793_v39 = vld [vmem:[#allocation48_spill] sm:$0xff]  ;;  %v12506_v5 = vpop.f32.mrf.mxu0 }
 0x40f   :  { %15794 = vst [vmem:[#allocation11_spill] sm:$0xff] %v12506_v5 }
 0x410   :  { %2943 = vmatpush.bf16.msra.mxu2 %v15789_v41  ;;  %v12586_v41 = vld [vmem:[%s15296_s4 + $0x270] sm:$0xff] }
 0x411   :  { %2959 = vmatpush.bf16.msra.mxu3 %v15790_v37  ;;  %15813 = vst [vmem:[#allocation27_spill] sm:$0xff] %v12586_v41  ;;  %v9592_v37 = vld [vmem:[%s15296_s4 + $0x1c8] sm:$0xff] }
 0x412   :  { %3964 = vmatpush.bf16.msrb.mxu0 %v15709_v47  ;;  %3980 = vmatpush.bf16.msrb.mxu1 %v11827_v20  ;;  %v15796_v47 = vld [vmem:[#allocation84_spill] sm:$0xff]  ;;  %v15797_v20 = vld [vmem:[#allocation85_spill] sm:$0xff] }
 0x414   :  { %2944 = vmatpush.bf16.msra.mxu2 %v15791_v51  ;;  %v9596_v51 = vld [vmem:[%s15296_s4 + $0x1c0] sm:$0xff] }
 0x415   :  { %2960 = vmatpush.bf16.msra.mxu3 %v15792_v52  ;;  %v9597_v52 = vld [vmem:[%s15296_s4 + $0x2b8] sm:$0xff] }
 0x416   :  { %3965 = vmatpush.bf16.msrb.mxu0 %v12132_v15  ;;  %3981 = vmatpush.bf16.msrb.mxu1 %v11848_v59  ;;  %v15798_v15 = vld [vmem:[#allocation51_spill] sm:$0xff]  ;;  %v12524_v59 = vpop.f32.mrf.mxu0 }
 0x417   :  { %15799 = vst [vmem:[#allocation21_spill] sm:$0xff] %v12524_v59  ;;  %v9621_v59 = vld [vmem:[%s15296_s4 + $0x288] sm:$0xff] }
 0x418   :  { %2945 = vmatpush.bf16.msra.mxu2 %v15796_v47  ;;  %2961 = vmatmul.bf16.vlgmr.msra.gmra.mxu3 %v12406_v33  ;;  %v9584_v33 = vld [vmem:[%s15296_s4 + $0x1a8] sm:$0xff] }
 0x419   :  { %3015 = vmatpush.bf16.msrb.mxu3 %v15793_v39 }
 0x41a   :  { %3966 = vmatpush.bf16.msrb.mxu0 %v12154_v49  ;;  %3982 = vmatpush.bf16.msrb.mxu1 %v12124_v46  ;;  %v15800_v49 = vld [vmem:[#allocation10_spill] sm:$0xff]  ;;  %v12528_v46 = vpop.f32.mrf.mxu1 }
 0x41b   :  { %15801 = vst [vmem:[#allocation23_spill] sm:$0xff] %v12528_v46  ;;  %v4136_v46 = vld [vmem:[#allocation2 + $0xb4] sm:$0x3] }
 0x41c   :  { %2946 = vmatpush.bf16.msra.mxu2 %v15797_v20  ;;  %v12624_v20 = vld [vmem:[%s15296_s4 + $0x230] sm:$0xff] }
 0x41d   :  { %3016 = vmatpush.bf16.msrb.mxu3 %v12162_v44  ;;  %15817 = vst [vmem:[#allocation30_spill] sm:$0xff] %v12624_v20 }
 0x41e   :  { %3967 = vmatpush.bf16.msrb.mxu0 %v12169_v43  ;;  %3983 = vmatpush.bf16.msrb.mxu1 %v12138_v34  ;;  %v15802_v43 = vld [vmem:[#allocation39_spill] sm:$0xff] }
 0x41f   :  { %2947 = vmatmul.bf16.vlgmr.msra.gmra.mxu2 %v15750_v45  ;;  %v9583_v34 = vld [vmem:[%s15296_s4 + $0x1b0] sm:$0xff]  ;;  %v12538_v45 = vpop.f32.mrf.mxu2 }
 0x420   :  { %2999 = vmatpush.bf16.msrb.mxu2 %v12175_v22 }
 0x421   :  { %3017 = vmatpush.bf16.msrb.mxu3 %v15798_v15  ;;  %3968 = vmatmul.bf16.vlgmr.msrb.gmra.mxu0 %v12411_v31  ;;  %v12544_v31 = vpop.f32.mrf.mxu3 }
 0x422   :  { %4024 = vmatpush.bf16.msra.mxu0 %v12310_v13  ;;  %4040 = vmatpush.bf16.msra.mxu1 %v12273_v7  ;;  %v15803_v7 = vld [vmem:[#allocation87_spill] sm:$0xff]  ;;  %v15804_v13 = vld [vmem:[#allocation88_spill] sm:$0xff]  ;;  %v12576_v1 = vpop.f32.mrf.mxu1 }
 0x423   :  { %3984 = vmatmul.bf16.vlgmr.msrb.gmra.mxu1 %v12416_v40  ;;  %v15805_v40 = vld [vmem:[#allocation91_spill] sm:$0xff]  ;;  %15811 = vst [vmem:[#allocation26_spill] sm:$0xff] %v12576_v1 }
 0x424   :  { %3000 = vmatpush.bf16.msrb.mxu2 %v15800_v49  ;;  %v7849_v1 = vld [vmem:[#allocation2 + $0x54] sm:$0xf] }
 0x425   :  { %3018 = vmatpush.bf16.msrb.mxu3 %v15802_v43 }
 0x426   :  { %4025 = vmatpush.bf16.msra.mxu0 %v9583_v34  ;;  %4041 = vmatpush.bf16.msra.mxu1 %v12288_v57  ;;  %v9585_v57 = vld [vmem:[%s15296_s4 + $0x1a0] sm:$0xff] }
 0x427   :  { %v2677_v0 = vpop.f32.mrf.mxu2 }
 0x428   :  { %3001 = vmatpush.bf16.msrb.mxu2 %v15803_v7  ;;  %v2682_v6 = vadd.f32 %v2677_v0, %v2666_v24  ;;  %v9598_v24 = vld [vmem:[%s15296_s4 + $0x2f8] sm:$0xff]  ;;  %v9605_v0 = vld [vmem:[%s15296_s4 + $0x2a8] sm:$0xff] }
 0x429   :  { %3019 = vmatpush.bf16.msrb.mxu3 %v15804_v13  ;;  %v2693_v62 = vpop.f32.mrf.mxu3 }
 0x42a   :  { %4026 = vmatpush.bf16.msra.mxu0 %v9584_v33  ;;  %4042 = vmatpush.bf16.msra.mxu1 %v12303_v14  ;;  %v9586_v14 = vld [vmem:[%s15296_s4 + $0x198] sm:$0xff]  ;;  %v12560_v50 = vadd.f32 %v2693_v62, %v2682_v6  ;;  %v12627_v34 = vpop.f32.mrf.mxu1  ;;  %v12633_v33 = vld [vmem:[%s15296_s4 + $0x260] sm:$0xff]  ;;  %v9606_v6 = vld [vmem:[%s15296_s4 + $0x2e8] sm:$0xff] }
 0x42b   :  { %15818 = vst [vmem:[#allocation31_spill] sm:$0xff] %v12627_v34  ;;  %v7925_v34 = vld [vmem:[#allocation2 + $0xa8] sm:$0xe] }
 0x42c   :  { %3002 = vmatpush.bf16.msrb.mxu2 %v15805_v40  ;;  %15819 = vst [vmem:[#allocation32_spill] sm:$0xff] %v12633_v33 }
 0x42d   :  { %3020 = vmatpush.bf16.msrb.mxu3 %v15806_v2 }
 0x42e   :  { %4027 = vmatpush.bf16.msra.mxu0 %v9585_v57  ;;  %4043 = vmatpush.bf16.msra.mxu1 %v12335_v25  ;;  %v9587_v25 = vld [vmem:[%s15296_s4 + $0x190] sm:$0xff]  ;;  %v12651_v57 = vld [vmem:[%s15296_s4 + $0x258] sm:$0xff] }
 0x430   :  { %3003 = vmatpush.bf16.msrb.mxu2 %v15807_v54 }
 0x431   :  { %3021 = vmatpush.bf16.msrb.mxu3 %v15808_v35  ;;  %v12662_v62 = vpop.f32.mrf.mxu3 }
 0x432   :  { %4028 = vmatpush.bf16.msra.mxu0 %v9586_v14  ;;  %4044 = vmatpush.bf16.msra.mxu1 %v12344_v19  ;;  %v12571_v19 = vpop.f32.mrf.mxu0  ;;  %v12654_v14 = vpop.f32.mrf.mxu2 }
 0x433   :  { %15810 = vst [vmem:[#allocation24_spill] sm:$0xff] %v12571_v19  ;;  %v9081_v19 = vld [vmem:[#allocation2 + $0x54] sm:$0x30] }
 0x434   :  { %3004 = vmatpush.bf16.msrb.mxu2 %v12260_v63 }
 0x435   :  { %3022 = vmatpush.bf16.msrb.mxu3 %v15809_v27 }
 0x436   :  { %4029 = vmatpush.bf16.msra.mxu0 %v9587_v25  ;;  %4045 = vmatpush.bf16.msra.mxu1 %v9589_v30  ;;  %v12667_v25 = vld [vmem:[%s15296_s4 + $0x220] sm:$0xff]  ;;  %v12673_v30 = vld [vmem:[%s15296_s4 + $0x250] sm:$0xff] }
 0x437   :  { %15821 = vst [vmem:[#allocation34_spill] sm:$0xff] %v12673_v30 }
 0x438   :  { %3005 = vmatpush.bf16.msrb.mxu2 %v15812_v8  ;;  %3023 = vmatmul.bf16.vlgmr.msrb.gmra.mxu3 %v12449_v60  ;;  %v12596_v60 = vld [vmem:[%s15296_s4 + $0x238] sm:$0xff] }
 0x439   :  { %3102 = vmatpush.bf16.msra.mxu3 %v12568_v11 }
 0x43a   :  { %4030 = vmatpush.bf16.msra.mxu0 %v9590_v61  ;;  %4046 = vmatpush.bf16.msra.mxu1 %v9592_v37  ;;  %v12618_v47 = vpop.f32.mrf.mxu0  ;;  %v9609_v61 = vld [vmem:[%s15296_s4 + $0x2a0] sm:$0xff] }
 0x43b   :  { %15816 = vst [vmem:[#allocation29_spill] sm:$0xff] %v12618_v47  ;;  %v9610_v37 = vld [vmem:[%s15296_s4 + $0x2e0] sm:$0xff]  ;;  %v9100_v47 = vld [vmem:[#allocation2 + $0xa8] sm:$0x70] }
 0x43c   :  { %3006 = vmatpush.bf16.msrb.mxu2 %v15814_v23 }
 0x43d   :  { %3103 = vmatpush.bf16.msra.mxu3 %v12586_v41 }
 0x43e   :  { %4031 = vmatpush.bf16.msra.mxu0 %v9594_v3  ;;  %4047 = vmatpush.bf16.msra.mxu1 %v9596_v51  ;;  %v12685_v3 = vld [vmem:[%s15296_s4 + $0x218] sm:$0xff]  ;;  %v12691_v51 = vld [vmem:[%s15296_s4 + $0x248] sm:$0xff] }
 0x43f   :  { %3007 = vmatmul.bf16.vlgmr.msrb.gmra.mxu2 %v12464_v16  ;;  %v9601_v16 = vld [vmem:[%s15296_s4 + $0x2b0] sm:$0xff]  ;;  %15822 = vst [vmem:[#allocation35_spill] sm:$0xff] %v12685_v3 }
 0x440   :  { %3071 = vmatpush.bf16.msra.mxu2 %v12596_v60  ;;  %15823 = vst [vmem:[#allocation9_spill] sm:$0xff] %v12691_v51 }
 0x441   :  { %3104 = vmatpush.bf16.msra.mxu3 %v12605_v12  ;;  %4032 = vmatmul.bf16.vlgmr.msra.gmra.mxu0 %v12471_v36  ;;  %v9602_v36 = vld [vmem:[%s15296_s4 + $0x2f0] sm:$0xff] }
 0x442   :  { %4120 = vmatpush.bf16.msrb.mxu0 %v9597_v52  ;;  %4141 = vmatpush.bf16.msrb.mxu1 %v9598_v24  ;;  %v9613_v52 = vld [vmem:[%s15296_s4 + $0x298] sm:$0xff]  ;;  %v2709_v24 = vpop.f32.mrf.mxu2 }
 0x443   :  { %4048 = vmatmul.bf16.vlgmr.msra.gmra.mxu1 %v12473_v29  ;;  %v12645_v29 = vld [vmem:[%s15296_s4 + $0x228] sm:$0xff] }
 0x444   :  { %3072 = vmatpush.bf16.msra.mxu2 %v12624_v20  ;;  %15820 = vst [vmem:[#allocation33_spill] sm:$0xff] %v12645_v29 }
 0x445   :  { %3105 = vmatpush.bf16.msra.mxu3 %v12633_v33 }
 0x446   :  { %4121 = vmatpush.bf16.msrb.mxu0 %v9601_v16  ;;  %4142 = vmatpush.bf16.msrb.mxu1 %v9602_v36  ;;  %v9614_v16 = vld [vmem:[%s15296_s4 + $0x2d8] sm:$0xff]  ;;  %v2714_v36 = vadd.f32 %v2709_v24, %v12560_v50  ;;  %v9617_v50 = vld [vmem:[%s15296_s4 + $0x290] sm:$0xff]  ;;  %v12724_v24 = vpop.f32.mrf.mxu0 }
 0x447   :  { %15827 = vst [vmem:[#allocation37_spill] sm:$0xff] %v12724_v24  ;;  %v7926_v24 = vor.u32 %v9100_v47, %v7925_v34  ;;  %v9626_v47 = vld [vmem:[%s15296_s4 + $0x280] sm:$0xff]  ;;  %v12765_v34 = vor.u32 %v9081_v19, %v7849_v1  ;;  %v9629_v19 = vld [vmem:[%s15296_s4 + $0x3b8] sm:$0xff] }
 0x448   :  { %3073 = vmatpush.bf16.msra.mxu2 %v12645_v29 }
 0x449   :  { %3106 = vmatpush.bf16.msra.mxu3 %v12651_v57  ;;  %v4118_v1 = vrot.slane %v7926_v24, 1 }
 0x44a   :  { %4122 = vmatpush.bf16.msrb.mxu0 %v9605_v0  ;;  %4143 = vmatpush.bf16.msrb.mxu1 %v9606_v6  ;;  %v2725_v0 = vpop.f32.mrf.mxu3  ;;  %v12704_v6 = vld [vmem:[%s15296_s4 + $0x210] sm:$0xff] }
 0x44b   :  { %15824 = vst [vmem:[#allocation36_spill] sm:$0xff] %v12704_v6 }
 0x44c   :  { %3074 = vmatpush.bf16.msra.mxu2 %v12667_v25 }
 0x44d   :  { %3107 = vmatpush.bf16.msra.mxu3 %v12673_v30 }
 0x44e   :  { %4123 = vmatpush.bf16.msrb.mxu0 %v9609_v61  ;;  %4144 = vmatpush.bf16.msrb.mxu1 %v9610_v37  ;;  %v12710_v61 = vld [vmem:[%s15296_s4 + $0x240] sm:$0xff]  ;;  %v12713_v37 = vadd.f32 %v2725_v0, %v2714_v36  ;;  %v12729_v36 = vpop.f32.mrf.mxu1  ;;  %v12734_v0 = vld [vmem:[%s15296_s4 + $0x208] sm:$0xff] }
 0x44f   :  { %15825 = vst [vmem:[#allocation8_spill] sm:$0xff] %v12710_v61 }
 0x450   :  { %3075 = vmatpush.bf16.msra.mxu2 %v12685_v3  ;;  %15828 = vst [vmem:[#allocation14_spill] sm:$0xff] %v12729_v36  ;;  %v9623_v36 = vld [vmem:[%s15296_s4 + $0x2c8] sm:$0xff] }
 0x451   :  { %3108 = vmatpush.bf16.msra.mxu3 %v12691_v51  ;;  %15829 = vst [vmem:[#allocation17_spill] sm:$0xff] %v12734_v0  ;;  %v12788_v51 = vpop.f32.mrf.mxu0 }
 0x452   :  { %4124 = vmatpush.bf16.msrb.mxu0 %v9613_v52  ;;  %4145 = vmatpush.bf16.msrb.mxu1 %v9614_v16  ;;  %v12721_v52 = vld [vmem:[%s15296_s4 + $0x378] sm:$0xff]  ;;  %v9619_v16 = vld [vmem:[%s15296_s4 + $0x2d0] sm:$0xff]  ;;  %15840 = vst [vmem:[#allocation41_spill] sm:$0xff] %v12788_v51  ;;  %v9642_v51 = vld [vmem:[%s15296_s4 + $0x3e0] sm:$0xff] }
 0x453   :  { %15826 = vst [vmem:[#allocation13_spill] sm:$0xff] %v12721_v52 }
 0x454   :  { %3076 = vmatpush.bf16.msra.mxu2 %v12704_v6 }
 0x455   :  { %3109 = vmatpush.bf16.msra.mxu3 %v12710_v61 }
 0x456   :  { %4125 = vmatpush.bf16.msrb.mxu0 %v9617_v50  ;;  %4146 = vmatpush.bf16.msrb.mxu1 %v9619_v16  ;;  %v15830_v50 = vld [vmem:[#allocation7_spill] sm:$0xff]  ;;  %v12796_v24 = vpop.f32.mrf.mxu1 }
 0x457   :  { %v12744_v16 = vld [vmem:[%s15296_s4 + $0x370] sm:$0xff]  ;;  %15842 = vst [vmem:[#allocation59_spill] sm:$0xff] %v12796_v24  ;;  %v12837_v24 = vld [vmem:[%s15296_s4 + $0x320] sm:$0xff] }
 0x458   :  { %3077 = vmatpush.bf16.msra.mxu2 %v12734_v0  ;;  %3110 = vmatmul.bf16.vlgmr.msra.gmra.mxu3 %v15830_v50  ;;  %15831 = vst [vmem:[#allocation16_spill] sm:$0xff] %v12744_v16  ;;  %v12753_v0 = vld [vmem:[%s15296_s4 + $0x200] sm:$0xff] }
 0x459   :  { %3198 = vmatpush.bf16.msrb.mxu3 %v12721_v52  ;;  %15832 = vst [vmem:[#allocation18_spill] sm:$0xff] %v12753_v0 }
 0x45a   :  { %4126 = vmatpush.bf16.msrb.mxu0 %v9621_v59  ;;  %4147 = vmatpush.bf16.msrb.mxu1 %v9623_v36  ;;  %v4138_v59 = vunpack.c.l.b16 %v4136_v46  ;;  %v12770_v36 = vld [vmem:[%s15296_s4 + $0x368] sm:$0xff]  ;;  %15848 = vst [vmem:[#allocation63_spill] sm:$0xff] %v12837_v24 }
 0x45b   :  { %15834 = vst [vmem:[#allocation38_spill] sm:$0xff] %v12770_v36  ;;  %v15835_v46 = vld [vmem:[#allocation54_spill] sm:$0xff] }
 0x45c   :  { %3078 = vmatpush.bf16.msra.mxu2 %v12753_v0  ;;  %v15836_v0 = vld [vmem:[#allocation52_spill] sm:$0xff] }
 0x45d   :  { %3199 = vmatpush.bf16.msrb.mxu3 %v12744_v16  ;;  %v12759_v16 = vld [vmem:[%s15296_s4 + $0x338] sm:$0xff]  ;;  %v1351_v52 = vadd.f32 %v15836_v0, %v15835_v46 }
 0x45e   :  { %15833 = vst [vmem:[#allocation40_spill] sm:$0xff] %v12759_v16  ;;  %4127 = vmatpush.bf16.msrb.mxu0 %v9626_v47  ;;  %v9630_v47 = vld [vmem:[%s15296_s4 + $0x3f8] sm:$0xff] }
 0x45f   :  { %3079 = vmatmul.bf16.vlgmr.msra.gmra.mxu2 %v12765_v34  ;;  %v15839_v0 = vld [vmem:[#allocation60_spill] sm:$0xff] }
 0x460   :  { %3173 = vmatpush.bf16.msrb.mxu2 %v12759_v16  ;;  %v9628_v16 = vld [vmem:[%s15296_s4 + $0x2c0] sm:$0xff]  ;;  %v1441_v46 = vadd.f32 %v15839_v0, %v1351_v52  ;;  %v9633_v52 = vld [vmem:[%s15296_s4 + $0x3b0] sm:$0xff] }
 0x461   :  { %3200 = vmatpush.bf16.msrb.mxu3 %v12770_v36  ;;  %4148 = vmatpush.bf16.msrb.mxu1 %v9628_v16  ;;  %v15837_v36 = vld [vmem:[#allocation20_spill] sm:$0xff] }
 0x462   :  { %4222 = vmatpush.bf16.msra.mxu0 %v9629_v19  ;;  %v15838_v61 = vunpack.c.l.b16 %v15837_v36  ;;  %v12793_v16 = vld [vmem:[%s15296_s4 + $0x330] sm:$0xff]  ;;  %v15844_v36 = vld [vmem:[#allocation62_spill] sm:$0xff] }
 0x463   :  { %4128 = vmatmul.bf16.vlgmr.msrb.gmra.mxu0 %v4118_v1  ;;  %15841 = vst [vmem:[#allocation42_spill] sm:$0xff] %v12793_v16  ;;  %v1526_v19 = vadd.f32 %v15844_v36, %v1441_v46  ;;  %v12820_v1 = vld [vmem:[%s15296_s4 + $0x358] sm:$0xff]  ;;  %v9637_v46 = vld [vmem:[%s15296_s4 + $0x3a8] sm:$0xff]  ;;  %v12832_v36 = vpop.f32.mrf.mxu3 }
 0x464   :  { %v4139_v6 = vpack.c.b16 %v4138_v59, %v15838_v61  ;;  %3174 = vmatpush.bf16.msrb.mxu2 %v12793_v16  ;;  %v12801_v61 = vld [vmem:[%s15296_s4 + $0x360] sm:$0xff]  ;;  %v9634_v59 = vld [vmem:[%s15296_s4 + $0x3f0] sm:$0xff]  ;;  %15846 = vst [vmem:[#allocation44_spill] sm:$0xff] %v12820_v1 }
 0x465   :  { %4247 = vmatpush.bf16.msra.mxu1 %v9630_v47  ;;  %15843 = vst [vmem:[#allocation57_spill] sm:$0xff] %v12801_v61  ;;  %3201 = vmatpush.bf16.msrb.mxu3 %v12801_v61  ;;  %v15847_v47 = vld [vmem:[#allocation76_spill] sm:$0xff]  ;;  %v15854_v16 = vld [vmem:[#allocation86_spill] sm:$0xff] }
 0x466   :  { %4149 = vmatmul.bf16.vlgmr.msrb.gmra.mxu1 %v4139_v6  ;;  %4223 = vmatpush.bf16.msra.mxu0 %v9633_v52  ;;  %v12814_v6 = vld [vmem:[%s15296_s4 + $0x328] sm:$0xff]  ;;  %v1615_v0 = vadd.f32 %v15847_v47, %v1526_v19  ;;  %v12824_v52 = vpop.f32.mrf.mxu2  ;;  %v12843_v19 = vld [vmem:[%s15296_s4 + $0x350] sm:$0xff]  ;;  %v15850_v47 = vld [vmem:[#allocation77_spill] sm:$0xff] }
 0x467   :  { %15845 = vst [vmem:[#allocation43_spill] sm:$0xff] %v12814_v6 }
 0x468   :  { %3175 = vmatpush.bf16.msrb.mxu2 %v12814_v6  ;;  %15849 = vst [vmem:[#allocation58_spill] sm:$0xff] %v12843_v19  ;;  %v15851_v6 = vld [vmem:[#allocation45_spill] sm:$0xff] }
 0x469   :  { %4248 = vmatpush.bf16.msra.mxu1 %v9634_v59  ;;  %3202 = vmatpush.bf16.msrb.mxu3 %v12820_v1  ;;  %v9638_v59 = vld [vmem:[%s15296_s4 + $0x3e8] sm:$0xff] }
 0x46a   :  { %4224 = vmatpush.bf16.msra.mxu0 %v9637_v46  ;;  %v1704_v46 = vadd.f32 %v15850_v47, %v1615_v0  ;;  %v9084_v1 = vld [vmem:[#allocation2 + $0x68] sm:$0x70]  ;;  %v4209_v47 = vld [vmem:[#allocation2 + $0xbc] sm:$0x1] }
 0x46b   :  { %v12863_v0 = vld [vmem:[%s15296_s4 + $0x348] sm:$0xff]  ;;  %v2780_v3 = vpop.f32.mrf.mxu3 }
 0x46c   :  { %3176 = vmatpush.bf16.msrb.mxu2 %v12837_v24  ;;  %v7861_v24 = vld [vmem:[#allocation2 + $0x68] sm:$0xe]  ;;  %v1799_v61 = vadd.f32 %v15851_v6, %v1704_v46  ;;  %15853 = vst [vmem:[#allocation47_spill] sm:$0xff] %v12863_v0 }
 0x46d   :  { %4249 = vmatpush.bf16.msra.mxu1 %v9638_v59  ;;  %3203 = vmatpush.bf16.msrb.mxu3 %v12843_v19  ;;  %v9641_v59 = vld [vmem:[%s15296_s4 + $0x3a0] sm:$0xff]  ;;  %v12857_v19 = vld [vmem:[%s15296_s4 + $0x318] sm:$0xff]  ;;  %v7862_v46 = vor.u32 %v9084_v1, %v7861_v24  ;;  %v9649_v1 = vld [vmem:[%s15296_s4 + $0x390] sm:$0xff] }
 0x46e   :  { %4225 = vmatpush.bf16.msra.mxu0 %v9641_v59  ;;  %15852 = vst [vmem:[#allocation46_spill] sm:$0xff] %v12857_v19  ;;  %v2749_v6 = vpop.f32.mrf.mxu2  ;;  %v9646_v59 = vld [vmem:[%s15296_s4 + $0x3d8] sm:$0xff]  ;;  %v1888_v4 = vadd.f32 %v15854_v16, %v1799_v61  ;;  %v12885_v24 = vld [vmem:[%s15296_s4 + $0x340] sm:$0xff]  ;;  %v2634_v61 = vadd.f32 %v12492_v48, %v12488_v28  ;;  %v9651_v28 = vld [vmem:[%s15296_s4 + $0x3d0] sm:$0xff] }
 0x46f   :  { %15856 = vst [vmem:[#allocation61_spill] sm:$0xff] %v12885_v24  ;;  %v7937_v48 = vld [vmem:[#allocation2 + $0xb4] sm:$0x8] }
 0x470   :  { %3177 = vmatpush.bf16.msrb.mxu2 %v12857_v19  ;;  %v2754_v19 = vadd.f32 %v2749_v6, %v12713_v37  ;;  %v15857_v37 = vld [vmem:[#allocation89_spill] sm:$0xff] }
 0x471   :  { %4250 = vmatpush.bf16.msra.mxu1 %v9642_v51  ;;  %3204 = vmatpush.bf16.msrb.mxu3 %v12863_v0  ;;  %v9645_v51 = vld [vmem:[%s15296_s4 + $0x398] sm:$0xff]  ;;  %v12877_v0 = vld [vmem:[%s15296_s4 + $0x310] sm:$0xff]  ;;  %v1976_v16 = vadd.f32 %v15857_v37, %v1888_v4  ;;  %v9083_v6 = vld [vmem:[#allocation2 + $0x60] sm:$0xf0]  ;;  %v12902_v4 = vpop.f32.mrf.mxu0  ;;  %v12907_v37 = vpop.f32.mrf.mxu1 }
 0x472   :  { %4226 = vmatpush.bf16.msra.mxu0 %v9645_v51  ;;  %15855 = vst [vmem:[#allocation65_spill] sm:$0xff] %v12877_v0  ;;  %v4215_v51 = vunpack.c.l.b16 %v4209_v47  ;;  %v12880_v30 = vadd.f32 %v2780_v3, %v2754_v19  ;;  %v12897_v3 = vld [vmem:[%s15296_s4 + $0x38] sm:$0xff]  ;;  %v12900_v19 = vrot.slane %v7862_v46, 1  ;;  %v7857_v47 = vld [vmem:[#allocation2 + $0x60] sm:$0xc]  ;;  %v12913_v46 = vld [vmem:[%s15296_s4 + $0x308] sm:$0xff] }
 0x473   :  { %15858 = vst [vmem:[#allocation49_spill] sm:$0xff] %v12897_v3 }
 0x474   :  { %3178 = vmatpush.bf16.msrb.mxu2 %v12877_v0  ;;  %15859 = vst [vmem:[#allocation50_spill] sm:$0xff] %v12902_v4  ;;  %v4217_v4 = vpack.c.b16 %v4215_v51, %v4215_v51  ;;  %v7858_v0 = vor.u32 %v9083_v6, %v7857_v47  ;;  %v9655_v51 = vld [vmem:[%s15296_s4 + $0x3c8] sm:$0xff] }
 0x475   :  { %4251 = vmatpush.bf16.msra.mxu1 %v9646_v59  ;;  %3205 = vmatpush.bf16.msrb.mxu3 %v12885_v24  ;;  %v9103_v59 = vld [vmem:[#allocation2 + $0xb4] sm:$0xf0]  ;;  %15860 = vst [vmem:[#allocation66_spill] sm:$0xff] %v12907_v37  ;;  %v9104_v24 = vld [vmem:[#allocation2 + $0xbc] sm:$0xf0]  ;;  %v9653_v37 = vld [vmem:[%s15296_s4 + $0x388] sm:$0xff] }
 0x476   :  { %4227 = vmatpush.bf16.msra.mxu0 %v9649_v1  ;;  %v2651_v1 = vadd.f32 %v12538_v45, %v2634_v61  ;;  %15861 = vst [vmem:[#allocation67_spill] sm:$0xff] %v12913_v46  ;;  %v12924_v45 = vld [vmem:[%s15296_s4 + $0x30] sm:$0xff]  ;;  %v7938_v61 = vor.u32 %v9103_v59, %v7937_v48  ;;  %v15863_v47 = vld [vmem:[#allocation6_spill] sm:$0xff]  ;;  %v12941_v48 = vld [vmem:[%s15296_s4 + $0x78] sm:$0xff]  ;;  %v12944_v59 = vrot.slane %v7858_v0, 2 }
 0x477   :  { %v9660_v0 = vld [vmem:[%s15296_s4 + $0x3c0] sm:$0xff] }
 0x478   :  { %3179 = vmatpush.bf16.msrb.mxu2 %v12913_v46  ;;  %3206 = vmatmul.bf16.vlgmr.msrb.gmra.mxu3 %v12900_v19  ;;  %v2667_v6 = vadd.f32 %v12544_v31, %v2651_v1  ;;  %v9658_v31 = vld [vmem:[%s15296_s4 + $0x380] sm:$0xff]  ;;  %v4218_v1 = vrot.slane %v7938_v61, 3 }
 0x479   :  { %3284 = vmatpush.bf16.msra.mxu3 %v12897_v3  ;;  %4252 = vmatpush.bf16.msra.mxu1 %v9651_v28  ;;  %v7941_v3 = vld [vmem:[#allocation2 + $0xbc] sm:$0xc]  ;;  %v15862_v28 = vld [vmem:[#allocation90_spill] sm:$0xff]  ;;  %v12962_v61 = vpop.f32.mrf.mxu0 }
 0x47a   :  { %v2071_v5 = vadd.f32 %v15862_v28, %v1976_v16  ;;  %4228 = vmatpush.bf16.msra.mxu0 %v9653_v37  ;;  %v12935_v37 = vld [vmem:[%s15296_s4 + $0x300] sm:$0xff]  ;;  %v4219_v28 = vrot.slane %v4217_v4, 3  ;;  %v7942_v46 = vor.u32 %v9104_v24, %v7941_v3  ;;  %v12953_v24 = vld [vmem:[%s15296_s4 + $0x28] sm:$0xff]  ;;  %15865 = vst [vmem:[#allocation64_spill] sm:$0xff] %v12962_v61 }
 0x47b   :  { %v15901_v61 = vld [vmem:[#allocation61_spill] sm:$0xff] }
 0x47c   :  { %v2160_v16 = vadd.f32 %v15863_v47, %v2071_v5  ;;  %3180 = vmatpush.bf16.msrb.mxu2 %v12935_v37  ;;  %v2683_v5 = vadd.f32 %v12654_v14, %v2667_v6  ;;  %v15864_v14 = vld [vmem:[#allocation97_spill] sm:$0xff]  ;;  %v4220_v4 = vsel %vm1218_vm4, %v4218_v1, %v4219_v28  ;;  %v12967_v47 = vld [vmem:[%s15296_s4 + $0x70] sm:$0xff]  ;;  %v12970_v6 = vpop.f32.mrf.mxu1  ;;  %v12984_v28 = vld [vmem:[%s15296_s4 + $0x68] sm:$0xff]  ;;  %v2751_v1 = vpop.f32.mrf.mxu2 }
 0x47d   :  { %3285 = vmatpush.bf16.msra.mxu3 %v12924_v45  ;;  %4253 = vmatpush.bf16.msra.mxu1 %v9655_v51  ;;  %v4245_v51 = vrot.slane %v7942_v46, 2  ;;  %15866 = vst [vmem:[#allocation53_spill] sm:$0xff] %v12970_v6  ;;  %v12977_v46 = vld [vmem:[%s15296_s4 + $0x20] sm:$0xff] }
 0x47e   :  { %4229 = vmatpush.bf16.msra.mxu0 %v9658_v31  ;;  %v2245_v3 = vadd.f32 %v15864_v14, %v2160_v16 }
 0x47f   :  { %3181 = vmatmul.bf16.vlgmr.msrb.gmra.mxu2 %v12944_v59 }
 0x480   :  { %3270 = vmatpush.bf16.msra.mxu2 %v12941_v48  ;;  %v2334_v31 = vadd.f32 %v12373_v21, %v2245_v3  ;;  %v12999_v3 = vld [vmem:[%s15296_s4 + $0x60] sm:$0xff] }
 0x481   :  { %3286 = vmatpush.bf16.msra.mxu3 %v12953_v24  ;;  %4254 = vmatpush.bf16.msra.mxu1 %v9660_v0  ;;  %v2699_v0 = vadd.f32 %v12662_v62, %v2683_v5  ;;  %v12991_v62 = vld [vmem:[%s15296_s4 + $0x18] sm:$0xff]  ;;  %v2782_v5 = vpop.f32.mrf.mxu3 }
 0x482   :  { %4230 = vmatmul.bf16.vlgmr.msra.gmra.mxu0 %v4220_v4  ;;  %v2423_v21 = vadd.f32 %v12377_v32, %v2334_v31  ;;  %v13005_v4 = vld [vmem:[%s15296_s4 + $0x10] sm:$0xff] }
 0x483   :  { %v2715_v16 = vadd.f32 %v12824_v52, %v2699_v0 }
 0x484   :  { %3271 = vmatpush.bf16.msra.mxu2 %v12967_v47  ;;  %4255 = vmatmul.bf16.vlgmr.msra.gmra.mxu1 %v4245_v51  ;;  %v2518_v52 = vadd.f32 %v12433_v17, %v2423_v21  ;;  %v2810_v17 = vadd.f32 %v12393_v26, %v12880_v30  ;;  %v13016_v51 = vld [vmem:[%s15296_s4 + $0x58] sm:$0xff] }
 0x485   :  { %3287 = vmatpush.bf16.msra.mxu3 %v12977_v46  ;;  %v2731_v14 = vadd.f32 %v12832_v36, %v2715_v16  ;;  %v13023_v16 = vld [vmem:[%s15296_s4 + $0x8] sm:$0xff] }
 0x486   :  { %v13011_v36 = vadd.f32 %v12431_v42, %v2518_v52  ;;  %v2831_v0 = vadd.f32 %v12396_v58, %v2810_v17  ;;  %v2851_v42 = vpop.f32.mrf.mxu2  ;;  %v13039_v52 = vld [vmem:[%s15296_s4] sm:$0xff]  ;;  %v4318_v17 = vmul.f32 %v12388_v9, %v12388_v9 }
 0x487   :  { %v2755_v32 = vadd.f32 %v2751_v1, %v2731_v14 }
 0x488   :  { %3272 = vmatpush.bf16.msra.mxu2 %v12984_v28  ;;  %15867 = vst [vmem:[#allocation68_spill] sm:$0xff] %v13011_v36  ;;  %v4319_v30 = vmul.f32 %v13011_v36, %v13011_v36  ;;  %v2856_v21 = vadd.f32 %v2851_v42, %v2831_v0  ;;  %v4264_v58 = vsel %vm4263_vm5, %v13011_v36, 0.0  ;;  %v13061_v36 = vld [vmem:[%s15296_s4 + $0x40] sm:$0xff] }
 0x489   :  { %3288 = vmatpush.bf16.msra.mxu3 %v12991_v62  ;;  %v2786_v31 = vadd.f32 %v2782_v5, %v2755_v32  ;;  %v2876_v26 = vpop.f32.mrf.mxu3  ;;  %v13031_v5 = vld [vmem:[%s15296_s4 + $0x50] sm:$0xff]  ;;  %v4265_v0 = vadd.f32 %v4264_v58, %v12388_v9 }
 0x48a   :  { %v2881_v1 = vadd.f32 %v2876_v26, %v2856_v21  ;;  %v4320_v32 = vsel %vm4263_vm5, %v4319_v30, 0.0  ;;  %v13051_v26 = vld [vmem:[%s15296_s4 + $0x48] sm:$0xff] }
 0x48b   :  { %v2811_v14 = vadd.f32 %v12419_v18, %v2786_v31  ;;  %v4321_v31 = vadd.f32 %v4320_v32, %v4318_v17  ;;  %v4266_v30 = vrot.slane %v4265_v0, 4 }
 0x48c   :  { %3273 = vmatpush.bf16.msra.mxu2 %v12999_v3  ;;  %v2912_v21 = vadd.f32 %v12451_v53, %v2881_v1 }
 0x48d   :  { %3289 = vmatpush.bf16.msra.mxu3 %v13005_v4  ;;  %v2832_v18 = vadd.f32 %v12423_v56, %v2811_v14  ;;  %v4322_v56 = vrot.slane %v4321_v31, 4 }
 0x48e   :  { %v13069_v53 = vadd.f32 %v12454_v55, %v2912_v21 }
 0x48f   :  { %v4323_v14 = vadd.f32 %v4322_v56, %v4321_v31 }
 0x490   :  { %3274 = vmatpush.bf16.msra.mxu2 %v13016_v51  ;;  %15868 = vst [vmem:[#allocation69_spill] sm:$0xff] %v13069_v53 }
 0x491   :  { %3290 = vmatpush.bf16.msra.mxu3 %v13023_v16  ;;  %v2878_v58 = vpop.f32.mrf.mxu3 }
 0x494   :  { %3275 = vmatpush.bf16.msra.mxu2 %v13031_v5 }
 0x495   :  { %3291 = vmatpush.bf16.msra.mxu3 %v13039_v52 }
 0x498   :  { %3276 = vmatpush.bf16.msra.mxu2 %v13051_v26  ;;  %3292 = vmatmul.bf16.vlgmr.msra.gmra.mxu3 %v12765_v34  ;;  %v4267_v34 = vadd.f32 %v4266_v30, %v4265_v0 }
 0x499   :  { %3346 = vmatpush.bf16.msrb.mxu3 %v15793_v39  ;;  %v2853_v39 = vpop.f32.mrf.mxu2 }
 0x49a   :  { %v2857_v42 = vadd.f32 %v2853_v39, %v2832_v18 }
 0x49c   :  { %3277 = vmatpush.bf16.msra.mxu2 %v13061_v36  ;;  %v2882_v9 = vadd.f32 %v2878_v58, %v2857_v42 }
 0x49d   :  { %3347 = vmatpush.bf16.msrb.mxu3 %v12162_v44 }
 0x49e   :  { %v2913_v44 = vadd.f32 %v12476_v38, %v2882_v9  ;;  %v4268_v38 = vrot.slane %v4267_v34, 2 }
 0x49f   :  { %3278 = vmatmul.bf16.vlgmr.msra.gmra.mxu2 %v15830_v50 }
 0x4a0   :  { %3330 = vmatpush.bf16.msrb.mxu2 %v12175_v22  ;;  %v13072_v1 = vadd.f32 %v12480_v10, %v2913_v44 }
 0x4a1   :  { %3348 = vmatpush.bf16.msrb.mxu3 %v15798_v15  ;;  %v4329_v15 = vmul.f32 %v13069_v53, %v13069_v53 }
 0x4a2   :  { %15869 = vst [vmem:[#allocation56_spill] sm:$0xff] %v13072_v1  ;;  %v4273_v22 = vsel %vm4263_vm5, %v13072_v1, 0.0  ;;  %v4330_v9 = vmul.f32 %v13072_v1, %v13072_v1  ;;  %v2948_v44 = vpop.f32.mrf.mxu2 }
 0x4a3   :  { %v4274_v55 = vadd.f32 %v4273_v22, %v13069_v53 }
 0x4a4   :  { %3331 = vmatpush.bf16.msrb.mxu2 %v15800_v49  ;;  %v4331_v10 = vsel %vm4263_vm5, %v4330_v9, 0.0  ;;  %v4324_v49 = vrot.slane %v4323_v14, 2 }
 0x4a5   :  { %3349 = vmatpush.bf16.msrb.mxu3 %v15802_v43  ;;  %v4275_v50 = vrot.slane %v4274_v55, 4  ;;  %v4332_v32 = vadd.f32 %v4331_v10, %v4329_v15  ;;  %v4269_v43 = vadd.f32 %v4268_v38, %v4267_v34 }
 0x4a6   :  { %v4325_v18 = vadd.f32 %v4324_v49, %v4323_v14 }
 0x4a7   :  { %v4276_v17 = vadd.f32 %v4275_v50, %v4274_v55  ;;  %v4333_v0 = vrot.slane %v4332_v32, 4  ;;  %v4270_v42 = vrot.slane %v4269_v43, 1  ;;  %v15878_v55 = vld [vmem:[#allocation9_spill] sm:$0xff] }
 0x4a8   :  { %3332 = vmatpush.bf16.msrb.mxu2 %v15803_v7  ;;  %v4326_v7 = vrot.slane %v4325_v18, 1 }
 0x4a9   :  { %3350 = vmatpush.bf16.msrb.mxu3 %v15804_v13  ;;  %v4277_v31 = vrot.slane %v4276_v17, 2  ;;  %v4334_v39 = vadd.f32 %v4333_v0, %v4332_v32  ;;  %v2962_v13 = vpop.f32.mrf.mxu3  ;;  %v4271_v34 = vadd.f32 %v4270_v42, %v4269_v43  ;;  %v15879_v32 = vld [vmem:[#allocation36_spill] sm:$0xff]  ;;  %v15881_v0 = vld [vmem:[#allocation13_spill] sm:$0xff]  ;;  %v7873_v42 = vld [vmem:[#allocation2 + $0x70] sm:$0xf] }
 0x4aa   :  { %v2963_v14 = vadd.f32 %v2962_v13, %v2948_v44  ;;  %v4327_v9 = vadd.f32 %v4326_v7, %v4325_v18  ;;  %v15882_v18 = vld [vmem:[#allocation17_spill] sm:$0xff]  ;;  %v15886_v7 = vld [vmem:[#allocation40_spill] sm:$0xff]  ;;  %v15888_v13 = vld [vmem:[#allocation42_spill] sm:$0xff] }
 0x4ab   :  { %v4278_v30 = vadd.f32 %v4277_v31, %v4276_v17  ;;  %v4335_v21 = vrot.slane %v4334_v39, 2  ;;  %v15880_v17 = vld [vmem:[#allocation8_spill] sm:$0xff]  ;;  %v15883_v31 = vld [vmem:[#allocation19_spill] sm:$0xff]  ;;  %v15889_v44 = vld [vmem:[#allocation57_spill] sm:$0xff] }
 0x4ac   :  { %3333 = vmatpush.bf16.msrb.mxu2 %v15805_v40 }
 0x4ad   :  { %3351 = vmatpush.bf16.msrb.mxu3 %v15806_v2  ;;  %v4279_v58 = vrot.slane %v4278_v30, 1  ;;  %v4336_v56 = vadd.f32 %v4335_v21, %v4334_v39  ;;  %v15884_v39 = vld [vmem:[#allocation16_spill] sm:$0xff]  ;;  %v15885_v21 = vld [vmem:[#allocation18_spill] sm:$0xff] }
 0x4af   :  { %v4280_v22 = vadd.f32 %v4279_v58, %v4278_v30  ;;  %v4337_v40 = vrot.slane %v4336_v56, 1  ;;  %v9087_v30 = vld [vmem:[#allocation2 + $0x70] sm:$0x30] }
 0x4b0   :  { %3334 = vmatpush.bf16.msrb.mxu2 %v15807_v54  ;;  %v7874_v58 = vor.u32 %v9087_v30, %v7873_v42  ;;  %v15899_v42 = vld [vmem:[#allocation47_spill] sm:$0xff] }
 0x4b1   :  { %3352 = vmatpush.bf16.msrb.mxu3 %v15808_v35  ;;  %v13091_v2 = vadd.f32 %v4280_v22, %v4271_v34  ;;  %v4338_v38 = vadd.f32 %v4337_v40, %v4336_v56  ;;  %v13110_v35 = vpop.f32.mrf.mxu3  ;;  %v15887_v56 = vld [vmem:[#allocation38_spill] sm:$0xff]  ;;  %v15890_v34 = vld [vmem:[#allocation43_spill] sm:$0xff]  ;;  %v15891_v22 = vld [vmem:[#allocation44_spill] sm:$0xff] }
 0x4b2   :  { %15873 = vst [vmem:[#allocation73_spill] sm:$0xff] %v13110_v35  ;;  %v15903_v35 = vld [vmem:[#allocation67_spill] sm:$0xff] }
 0x4b3   :  { %15870 = vst [vmem:[#allocation70_spill] sm:$0xff] %v13091_v2  ;;  %v13095_v54 = vadd.f32 %v4338_v38, %v4327_v9  ;;  %v15894_v9 = vld [vmem:[#allocation63_spill] sm:$0xff]  ;;  %v15895_v38 = vld [vmem:[#allocation58_spill] sm:$0xff]  ;;  %v15900_v2 = vld [vmem:[#allocation65_spill] sm:$0xff] }
 0x4b4   :  { %3335 = vmatpush.bf16.msrb.mxu2 %v12260_v63  ;;  %v13108_v63 = vpop.f32.mrf.mxu2 }
 0x4b5   :  { %3353 = vmatpush.bf16.msrb.mxu3 %v15809_v27  ;;  %15871 = vst [vmem:[#allocation71_spill] sm:$0xff] %v13095_v54  ;;  %v15874_v27 = vld [vmem:[#allocation11_spill] sm:$0xff] }
 0x4b6   :  { %15872 = vst [vmem:[#allocation72_spill] sm:$0xff] %v13108_v63  ;;  %v13249_v63 = vld [vmem:[%s15296_s4 + $0x148] sm:$0xff] }
 0x4b8   :  { %3336 = vmatpush.bf16.msrb.mxu2 %v15812_v8  ;;  %3354 = vmatmul.bf16.vlgmr.msrb.gmra.mxu3 %v12900_v19  ;;  %v2981_v8 = vadd.f32 %v15874_v27, %v2963_v14  ;;  %v15876_v19 = vld [vmem:[#allocation35_spill] sm:$0xff]  ;;  %v15896_v27 = vld [vmem:[#allocation24_spill] sm:$0xff] }
 0x4b9   :  { %3433 = vmatpush.bf16.msra.mxu3 %v12568_v11 }
 0x4bb   :  { %v3024_v50 = vpop.f32.mrf.mxu3 }
 0x4bc   :  { %3337 = vmatpush.bf16.msrb.mxu2 %v15814_v23  ;;  %v15875_v23 = vld [vmem:[#allocation34_spill] sm:$0xff] }
 0x4bd   :  { %3434 = vmatpush.bf16.msra.mxu3 %v12586_v41 }
 0x4bf   :  { %3338 = vmatmul.bf16.vlgmr.msrb.gmra.mxu2 %v12944_v59  ;;  %v15877_v59 = vld [vmem:[#allocation15_spill] sm:$0xff] }
 0x4c0   :  { %3402 = vmatpush.bf16.msra.mxu2 %v12596_v60  ;;  %v2997_v15 = vadd.f32 %v15877_v59, %v2981_v8  ;;  %v7885_v59 = vld [vmem:[#allocation2 + $0x84] sm:$0xe] }
 0x4c1   :  { %3435 = vmatpush.bf16.msra.mxu3 %v12605_v12 }
 0x4c2   :  { %v3008_v10 = vpop.f32.mrf.mxu2 }
 0x4c3   :  { %v3013_v49 = vadd.f32 %v3008_v10, %v2997_v15  ;;  %v13133_v14 = vpop.f32.mrf.mxu3  ;;  %v9090_v15 = vld [vmem:[#allocation2 + $0x84] sm:$0x70] }
 0x4c4   :  { %3403 = vmatpush.bf16.msra.mxu2 %v12624_v20  ;;  %15893 = vst [vmem:[#allocation75_spill] sm:$0xff] %v13133_v14  ;;  %v15897_v10 = vld [vmem:[#allocation46_spill] sm:$0xff]  ;;  %v7886_v1 = vor.u32 %v9090_v15, %v7885_v59  ;;  %v15902_v14 = vld [vmem:[#allocation49_spill] sm:$0xff] }
 0x4c5   :  { %3436 = vmatpush.bf16.msra.mxu3 %v12633_v33  ;;  %v3029_v43 = vadd.f32 %v3024_v50, %v3013_v49  ;;  %v15898_v49 = vld [vmem:[#allocation26_spill] sm:$0xff] }
 0x4c6   :  { %v15907_v15 = vld [vmem:[#allocation14_spill] sm:$0xff] }
 0x4c7   :  { %v3045_v8 = vadd.f32 %v15896_v27, %v3029_v43  ;;  %v13144_v43 = vrot.slane %v7886_v1, 1  ;;  %v7881_v27 = vld [vmem:[#allocation2 + $0x7c] sm:$0xc] }
 0x4c8   :  { %3404 = vmatpush.bf16.msra.mxu2 %v12645_v29 }
 0x4c9   :  { %3437 = vmatpush.bf16.msra.mxu3 %v12651_v57  ;;  %v3061_v50 = vadd.f32 %v15898_v49, %v3045_v8 }
 0x4ca   :  { %v13131_v40 = vpop.f32.mrf.mxu2 }
 0x4cb   :  { %15892 = vst [vmem:[#allocation74_spill] sm:$0xff] %v13131_v40  ;;  %v9089_v40 = vld [vmem:[#allocation2 + $0x7c] sm:$0xf0] }
 0x4cc   :  { %3405 = vmatpush.bf16.msra.mxu2 %v12667_v25  ;;  %v7882_v8 = vor.u32 %v9089_v40, %v7881_v27  ;;  %v15906_v40 = vld [vmem:[#allocation37_spill] sm:$0xff] }
 0x4cd   :  { %3438 = vmatpush.bf16.msra.mxu3 %v15875_v23 }
 0x4d0   :  { %3406 = vmatpush.bf16.msra.mxu2 %v15876_v19 }
 0x4d1   :  { %3439 = vmatpush.bf16.msra.mxu3 %v15878_v55 }
 0x4d4   :  { %3407 = vmatpush.bf16.msra.mxu2 %v15879_v32 }
 0x4d5   :  { %3440 = vmatpush.bf16.msra.mxu3 %v15880_v17 }
 0x4d8   :  { %3408 = vmatpush.bf16.msra.mxu2 %v15882_v18  ;;  %3441 = vmatmul.bf16.vlgmr.msra.gmra.mxu3 %v15883_v31 }
 0x4d9   :  { %3529 = vmatpush.bf16.msrb.mxu3 %v15881_v0 }
 0x4db   :  { %v3111_v54 = vpop.f32.mrf.mxu3 }
 0x4dc   :  { %3409 = vmatpush.bf16.msra.mxu2 %v15885_v21 }
 0x4dd   :  { %3530 = vmatpush.bf16.msrb.mxu3 %v15884_v39 }
 0x4df   :  { %3410 = vmatmul.bf16.vlgmr.msra.gmra.mxu2 %v7874_v58 }
 0x4e0   :  { %3504 = vmatpush.bf16.msrb.mxu2 %v15886_v7 }
 0x4e1   :  { %3531 = vmatpush.bf16.msrb.mxu3 %v15887_v56 }
 0x4e2   :  { %v3080_v30 = vpop.f32.mrf.mxu2 }
 0x4e3   :  { %v3085_v53 = vadd.f32 %v3080_v30, %v3061_v50 }
 0x4e4   :  { %3505 = vmatpush.bf16.msrb.mxu2 %v15888_v13 }
 0x4e5   :  { %3532 = vmatpush.bf16.msrb.mxu3 %v15889_v44  ;;  %v3116_v6 = vadd.f32 %v3111_v54, %v3085_v53  ;;  %v13151_v53 = vrot.slane %v7882_v8, 2  ;;  %v13161_v54 = vpop.f32.mrf.mxu3 }
 0x4e6   :  { %15905 = vst [vmem:[#allocation79_spill] sm:$0xff] %v13161_v54 }
 0x4e7   :  { %v3141_v59 = vadd.f32 %v15906_v40, %v3116_v6  ;;  %v13176_v6 = vld [vmem:[%s15296_s4 + $0x178] sm:$0xff]  ;;  %v13183_v40 = vld [vmem:[%s15296_s4 + $0x170] sm:$0xff] }
 0x4e8   :  { %3506 = vmatpush.bf16.msrb.mxu2 %v15890_v34 }
 0x4e9   :  { %3533 = vmatpush.bf16.msrb.mxu3 %v15891_v22  ;;  %v3162_v49 = vadd.f32 %v15907_v15, %v3141_v59  ;;  %v13190_v59 = vld [vmem:[%s15296_s4 + $0x138] sm:$0xff]  ;;  %v13203_v15 = vld [vmem:[%s15296_s4 + $0x130] sm:$0xff] }
 0x4ea   :  { %v13158_v1 = vpop.f32.mrf.mxu2 }
 0x4eb   :  { %15904 = vst [vmem:[#allocation78_spill] sm:$0xff] %v13158_v1 }
 0x4ec   :  { %3507 = vmatpush.bf16.msrb.mxu2 %v15894_v9 }
 0x4ed   :  { %3534 = vmatpush.bf16.msrb.mxu3 %v15895_v38 }
 0x4f0   :  { %3508 = vmatpush.bf16.msrb.mxu2 %v15897_v10 }
 0x4f1   :  { %3535 = vmatpush.bf16.msrb.mxu3 %v15899_v42 }
 0x4f4   :  { %3509 = vmatpush.bf16.msrb.mxu2 %v15900_v2 }
 0x4f5   :  { %3536 = vmatpush.bf16.msrb.mxu3 %v15901_v61 }
 0x4f8   :  { %3510 = vmatpush.bf16.msrb.mxu2 %v15903_v35  ;;  %3537 = vmatmul.bf16.vlgmr.msrb.gmra.mxu3 %v13144_v43 }
 0x4f9   :  { %3615 = vmatpush.bf16.msra.mxu3 %v15902_v14 }
 0x4fb   :  { %v3207_v27 = vpop.f32.mrf.mxu3 }
 0x4fc   :  { %3511 = vmatpush.bf16.msrb.mxu2 %v12935_v37 }
 0x4fd   :  { %3616 = vmatpush.bf16.msra.mxu3 %v12924_v45 }
 0x4ff   :  { %3512 = vmatmul.bf16.vlgmr.msrb.gmra.mxu2 %v13151_v53 }
 0x500   :  { %3601 = vmatpush.bf16.msra.mxu2 %v12941_v48 }
 0x501   :  { %3617 = vmatpush.bf16.msra.mxu3 %v12953_v24 }
 0x502   :  { %v3182_v50 = vpop.f32.mrf.mxu2 }
 0x503   :  { %v3187_v30 = vadd.f32 %v3182_v50, %v3162_v49  ;;  %v13209_v49 = vld [vmem:[%s15296_s4 + $0x160] sm:$0xff]  ;;  %v13215_v50 = vld [vmem:[%s15296_s4 + $0x128] sm:$0xff] }
 0x504   :  { %3602 = vmatpush.bf16.msra.mxu2 %v12967_v47 }
 0x505   :  { %3618 = vmatpush.bf16.msra.mxu3 %v12977_v46  ;;  %v13169_v8 = vadd.f32 %v3207_v27, %v3187_v30  ;;  %v13225_v27 = vld [vmem:[%s15296_s4 + $0x158] sm:$0xff] }
 0x507   :  { %15908 = vst [vmem:[#allocation80_spill] sm:$0xff] %v13169_v8  ;;  %v13231_v8 = vld [vmem:[%s15296_s4 + $0x120] sm:$0xff] }
 0x508   :  { %3603 = vmatpush.bf16.msra.mxu2 %v12984_v28  ;;  %15911 = vst [vmem:[#allocation83_spill] sm:$0xff] %v13231_v8 }
 0x509   :  { %3619 = vmatpush.bf16.msra.mxu3 %v12991_v62 }
 0x50a   :  { %v13220_v30 = vpop.f32.mrf.mxu2 }
 0x50b   :  { %15910 = vst [vmem:[#allocation82_spill] sm:$0xff] %v13220_v30  ;;  %v13243_v30 = vld [vmem:[%s15296_s4 + $0x118] sm:$0xff] }
 0x50c   :  { %3604 = vmatpush.bf16.msra.mxu2 %v12999_v3  ;;  %15913 = vst [vmem:[#allocation84_spill] sm:$0xff] %v13243_v30 }
 0x50d   :  { %3620 = vmatpush.bf16.msra.mxu3 %v13005_v4 }
 0x510   :  { %3605 = vmatpush.bf16.msra.mxu2 %v13016_v51 }
 0x511   :  { %3621 = vmatpush.bf16.msra.mxu3 %v13023_v16 }
 0x514   :  { %3606 = vmatpush.bf16.msra.mxu2 %v13031_v5 }
 0x515   :  { %3622 = vmatpush.bf16.msra.mxu3 %v13039_v52 }
 0x518   :  { %3607 = vmatpush.bf16.msra.mxu2 %v13051_v26  ;;  %3623 = vmatmul.bf16.vlgmr.msra.gmra.mxu3 %v7874_v58  ;;  %v13196_v58 = vld [vmem:[%s15296_s4 + $0x168] sm:$0xff] }
 0x519   :  { %3677 = vmatpush.bf16.msrb.mxu3 %v13176_v6 }
 0x51c   :  { %3608 = vmatpush.bf16.msra.mxu2 %v13061_v36 }
 0x51d   :  { %3678 = vmatpush.bf16.msrb.mxu3 %v13183_v40 }
 0x51f   :  { %3609 = vmatmul.bf16.vlgmr.msra.gmra.mxu2 %v15883_v31  ;;  %v13218_v31 = vpop.f32.mrf.mxu3 }
 0x520   :  { %3661 = vmatpush.bf16.msrb.mxu2 %v13190_v59  ;;  %15909 = vst [vmem:[#allocation81_spill] sm:$0xff] %v13218_v31  ;;  %v13237_v31 = vld [vmem:[%s15296_s4 + $0x150] sm:$0xff] }
 0x521   :  { %3679 = vmatpush.bf16.msrb.mxu3 %v13196_v58  ;;  %15912 = vst [vmem:[#allocation48_spill] sm:$0xff] %v13237_v31 }
 0x522   :  { %v3279_v1 = vpop.f32.mrf.mxu2 }
 0x524   :  { %3662 = vmatpush.bf16.msrb.mxu2 %v13203_v15 }
 0x525   :  { %3680 = vmatpush.bf16.msrb.mxu3 %v13209_v49 }
 0x527   :  { %v3293_v54 = vpop.f32.mrf.mxu3 }
 0x528   :  { %3663 = vmatpush.bf16.msrb.mxu2 %v13215_v50 }
 0x529   :  { %3681 = vmatpush.bf16.msrb.mxu3 %v13225_v27 }
 0x52c   :  { %3664 = vmatpush.bf16.msrb.mxu2 %v13231_v8  ;;  %v3294_v8 = vadd.f32 %v3293_v54, %v3279_v1  ;;  %v13268_v1 = vld [vmem:[%s15296_s4 + $0x108] sm:$0xff]  ;;  %v13276_v54 = vld [vmem:[%s15296_s4 + $0x100] sm:$0xff] }
 0x52d   :  { %3682 = vmatpush.bf16.msrb.mxu3 %v13237_v31  ;;  %v13255_v31 = vld [vmem:[%s15296_s4 + $0x110] sm:$0xff]  ;;  %15914 = vst [vmem:[#allocation85_spill] sm:$0xff] %v13268_v1 }
 0x52e   :  { %15915 = vst [vmem:[#allocation51_spill] sm:$0xff] %v13276_v54 }
 0x530   :  { %3665 = vmatpush.bf16.msrb.mxu2 %v13243_v30  ;;  %v13261_v30 = vld [vmem:[%s15296_s4 + $0x140] sm:$0xff] }
 0x531   :  { %3683 = vmatpush.bf16.msrb.mxu3 %v13249_v63 }
 0x534   :  { %3666 = vmatpush.bf16.msrb.mxu2 %v13255_v31 }
 0x535   :  { %3684 = vmatpush.bf16.msrb.mxu3 %v13261_v30 }
 0x538   :  { %3667 = vmatpush.bf16.msrb.mxu2 %v13268_v1  ;;  %3685 = vmatmul.bf16.vlgmr.msrb.gmra.mxu3 %v13144_v43  ;;  %v13285_v43 = vpop.f32.mrf.mxu2  ;;  %v13288_v1 = vpop.f32.mrf.mxu3 }
 0x539   :  { %3764 = vmatpush.bf16.msra.mxu3 %v12568_v11  ;;  %15916 = vst [vmem:[#allocation10_spill] sm:$0xff] %v13285_v43 }
 0x53a   :  { %15917 = vst [vmem:[#allocation39_spill] sm:$0xff] %v13288_v1  ;;  %v7909_v1 = vld [vmem:[#allocation2 + $0xa0] sm:$0xe] }
 0x53c   :  { %3668 = vmatpush.bf16.msrb.mxu2 %v13276_v54 }
 0x53d   :  { %3765 = vmatpush.bf16.msra.mxu3 %v12586_v41  ;;  %v3307_v41 = vpop.f32.mrf.mxu0 }
 0x53e   :  { %v3312_v54 = vadd.f32 %v3307_v41, %v3294_v8  ;;  %v15918_v41 = vld [vmem:[#allocation22_spill] sm:$0xff] }
 0x53f   :  { %3669 = vmatmul.bf16.vlgmr.msrb.gmra.mxu2 %v13151_v53  ;;  %v7897_v8 = vld [vmem:[#allocation2 + $0x8c] sm:$0xf] }
 0x540   :  { %3733 = vmatpush.bf16.msra.mxu2 %v12596_v60 }
 0x541   :  { %3766 = vmatpush.bf16.msra.mxu3 %v12605_v12  ;;  %v3323_v12 = vpop.f32.mrf.mxu1 }
 0x542   :  { %v3328_v53 = vadd.f32 %v3323_v12, %v3312_v54  ;;  %v9093_v12 = vld [vmem:[#allocation2 + $0x8c] sm:$0x30] }
 0x544   :  { %3734 = vmatpush.bf16.msra.mxu2 %v12624_v20  ;;  %v3339_v20 = vpop.f32.mrf.mxu2 }
 0x545   :  { %3767 = vmatpush.bf16.msra.mxu3 %v12633_v33  ;;  %v3355_v33 = vpop.f32.mrf.mxu3 }
 0x548   :  { %3735 = vmatpush.bf16.msra.mxu2 %v12645_v29  ;;  %v3344_v29 = vadd.f32 %v3339_v20, %v3328_v53  ;;  %v13302_v20 = vor.u32 %v9093_v12, %v7897_v8 }
 0x549   :  { %3768 = vmatpush.bf16.msra.mxu3 %v12651_v57 }
 0x54a   :  { %v3360_v43 = vadd.f32 %v3355_v33, %v3344_v29  ;;  %v13306_v33 = vpop.f32.mrf.mxu0  ;;  %v13310_v29 = vpop.f32.mrf.mxu1 }
 0x54b   :  { %15919 = vst [vmem:[#allocation87_spill] sm:$0xff] %v13306_v33 }
 0x54c   :  { %3736 = vmatpush.bf16.msra.mxu2 %v12667_v25  ;;  %15920 = vst [vmem:[#allocation88_spill] sm:$0xff] %v13310_v29  ;;  %v13313_v54 = vpop.f32.mrf.mxu2 }
 0x54d   :  { %3769 = vmatpush.bf16.msra.mxu3 %v15875_v23  ;;  %15921 = vst [vmem:[#allocation91_spill] sm:$0xff] %v13313_v54  ;;  %v13316_v8 = vpop.f32.mrf.mxu3 }
 0x54e   :  { %15922 = vst [vmem:[#allocation92_spill] sm:$0xff] %v13316_v8  ;;  %v9095_v8 = vld [vmem:[#allocation2 + $0x98] sm:$0xf0] }
 0x550   :  { %3737 = vmatpush.bf16.msra.mxu2 %v15876_v19 }
 0x551   :  { %3770 = vmatpush.bf16.msra.mxu3 %v15878_v55 }
 0x552   :  { %v3371_v53 = vpop.f32.mrf.mxu0  ;;  %v3387_v33 = vpop.f32.mrf.mxu1 }
 0x553   :  { %v3376_v12 = vadd.f32 %v3371_v53, %v3360_v43  ;;  %v7905_v53 = vld [vmem:[#allocation2 + $0x98] sm:$0xc] }
 0x554   :  { %3738 = vmatpush.bf16.msra.mxu2 %v15879_v32 }
 0x555   :  { %3771 = vmatpush.bf16.msra.mxu3 %v15880_v17  ;;  %v3392_v29 = vadd.f32 %v3387_v33, %v3376_v12  ;;  %v7906_v33 = vor.u32 %v9095_v8, %v7905_v53 }
 0x558   :  { %3739 = vmatpush.bf16.msra.mxu2 %v15882_v18  ;;  %3772 = vmatmul.bf16.vlgmr.msra.gmra.mxu3 %v15918_v41 }
 0x559   :  { %3860 = vmatpush.bf16.msrb.mxu3 %v15881_v0 }
 0x55c   :  { %3740 = vmatpush.bf16.msra.mxu2 %v15885_v21 }
 0x55d   :  { %3861 = vmatpush.bf16.msrb.mxu3 %v15884_v39 }
 0x55f   :  { %3741 = vmatmul.bf16.vlgmr.msra.gmra.mxu2 %v13302_v20 }
 0x560   :  { %3835 = vmatpush.bf16.msrb.mxu2 %v15886_v7 }
 0x561   :  { %3862 = vmatpush.bf16.msrb.mxu3 %v15887_v56 }
 0x564   :  { %3836 = vmatpush.bf16.msrb.mxu2 %v15888_v13  ;;  %v9096_v13 = vld [vmem:[#allocation2 + $0xa0] sm:$0x70] }
 0x565   :  { %3863 = vmatpush.bf16.msrb.mxu3 %v15889_v44  ;;  %v3411_v44 = vpop.f32.mrf.mxu2 }
 0x566   :  { %v3416_v54 = vadd.f32 %v3411_v44, %v3392_v29  ;;  %v13330_v44 = vpop.f32.mrf.mxu0 }
 0x568   :  { %3837 = vmatpush.bf16.msrb.mxu2 %v15890_v34  ;;  %v7910_v34 = vor.u32 %v9096_v13, %v7909_v1  ;;  %v3833_v13 = vrot.slane %v7906_v33, 2 }
 0x569   :  { %3864 = vmatpush.bf16.msrb.mxu3 %v15891_v22  ;;  %v3442_v22 = vpop.f32.mrf.mxu3 }
 0x56a   :  { %v3447_v56 = vadd.f32 %v3442_v22, %v3416_v54  ;;  %v3858_v43 = vrot.slane %v7910_v34, 1  ;;  %v13334_v34 = vpop.f32.mrf.mxu1 }
 0x56c   :  { %3838 = vmatpush.bf16.msrb.mxu2 %v15894_v9 }
 0x56d   :  { %3865 = vmatpush.bf16.msrb.mxu3 %v15895_v38  ;;  %v13337_v22 = vpop.f32.mrf.mxu2 }
 0x570   :  { %3839 = vmatpush.bf16.msrb.mxu2 %v15897_v10 }
 0x571   :  { %3866 = vmatpush.bf16.msrb.mxu3 %v15899_v42 }
 0x574   :  { %3840 = vmatpush.bf16.msrb.mxu2 %v15900_v2 }
 0x575   :  { %3867 = vmatpush.bf16.msrb.mxu3 %v15901_v61 }
 0x578   :  { %3841 = vmatpush.bf16.msrb.mxu2 %v15903_v35  ;;  %3868 = vmatmul.bf16.vlgmr.msrb.gmra.mxu3 %v3858_v43 }
 0x579   :  { %3946 = vmatpush.bf16.msra.mxu3 %v15902_v14  ;;  %v3488_v14 = vpop.f32.mrf.mxu1 }
 0x57c   :  { %3842 = vmatpush.bf16.msrb.mxu2 %v12935_v37 }
 0x57d   :  { %3947 = vmatpush.bf16.msra.mxu3 %v12924_v45  ;;  %v3467_v45 = vpop.f32.mrf.mxu0 }
 0x57f   :  { %3843 = vmatmul.bf16.vlgmr.msrb.gmra.mxu2 %v3833_v13 }
 0x580   :  { %3932 = vmatpush.bf16.msra.mxu2 %v12941_v48  ;;  %v13340_v48 = vpop.f32.mrf.mxu3 }
 0x581   :  { %3948 = vmatpush.bf16.msra.mxu3 %v12953_v24  ;;  %v3472_v24 = vadd.f32 %v3467_v45, %v3447_v56  ;;  %v15938_v45 = vld [vmem:[#allocation44_spill] sm:$0xff] }
 0x584   :  { %3933 = vmatpush.bf16.msra.mxu2 %v12967_v47  ;;  %v3493_v47 = vadd.f32 %v3488_v14, %v3472_v24 }
 0x585   :  { %3949 = vmatpush.bf16.msra.mxu3 %v12977_v46  ;;  %v3513_v46 = vpop.f32.mrf.mxu2 }
 0x588   :  { %3934 = vmatpush.bf16.msra.mxu2 %v12984_v28  ;;  %v3518_v28 = vadd.f32 %v3513_v46, %v3493_v47  ;;  %v3538_v1 = vpop.f32.mrf.mxu3  ;;  %v7933_v47 = vld [vmem:[#allocation2 + $0xbc] sm:$0xe]  ;;  %v9102_v46 = vld [vmem:[#allocation2 + $0xbc] sm:$0x70] }
 0x589   :  { %3950 = vmatpush.bf16.msra.mxu3 %v12991_v62 }
 0x58a   :  { %v13346_v29 = vadd.f32 %v3538_v1, %v3518_v28 }
 0x58c   :  { %3935 = vmatpush.bf16.msra.mxu2 %v12999_v3 }
 0x58d   :  { %3951 = vmatpush.bf16.msra.mxu3 %v13005_v4  ;;  %v13363_v3 = vpop.f32.mrf.mxu2  ;;  %v15923_v4 = vld [vmem:[#allocation83_spill] sm:$0xff] }
 0x590   :  { %3936 = vmatpush.bf16.msra.mxu2 %v13016_v51  ;;  %v13361_v62 = vpop.f32.mrf.mxu3  ;;  %v13368_v51 = vpop.f32.mrf.mxu0 }
 0x591   :  { %3952 = vmatpush.bf16.msra.mxu3 %v13023_v16  ;;  %v15925_v16 = vld [vmem:[#allocation84_spill] sm:$0xff] }
 0x594   :  { %3937 = vmatpush.bf16.msra.mxu2 %v13031_v5 }
 0x595   :  { %3953 = vmatpush.bf16.msra.mxu3 %v13039_v52 }
 0x598   :  { %3938 = vmatpush.bf16.msra.mxu2 %v13051_v26  ;;  %3954 = vmatmul.bf16.vlgmr.msra.gmra.mxu3 %v13302_v20  ;;  %v13372_v26 = vpop.f32.mrf.mxu1 }
 0x599   :  { %4008 = vmatpush.bf16.msrb.mxu3 %v13176_v6  ;;  %v13376_v6 = vpop.f32.mrf.mxu0 }
 0x59b   :  { %v3624_v5 = vpop.f32.mrf.mxu3 }
 0x59c   :  { %3939 = vmatpush.bf16.msra.mxu2 %v13061_v36  ;;  %v15924_v36 = vld [vmem:[#allocation48_spill] sm:$0xff] }
 0x59d   :  { %4009 = vmatpush.bf16.msrb.mxu3 %v13183_v40  ;;  %v15926_v40 = vld [vmem:[#allocation85_spill] sm:$0xff] }
 0x59f   :  { %3940 = vmatmul.bf16.vlgmr.msra.gmra.mxu2 %v15918_v41 }
 0x5a0   :  { %3992 = vmatpush.bf16.msrb.mxu2 %v13190_v59  ;;  %v13380_v59 = vpop.f32.mrf.mxu1 }
 0x5a1   :  { %4010 = vmatpush.bf16.msrb.mxu3 %v13196_v58  ;;  %v15927_v58 = vld [vmem:[#allocation27_spill] sm:$0xff] }
 0x5a2   :  { %v3610_v52 = vpop.f32.mrf.mxu2 }
 0x5a3   :  { %v3625_v56 = vadd.f32 %v3624_v5, %v3610_v52  ;;  %v13396_v20 = vpop.f32.mrf.mxu3  ;;  %v7929_v52 = vld [vmem:[#allocation2 + $0xb4] sm:$0xc] }
 0x5a4   :  { %3993 = vmatpush.bf16.msrb.mxu2 %v13203_v15  ;;  %v15928_v15 = vld [vmem:[#allocation51_spill] sm:$0xff] }
 0x5a5   :  { %4011 = vmatpush.bf16.msrb.mxu3 %v13209_v49  ;;  %v13386_v49 = vpop.f32.mrf.mxu0 }
 0x5a8   :  { %3994 = vmatpush.bf16.msrb.mxu2 %v13215_v50  ;;  %v15930_v50 = vld [vmem:[#allocation30_spill] sm:$0xff] }
 0x5a9   :  { %4012 = vmatpush.bf16.msrb.mxu3 %v13225_v27 }
 0x5aa   :  { %v13393_v27 = vpop.f32.mrf.mxu2 }
 0x5ac   :  { %3995 = vmatpush.bf16.msrb.mxu2 %v15923_v4 }
 0x5ad   :  { %4013 = vmatpush.bf16.msrb.mxu3 %v15924_v36  ;;  %v3638_v41 = vpop.f32.mrf.mxu0  ;;  %v7934_v36 = vor.u32 %v9102_v46, %v7933_v47  ;;  %v15945_v46 = vld [vmem:[#allocation87_spill] sm:$0xff] }
 0x5b0   :  { %3996 = vmatpush.bf16.msrb.mxu2 %v15925_v16 }
 0x5b1   :  { %4014 = vmatpush.bf16.msrb.mxu3 %v13249_v63  ;;  %v15929_v63 = vld [vmem:[#allocation28_spill] sm:$0xff] }
 0x5b4   :  { %3997 = vmatpush.bf16.msrb.mxu2 %v13255_v31  ;;  %v15931_v31 = vld [vmem:[#allocation32_spill] sm:$0xff] }
 0x5b5   :  { %4015 = vmatpush.bf16.msrb.mxu3 %v13261_v30  ;;  %v15932_v30 = vld [vmem:[#allocation33_spill] sm:$0xff] }
 0x5b8   :  { %3998 = vmatpush.bf16.msrb.mxu2 %v15926_v40  ;;  %4016 = vmatmul.bf16.vlgmr.msrb.gmra.mxu3 %v3858_v43 }
 0x5b9   :  { %4095 = vmatpush.bf16.msra.mxu3 %v12568_v11  ;;  %v13390_v11 = vpop.f32.mrf.mxu1 }
 0x5bb   :  { %v3686_v53 = vpop.f32.mrf.mxu3 }
 0x5bc   :  { %3999 = vmatpush.bf16.msrb.mxu2 %v15928_v15 }
 0x5bd   :  { %4096 = vmatpush.bf16.msra.mxu3 %v15927_v58 }
 0x5bf   :  { %4000 = vmatmul.bf16.vlgmr.msrb.gmra.mxu2 %v3833_v13  ;;  %v15937_v13 = vld [vmem:[#allocation43_spill] sm:$0xff] }
 0x5c0   :  { %4064 = vmatpush.bf16.msra.mxu2 %v12596_v60  ;;  %v3643_v60 = vadd.f32 %v3638_v41, %v3625_v56 }
 0x5c1   :  { %4097 = vmatpush.bf16.msra.mxu3 %v15929_v63  ;;  %v3654_v54 = vpop.f32.mrf.mxu1 }
 0x5c2   :  { %v3659_v8 = vadd.f32 %v3654_v54, %v3643_v60  ;;  %v3670_v12 = vpop.f32.mrf.mxu2 }
 0x5c4   :  { %4065 = vmatpush.bf16.msra.mxu2 %v15930_v50  ;;  %v3675_v43 = vadd.f32 %v3670_v12, %v3659_v8 }
 0x5c5   :  { %4098 = vmatpush.bf16.msra.mxu3 %v15931_v31 }
 0x5c6   :  { %v3691_v33 = vadd.f32 %v3686_v53, %v3675_v43  ;;  %v15939_v53 = vld [vmem:[#allocation72_spill] sm:$0xff] }
 0x5c8   :  { %4066 = vmatpush.bf16.msra.mxu2 %v15932_v30 }
 0x5c9   :  { %4099 = vmatpush.bf16.msra.mxu3 %v12651_v57  ;;  %v15933_v57 = vld [vmem:[#allocation25_spill] sm:$0xff] }
 0x5cc   :  { %4067 = vmatpush.bf16.msra.mxu2 %v12667_v25  ;;  %v7921_v25 = vld [vmem:[#allocation2 + $0xa8] sm:$0xf] }
 0x5cd   :  { %4100 = vmatpush.bf16.msra.mxu3 %v15875_v23  ;;  %v9099_v23 = vld [vmem:[#allocation2 + $0xa8] sm:$0x30] }
 0x5d0   :  { %4068 = vmatpush.bf16.msra.mxu2 %v15876_v19  ;;  %v7922_v19 = vor.u32 %v9099_v23, %v7921_v25 }
 0x5d1   :  { %4101 = vmatpush.bf16.msra.mxu3 %v15878_v55  ;;  %v15934_v55 = vld [vmem:[#allocation38_spill] sm:$0xff] }
 0x5d4   :  { %4069 = vmatpush.bf16.msra.mxu2 %v15879_v32  ;;  %v13411_v32 = vpop.f32.mrf.mxu0 }
 0x5d5   :  { %4102 = vmatpush.bf16.msra.mxu3 %v15880_v17  ;;  %v15935_v17 = vld [vmem:[#allocation42_spill] sm:$0xff] }
 0x5d8   :  { %4070 = vmatpush.bf16.msra.mxu2 %v15882_v18  ;;  %4103 = vmatmul.bf16.vlgmr.msra.gmra.mxu3 %v15933_v57  ;;  %v13415_v18 = vpop.f32.mrf.mxu1 }
 0x5d9   :  { %4191 = vmatpush.bf16.msrb.mxu3 %v15881_v0  ;;  %v15936_v0 = vld [vmem:[#allocation57_spill] sm:$0xff] }
 0x5dc   :  { %4071 = vmatpush.bf16.msra.mxu2 %v15885_v21  ;;  %v3702_v21 = vpop.f32.mrf.mxu0 }
 0x5dd   :  { %4192 = vmatpush.bf16.msrb.mxu3 %v15884_v39  ;;  %v13418_v39 = vpop.f32.mrf.mxu2  ;;  %v3707_v24 = vadd.f32 %v3702_v21, %v3691_v33  ;;  %v15940_v33 = vld [vmem:[#allocation73_spill] sm:$0xff] }
 0x5de   :  { %v2965_v57 = vadd.f32 %v15940_v33, %v15939_v53 }
 0x5df   :  { %4072 = vmatmul.bf16.vlgmr.msra.gmra.mxu2 %v7922_v19 }
 0x5e0   :  { %4166 = vmatpush.bf16.msrb.mxu2 %v15886_v7  ;;  %v13421_v7 = vpop.f32.mrf.mxu3  ;;  %v3718_v14 = vpop.f32.mrf.mxu1 }
 0x5e1   :  { %4193 = vmatpush.bf16.msrb.mxu3 %v15934_v55  ;;  %v3723_v28 = vadd.f32 %v3718_v14, %v3707_v24  ;;  %v15941_v55 = vld [vmem:[#allocation21_spill] sm:$0xff]  ;;  %v3627_v24 = vadd.f32 %v13396_v20, %v13393_v27  ;;  %v15944_v14 = vld [vmem:[#allocation23_spill] sm:$0xff] }
 0x5e4   :  { %4167 = vmatpush.bf16.msrb.mxu2 %v15935_v17  ;;  %v3704_v56 = vpop.f32.mrf.mxu0  ;;  %v2982_v17 = vadd.f32 %v15941_v55, %v2965_v57  ;;  %v15953_v55 = vld [vmem:[#allocation78_spill] sm:$0xff] }
 0x5e5   :  { %4194 = vmatpush.bf16.msrb.mxu3 %v15936_v0  ;;  %v3742_v1 = vpop.f32.mrf.mxu2  ;;  %v15942_v0 = vld [vmem:[#allocation10_spill] sm:$0xff] }
 0x5e6   :  { %v3747_v4 = vadd.f32 %v3742_v1, %v3723_v28  ;;  %v2998_v47 = vadd.f32 %v15944_v14, %v2982_v17 }
 0x5e8   :  { %4168 = vmatpush.bf16.msrb.mxu2 %v15937_v13  ;;  %v3773_v16 = vpop.f32.mrf.mxu3  ;;  %v3720_v40 = vpop.f32.mrf.mxu1  ;;  %v15943_v13 = vld [vmem:[#allocation39_spill] sm:$0xff] }
 0x5e9   :  { %4195 = vmatpush.bf16.msrb.mxu3 %v15938_v45  ;;  %v3778_v5 = vadd.f32 %v3773_v16, %v3747_v4  ;;  %v3296_v45 = vadd.f32 %v15943_v13, %v15942_v0 }
 0x5eb   :  { %v3313_v28 = vadd.f32 %v15945_v46, %v3296_v45 }
 0x5ec   :  { %4169 = vmatpush.bf16.msrb.mxu2 %v15894_v9  ;;  %v4189_v9 = vrot.slane %v7934_v36, 1  ;;  %v3798_v58 = vpop.f32.mrf.mxu0  ;;  %v15946_v36 = vld [vmem:[#allocation74_spill] sm:$0xff] }
 0x5ed   :  { %4196 = vmatpush.bf16.msrb.mxu3 %v15895_v38  ;;  %v9101_v38 = vld [vmem:[#allocation2 + $0xb4] sm:$0xf0]  ;;  %v3744_v63 = vpop.f32.mrf.mxu2  ;;  %v3014_v16 = vadd.f32 %v15946_v36, %v2998_v47 }
 0x5f0   :  { %4170 = vmatpush.bf16.msrb.mxu2 %v15897_v10  ;;  %v7930_v10 = vor.u32 %v9101_v38, %v7929_v52  ;;  %v3819_v15 = vpop.f32.mrf.mxu1  ;;  %v3775_v50 = vpop.f32.mrf.mxu3  ;;  %v15947_v52 = vld [vmem:[#allocation88_spill] sm:$0xff] }
 0x5f1   :  { %4197 = vmatpush.bf16.msrb.mxu3 %v15899_v42  ;;  %v3329_v38 = vadd.f32 %v15947_v52, %v3313_v28 }
 0x5f2   :  { %v4164_v42 = vrot.slane %v7930_v10, 2 }
 0x5f4   :  { %4171 = vmatpush.bf16.msrb.mxu2 %v15900_v2  ;;  %v3803_v2 = vadd.f32 %v3798_v58, %v3778_v5  ;;  %v13431_v31 = vpop.f32.mrf.mxu0  ;;  %v3644_v5 = vadd.f32 %v13411_v32, %v3627_v24  ;;  %v15954_v24 = vld [vmem:[#allocation79_spill] sm:$0xff] }
 0x5f5   :  { %4198 = vmatpush.bf16.msrb.mxu3 %v15901_v61 }
 0x5f6   :  { %v3824_v30 = vadd.f32 %v3819_v15, %v3803_v2  ;;  %v15949_v15 = vld [vmem:[#allocation91_spill] sm:$0xff]  ;;  %v3660_v27 = vadd.f32 %v13415_v18, %v3644_v5  ;;  %v15955_v5 = vld [vmem:[#allocation41_spill] sm:$0xff] }
 0x5f7   :  { %v3345_v2 = vadd.f32 %v15949_v15, %v3329_v38 }
 0x5f8   :  { %4172 = vmatpush.bf16.msrb.mxu2 %v15903_v35  ;;  %4199 = vmatmul.bf16.vlgmr.msrb.gmra.mxu3 %v4189_v9  ;;  %v13433_v61 = vpop.f32.mrf.mxu1  ;;  %v3676_v20 = vadd.f32 %v13418_v39, %v3660_v27 }
 0x5fa   :  { %v3692_v32 = vadd.f32 %v13421_v7, %v3676_v20 }
 0x5fb   :  { %v3869_v35 = vpop.f32.mrf.mxu3 }
 0x5fc   :  { %4173 = vmatpush.bf16.msrb.mxu2 %v12935_v37  ;;  %v3900_v8 = vpop.f32.mrf.mxu0  ;;  %v3708_v0 = vadd.f32 %v3704_v56, %v3692_v32 }
 0x5fe   :  { %v3724_v46 = vadd.f32 %v3720_v40, %v3708_v0 }
 0x5ff   :  { %4174 = vmatmul.bf16.vlgmr.msrb.gmra.mxu2 %v4164_v42  ;;  %v15948_v42 = vld [vmem:[#allocation75_spill] sm:$0xff] }
 0x600   :  { %v3925_v43 = vpop.f32.mrf.mxu1  ;;  %v3030_v58 = vadd.f32 %v15948_v42, %v3014_v16  ;;  %v3748_v28 = vadd.f32 %v3744_v63, %v3724_v46  ;;  %v3574_v46 = vadd.f32 %v13376_v6, %v13346_v29 }
 0x602   :  { %v3844_v41 = vpop.f32.mrf.mxu2  ;;  %v3779_v38 = vadd.f32 %v3775_v50, %v3748_v28  ;;  %v15958_v50 = vld [vmem:[#allocation81_spill] sm:$0xff]  ;;  %v13509_v6 = vadd.f32 %v13380_v59, %v3574_v46 }
 0x603   :  { %v3849_v60 = vadd.f32 %v3844_v41, %v3824_v30  ;;  %v13439_v25 = vpop.f32.mrf.mxu3  ;;  %v15950_v30 = vld [vmem:[#allocation29_spill] sm:$0xff] }
 0x604   :  { %v13441_v19 = vpop.f32.mrf.mxu0  ;;  %v3046_v41 = vadd.f32 %v15950_v30, %v3030_v58  ;;  %v3804_v63 = vadd.f32 %v13431_v31, %v3779_v38  ;;  %v4351_v59 = vmul.f32 %v13509_v6, %v13509_v6 }
 0x605   :  { %v3874_v54 = vadd.f32 %v3869_v35, %v3849_v60  ;;  %v15951_v60 = vld [vmem:[#allocation92_spill] sm:$0xff] }
 0x606   :  { %v3361_v35 = vadd.f32 %v15951_v60, %v3345_v2  ;;  %v3825_v60 = vadd.f32 %v13433_v61, %v3804_v63 }
 0x607   :  { %v3905_v12 = vadd.f32 %v3900_v8, %v3874_v54 }
 0x608   :  { %v13446_v21 = vpop.f32.mrf.mxu1  ;;  %v3377_v33 = vadd.f32 %v13330_v44, %v3361_v35 }
 0x609   :  { %v13435_v37 = vadd.f32 %v3925_v43, %v3905_v12  ;;  %v15952_v43 = vld [vmem:[#allocation31_spill] sm:$0xff] }
 0x60a   :  { %v3846_v23 = vpop.f32.mrf.mxu2  ;;  %v3062_v53 = vadd.f32 %v15952_v43, %v3046_v41  ;;  %v3393_v18 = vadd.f32 %v13334_v34, %v3377_v33  ;;  %v15956_v34 = vld [vmem:[#allocation59_spill] sm:$0xff] }
 0x60b   :  { %v3850_v35 = vadd.f32 %v3846_v23, %v3825_v60  ;;  %v15961_v23 = vld [vmem:[#allocation80_spill] sm:$0xff] }
 0x60c   :  { %v3969_v9 = vpop.f32.mrf.mxu0  ;;  %v3086_v17 = vadd.f32 %v15953_v55, %v3062_v53  ;;  %v3417_v47 = vadd.f32 %v13337_v22, %v3393_v18  ;;  %v15957_v22 = vld [vmem:[#allocation82_spill] sm:$0xff]  ;;  %v15959_v53 = vld [vmem:[#allocation64_spill] sm:$0xff]  ;;  %v15960_v18 = vld [vmem:[#allocation53_spill] sm:$0xff] }
 0x60e   :  { %v3117_v14 = vadd.f32 %v15954_v24, %v3086_v17  ;;  %v3448_v52 = vadd.f32 %v13340_v48, %v3417_v47 }
 0x610   :  { %v3985_v10 = vpop.f32.mrf.mxu1  ;;  %v3142_v44 = vadd.f32 %v15955_v5, %v3117_v14  ;;  %v15963_v14 = vld [vmem:[#allocation66_spill] sm:$0xff] }
 0x614   :  { %v3971_v12 = vpop.f32.mrf.mxu0 }
 0x618   :  { %v3987_v57 = vpop.f32.mrf.mxu1 }
 0x61b   :  { %v3955_v1 = vpop.f32.mrf.mxu3 }
 0x61c   :  { %v4033_v7 = vpop.f32.mrf.mxu0 }
 0x620   :  { %v4049_v36 = vpop.f32.mrf.mxu1 }
 0x622   :  { %v3941_v4 = vpop.f32.mrf.mxu2 }
 0x623   :  { %v3957_v54 = vpop.f32.mrf.mxu3  ;;  %v3956_v39 = vadd.f32 %v3955_v1, %v3941_v4  ;;  %v3163_v1 = vadd.f32 %v15956_v34, %v3142_v44  ;;  %v3473_v4 = vadd.f32 %v13368_v51, %v3448_v52 }
 0x625   :  { %v3974_v16 = vadd.f32 %v3969_v9, %v3956_v39  ;;  %v3188_v40 = vadd.f32 %v15957_v22, %v3163_v1  ;;  %v4035_v9 = vpop.f32.mrf.mxu0  ;;  %v3494_v20 = vadd.f32 %v13372_v26, %v3473_v4  ;;  %v3875_v26 = vadd.f32 %v13439_v25, %v3850_v35 }
 0x627   :  { %v3990_v42 = vadd.f32 %v3985_v10, %v3974_v16  ;;  %v3213_v41 = vadd.f32 %v15958_v50, %v3188_v40  ;;  %v3519_v10 = vadd.f32 %v13363_v3, %v3494_v20 }
 0x628   :  { %v4051_v30 = vpop.f32.mrf.mxu1 }
 0x629   :  { %v3244_v31 = vadd.f32 %v15959_v53, %v3213_v41 }
 0x62a   :  { %v3943_v8 = vpop.f32.mrf.mxu2 }
 0x62b   :  { %v3958_v56 = vadd.f32 %v3957_v54, %v3943_v8  ;;  %v13482_v3 = vadd.f32 %v15960_v18, %v3244_v31  ;;  %v9716_v31 = vmov 72.0  }
 0x62c   :  { %9489 = vrcp.f32 %v9716_v31 }
 0x62d   :  { %v3975_v27 = vadd.f32 %v3971_v12, %v3958_v56  ;;  %v3544_v12 = vadd.f32 %v13361_v62, %v3519_v10  ;;  %v4129_v33 = vpop.f32.mrf.mxu0  ;;  %v4341_v62 = vmul.f32 %v13482_v3, %v13482_v3  ;;  %v4282_v5 = vsel %vm4263_vm5, %v13482_v3, 0.0 }
 0x62f   :  { %v3991_v51 = vadd.f32 %v3987_v57, %v3975_v27  ;;  %v3575_v61 = vadd.f32 %v13386_v49, %v3544_v12  ;;  %v15962_v57 = vld [vmem:[#allocation50_spill] sm:$0xff] }
 0x630   :  { %v4150_v17 = vpop.f32.mrf.mxu1  ;;  %v3243_v39 = vadd.f32 %v15962_v57, %v15961_v23 }
 0x631   :  { %v13491_v25 = vadd.f32 %v13390_v11, %v3575_v61  ;;  %v4342_v11 = vsel %vm4263_vm5, %v4341_v62, 0.0 }
 0x632   :  { %v13494_v47 = vadd.f32 %v15963_v14, %v3243_v39  ;;  %v9490_v62 = vpop.eup %9489 }
 0x633   :  { %v4352_v44 = vmul.f32 %v13491_v25, %v13491_v25  ;;  %vm4391_vm6 = vweird.f32 %v9490_v62 }
 0x634   :  { %v4340_v29 = vmul.f32 %v13494_v47, %v13494_v47 }
 0x635   :  { %v4131_v16 = vpop.f32.mrf.mxu0 }
 0x636   :  { %v4343_v1 = vadd.f32 %v4342_v11, %v4340_v29 }
 0x638   :  { %v4152_v38 = vpop.f32.mrf.mxu1  ;;  %v4344_v10 = vrot.slane %v4343_v1, 4 }
 0x63a   :  { %v4345_v12 = vadd.f32 %v4344_v10, %v4343_v1 }
 0x63b   :  { %v4017_v13 = vpop.f32.mrf.mxu3 }
 0x63d   :  { %v4231_v20 = vpop.f32.mrf.mxu0 }
 0x640   :  { %v4256_v35 = vpop.f32.mrf.mxu1 }
 0x642   :  { %v4001_v45 = vpop.f32.mrf.mxu2 }
 0x643   :  { %v4006_v58 = vadd.f32 %v4001_v45, %v3990_v42  ;;  %v4019_v15 = vpop.f32.mrf.mxu3  ;;  %v3906_v45 = vadd.f32 %v13441_v19, %v3875_v26  ;;  %v4283_v42 = vadd.f32 %v4282_v5, %v13494_v47 }
 0x645   :  { %v4022_v48 = vadd.f32 %v4017_v13, %v4006_v58  ;;  %v4353_v58 = vsel %vm4263_vm5, %v4352_v44, 0.0  ;;  %v4284_v27 = vrot.slane %v4283_v42, 4  ;;  %v4233_v14 = vpop.f32.mrf.mxu0 }
 0x647   :  { %v4038_v32 = vadd.f32 %v4033_v7, %v4022_v48  ;;  %v4362_v48 = vmul.f32 %v13435_v37, %v13435_v37 }
 0x649   :  { %v4054_v0 = vadd.f32 %v4049_v36, %v4038_v32  ;;  %v13499_v36 = vadd.f32 %v13446_v21, %v3906_v45  ;;  %v4291_v21 = vsel %vm4263_vm5, %v13491_v25, 0.0 }
 0x64a   :  { %v4003_v2 = vpop.f32.mrf.mxu2  ;;  %v4292_v4 = vadd.f32 %v4291_v21, %v13509_v6 }
 0x64b   :  { %v4007_v54 = vadd.f32 %v4003_v2, %v3991_v51  ;;  %v4363_v34 = vmul.f32 %v13499_v36, %v13499_v36 }
 0x64c   :  { %v4293_v60 = vrot.slane %v4292_v4, 4 }
 0x64d   :  { %v4023_v55 = vadd.f32 %v4019_v15, %v4007_v54  ;;  %v4300_v15 = vsel %vm4263_vm5, %v13499_v36, 0.0 }
 0x64e   :  { %v4301_v50 = vadd.f32 %v4300_v15, %v13435_v37 }
 0x64f   :  { %v4039_v24 = vadd.f32 %v4035_v9, %v4023_v55  ;;  %v4364_v9 = vsel %vm4263_vm5, %v4363_v34, 0.0 }
 0x650   :  { %v4365_v54 = vadd.f32 %v4364_v9, %v4362_v48 }
 0x651   :  { %v4055_v19 = vadd.f32 %v4051_v30, %v4039_v24  ;;  %v4354_v30 = vadd.f32 %v4353_v58, %v4351_v59 }
 0x652   :  { %v4366_v55 = vrot.slane %v4365_v54, 4 }
 0x653   :  { %v4355_v32 = vrot.slane %v4354_v30, 4 }
 0x654   :  { %v4367_v46 = vadd.f32 %v4366_v55, %v4365_v54 }
 0x655   :  { %v4356_v61 = vadd.f32 %v4355_v32, %v4354_v30 }
 0x656   :  { %v4368_v29 = vrot.slane %v4367_v46, 2 }
 0x65b   :  { %v4104_v8 = vpop.f32.mrf.mxu3 }
 0x662   :  { %v4073_v43 = vpop.f32.mrf.mxu2 }
 0x663   :  { %v4078_v13 = vadd.f32 %v4073_v43, %v4054_v0  ;;  %v4106_v7 = vpop.f32.mrf.mxu3  ;;  %v4302_v43 = vrot.slane %v4301_v50, 4 }
 0x665   :  { %v4109_v49 = vadd.f32 %v4104_v8, %v4078_v13  ;;  %v4285_v8 = vadd.f32 %v4284_v27, %v4283_v42  ;;  %v4303_v23 = vadd.f32 %v4302_v43, %v4301_v50  ;;  %v4346_v13 = vrot.slane %v4345_v12, 2 }
 0x667   :  { %v4134_v56 = vadd.f32 %v4129_v33, %v4109_v49  ;;  %v4294_v33 = vadd.f32 %v4293_v60, %v4292_v4  ;;  %v4286_v0 = vrot.slane %v4285_v8, 2  ;;  %v4347_v11 = vadd.f32 %v4346_v13, %v4345_v12 }
 0x669   :  { %v4155_v40 = vadd.f32 %v4150_v17, %v4134_v56  ;;  %v4295_v45 = vrot.slane %v4294_v33, 2  ;;  %v4287_v49 = vadd.f32 %v4286_v0, %v4285_v8  ;;  %v4348_v15 = vrot.slane %v4347_v11, 1  ;;  %v15964_v8 = vld [vmem:[#allocation70_spill] sm:$0xff] }
 0x66a   :  { %v4075_v28 = vpop.f32.mrf.mxu2 }
 0x66b   :  { %v4079_v52 = vadd.f32 %v4075_v28, %v4055_v19  ;;  %v4258_v28 = vpop.f32.mrf.mxu1  ;;  %v4357_v19 = vrot.slane %v4356_v61, 2  ;;  %v4296_v44 = vadd.f32 %v4295_v45, %v4294_v33  ;;  %v4288_v21 = vrot.slane %v4287_v49, 1  ;;  %v15965_v33 = vld [vmem:[#allocation71_spill] sm:$0xff] }
 0x66d   :  { %v4110_v2 = vadd.f32 %v4106_v7, %v4079_v52  ;;  %v4358_v34 = vadd.f32 %v4357_v19, %v4356_v61  ;;  %v4289_v9 = vadd.f32 %v4288_v21, %v4287_v49  ;;  %v13540_v19 = vld [vmem:[%s15299_s7 + $0xf8] sm:$0xff] }
 0x66e   :  { %4740 = vmatpush.bf16.msrb.mxu1 %v13540_v19 }
 0x66f   :  { %v4135_v51 = vadd.f32 %v4131_v16, %v4110_v2  ;;  %v4304_v16 = vrot.slane %v4303_v23, 2  ;;  %v4297_v2 = vrot.slane %v4296_v44, 1  ;;  %v4290_v32 = vadd.f32 %v4289_v9, %v15964_v8  ;;  %v13643_v9 = vld [vmem:[%s15299_s7 + $0x58] sm:$0xff]  ;;  %v4384_v8 = vld [vmem:[%s15297_s5] sm:$0x1] }
 0x671   :  { %v4156_v26 = vadd.f32 %v4152_v38, %v4135_v51  ;;  %v4387_v38 = vmul.f32 72.0, %v9490_v62  ;;  %v4305_v1 = vadd.f32 %v4304_v16, %v4303_v23  ;;  %v4298_v10 = vadd.f32 %v4297_v2, %v4296_v44  ;;  %v13550_v16 = vld [vmem:[%s15299_s7 + $0xb8] sm:$0xff]  ;;  %v13559_v44 = vld [vmem:[%s15299_s7 + $0x30] sm:$0xff]  ;;  %v13619_v2 = vld [vmem:[%s15299_s7 + $0x60] sm:$0xff] }
 0x672   :  { %15968 = vst [vmem:[#allocation95_spill] sm:$0xff] %v13550_v16  ;;  %4661 = vmatpush.bf16.msrb.mxu0 %v13550_v16 }
 0x673   :  { %v4306_v30 = vrot.slane %v4305_v1, 1  ;;  %v4299_v55 = vadd.f32 %v4298_v10, %v4290_v32  ;;  %v13667_v10 = vld [vmem:[%s15299_s7 + $0x50] sm:$0xff] }
 0x67b   :  { %v4200_v22 = vpop.f32.mrf.mxu3 }
 0x682   :  { %v4175_v63 = vpop.f32.mrf.mxu2 }
 0x683   :  { %v4180_v41 = vadd.f32 %v4175_v63, %v4155_v40  ;;  %v4202_v39 = vpop.f32.mrf.mxu3  ;;  %v4369_v40 = vadd.f32 %v4368_v29, %v4367_v46  ;;  %v13576_v29 = vld [vmem:[%s15299_s7 + $0xb0] sm:$0xff] }
 0x684   :  { %4662 = vmatpush.bf16.msrb.mxu0 %v13576_v29 }
 0x685   :  { %v4205_v53 = vadd.f32 %v4200_v22, %v4180_v41  ;;  %v4388_v22 = vsub.f32 1.0, %v4387_v38  ;;  %v4349_v41 = vadd.f32 %v4348_v15, %v4347_v11  ;;  %v4370_v51 = vrot.slane %v4369_v40, 1  ;;  %v13571_v38 = vld [vmem:[%s15299_s7 + $0x70] sm:$0xff]  ;;  %v13612_v15 = vld [vmem:[%s15299_s7 + $0xe0] sm:$0xff] }
 0x687   :  { %v4236_v57 = vadd.f32 %v4231_v20, %v4205_v53  ;;  %v4359_v20 = vrot.slane %v4358_v34, 1  ;;  %v4389_v60 = vmul.f32 %v9490_v62, %v4388_v22  ;;  %v4307_v53 = vadd.f32 %v4306_v30, %v4305_v1  ;;  %v13595_v1 = vld [vmem:[%s15299_s7 + $0x68] sm:$0xff] }
 0x688   :  { %v4371_v0 = vadd.f32 %v4370_v51, %v4369_v40  ;;  %v13631_v40 = vld [vmem:[%s15299_s7 + $0x18] sm:$0xff] }
 0x689   :  { %v4261_v5 = vadd.f32 %v4256_v35, %v4236_v57  ;;  %v4360_v43 = vadd.f32 %v4359_v20, %v4358_v34  ;;  %v4308_v57 = vadd.f32 %v4307_v53, %v4299_v55  ;;  %v13588_v34 = vld [vmem:[%s15299_s7 + $0xe8] sm:$0xff]  ;;  %15970 = vst [vmem:[#allocation55_spill] sm:$0xff] %v13631_v40  ;;  %v13648_v20 = vld [vmem:[%s15299_s7 + $0x98] sm:$0xff]  ;;  %v4385_v55 = vld [vmem:[%s15298_s6] sm:$0x1] }
 0x68a   :  { %v4177_v17 = vpop.f32.mrf.mxu2  ;;  %v13699_v53 = vld [vmem:[%s15299_s7 + $0x88] sm:$0xff] }
 0x68b   :  { %v4181_v18 = vadd.f32 %v4177_v17, %v4156_v26  ;;  %v4373_v4 = vmul.f32 %v4261_v5, %v4261_v5  ;;  %v4350_v26 = vadd.f32 %v4349_v41, %v15965_v33  ;;  %v4390_v17 = vadd.f32 %v9490_v62, %v4389_v60  ;;  %v13672_v60 = vld [vmem:[%s15299_s7 + $0x90] sm:$0xff]  ;;  %v13706_v33 = vld [vmem:[%s15299_s7] sm:$0xff] }
 0x68c   :  { %15976 = vst [vmem:[#allocation62_spill] sm:$0xff] %v13706_v33 }
 0x68d   :  { %v4206_v24 = vadd.f32 %v4202_v39, %v4181_v18  ;;  %v4361_v23 = vadd.f32 %v4360_v43, %v4350_v26  ;;  %v4392_v45 = vsel %vm4391_vm6, %v9490_v62, %v4390_v17  ;;  %v13545_v62 = vld [vmem:[%s15299_s7 + $0x78] sm:$0xff]  ;;  %v13694_v43 = vld [vmem:[%s15299_s7 + $0x48] sm:$0xff]  ;;  %v13711_v26 = vld [vmem:[%s15299_s7 + $0xc0] sm:$0xff] }
 0x68e   :  { %15967 = vst [vmem:[#allocation94_spill] sm:$0xff] %v13545_v62  ;;  %4521 = vmatpush.bf16.msra.mxu2 %v13545_v62  ;;  %v13721_v17 = vld [vmem:[%s15299_s7 + $0x178] sm:$0xff] }
 0x68f   :  { %v4237_v7 = vadd.f32 %v4233_v14, %v4206_v24  ;;  %v4372_v14 = vadd.f32 %v4371_v0, %v4361_v23  ;;  %15977 = vst [vmem:[#allocation76_spill] sm:$0xff] %v13711_v26  ;;  %v13726_v0 = vld [vmem:[%s15299_s7 + $0x1f8] sm:$0xff]  ;;  %v13734_v23 = vld [vmem:[%s15299_s7 + $0x40] sm:$0xff] }
 0x690   :  { %15978 = vst [vmem:[#allocation77_spill] sm:$0xff] %v13721_v17 }
 0x691   :  { %v4262_v52 = vadd.f32 %v4258_v28, %v4237_v7  ;;  %v13535_v28 = vld [vmem:[%s15299_s7 + $0x38] sm:$0xff]  ;;  %15979 = vst [vmem:[#allocation45_spill] sm:$0xff] %v13726_v0 }
 0x692   :  { %15966 = vst [vmem:[#allocation93_spill] sm:$0xff] %v13535_v28  ;;  %4582 = vmatpush.bf16.msra.mxu3 %v13535_v28  ;;  %4522 = vmatpush.bf16.msra.mxu2 %v13571_v38 }
 0x693   :  { %v4309_v56 = vsel %vm4263_vm5, %v4262_v52, 0.0  ;;  %v4374_v42 = vmul.f32 %v4262_v52, %v4262_v52  ;;  %v13564_v52 = vld [vmem:[%s15299_s7 + $0xf0] sm:$0xff] }
 0x694   :  { %v4310_v58 = vadd.f32 %v4309_v56, %v4261_v5  ;;  %4741 = vmatpush.bf16.msrb.mxu1 %v13564_v52 }
 0x695   :  { %v4375_v59 = vsel %vm4263_vm5, %v4374_v42, 0.0  ;;  %v13583_v42 = vld [vmem:[%s15299_s7 + $0x28] sm:$0xff] }
 0x696   :  { %v4311_v63 = vrot.slane %v4310_v58, 4  ;;  %v4376_v27 = vadd.f32 %v4375_v59, %v4373_v4  ;;  %4583 = vmatpush.bf16.msra.mxu3 %v13559_v44  ;;  %v13600_v4 = vld [vmem:[%s15299_s7 + $0xa8] sm:$0xff]  ;;  %4523 = vmatpush.bf16.msra.mxu2 %v13595_v1  ;;  %v13624_v59 = vld [vmem:[%s15299_s7 + $0xa0] sm:$0xff] }
 0x697   :  { %4663 = vmatpush.bf16.msrb.mxu0 %v13600_v4 }
 0x698   :  { %v4312_v48 = vadd.f32 %v4311_v63, %v4310_v58  ;;  %v4377_v50 = vrot.slane %v4376_v27, 4  ;;  %4742 = vmatpush.bf16.msrb.mxu1 %v13588_v34  ;;  %v13607_v58 = vld [vmem:[%s15299_s7 + $0x20] sm:$0xff]  ;;  %v13636_v63 = vld [vmem:[%s15299_s7 + $0xd8] sm:$0xff] }
 0x699   :  { %15969 = vst [vmem:[#allocation96_spill] sm:$0xff] %v13607_v58 }
 0x69a   :  { %v4313_v35 = vrot.slane %v4312_v48, 2  ;;  %v4378_v54 = vadd.f32 %v4377_v50, %v4376_v27  ;;  %4584 = vmatpush.bf16.msra.mxu3 %v13583_v42  ;;  %15971 = vst [vmem:[#allocation7_spill] sm:$0xff] %v13636_v63  ;;  %4524 = vmatpush.bf16.msra.mxu2 %v13619_v2  ;;  %v13660_v50 = vld [vmem:[%s15299_s7 + $0xd0] sm:$0xff] }
 0x69b   :  { %4664 = vmatpush.bf16.msrb.mxu0 %v13624_v59  ;;  %15973 = vst [vmem:[#allocation52_spill] sm:$0xff] %v13660_v50 }
 0x69c   :  { %v4314_v31 = vadd.f32 %v4313_v35, %v4312_v48  ;;  %v4379_v12 = vrot.slane %v4378_v54, 2  ;;  %4743 = vmatpush.bf16.msrb.mxu1 %v13612_v15  ;;  %v13655_v48 = vld [vmem:[%s15299_s7 + $0x10] sm:$0xff]  ;;  %v13679_v35 = vld [vmem:[%s15299_s7 + $0x8] sm:$0xff] }
 0x69d   :  { %15972 = vst [vmem:[#allocation54_spill] sm:$0xff] %v13655_v48 }
 0x69e   :  { %v4315_v18 = vrot.slane %v4314_v31, 1  ;;  %v4380_v61 = vadd.f32 %v4379_v12, %v4378_v54  ;;  %4585 = vmatpush.bf16.msra.mxu3 %v13607_v58  ;;  %4525 = vmatpush.bf16.msra.mxu2 %v13643_v9  ;;  %15974 = vst [vmem:[#allocation20_spill] sm:$0xff] %v13679_v35  ;;  %v13684_v54 = vld [vmem:[%s15299_s7 + $0xc8] sm:$0xff] }
 0x69f   :  { %4665 = vmatpush.bf16.msrb.mxu0 %v13648_v20  ;;  %15975 = vst [vmem:[#allocation60_spill] sm:$0xff] %v13684_v54 }
 0x6a0   :  { %v4316_v39 = vadd.f32 %v4315_v18, %v4314_v31  ;;  %v4381_v13 = vrot.slane %v4380_v61, 1  ;;  %4744 = vmatpush.bf16.msrb.mxu1 %v13636_v63 }
 0x6a2   :  { %v4317_v24 = vadd.f32 %v4316_v39, %v4308_v57  ;;  %v4382_v46 = vadd.f32 %v4381_v13, %v4380_v61  ;;  %4586 = vmatpush.bf16.msra.mxu3 %v13631_v40  ;;  %4526 = vmatpush.bf16.msra.mxu2 %v13667_v10  ;;  %v13739_v57 = vld [vmem:[%s15299_s7 + $0x80] sm:$0xff]  ;;  %v13744_v39 = vld [vmem:[%s15299_s7 + $0x138] sm:$0xff] }
 0x6a3   :  { %4666 = vmatpush.bf16.msrb.mxu0 %v13672_v60  ;;  %v13749_v13 = vld [vmem:[%s15299_s7 + $0x1b8] sm:$0xff] }
 0x6a4   :  { %v4383_v49 = vadd.f32 %v4382_v46, %v4372_v14  ;;  %v13530_v7 = vmul.f32 %v4392_v45, %v4317_v24  ;;  %4745 = vmatpush.bf16.msrb.mxu1 %v13660_v50  ;;  %15980 = vst [vmem:[#allocation86_spill] sm:$0xff] %v13749_v13  ;;  %v15981_v24 = vld [vmem:[#allocation12_spill] sm:$0xff]  ;;  %v15982_v46 = vld [vmem:[#allocation69_spill] sm:$0xff] }
 0x6a5   :  { %v13949_v50 = vld [vmem:[%s15299_s7 + $0x238] sm:$0xff] }
 0x6a6   :  { %v4394_v5 = vmul.f32 %v4392_v45, %v4383_v49  ;;  %v4395_v11 = vmul.f32 %v13530_v7, %v13530_v7  ;;  %4587 = vmatpush.bf16.msra.mxu3 %v13655_v48  ;;  %4527 = vmatpush.bf16.msra.mxu2 %v13694_v43 }
 0x6a7   :  { %4667 = vmatpush.bf16.msrb.mxu0 %v13699_v53 }
 0x6a8   :  { %v4396_v21 = vsub.f32 %v4394_v5, %v4395_v11  ;;  %4746 = vmatpush.bf16.msrb.mxu1 %v13684_v54  ;;  %v13767_v5 = vld [vmem:[%s15299_s7 + $0x1f0] sm:$0xff]  ;;  %v13930_v54 = vld [vmem:[%s15299_s7 + $0x1c0] sm:$0xff] }
 0x6a9   :  { %15984 = vst [vmem:[#allocation90_spill] sm:$0xff] %v13767_v5 }
 0x6aa   :  { %v4397_v56 = vadd.f32 1e-05, %v4396_v21  ;;  %4588 = vmatpush.bf16.msra.mxu3 %v13679_v35  ;;  %4528 = vmatpush.bf16.msra.mxu2 %v13734_v23  ;;  %v13778_v21 = vld [vmem:[%s15299_s7 + $0x130] sm:$0xff]  ;;  %16004 = vst [vmem:[#allocation26_spill] sm:$0xff] %v13930_v54 }
 0x6ab   :  { %4668 = vmatpush.bf16.msrb.mxu0 %v13739_v57 }
 0x6ac   :  { %9491 = vrsqrt.f32 %v4397_v56  ;;  %vm4404_vm8 = vweird.f32 %v4397_v56  ;;  %4747 = vmatpush.bf16.msrb.mxu1 %v13711_v26  ;;  %v13925_v26 = vld [vmem:[%s15299_s7 + $0x140] sm:$0xff] }
 0x6ad   :  { %16003 = vst [vmem:[#allocation46_spill] sm:$0xff] %v13925_v26 }
 0x6ae   :  { %4589 = vmatpush.bf16.msra.mxu3 %v13706_v33  ;;  %4821 = vmatpush.bf16.msrb.mxu2 %v13744_v39 }
 0x6af   :  { %4980 = vmatpush.bf16.msra.mxu0 %v13749_v13 }
 0x6b0   :  { %5061 = vmatpush.bf16.msra.mxu1 %v13726_v0  ;;  %v13913_v0 = vld [vmem:[%s15299_s7 + $0x108] sm:$0xff] }
 0x6b1   :  { %16001 = vst [vmem:[#allocation58_spill] sm:$0xff] %v13913_v0 }
 0x6b2   :  { %v9492_v22 = vpop.eup %9491  ;;  %4901 = vmatpush.bf16.msrb.mxu3 %v13721_v17  ;;  %4822 = vmatpush.bf16.msrb.mxu2 %v13778_v21 }
 0x6b3   :  { %v4399_v27 = vmul.f32 %v9492_v22, %v4397_v56  ;;  %vm4405_vm7 = vweird.f32 %v9492_v22  ;;  %v13783_v56 = vld [vmem:[%s15299_s7 + $0x1b0] sm:$0xff] }
 0x6b4   :  { %vm4406_vm9 = vmor %vm4404_vm8, %vm4405_vm7  ;;  %15985 = vst [vmem:[#allocation6_spill] sm:$0xff] %v13783_v56  ;;  %5062 = vmatpush.bf16.msra.mxu1 %v13767_v5  ;;  %4981 = vmatpush.bf16.msra.mxu0 %v13783_v56  ;;  %v13906_v5 = vld [vmem:[%s15299_s7 + $0x1c8] sm:$0xff] }
 0x6b5   :  { %v4400_v30 = vmul.f32 %v9492_v22, %v4399_v27  ;;  %16000 = vst [vmem:[#allocation63_spill] sm:$0xff] %v13906_v5 }
 0x6b7   :  { %v4401_v41 = vmul.f32 0.5, %v4400_v30  ;;  %v13792_v30 = vld [vmem:[%s15299_s7 + $0x168] sm:$0xff] }
 0x6b8   :  { %15986 = vst [vmem:[#allocation97_spill] sm:$0xff] %v13792_v30 }
 0x6b9   :  { %v4402_v51 = vsub.f32 1.5, %v4401_v41  ;;  %v13797_v41 = vld [vmem:[%s15299_s7 + $0x1e8] sm:$0xff] }
 0x6ba   :  { %15987 = vst [vmem:[#allocation11_spill] sm:$0xff] %v13797_v41  ;;  %5063 = vmatpush.bf16.msra.mxu1 %v13797_v41  ;;  %v13901_v41 = vld [vmem:[%s15299_s7 + $0x148] sm:$0xff] }
 0x6bb   :  { %v4403_v32 = vmul.f32 %v9492_v22, %v4402_v51  ;;  %15999 = vst [vmem:[#allocation40_spill] sm:$0xff] %v13901_v41 }
 0x6bd   :  { %v4407_v31 = vsel %vm4406_vm9, %v9492_v22, %v4403_v32  ;;  %v13808_v32 = vld [vmem:[%s15299_s7 + $0x128] sm:$0xff] }
 0x6be   :  { %v4408_v12 = vmul.f32 %v4407_v31, %v4384_v8  ;;  %v13813_v31 = vld [vmem:[%s15299_s7 + $0x1a8] sm:$0xff]  ;;  %4823 = vmatpush.bf16.msrb.mxu2 %v13808_v32 }
 0x6bf   :  { %15988 = vst [vmem:[#allocation34_spill] sm:$0xff] %v13813_v31  ;;  %4982 = vmatpush.bf16.msra.mxu0 %v13813_v31 }
 0x6c0   :  { %v4409_v18 = vmul.f32 %v4408_v12, %v13530_v7  ;;  %v13729_v61 = vperm.slane %v4408_v12, 0  ;;  %v13762_v7 = vld [vmem:[%s15299_s7 + $0x170] sm:$0xff] }
 0x6c1   :  { %15983 = vst [vmem:[#allocation89_spill] sm:$0xff] %v13762_v7  ;;  %4902 = vmatpush.bf16.msrb.mxu3 %v13762_v7 }
 0x6c2   :  { %v4410_v45 = vsub.f32 %v4385_v55, %v4409_v18  ;;  %v4414_v14 = vmul.f32 %v13729_v61, %v15981_v24  ;;  %v4421_v49 = vmul.f32 %v13729_v61, %v15982_v46  ;;  %v13824_v18 = vld [vmem:[%s15299_s7 + $0x160] sm:$0xff]  ;;  %v4425_v46 = vmul.f32 %v13729_v61, %v13494_v47  ;;  %v13865_v47 = vld [vmem:[%s15299_s7 + $0x118] sm:$0xff] }
 0x6c3   :  { %15989 = vst [vmem:[#allocation35_spill] sm:$0xff] %v13824_v18  ;;  %v13838_v24 = vld [vmem:[%s15299_s7 + $0x120] sm:$0xff]  ;;  %v4426_v63 = vmul.f32 %v13729_v61, %v13482_v3  ;;  %v13979_v3 = vld [vmem:[%s15299_s7 + $0x230] sm:$0xff] }
 0x6c4   :  { %v13769_v11 = vperm.slane %v4410_v45, 0  ;;  %v13829_v45 = vld [vmem:[%s15299_s7 + $0x1e0] sm:$0xff]  ;;  %4824 = vmatpush.bf16.msrb.mxu2 %v13838_v24 }
 0x6c5   :  { %4903 = vmatpush.bf16.msrb.mxu3 %v13792_v30  ;;  %15990 = vst [vmem:[#allocation15_spill] sm:$0xff] %v13829_v45  ;;  %5064 = vmatpush.bf16.msra.mxu1 %v13829_v45  ;;  %v13889_v45 = vld [vmem:[%s15299_s7 + $0x110] sm:$0xff] }
 0x6c6   :  { %v4419_v22 = vadd.f32 %v13769_v11, %v4414_v14  ;;  %v4423_v27 = vadd.f32 %v4421_v49, %v13769_v11  ;;  %v13843_v14 = vld [vmem:[%s15299_s7 + $0x1a0] sm:$0xff]  ;;  %v13852_v49 = vld [vmem:[%s15299_s7 + $0x158] sm:$0xff]  ;;  %15997 = vst [vmem:[#allocation16_spill] sm:$0xff] %v13889_v45 }
 0x6c7   :  { %15991 = vst [vmem:[#allocation9_spill] sm:$0xff] %v13843_v14  ;;  %4983 = vmatpush.bf16.msra.mxu0 %v13843_v14 }
 0x6c8   :  { %v13799_v51 = vpack.c.bf16 %v4419_v22, %v4419_v22  ;;  %v13801_v8 = vpack.c.bf16 %v4423_v27, %v4423_v27  ;;  %15992 = vst [vmem:[#allocation36_spill] sm:$0xff] %v13852_v49  ;;  %v13857_v22 = vld [vmem:[%s15299_s7 + $0x1d8] sm:$0xff]  ;;  %v4427_v27 = vadd.f32 %v4425_v46, %v13769_v11  ;;  %v13877_v46 = vld [vmem:[%s15299_s7 + $0x150] sm:$0xff]  ;;  %4825 = vmatpush.bf16.msrb.mxu2 %v13865_v47 }
 0x6c9   :  { %4904 = vmatpush.bf16.msrb.mxu3 %v13824_v18  ;;  %15993 = vst [vmem:[#allocation8_spill] sm:$0xff] %v13857_v22  ;;  %5065 = vmatpush.bf16.msra.mxu1 %v13857_v22  ;;  %v13894_v22 = vld [vmem:[%s15299_s7 + $0x190] sm:$0xff] }
 0x6ca   :  { %4590 = vmatmul.bf16.vlgmr.msra.gmra.mxu3 %v13799_v51  ;;  %4748 = vmatmul.bf16.vlgmr.msrb.gmra.mxu1 %v13801_v8  ;;  %v4471_v12 = vrot.slane %v13799_v51, 1  ;;  %v15503_v55 = vrot.slane %v13799_v51, 2  ;;  %15995 = vst [vmem:[#allocation17_spill] sm:$0xff] %v13877_v46 }
 0x6cb   :  { %15998 = vst [vmem:[#allocation18_spill] sm:$0xff] %v13894_v22 }
 0x6cc   :  { %4529 = vmatmul.bf16.vlgmr.msra.gmra.mxu2 %v4471_v12  ;;  %4669 = vmatmul.bf16.vlgmr.msrb.gmra.mxu0 %v15503_v55  ;;  %v13870_v12 = vld [vmem:[%s15299_s7 + $0x198] sm:$0xff]  ;;  %v13882_v55 = vld [vmem:[%s15299_s7 + $0x1d0] sm:$0xff] }
 0x6cd   :  { %15994 = vst [vmem:[#allocation13_spill] sm:$0xff] %v13870_v12  ;;  %4905 = vmatpush.bf16.msrb.mxu3 %v13852_v49  ;;  %4984 = vmatpush.bf16.msra.mxu0 %v13870_v12 }
 0x6ce   :  { %15996 = vst [vmem:[#allocation19_spill] sm:$0xff] %v13882_v55  ;;  %5066 = vmatpush.bf16.msra.mxu1 %v13882_v55  ;;  %4826 = vmatpush.bf16.msrb.mxu2 %v13889_v45  ;;  %v13918_v55 = vld [vmem:[%s15299_s7 + $0x188] sm:$0xff]  ;;  %v16008_v45 = vld [vmem:[#allocation56_spill] sm:$0xff] }
 0x6cf   :  { %16002 = vst [vmem:[#allocation24_spill] sm:$0xff] %v13918_v55  ;;  %v4422_v49 = vmul.f32 %v13729_v61, %v16008_v45 }
 0x6d1   :  { %4906 = vmatpush.bf16.msrb.mxu3 %v13877_v46  ;;  %4985 = vmatpush.bf16.msra.mxu0 %v13894_v22  ;;  %v13944_v46 = vpack.c.bf16 %v4427_v27, %v4427_v27  ;;  %v4433_v22 = vmul.f32 %v13729_v61, %v13435_v37  ;;  %v13982_v45 = vadd.f32 %v4422_v49, %v13769_v11 }
 0x6d2   :  { %5067 = vmatpush.bf16.msra.mxu1 %v13906_v5  ;;  %4827 = vmatpush.bf16.msrb.mxu2 %v13913_v0  ;;  %v13942_v5 = vld [vmem:[%s15299_s7 + $0x180] sm:$0xff]  ;;  %v16007_v0 = vld [vmem:[#allocation68_spill] sm:$0xff]  ;;  %v4430_v37 = vmul.f32 %v13729_v61, %v13491_v25 }
 0x6d3   :  { %16006 = vst [vmem:[#allocation65_spill] sm:$0xff] %v13942_v5  ;;  %v13998_v49 = vadd.f32 %v4433_v22, %v13769_v11  ;;  %v14050_v22 = vld [vmem:[%s15299_s7 + $0x208] sm:$0xff] }
 0x6d4   :  { %v14006_v25 = vadd.f32 %v4430_v37, %v13769_v11  ;;  %v5155_v37 = vrot.slane %v13799_v51, 3 }
 0x6d5   :  { %4907 = vmatpush.bf16.msrb.mxu3 %v13901_v41  ;;  %4986 = vmatpush.bf16.msra.mxu0 %v13918_v55  ;;  %v13937_v41 = vld [vmem:[%s15299_s7 + $0x100] sm:$0xff]  ;;  %v4415_v55 = vmul.f32 %v13729_v61, %v16007_v0  ;;  %v15546_v0 = vrot.slane %v13944_v46, 1  ;;  %16010 = vst [vmem:[#allocation61_spill] sm:$0xff] %v13998_v49 }
 0x6d6   :  { %16005 = vst [vmem:[#allocation47_spill] sm:$0xff] %v13937_v41  ;;  %5068 = vmatpush.bf16.msra.mxu1 %v13930_v54  ;;  %4828 = vmatpush.bf16.msrb.mxu2 %v13937_v41  ;;  %v4771_v54 = vrot.slane %v13801_v8, 1  ;;  %v16020_v49 = vld [vmem:[#allocation58_spill] sm:$0xff] }
 0x6d7   :  { %v13959_v27 = vadd.f32 %v13769_v11, %v4415_v55  ;;  %v4434_v55 = vmul.f32 %v13729_v61, %v13499_v36  ;;  %v16009_v36 = vrot.slane %v13801_v8, 2  ;;  %16012 = vst [vmem:[#allocation67_spill] sm:$0xff] %v14006_v25  ;;  %v16013_v25 = vrot.slane %v13799_v51, 2  ;;  %v16014_v51 = vld [vmem:[#allocation7_spill] sm:$0xff] }
 0x6d9   :  { %4908 = vmatpush.bf16.msrb.mxu3 %v13925_v26  ;;  %4987 = vmatpush.bf16.msra.mxu0 %v13942_v5 }
 0x6da   :  { %5184 = vmatpush.bf16.msrb.mxu1 %v13550_v16  ;;  %v4429_v16 = vmul.f32 %v13729_v61, %v13509_v6  ;;  %5141 = vmatpush.bf16.msra.mxu2 %v13949_v50  ;;  %v13985_v6 = vadd.f32 %v4426_v63, %v13769_v11  ;;  %v14001_v63 = vadd.f32 %v4434_v55, %v13769_v11  ;;  %v14032_v61 = vld [vmem:[%s15299_s7 + $0x218] sm:$0xff]  ;;  %v14059_v55 = vld [vmem:[%s15299_s7 + $0x200] sm:$0xff] }
 0x6db   :  { %5069 = vmatmul.bf16.vlgmr.msra.gmra.mxu1 %v15546_v0  ;;  %v14073_v0 = vrot.slane %v13944_v46, 2 }
 0x6dc   :  { %4909 = vmatmul.bf16.vlgmr.msrb.gmra.mxu3 %v16009_v36  ;;  %16011 = vst [vmem:[#allocation49_spill] sm:$0xff] %v14001_v63  ;;  %4829 = vmatmul.bf16.vlgmr.msrb.gmra.mxu2 %v4771_v54  ;;  %v14023_v54 = vld [vmem:[%s15299_s7 + $0x220] sm:$0xff]  ;;  %v5183_v36 = vpack.c.bf16 %v13959_v27, %v13959_v27  ;;  %v16015_v27 = vld [vmem:[#allocation36_spill] sm:$0xff] }
 0x6dd   :  { %5157 = vmatpush.bf16.msra.mxu3 %v13545_v62  ;;  %5170 = vmatpush.bf16.msrb.mxu0 %v13535_v28  ;;  %v13995_v62 = vadd.f32 %v4429_v16, %v13769_v11  ;;  %v14014_v16 = vld [vmem:[%s15299_s7 + $0x228] sm:$0xff]  ;;  %v14041_v11 = vld [vmem:[%s15299_s7 + $0x210] sm:$0xff]  ;;  %v16019_v63 = vld [vmem:[#allocation17_spill] sm:$0xff]  ;;  %s6996_s7 = sshll.u32 %s9718_s19, 4  ;;  %s6997_s7 = int_to_ptr.vmem [resolvable:$true] %s6996_s7 }
 0x6de   :  { %5185 = vmatpush.bf16.msrb.mxu1 %v13576_v29  ;;  %4988 = vmatmul.bf16.vlgmr.msra.gmra.mxu0 %v13944_v46 }
 0x6df   :  { %5142 = vmatpush.bf16.msra.mxu2 %v13979_v3 }
 0x6e1   :  { %5158 = vmatpush.bf16.msra.mxu3 %v13571_v38  ;;  %5171 = vmatpush.bf16.msrb.mxu0 %v13559_v44 }
 0x6e2   :  { %5186 = vmatpush.bf16.msrb.mxu1 %v13600_v4 }
 0x6e3   :  { %5143 = vmatpush.bf16.msra.mxu2 %v14014_v16 }
 0x6e5   :  { %5159 = vmatpush.bf16.msra.mxu3 %v13595_v1  ;;  %5172 = vmatpush.bf16.msrb.mxu0 %v13583_v42 }
 0x6e6   :  { %5187 = vmatpush.bf16.msrb.mxu1 %v13624_v59 }
 0x6e7   :  { %5144 = vmatpush.bf16.msra.mxu2 %v14023_v54 }
 0x6e9   :  { %5160 = vmatpush.bf16.msra.mxu3 %v13619_v2  ;;  %5173 = vmatpush.bf16.msrb.mxu0 %v13607_v58 }
 0x6ea   :  { %5188 = vmatpush.bf16.msrb.mxu1 %v13648_v20 }
 0x6eb   :  { %5145 = vmatpush.bf16.msra.mxu2 %v14032_v61 }
 0x6ed   :  { %5161 = vmatpush.bf16.msra.mxu3 %v13643_v9  ;;  %5174 = vmatpush.bf16.msrb.mxu0 %v13631_v40 }
 0x6ee   :  { %5189 = vmatpush.bf16.msrb.mxu1 %v13672_v60 }
 0x6ef   :  { %5146 = vmatpush.bf16.msra.mxu2 %v14041_v11 }
 0x6f1   :  { %5162 = vmatpush.bf16.msra.mxu3 %v13667_v10  ;;  %5175 = vmatpush.bf16.msrb.mxu0 %v13655_v48 }
 0x6f2   :  { %5190 = vmatpush.bf16.msrb.mxu1 %v13699_v53 }
 0x6f3   :  { %5147 = vmatpush.bf16.msra.mxu2 %v14050_v22 }
 0x6f5   :  { %5163 = vmatpush.bf16.msra.mxu3 %v13694_v43  ;;  %5176 = vmatpush.bf16.msrb.mxu0 %v13679_v35 }
 0x6f6   :  { %5191 = vmatpush.bf16.msrb.mxu1 %v13739_v57 }
 0x6f7   :  { %5148 = vmatpush.bf16.msra.mxu2 %v14059_v55 }
 0x6f9   :  { %5164 = vmatpush.bf16.msra.mxu3 %v13734_v23  ;;  %5177 = vmatpush.bf16.msrb.mxu0 %v13706_v33 }
 0x6fa   :  { %5243 = vmatpush.bf16.msra.mxu1 %v13749_v13  ;;  %5149 = vmatmul.bf16.vlgmr.msra.gmra.mxu2 %v14073_v0  ;;  %v16025_v13 = vld [vmem:[#allocation45_spill] sm:$0xff] }
 0x6fb   :  { %5198 = vmatpush.bf16.msrb.mxu2 %v13540_v19  ;;  %5192 = vmatmul.bf16.vlgmr.msrb.gmra.mxu1 %v5183_v36  ;;  %v16018_v36 = vld [vmem:[#allocation52_spill] sm:$0xff] }
 0x6fc   :  { %5165 = vmatmul.bf16.vlgmr.msra.gmra.mxu3 %v5155_v37  ;;  %5178 = vmatmul.bf16.vlgmr.msrb.gmra.mxu0 %v16013_v25  ;;  %v16016_v25 = vld [vmem:[#allocation16_spill] sm:$0xff]  ;;  %v16017_v37 = vld [vmem:[#allocation18_spill] sm:$0xff] }
 0x6fd   :  { %5214 = vmatpush.bf16.msrb.mxu3 %v13744_v39  ;;  %5229 = vmatpush.bf16.msra.mxu0 %v13721_v17 }
 0x6fe   :  { %5244 = vmatpush.bf16.msra.mxu1 %v13783_v56  ;;  %v16023_v56 = vld [vmem:[#allocation40_spill] sm:$0xff] }
 0x6ff   :  { %5199 = vmatpush.bf16.msrb.mxu2 %v13564_v52 }
 0x701   :  { %5215 = vmatpush.bf16.msrb.mxu3 %v13778_v21  ;;  %5230 = vmatpush.bf16.msra.mxu0 %v13762_v7 }
 0x702   :  { %5245 = vmatpush.bf16.msra.mxu1 %v13813_v31  ;;  %v16022_v31 = vld [vmem:[#allocation60_spill] sm:$0xff] }
 0x703   :  { %5200 = vmatpush.bf16.msrb.mxu2 %v13588_v34 }
 0x705   :  { %5216 = vmatpush.bf16.msrb.mxu3 %v13808_v32  ;;  %5231 = vmatpush.bf16.msra.mxu0 %v13792_v30 }
 0x706   :  { %5246 = vmatpush.bf16.msra.mxu1 %v13843_v14  ;;  %v16021_v14 = vld [vmem:[#allocation24_spill] sm:$0xff] }
 0x707   :  { %5201 = vmatpush.bf16.msrb.mxu2 %v13612_v15 }
 0x709   :  { %5217 = vmatpush.bf16.msrb.mxu3 %v13838_v24  ;;  %5232 = vmatpush.bf16.msra.mxu0 %v13824_v18 }
 0x70a   :  { %5247 = vmatpush.bf16.msra.mxu1 %v13870_v12  ;;  %v16024_v12 = vld [vmem:[#allocation76_spill] sm:$0xff] }
 0x70b   :  { %5202 = vmatpush.bf16.msrb.mxu2 %v16014_v51 }
 0x70d   :  { %5218 = vmatpush.bf16.msrb.mxu3 %v13865_v47  ;;  %5233 = vmatpush.bf16.msra.mxu0 %v16015_v27 }
 0x70e   :  { %5248 = vmatpush.bf16.msra.mxu1 %v16017_v37  ;;  %v5212_v37 = vrot.slane %v13801_v8, 3 }
 0x70f   :  { %5203 = vmatpush.bf16.msrb.mxu2 %v16018_v36 }
 0x711   :  { %5219 = vmatpush.bf16.msrb.mxu3 %v16016_v25  ;;  %5234 = vmatpush.bf16.msra.mxu0 %v16019_v63 }
 0x712   :  { %5249 = vmatpush.bf16.msra.mxu1 %v16021_v14  ;;  %v5228_v14 = vpack.c.bf16 %v13982_v45, %v13982_v45  ;;  %v16029_v45 = vld [vmem:[#allocation11_spill] sm:$0xff] }
 0x713   :  { %5204 = vmatpush.bf16.msrb.mxu2 %v16022_v31 }
 0x715   :  { %5220 = vmatpush.bf16.msrb.mxu3 %v16020_v49  ;;  %5235 = vmatpush.bf16.msra.mxu0 %v16023_v56 }
 0x716   :  { %5250 = vmatpush.bf16.msra.mxu1 %v13942_v5  ;;  %v16027_v5 = vrot.slane %v13801_v8, 2  ;;  %v16031_v8 = vld [vmem:[#allocation8_spill] sm:$0xff] }
 0x717   :  { %5205 = vmatpush.bf16.msrb.mxu2 %v16024_v12 }
 0x719   :  { %5221 = vmatpush.bf16.msrb.mxu3 %v13937_v41  ;;  %5236 = vmatpush.bf16.msra.mxu0 %v13925_v26  ;;  %v16026_v41 = vld [vmem:[#allocation94_spill] sm:$0xff] }
 0x71a   :  { %5301 = vmatpush.bf16.msrb.mxu1 %v13535_v28  ;;  %5206 = vmatmul.bf16.vlgmr.msrb.gmra.mxu2 %v16027_v5  ;;  %v16028_v28 = vld [vmem:[#allocation90_spill] sm:$0xff]  ;;  %v16030_v5 = vld [vmem:[#allocation15_spill] sm:$0xff] }
 0x71b   :  { %5251 = vmatmul.bf16.vlgmr.msra.gmra.mxu1 %v14073_v0  ;;  %5259 = vmatpush.bf16.msra.mxu2 %v16025_v13 }
 0x71c   :  { %5222 = vmatmul.bf16.vlgmr.msrb.gmra.mxu3 %v5212_v37  ;;  %5237 = vmatmul.bf16.vlgmr.msra.gmra.mxu0 %v5228_v14  ;;  %v16032_v14 = vld [vmem:[#allocation19_spill] sm:$0xff] }
 0x71d   :  { %5274 = vmatpush.bf16.msra.mxu3 %v13949_v50  ;;  %5288 = vmatpush.bf16.msrb.mxu0 %v16026_v41  ;;  %v16033_v37 = vld [vmem:[#allocation63_spill] sm:$0xff] }
 0x71e   :  { %5302 = vmatpush.bf16.msrb.mxu1 %v13559_v44 }
 0x71f   :  { %5260 = vmatpush.bf16.msra.mxu2 %v16028_v28 }
 0x721   :  { %5275 = vmatpush.bf16.msra.mxu3 %v13979_v3  ;;  %5289 = vmatpush.bf16.msrb.mxu0 %v13571_v38 }
 0x722   :  { %5303 = vmatpush.bf16.msrb.mxu1 %v13583_v42 }
 0x723   :  { %5261 = vmatpush.bf16.msra.mxu2 %v16029_v45 }
 0x725   :  { %5276 = vmatpush.bf16.msra.mxu3 %v14014_v16  ;;  %5290 = vmatpush.bf16.msrb.mxu0 %v13595_v1 }
 0x726   :  { %5304 = vmatpush.bf16.msrb.mxu1 %v13607_v58  ;;  %v16036_v58 = vld [vmem:[#allocation95_spill] sm:$0xff] }
 0x727   :  { %5262 = vmatpush.bf16.msra.mxu2 %v16030_v5 }
 0x729   :  { %5277 = vmatpush.bf16.msra.mxu3 %v14023_v54  ;;  %5291 = vmatpush.bf16.msrb.mxu0 %v13619_v2 }
 0x72a   :  { %5305 = vmatpush.bf16.msrb.mxu1 %v13631_v40  ;;  %v16035_v40 = vld [vmem:[#allocation26_spill] sm:$0xff] }
 0x72b   :  { %5263 = vmatpush.bf16.msra.mxu2 %v16031_v8 }
 0x72d   :  { %5278 = vmatpush.bf16.msra.mxu3 %v14032_v61  ;;  %5292 = vmatpush.bf16.msrb.mxu0 %v13643_v9 }
 0x72e   :  { %5306 = vmatpush.bf16.msrb.mxu1 %v13655_v48  ;;  %v14146_v48 = vpack.c.bf16 %v13985_v6, %v13985_v6  ;;  %v16037_v6 = vrot.slane %v13944_v46, 1 }
 0x72f   :  { %5264 = vmatpush.bf16.msra.mxu2 %v16032_v14 }
 0x730   :  { %16034 = vst [vmem:[#allocation37_spill] sm:$0xff] %v14146_v48 }
 0x731   :  { %5279 = vmatpush.bf16.msra.mxu3 %v14041_v11  ;;  %5293 = vmatpush.bf16.msrb.mxu0 %v13667_v10 }
 0x732   :  { %5307 = vmatpush.bf16.msrb.mxu1 %v13679_v35  ;;  %v15566_v35 = vrot.slane %v13944_v46, 3 }
 0x733   :  { %5265 = vmatpush.bf16.msra.mxu2 %v16033_v37 }
 0x735   :  { %5280 = vmatpush.bf16.msra.mxu3 %v14050_v22  ;;  %5294 = vmatpush.bf16.msrb.mxu0 %v13694_v43 }
 0x736   :  { %5308 = vmatpush.bf16.msrb.mxu1 %v13706_v33 }
 0x737   :  { %5266 = vmatpush.bf16.msra.mxu2 %v16035_v40 }
 0x739   :  { %5281 = vmatpush.bf16.msra.mxu3 %v14059_v55  ;;  %5295 = vmatpush.bf16.msrb.mxu0 %v13734_v23 }
 0x73a   :  { %5362 = vmatpush.bf16.msra.mxu1 %v13721_v17  ;;  %5267 = vmatmul.bf16.vlgmr.msra.gmra.mxu2 %v15566_v35 }
 0x73b   :  { %5309 = vmatmul.bf16.vlgmr.msrb.gmra.mxu1 %v13944_v46  ;;  %5314 = vmatpush.bf16.msrb.mxu2 %v16036_v58 }
 0x73c   :  { %5282 = vmatmul.bf16.vlgmr.msra.gmra.mxu3 %v14146_v48  ;;  %5296 = vmatmul.bf16.vlgmr.msrb.gmra.mxu0 %v16037_v6  ;;  %v14183_v48 = vpack.c.bf16 %v13995_v62, %v13995_v62  ;;  %v16038_v62 = vld [vmem:[#allocation47_spill] sm:$0xff] }
 0x73d   :  { %5329 = vmatpush.bf16.msrb.mxu3 %v13540_v19  ;;  %5346 = vmatpush.bf16.msra.mxu0 %v13744_v39 }
 0x73e   :  { %5363 = vmatpush.bf16.msra.mxu1 %v13762_v7 }
 0x73f   :  { %5315 = vmatpush.bf16.msrb.mxu2 %v13576_v29 }
 0x741   :  { %5330 = vmatpush.bf16.msrb.mxu3 %v13564_v52  ;;  %5347 = vmatpush.bf16.msra.mxu0 %v13778_v21 }
 0x742   :  { %5364 = vmatpush.bf16.msra.mxu1 %v13792_v30 }
 0x743   :  { %5316 = vmatpush.bf16.msrb.mxu2 %v13600_v4 }
 0x745   :  { %5331 = vmatpush.bf16.msrb.mxu3 %v13588_v34  ;;  %5348 = vmatpush.bf16.msra.mxu0 %v13808_v32 }
 0x746   :  { %5365 = vmatpush.bf16.msra.mxu1 %v13824_v18 }
 0x747   :  { %5317 = vmatpush.bf16.msrb.mxu2 %v13624_v59  ;;  %v4749_v6 = vpop.f32.mrf.mxu1 }
 0x749   :  { %5332 = vmatpush.bf16.msrb.mxu3 %v13612_v15  ;;  %5349 = vmatpush.bf16.msra.mxu0 %v13838_v24  ;;  %v4670_v35 = vpop.f32.mrf.mxu0 }
 0x74a   :  { %5366 = vmatpush.bf16.msra.mxu1 %v16015_v27 }
 0x74b   :  { %5318 = vmatpush.bf16.msrb.mxu2 %v13648_v20 }
 0x74d   :  { %5333 = vmatpush.bf16.msrb.mxu3 %v16014_v51  ;;  %5350 = vmatpush.bf16.msra.mxu0 %v13865_v47  ;;  %v4591_v30 = vpop.f32.mrf.mxu3 }
 0x74e   :  { %5367 = vmatpush.bf16.msra.mxu1 %v16019_v63  ;;  %v16044_v63 = vld [vmem:[#allocation18_spill] sm:$0xff] }
 0x74f   :  { %5319 = vmatpush.bf16.msrb.mxu2 %v13672_v60  ;;  %v4530_v18 = vpop.f32.mrf.mxu2  ;;  %v4751_v7 = vpop.f32.mrf.mxu1 }
 0x750   :  { %v4592_v17 = vadd.f32 %v4591_v30, %v4530_v18  ;;  %v15574_v30 = vrot.slane %v14183_v48, 2  ;;  %v5344_v18 = vrot.slane %v14183_v48, 1 }
 0x751   :  { %5334 = vmatpush.bf16.msrb.mxu3 %v16018_v36  ;;  %5351 = vmatpush.bf16.msra.mxu0 %v16016_v25  ;;  %v4672_v27 = vpop.f32.mrf.mxu0 }
 0x752   :  { %5368 = vmatpush.bf16.msra.mxu1 %v16023_v56  ;;  %v4674_v33 = vadd.f32 %v4670_v35, %v4592_v17  ;;  %v16039_v27 = vld [vmem:[#allocation86_spill] sm:$0xff] }
 0x753   :  { %5320 = vmatpush.bf16.msrb.mxu2 %v13699_v53 }
 0x754   :  { %v4753_v17 = vadd.f32 %v4749_v6, %v4674_v33  ;;  %v16041_v6 = vld [vmem:[#allocation34_spill] sm:$0xff] }
 0x755   :  { %5335 = vmatpush.bf16.msrb.mxu3 %v16022_v31  ;;  %5352 = vmatpush.bf16.msra.mxu0 %v16020_v49  ;;  %v4593_v7 = vpop.f32.mrf.mxu3 }
 0x756   :  { %5369 = vmatpush.bf16.msra.mxu1 %v13925_v26 }
 0x757   :  { %5321 = vmatpush.bf16.msrb.mxu2 %v13739_v57  ;;  %v4532_v35 = vpop.f32.mrf.mxu2 }
 0x758   :  { %v5070_v33 = vpop.f32.mrf.mxu1  ;;  %v16042_v35 = vld [vmem:[#allocation9_spill] sm:$0xff] }
 0x759   :  { %5336 = vmatpush.bf16.msrb.mxu3 %v16024_v12  ;;  %5353 = vmatpush.bf16.msra.mxu0 %v16038_v62 }
 0x75a   :  { %5424 = vmatpush.bf16.msrb.mxu1 %v16026_v41  ;;  %5322 = vmatmul.bf16.vlgmr.msrb.gmra.mxu2 %v14073_v0  ;;  %v16040_v41 = vld [vmem:[#allocation6_spill] sm:$0xff] }
 0x75b   :  { %5370 = vmatmul.bf16.vlgmr.msra.gmra.mxu1 %v15574_v30  ;;  %5377 = vmatpush.bf16.msra.mxu2 %v16039_v27  ;;  %v4989_v7 = vpop.f32.mrf.mxu0  ;;  %v16043_v30 = vld [vmem:[#allocation13_spill] sm:$0xff] }
 0x75c   :  { %5337 = vmatmul.bf16.vlgmr.msrb.gmra.mxu3 %v14183_v48  ;;  %5354 = vmatmul.bf16.vlgmr.msra.gmra.mxu0 %v5344_v18 }
 0x75d   :  { %5394 = vmatpush.bf16.msra.mxu3 %v16025_v13  ;;  %5410 = vmatpush.bf16.msrb.mxu0 %v13949_v50 }
 0x75e   :  { %5425 = vmatpush.bf16.msrb.mxu1 %v13571_v38 }
 0x75f   :  { %5378 = vmatpush.bf16.msra.mxu2 %v16040_v41  ;;  %v4910_v38 = vpop.f32.mrf.mxu3 }
 0x760   :  { %v5072_v18 = vpop.f32.mrf.mxu1 }
 0x761   :  { %5395 = vmatpush.bf16.msra.mxu3 %v16028_v28  ;;  %5411 = vmatpush.bf16.msrb.mxu0 %v13979_v3  ;;  %v16045_v18 = vld [vmem:[#allocation61_spill] sm:$0xff] }
 0x762   :  { %5426 = vmatpush.bf16.msrb.mxu1 %v13595_v1  ;;  %v4830_v1 = vpop.f32.mrf.mxu2 }
 0x763   :  { %5379 = vmatpush.bf16.msra.mxu2 %v16041_v6  ;;  %v4834_v26 = vadd.f32 %v4830_v1, %v4753_v17  ;;  %v4991_v56 = vpop.f32.mrf.mxu0  ;;  %v14225_v17 = vpack.c.bf16 %v16045_v18, %v16045_v18  ;;  %v16046_v1 = vld [vmem:[#allocation24_spill] sm:$0xff] }
 0x765   :  { %5396 = vmatpush.bf16.msra.mxu3 %v16029_v45  ;;  %5412 = vmatpush.bf16.msrb.mxu0 %v14014_v16 }
 0x766   :  { %5427 = vmatpush.bf16.msrb.mxu1 %v13619_v2  ;;  %v4914_v2 = vadd.f32 %v4910_v38, %v4834_v26  ;;  %v16048_v26 = vrot.slane %v13944_v46, 3  ;;  %v16060_v46 = vld [vmem:[#allocation35_spill] sm:$0xff] }
 0x767   :  { %5380 = vmatpush.bf16.msra.mxu2 %v16042_v35 }
 0x769   :  { %5397 = vmatpush.bf16.msra.mxu3 %v16030_v5  ;;  %5413 = vmatpush.bf16.msrb.mxu0 %v14023_v54  ;;  %v4912_v5 = vpop.f32.mrf.mxu3 }
 0x76a   :  { %5428 = vmatpush.bf16.msrb.mxu1 %v13643_v9  ;;  %v4832_v56 = vpop.f32.mrf.mxu2  ;;  %v5408_v5 = vrot.slane %v14225_v17, 2 }
 0x76b   :  { %5381 = vmatpush.bf16.msra.mxu2 %v16043_v30 }
 0x76d   :  { %5398 = vmatpush.bf16.msra.mxu3 %v16031_v8  ;;  %5414 = vmatpush.bf16.msrb.mxu0 %v14032_v61  ;;  %v4993_v8 = vadd.f32 %v4989_v7, %v4914_v2 }
 0x76e   :  { %5429 = vmatpush.bf16.msrb.mxu1 %v13667_v10  ;;  %v5392_v10 = vrot.slane %v14225_v17, 1 }
 0x76f   :  { %5382 = vmatpush.bf16.msra.mxu2 %v16044_v63  ;;  %v5074_v9 = vadd.f32 %v5070_v33, %v4993_v8  ;;  %v16049_v8 = vld [vmem:[#allocation93_spill] sm:$0xff] }
 0x771   :  { %5399 = vmatpush.bf16.msra.mxu3 %v16032_v14  ;;  %5415 = vmatpush.bf16.msrb.mxu0 %v14041_v11 }
 0x772   :  { %5430 = vmatpush.bf16.msrb.mxu1 %v13694_v43  ;;  %v16047_v43 = vld [vmem:[#allocation65_spill] sm:$0xff] }
 0x773   :  { %5383 = vmatpush.bf16.msra.mxu2 %v16046_v1 }
 0x775   :  { %5400 = vmatpush.bf16.msra.mxu3 %v16033_v37  ;;  %5416 = vmatpush.bf16.msrb.mxu0 %v14050_v22 }
 0x776   :  { %5431 = vmatpush.bf16.msrb.mxu1 %v13734_v23 }
 0x777   :  { %5384 = vmatpush.bf16.msra.mxu2 %v16047_v43 }
 0x779   :  { %5401 = vmatpush.bf16.msra.mxu3 %v16035_v40  ;;  %5417 = vmatpush.bf16.msrb.mxu0 %v14059_v55 }
 0x77a   :  { %5480 = vmatpush.bf16.msra.mxu1 %v13744_v39  ;;  %5385 = vmatmul.bf16.vlgmr.msra.gmra.mxu2 %v14225_v17  ;;  %v16051_v39 = vld [vmem:[#allocation55_spill] sm:$0xff] }
 0x77b   :  { %5432 = vmatmul.bf16.vlgmr.msrb.gmra.mxu1 %v16048_v26  ;;  %5437 = vmatpush.bf16.msrb.mxu2 %v16049_v8 }
 0x77c   :  { %5402 = vmatmul.bf16.vlgmr.msra.gmra.mxu3 %v5392_v10  ;;  %5418 = vmatmul.bf16.vlgmr.msrb.gmra.mxu0 %v5408_v5 }
 0x77d   :  { %5450 = vmatpush.bf16.msrb.mxu3 %v16036_v58  ;;  %5464 = vmatpush.bf16.msra.mxu0 %v13540_v19  ;;  %v5193_v58 = vpop.f32.mrf.mxu1  ;;  %v5179_v19 = vpop.f32.mrf.mxu0 }
 0x77e   :  { %5481 = vmatpush.bf16.msra.mxu1 %v13778_v21 }
 0x77f   :  { %5438 = vmatpush.bf16.msrb.mxu2 %v13559_v44  ;;  %v5166_v44 = vpop.f32.mrf.mxu3 }
 0x781   :  { %5451 = vmatpush.bf16.msrb.mxu3 %v13576_v29  ;;  %5465 = vmatpush.bf16.msra.mxu0 %v13564_v52  ;;  %v16050_v29 = vld [vmem:[#allocation96_spill] sm:$0xff]  ;;  %v5180_v52 = vadd.f32 %v5179_v19, %v5166_v44 }
 0x782   :  { %5482 = vmatpush.bf16.msra.mxu1 %v13808_v32  ;;  %v16053_v32 = vld [vmem:[#allocation20_spill] sm:$0xff] }
 0x783   :  { %5439 = vmatpush.bf16.msrb.mxu2 %v13583_v42 }
 0x785   :  { %5452 = vmatpush.bf16.msrb.mxu3 %v13600_v4  ;;  %5466 = vmatpush.bf16.msra.mxu0 %v13588_v34  ;;  %v5150_v4 = vpop.f32.mrf.mxu2  ;;  %v5195_v23 = vpop.f32.mrf.mxu1  ;;  %v5197_v34 = vadd.f32 %v5193_v58, %v5180_v52 }
 0x786   :  { %5483 = vmatpush.bf16.msra.mxu1 %v13838_v24  ;;  %v14258_v42 = vadd.f32 %v5150_v4, %v5074_v9  ;;  %v16054_v24 = vld [vmem:[#allocation62_spill] sm:$0xff] }
 0x787   :  { %5440 = vmatpush.bf16.msrb.mxu2 %v16050_v29 }
 0x789   :  { %5453 = vmatpush.bf16.msrb.mxu3 %v13624_v59  ;;  %5467 = vmatpush.bf16.msra.mxu0 %v13612_v15  ;;  %v5181_v59 = vpop.f32.mrf.mxu0  ;;  %v16052_v15 = vld [vmem:[#allocation54_spill] sm:$0xff] }
 0x78a   :  { %5484 = vmatpush.bf16.msra.mxu1 %v13865_v47  ;;  %v16056_v47 = vld [vmem:[#allocation77_spill] sm:$0xff] }
 0x78b   :  { %5441 = vmatpush.bf16.msrb.mxu2 %v16051_v39 }
 0x78d   :  { %5454 = vmatpush.bf16.msrb.mxu3 %v13648_v20  ;;  %5468 = vmatpush.bf16.msra.mxu0 %v16014_v51  ;;  %v5168_v20 = vpop.f32.mrf.mxu3  ;;  %v5152_v21 = vpop.f32.mrf.mxu2 }
 0x78e   :  { %5485 = vmatpush.bf16.msra.mxu1 %v16016_v25  ;;  %v16062_v25 = vld [vmem:[#allocation36_spill] sm:$0xff] }
 0x78f   :  { %5442 = vmatpush.bf16.msrb.mxu2 %v16052_v15 }
 0x791   :  { %5455 = vmatpush.bf16.msrb.mxu3 %v13672_v60  ;;  %5469 = vmatpush.bf16.msra.mxu0 %v16018_v36  ;;  %v5478_v60 = vrot.slane %v14183_v48, 3  ;;  %v16063_v36 = vld [vmem:[#allocation8_spill] sm:$0xff] }
 0x792   :  { %5486 = vmatpush.bf16.msra.mxu1 %v16020_v49 }
 0x793   :  { %5443 = vmatpush.bf16.msrb.mxu2 %v16053_v32 }
 0x795   :  { %5456 = vmatpush.bf16.msrb.mxu3 %v13699_v53  ;;  %5470 = vmatpush.bf16.msra.mxu0 %v16022_v31  ;;  %v16055_v53 = vld [vmem:[#allocation37_spill] sm:$0xff] }
 0x796   :  { %5487 = vmatpush.bf16.msra.mxu1 %v16038_v62 }
 0x797   :  { %5444 = vmatpush.bf16.msrb.mxu2 %v16054_v24 }
 0x798   :  { %v5252_v31 = vpop.f32.mrf.mxu1 }
 0x799   :  { %5457 = vmatpush.bf16.msrb.mxu3 %v13739_v57  ;;  %5471 = vmatpush.bf16.msra.mxu0 %v16024_v12  ;;  %v16057_v57 = vrot.slane %v14183_v48, 2  ;;  %v5238_v12 = vpop.f32.mrf.mxu0 }
 0x79a   :  { %5540 = vmatpush.bf16.msrb.mxu1 %v13949_v50  ;;  %5445 = vmatmul.bf16.vlgmr.msrb.gmra.mxu2 %v14073_v0  ;;  %v16058_v50 = vld [vmem:[#allocation89_spill] sm:$0xff]  ;;  %v16061_v0 = vld [vmem:[#allocation15_spill] sm:$0xff] }
 0x79b   :  { %5488 = vmatmul.bf16.vlgmr.msra.gmra.mxu1 %v5478_v60  ;;  %5495 = vmatpush.bf16.msra.mxu2 %v16056_v47 }
 0x79c   :  { %5458 = vmatmul.bf16.vlgmr.msrb.gmra.mxu3 %v16055_v53  ;;  %5472 = vmatmul.bf16.vlgmr.msra.gmra.mxu0 %v16057_v57 }
 0x79d   :  { %5509 = vmatpush.bf16.msra.mxu3 %v16039_v27  ;;  %5525 = vmatpush.bf16.msrb.mxu0 %v16025_v13  ;;  %v16059_v13 = vld [vmem:[#allocation97_spill] sm:$0xff] }
 0x79e   :  { %5541 = vmatpush.bf16.msrb.mxu1 %v13979_v3  ;;  %v16064_v27 = vld [vmem:[#allocation17_spill] sm:$0xff] }
 0x79f   :  { %5496 = vmatpush.bf16.msra.mxu2 %v16058_v50  ;;  %v5223_v48 = vpop.f32.mrf.mxu3 }
 0x7a0   :  { %v5254_v3 = vpop.f32.mrf.mxu1 }
 0x7a1   :  { %5510 = vmatpush.bf16.msra.mxu3 %v16040_v41  ;;  %5526 = vmatpush.bf16.msrb.mxu0 %v16028_v28  ;;  %v5207_v28 = vpop.f32.mrf.mxu2  ;;  %v16067_v41 = vld [vmem:[#allocation46_spill] sm:$0xff] }
 0x7a2   :  { %5542 = vmatpush.bf16.msrb.mxu1 %v14014_v16  ;;  %v5211_v49 = vadd.f32 %v5207_v28, %v5197_v34  ;;  %v5240_v16 = vpop.f32.mrf.mxu0  ;;  %v5587_v28 = vmul.f32 %v14258_v42, %v14258_v42 }
 0x7a3   :  { %5497 = vmatpush.bf16.msra.mxu2 %v16059_v13 }
 0x7a4   :  { %v5227_v51 = vadd.f32 %v5223_v48, %v5211_v49 }
 0x7a5   :  { %5511 = vmatpush.bf16.msra.mxu3 %v16041_v6  ;;  %5527 = vmatpush.bf16.msrb.mxu0 %v16029_v45 }
 0x7a6   :  { %5543 = vmatpush.bf16.msrb.mxu1 %v14023_v54  ;;  %v5242_v45 = vadd.f32 %v5238_v12, %v5227_v51 }
 0x7a7   :  { %5498 = vmatpush.bf16.msra.mxu2 %v16060_v46  ;;  %v5225_v54 = vpop.f32.mrf.mxu3  ;;  %v5555_v46 = vsel %vm5554_vm10, %v14258_v42, 0.0 }
 0x7a8   :  { %v5256_v62 = vadd.f32 %v5252_v31, %v5242_v45 }
 0x7a9   :  { %5512 = vmatpush.bf16.msra.mxu3 %v16042_v35  ;;  %5528 = vmatpush.bf16.msrb.mxu0 %v16061_v0  ;;  %v5556_v0 = vrot.slane %v5555_v46, 4 }
 0x7aa   :  { %5544 = vmatpush.bf16.msrb.mxu1 %v14032_v61  ;;  %v16065_v61 = vld [vmem:[#allocation40_spill] sm:$0xff] }
 0x7ab   :  { %5499 = vmatpush.bf16.msra.mxu2 %v16062_v25  ;;  %v5557_v25 = vadd.f32 %v5556_v0, %v5555_v46 }
 0x7ad   :  { %5513 = vmatpush.bf16.msra.mxu3 %v16043_v30  ;;  %5529 = vmatpush.bf16.msrb.mxu0 %v16063_v36  ;;  %v5209_v30 = vpop.f32.mrf.mxu2  ;;  %v5588_v36 = vsel %vm5554_vm10, %v5587_v28, 0.0 }
 0x7ae   :  { %5545 = vmatpush.bf16.msrb.mxu1 %v14041_v11 }
 0x7af   :  { %5500 = vmatpush.bf16.msra.mxu2 %v16064_v27 }
 0x7b1   :  { %5514 = vmatpush.bf16.msra.mxu3 %v16044_v63  ;;  %5530 = vmatpush.bf16.msrb.mxu0 %v16032_v14  ;;  %v16066_v63 = vld [vmem:[#allocation49_spill] sm:$0xff] }
 0x7b2   :  { %5546 = vmatpush.bf16.msrb.mxu1 %v14050_v22  ;;  %v5539_v11 = vpack.c.bf16 %v16066_v63, %v16066_v63  ;;  %v16068_v22 = vld [vmem:[#allocation67_spill] sm:$0xff]  ;;  %v5589_v63 = vrot.slane %v5588_v36, 4 }
 0x7b3   :  { %5501 = vmatpush.bf16.msra.mxu2 %v16065_v61  ;;  %v5494_v14 = vpack.c.bf16 %v16068_v22, %v16068_v22 }
 0x7b5   :  { %5515 = vmatpush.bf16.msra.mxu3 %v16046_v1  ;;  %5531 = vmatpush.bf16.msrb.mxu0 %v16033_v37  ;;  %v5523_v37 = vrot.slane %v14225_v17, 3 }
 0x7b6   :  { %5547 = vmatpush.bf16.msrb.mxu1 %v14059_v55 }
 0x7b7   :  { %5502 = vmatpush.bf16.msra.mxu2 %v16067_v41 }
 0x7b8   :  { %v5310_v33 = vpop.f32.mrf.mxu1 }
 0x7b9   :  { %5516 = vmatpush.bf16.msra.mxu3 %v16047_v43  ;;  %5532 = vmatpush.bf16.msrb.mxu0 %v16035_v40  ;;  %v5297_v55 = vpop.f32.mrf.mxu0 }
 0x7ba   :  { %5548 = vmatmul.bf16.vlgmr.msrb.gmra.mxu1 %v5539_v11  ;;  %5503 = vmatmul.bf16.vlgmr.msra.gmra.mxu2 %v5494_v14  ;;  %v5311_v6 = vadd.f32 %v5310_v33, %v5297_v55  ;;  %v5558_v11 = vrot.slane %v5557_v25, 2 }
 0x7bc   :  { %5517 = vmatmul.bf16.vlgmr.msra.gmra.mxu3 %v5408_v5  ;;  %5533 = vmatmul.bf16.vlgmr.msrb.gmra.mxu0 %v5523_v37  ;;  %v9717_v37 = vmov 8.0  }
 0x7bd   :  { %v5268_v35 = vpop.f32.mrf.mxu2  ;;  %9493 = vrcp.f32 %v9717_v37 }
 0x7be   :  { %v5272_v2 = vadd.f32 %v5268_v35, %v5256_v62  ;;  %v5590_v35 = vadd.f32 %v5589_v63, %v5588_v36 }
 0x7bf   :  { %v5283_v7 = vpop.f32.mrf.mxu3 }
 0x7c0   :  { %v5312_v38 = vpop.f32.mrf.mxu1  ;;  %v14318_v40 = vadd.f32 %v5283_v7, %v5272_v2  ;;  %v14337_v7 = vadd.f32 %v5558_v11, %v5557_v25  ;;  %v9233_v25 = vld [vmem:[%s15302_s10 + $0x1c4] sm:$0xf] }
 0x7c1   :  { %v5299_v9 = vpop.f32.mrf.mxu0 }
 0x7c2   :  { %v5563_v3 = vsel %vm5554_vm10, %v14318_v40, 0.0  ;;  %v5596_v49 = vmul.f32 %v14318_v40, %v14318_v40 }
 0x7c3   :  { %v5564_v45 = vrot.slane %v5563_v3, 4 }
 0x7c4   :  { %v5597_v54 = vsel %vm5554_vm10, %v5596_v49, 0.0 }
 0x7c5   :  { %v5270_v56 = vpop.f32.mrf.mxu2  ;;  %v5565_v41 = vadd.f32 %v5564_v45, %v5563_v3  ;;  %v5598_v22 = vrot.slane %v5597_v54, 4 }
 0x7c7   :  { %v5285_v18 = vpop.f32.mrf.mxu3  ;;  %v5566_v38 = vrot.slane %v5565_v41, 2  ;;  %v5599_v2 = vadd.f32 %v5598_v22, %v5597_v54  ;;  %v9234_v22 = vld [vmem:[%s15302_s10 + $0x1cc] sm:$0xf] }
 0x7d8   :  { %v5371_v1 = vpop.f32.mrf.mxu1 }
 0x7d9   :  { %v5355_v10 = vpop.f32.mrf.mxu0 }
 0x7dd   :  { %v5323_v26 = vpop.f32.mrf.mxu2 }
 0x7de   :  { %v5327_v17 = vadd.f32 %v5323_v26, %v5311_v6 }
 0x7df   :  { %v5338_v43 = vpop.f32.mrf.mxu3 }
 0x7e0   :  { %v5373_v5 = vpop.f32.mrf.mxu1  ;;  %v5342_v58 = vadd.f32 %v5338_v43, %v5327_v17  ;;  %v5560_v17 = vrot.slane %v14337_v7, 1 }
 0x7e1   :  { %v5357_v8 = vpop.f32.mrf.mxu0 }
 0x7e2   :  { %v5359_v19 = vadd.f32 %v5355_v10, %v5342_v58  ;;  %v14339_v10 = vpop.eup %9493  ;;  %v5591_v8 = vrot.slane %v5590_v35, 2  ;;  %v5567_v58 = vadd.f32 %v5566_v38, %v5565_v41  ;;  %v9236_v41 = vld [vmem:[%s15302_s10 + $0x1d4] sm:$0xf0] }
 0x7e3   :  { %vm5630_vm11 = vweird.f32 %v14339_v10 }
 0x7e4   :  { %v5375_v44 = vadd.f32 %v5371_v1, %v5359_v19  ;;  %v5600_v19 = vrot.slane %v5599_v2, 2 }
 0x7e5   :  { %v5325_v52 = vpop.f32.mrf.mxu2 }
 0x7e7   :  { %v5340_v29 = vpop.f32.mrf.mxu3 }
 0x7f8   :  { %v5433_v4 = vpop.f32.mrf.mxu1 }
 0x7f9   :  { %v5419_v23 = vpop.f32.mrf.mxu0 }
 0x7fd   :  { %v5386_v39 = vpop.f32.mrf.mxu2 }
 0x7fe   :  { %v5390_v15 = vadd.f32 %v5386_v39, %v5375_v44  ;;  %v9239_v39 = vld [vmem:[%s15302_s10 + $0x1ec] sm:$0xf0] }
 0x7ff   :  { %v5403_v34 = vpop.f32.mrf.mxu3 }
 0x800   :  { %v5435_v59 = vpop.f32.mrf.mxu1  ;;  %v5407_v21 = vadd.f32 %v5403_v34, %v5390_v15  ;;  %v8345_v34 = vld [vmem:[%s15302_s10 + $0x1e0] sm:$0xf] }
 0x801   :  { %v5421_v20 = vpop.f32.mrf.mxu0  ;;  %v9237_v59 = vld [vmem:[%s15302_s10 + $0x1e4] sm:$0xf] }
 0x802   :  { %v14320_v32 = vadd.f32 %v5419_v23, %v5407_v21  ;;  %v5626_v23 = vmul.f32 8.0, %v14339_v10  ;;  %v8346_v20 = vor.u32 %v9239_v39, %v8345_v34  ;;  %v8347_v21 = vld [vmem:[%s15302_s10 + $0x1f0] sm:$0xf0] }
 0x804   :  { %v5605_v51 = vmul.f32 %v14320_v32, %v14320_v32  ;;  %v5571_v27 = vsel %vm5554_vm10, %v14320_v32, 0.0  ;;  %5894 = vmatpush.bf16.msrb.mxu2 %v8346_v20  ;;  %v5627_v54 = vsub.f32 1.0, %v5626_v23  ;;  %v5561_v23 = vadd.f32 %v5560_v17, %v14337_v7  ;;  %v9227_v7 = vld [vmem:[%s15302_s10 + $0x18c] sm:$0xf0] }
 0x805   :  { %v5388_v24 = vpop.f32.mrf.mxu2  ;;  %v5572_v33 = vrot.slane %v5571_v27, 4 }
 0x806   :  { %v5606_v30 = vsel %vm5554_vm10, %v5605_v51, 0.0  ;;  %v9240_v24 = vld [vmem:[%s15302_s10 + $0x1f4] sm:$0xf0]  ;;  %v9235_v51 = vld [vmem:[%s15302_s10 + $0x1cc] sm:$0xf0] }
 0x807   :  { %v5405_v60 = vpop.f32.mrf.mxu3  ;;  %v5607_v55 = vrot.slane %v5606_v30, 4  ;;  %v5573_v18 = vadd.f32 %v5572_v33, %v5571_v27  ;;  %v8331_v27 = vld [vmem:[%s15302_s10 + $0x1d0] sm:$0xf0] }
 0x808   :  { %v8353_v60 = vld [vmem:[%s15302_s10 + $0x1e8] sm:$0xf]  ;;  %v8334_v11 = vor.u32 %v9233_v25, %v8331_v27  ;;  %v8307_v25 = vld [vmem:[%s15302_s10 + $0x198] sm:$0xf0]  ;;  %v8281_v27 = vld [vmem:[%s15302_s10 + $0x160] sm:$0xf] }
 0x809   :  { %v5608_v56 = vadd.f32 %v5607_v55, %v5606_v30  ;;  %v5574_v44 = vrot.slane %v5573_v18, 2  ;;  %v8337_v30 = vld [vmem:[%s15302_s10 + $0x1c8] sm:$0xf] }
 0x80a   :  { %v8338_v55 = vor.u32 %v9236_v41, %v8337_v30  ;;  %v9223_v30 = vld [vmem:[%s15302_s10 + $0x16c] sm:$0xf0]  ;;  %v8283_v41 = vld [vmem:[%s15302_s10 + $0x170] sm:$0xf0] }
 0x80b   :  { %v5609_v52 = vrot.slane %v5608_v56, 2  ;;  %v5575_v46 = vadd.f32 %v5574_v44, %v5573_v18  ;;  %v8313_v18 = vld [vmem:[%s15302_s10 + $0x1a0] sm:$0xf] }
 0x80d   :  { %v5610_v3 = vadd.f32 %v5609_v52, %v5608_v56  ;;  %v5576_v37 = vrot.slane %v5575_v46, 1  ;;  %v9231_v56 = vld [vmem:[%s15302_s10 + $0x1ac] sm:$0xf0]  ;;  %v9232_v52 = vld [vmem:[%s15302_s10 + $0x1b4] sm:$0xf0] }
 0x80f   :  { %v5577_v20 = vadd.f32 %v5576_v37, %v5575_v46 }
 0x818   :  { %v5489_v53 = vpop.f32.mrf.mxu1 }
 0x819   :  { %v5473_v47 = vpop.f32.mrf.mxu0 }
 0x81d   :  { %v5446_v50 = vpop.f32.mrf.mxu2 }
 0x81e   :  { %v5447_v16 = vadd.f32 %v5446_v50, %v5433_v4  ;;  %v8350_v50 = vor.u32 %v9237_v59, %v8347_v21 }
 0x81f   :  { %v5459_v57 = vpop.f32.mrf.mxu3 }
 0x820   :  { %v5491_v31 = vpop.f32.mrf.mxu1  ;;  %v5463_v62 = vadd.f32 %v5459_v57, %v5447_v16  ;;  %5907 = vmatpush.bf16.msrb.mxu3 %v8350_v50  ;;  %v8329_v16 = vld [vmem:[%s15302_s10 + $0x1c0] sm:$0xf] }
 0x821   :  { %v5475_v12 = vpop.f32.mrf.mxu0  ;;  %v8354_v31 = vor.u32 %v9240_v24, %v8353_v60 }
 0x822   :  { %v5477_v6 = vadd.f32 %v5473_v47, %v5463_v62  ;;  %v5568_v47 = vrot.slane %v5567_v58, 1  ;;  %v9238_v12 = vld [vmem:[%s15302_s10 + $0x1ec] sm:$0xf]  ;;  %v8330_v62 = vor.u32 %v9235_v51, %v8329_v16 }
 0x823   :  { %5920 = vmatpush.bf16.msra.mxu0 %v8354_v31  ;;  %v9225_v31 = vld [vmem:[%s15302_s10 + $0x184] sm:$0xf] }
 0x824   :  { %v5493_v1 = vadd.f32 %v5489_v53, %v5477_v6  ;;  %v5592_v53 = vadd.f32 %v5591_v8, %v5590_v35  ;;  %5895 = vmatpush.bf16.msrb.mxu2 %v8330_v62  ;;  %v8339_v6 = vld [vmem:[%s15302_s10 + $0x1d8] sm:$0xf0]  ;;  %v5611_v35 = vrot.slane %v5610_v3, 1  ;;  %5908 = vmatpush.bf16.msrb.mxu3 %v8334_v11  ;;  %v8315_v8 = vld [vmem:[%s15302_s10 + $0x1b0] sm:$0xf0] }
 0x825   :  { %v5448_v48 = vpop.f32.mrf.mxu2  ;;  %v9221_v11 = vld [vmem:[%s15302_s10 + $0x164] sm:$0xf] }
 0x826   :  { %v5601_v48 = vadd.f32 %v5600_v19, %v5599_v2  ;;  %v8321_v19 = vld [vmem:[%s15302_s10 + $0x1a8] sm:$0xf] }
 0x827   :  { %v5461_v13 = vpop.f32.mrf.mxu3  ;;  %5921 = vmatpush.bf16.msra.mxu0 %v8338_v55  ;;  %v8322_v59 = vor.u32 %v9232_v52, %v8321_v19  ;;  %v8286_v55 = vor.u32 %v9221_v11, %v8283_v41  ;;  %v9220_v19 = vld [vmem:[%s15302_s10 + $0x154] sm:$0xf0]  ;;  %v8275_v52 = vld [vmem:[%s15302_s10 + $0x158] sm:$0xf0]  ;;  %v9206_v41 = vld [vmem:[%s15302_s10 + $0xec] sm:$0xf] }
 0x828   :  { %v8355_v13 = vld [vmem:[%s15302_s10 + $0x1f8] sm:$0xf0]  ;;  %v9208_v11 = vld [vmem:[%s15302_s10 + $0xf4] sm:$0xf0] }
 0x829   :  { %v8358_v28 = vor.u32 %v9238_v12, %v8355_v13  ;;  %v8299_v12 = vld [vmem:[%s15302_s10 + $0x190] sm:$0xf0]  ;;  %v8305_v13 = vld [vmem:[%s15302_s10 + $0x188] sm:$0xf] }
 0x82b   :  { %5933 = vmatpush.bf16.msra.mxu1 %v8358_v28  ;;  %5922 = vmatpush.bf16.msra.mxu0 %v8322_v59  ;;  %v8302_v28 = vor.u32 %v9225_v31, %v8299_v12  ;;  %v9215_v59 = vld [vmem:[%s15302_s10 + $0x12c] sm:$0xf0]  ;;  %v9209_v12 = vld [vmem:[%s15302_s10 + $0x104] sm:$0xf] }
 0x837   :  { %v5549_v61 = vpop.f32.mrf.mxu1 }
 0x839   :  { %v5534_v14 = vpop.f32.mrf.mxu0 }
 0x83d   :  { %v5504_v43 = vpop.f32.mrf.mxu2 }
 0x83e   :  { %v5508_v5 = vadd.f32 %v5504_v43, %v5493_v1  ;;  %v5569_v1 = vadd.f32 %v5568_v47, %v5567_v58  ;;  %v5628_v43 = vmul.f32 %v14339_v10, %v5627_v54  ;;  %v8297_v47 = vld [vmem:[%s15302_s10 + $0x180] sm:$0xf] }
 0x83f   :  { %v5518_v9 = vpop.f32.mrf.mxu3  ;;  %v5551_v26 = vpop.f32.mrf.mxu1  ;;  %v8298_v50 = vor.u32 %v9227_v7, %v8297_v47  ;;  %v9214_v47 = vld [vmem:[%s15302_s10 + $0x12c] sm:$0xf] }
 0x840   :  { %v5522_v4 = vadd.f32 %v5518_v9, %v5508_v5  ;;  %v8342_v9 = vor.u32 %v9234_v22, %v8339_v6  ;;  %v8314_v26 = vor.u32 %v9231_v56, %v8313_v18  ;;  %v9229_v5 = vld [vmem:[%s15302_s10 + $0x1a4] sm:$0xf]  ;;  %v5570_v17 = vadd.f32 %v5569_v1, %v5561_v23  ;;  %v8289_v22 = vld [vmem:[%s15302_s10 + $0x168] sm:$0xf]  ;;  %v9222_v6 = vld [vmem:[%s15302_s10 + $0x16c] sm:$0xf] }
 0x841   :  { %v5536_v29 = vpop.f32.mrf.mxu0  ;;  %v8318_v58 = vor.u32 %v9229_v5, %v8315_v8  ;;  %v9219_v18 = vld [vmem:[%s15302_s10 + $0x14c] sm:$0xf0]  ;;  %v9217_v56 = vld [vmem:[%s15302_s10 + $0x144] sm:$0xf]  ;;  %v8267_v5 = vld [vmem:[%s15302_s10 + $0x150] sm:$0xf0] }
 0x842   :  { %v5538_v15 = vadd.f32 %v5534_v14, %v5522_v4  ;;  %v5602_v14 = vrot.slane %v5601_v48, 1  ;;  %5934 = vmatpush.bf16.msra.mxu1 %v8342_v9  ;;  %v9230_v4 = vld [vmem:[%s15302_s10 + $0x1ac] sm:$0xf]  ;;  %5896 = vmatpush.bf16.msrb.mxu2 %v8314_v26  ;;  %v8265_v9 = vld [vmem:[%s15302_s10 + $0x140] sm:$0xf] }
 0x843   :  { %5909 = vmatpush.bf16.msrb.mxu3 %v8318_v58  ;;  %v8266_v26 = vor.u32 %v9219_v18, %v8265_v9  ;;  %v8273_v8 = vld [vmem:[%s15302_s10 + $0x148] sm:$0xf]  ;;  %v9218_v58 = vld [vmem:[%s15302_s10 + $0x14c] sm:$0xf] }
 0x844   :  { %v14367_v0 = vadd.f32 %v5549_v61, %v5538_v15  ;;  %v5593_v61 = vrot.slane %v5592_v53, 1  ;;  %v5603_v39 = vadd.f32 %v5602_v14, %v5601_v48  ;;  %v8323_v15 = vld [vmem:[%s15302_s10 + $0x1b8] sm:$0xf0]  ;;  %v9202_v18 = vld [vmem:[%s15302_s10 + $0xcc] sm:$0xf] }
 0x845   :  { %v5506_v49 = vpop.f32.mrf.mxu2  ;;  %v8326_v24 = vor.u32 %v9230_v4, %v8323_v15  ;;  %v8249_v4 = vld [vmem:[%s15302_s10 + $0x120] sm:$0xf]  ;;  %v9213_v15 = vld [vmem:[%s15302_s10 + $0x124] sm:$0xf] }
 0x846   :  { %v5579_v36 = vsel %vm5554_vm10, %v14367_v0, 0.0  ;;  %v5614_v45 = vmul.f32 %v14367_v0, %v14367_v0  ;;  %v5594_v34 = vadd.f32 %v5593_v61, %v5592_v53  ;;  %v5612_v53 = vadd.f32 %v5611_v35, %v5610_v3  ;;  %v9228_v3 = vld [vmem:[%s15302_s10 + $0x194] sm:$0xf0]  ;;  %v9226_v49 = vld [vmem:[%s15302_s10 + $0x18c] sm:$0xf]  ;;  %5897 = vmatpush.bf16.msrb.mxu2 %v8298_v50 }
 0x847   :  { %v5520_v57 = vpop.f32.mrf.mxu3  ;;  %v5580_v63 = vrot.slane %v5579_v36, 4  ;;  %5935 = vmatpush.bf16.msra.mxu1 %v8326_v24  ;;  %v8306_v51 = vor.u32 %v9228_v3, %v8305_v13  ;;  %5910 = vmatpush.bf16.msrb.mxu3 %v8302_v28  ;;  %v8310_v62 = vor.u32 %v9226_v49, %v8307_v25  ;;  %v8291_v35 = vld [vmem:[%s15302_s10 + $0x178] sm:$0xf0]  ;;  %v9216_v24 = vld [vmem:[%s15302_s10 + $0x134] sm:$0xf0] }
 0x848   :  { %v5615_v33 = vsel %vm5554_vm10, %v5614_v45, 0.0  ;;  %v5629_v57 = vadd.f32 %v14339_v10, %v5628_v43  ;;  %v5604_v16 = vadd.f32 %v5603_v39, %v5594_v34  ;;  %v8278_v39 = vor.u32 %v9218_v58, %v8275_v52  ;;  %v9211_v50 = vld [vmem:[%s15302_s10 + $0x10c] sm:$0xf0]  ;;  %v8235_v13 = vld [vmem:[%s15302_s10 + $0x110] sm:$0xf0] }
 0x849   :  { %v5581_v38 = vadd.f32 %v5580_v63, %v5579_v36  ;;  %v5616_v2 = vrot.slane %v5615_v33, 4  ;;  %v5578_v36 = vadd.f32 %v5577_v20, %v5570_v17  ;;  %5923 = vmatpush.bf16.msra.mxu0 %v8306_v51  ;;  %v8282_v63 = vor.u32 %v9223_v30, %v8281_v27  ;;  %v8251_v20 = vld [vmem:[%s15302_s10 + $0x130] sm:$0xf0]  ;;  %v9212_v3 = vld [vmem:[%s15302_s10 + $0x114] sm:$0xf0] }
 0x84a   :  { %v5631_v61 = vsel %vm5630_vm11, %v14339_v10, %v5629_v57  ;;  %v5613_v14 = vadd.f32 %v5612_v53, %v5604_v16  ;;  %v9224_v10 = vld [vmem:[%s15302_s10 + $0x174] sm:$0xf0]  ;;  %v8254_v17 = vor.u32 %v9213_v15, %v8251_v20  ;;  %v8259_v53 = vld [vmem:[%s15302_s10 + $0x138] sm:$0xf0]  ;;  %v8233_v57 = vld [vmem:[%s15302_s10 + $0x100] sm:$0xf] }
 0x84b   :  { %v5582_v29 = vrot.slane %v5581_v38, 2  ;;  %v5617_v44 = vadd.f32 %v5616_v2, %v5615_v33  ;;  %5936 = vmatpush.bf16.msra.mxu1 %v8310_v62  ;;  %5898 = vmatpush.bf16.msrb.mxu2 %v8282_v63  ;;  %v8294_v2 = vor.u32 %v9222_v6, %v8291_v35  ;;  %v8262_v28 = vor.u32 %v9214_v47, %v8259_v53  ;;  %v9210_v49 = vld [vmem:[%s15302_s10 + $0x10c] sm:$0xf]  ;;  %v8243_v51 = vld [vmem:[%s15302_s10 + $0x118] sm:$0xf0] }
 0x84c   :  { %5911 = vmatpush.bf16.msrb.mxu3 %v8286_v55  ;;  %v8234_v16 = vor.u32 %v9211_v50, %v8233_v57  ;;  %v8473_v25 = vld [vmem:[%s15302_s10 + $0xe0] sm:$0xf]  ;;  %v9205_v62 = vld [vmem:[%s15302_s10 + $0xe4] sm:$0xf]  ;;  %v8475_v27 = vld [vmem:[%s15302_s10 + $0xf0] sm:$0xf0] }
 0x84d   :  { %v5583_v21 = vadd.f32 %v5582_v29, %v5581_v38  ;;  %v5618_v60 = vrot.slane %v5617_v44, 2  ;;  %v8290_v38 = vor.u32 %v9224_v10, %v8289_v22  ;;  %v8270_v29 = vor.u32 %v9217_v56, %v8267_v5  ;;  %v8481_v30 = vld [vmem:[%s15302_s10 + $0xe8] sm:$0xf]  ;;  %v8483_v22 = vld [vmem:[%s15302_s10 + $0xf8] sm:$0xf0] }
 0x84e   :  { %v8478_v63 = vor.u32 %v9205_v62, %v8475_v27  ;;  %v9203_v55 = vld [vmem:[%s15302_s10 + $0xcc] sm:$0xf0]  ;;  %v9201_v10 = vld [vmem:[%s15302_s10 + $0xc4] sm:$0xf]  ;;  %v8486_v6 = vor.u32 %v9206_v41, %v8483_v22  ;;  %v8459_v35 = vld [vmem:[%s15302_s10 + $0xd0] sm:$0xf0] }
 0x84f   :  { %v5584_v48 = vrot.slane %v5583_v21, 1  ;;  %v5619_v46 = vadd.f32 %v5618_v60, %v5617_v44  ;;  %5924 = vmatpush.bf16.msra.mxu0 %v8290_v38  ;;  %v8274_v44 = vor.u32 %v9220_v19, %v8273_v8  ;;  %5937 = vmatpush.bf16.msra.mxu1 %v8294_v2  ;;  %v8257_v60 = vld [vmem:[%s15302_s10 + $0x128] sm:$0xf]  ;;  %v9204_v2 = vld [vmem:[%s15302_s10 + $0xd4] sm:$0xf0] }
 0x850   :  { %5899 = vmatpush.bf16.msrb.mxu2 %v8266_v26  ;;  %5912 = vmatpush.bf16.msrb.mxu3 %v8270_v29  ;;  %v8258_v31 = vor.u32 %v9216_v24, %v8257_v60  ;;  %v8465_v38 = vld [vmem:[%s15302_s10 + $0xc8] sm:$0xf]  ;;  %v8467_v56 = vld [vmem:[%s15302_s10 + $0xd8] sm:$0xf0]  ;;  %v8441_v26 = vld [vmem:[%s15302_s10 + $0xa0] sm:$0xf] }
 0x851   :  { %v5585_v45 = vadd.f32 %v5584_v48, %v5583_v21  ;;  %v5620_v54 = vrot.slane %v5619_v46, 1  ;;  %v8250_v21 = vor.u32 %v9215_v59, %v8249_v4  ;;  %v8241_v48 = vld [vmem:[%s15302_s10 + $0x108] sm:$0xf]  ;;  %v9199_v5 = vld [vmem:[%s15302_s10 + $0xac] sm:$0xf0]  ;;  %v8466_v19 = vor.u32 %v9204_v2, %v8465_v38 }
 0x852   :  { %v9197_v29 = vld [vmem:[%s15302_s10 + $0xa4] sm:$0xf]  ;;  %v8470_v52 = vor.u32 %v9202_v18, %v8467_v56  ;;  %v8449_v4 = vld [vmem:[%s15302_s10 + $0xa8] sm:$0xf]  ;;  %v8451_v59 = vld [vmem:[%s15302_s10 + $0xb8] sm:$0xf0] }
 0x853   :  { %v5586_v37 = vadd.f32 %v5585_v45, %v5578_v36  ;;  %v5621_v33 = vadd.f32 %v5620_v54, %v5619_v46  ;;  %5925 = vmatpush.bf16.msra.mxu0 %v8274_v44  ;;  %5938 = vmatpush.bf16.msra.mxu1 %v8278_v39  ;;  %v9207_v36 = vld [vmem:[%s15302_s10 + $0xec] sm:$0xf0]  ;;  %v8238_v45 = vor.u32 %v9209_v12, %v8235_v13  ;;  %v8443_v44 = vld [vmem:[%s15302_s10 + $0xb0] sm:$0xf0]  ;;  %v9198_v39 = vld [vmem:[%s15302_s10 + $0xac] sm:$0xf] }
 0x854   :  { %5900 = vmatpush.bf16.msrb.mxu2 %v8250_v21  ;;  %5913 = vmatpush.bf16.msrb.mxu3 %v8254_v17  ;;  %v8474_v54 = vor.u32 %v9207_v36, %v8473_v25  ;;  %v8446_v20 = vor.u32 %v9197_v29, %v8443_v44  ;;  %v8425_v21 = vld [vmem:[%s15302_s10 + $0x80] sm:$0xf]  ;;  %v9195_v60 = vld [vmem:[%s15302_s10 + $0x8c] sm:$0xf0]  ;;  %v9193_v47 = vld [vmem:[%s15302_s10 + $0x84] sm:$0xf]  ;;  %v8454_v53 = vor.u32 %v9198_v39, %v8451_v59 }
 0x855   :  { %v5622_v1 = vadd.f32 %v5621_v33, %v5613_v14  ;;  %v14488_v43 = vmul.f32 %v5631_v61, %v5586_v37  ;;  %v8246_v14 = vor.u32 %v9210_v49, %v8243_v51  ;;  %v8482_v37 = vor.u32 %v9208_v11, %v8481_v30  ;;  %v8457_v33 = vld [vmem:[%s15302_s10 + $0xc0] sm:$0xf]  ;;  %v8433_v57 = vld [vmem:[%s15302_s10 + $0x88] sm:$0xf]  ;;  %v9196_v50 = vld [vmem:[%s15302_s10 + $0x94] sm:$0xf0] }
 0x856   :  { %v8458_v9 = vor.u32 %v9203_v55, %v8457_v33  ;;  %v9194_v12 = vld [vmem:[%s15302_s10 + $0x8c] sm:$0xf]  ;;  %v8435_v13 = vld [vmem:[%s15302_s10 + $0x98] sm:$0xf0]  ;;  %v9191_v49 = vld [vmem:[%s15302_s10 + $0x6c] sm:$0xf0] }
 0x857   :  { %v5633_v23 = vmul.f32 %v5631_v61, %v5622_v1  ;;  %v5634_v34 = vmul.f32 %v14488_v43, %v14488_v43  ;;  %5926 = vmatpush.bf16.msra.mxu0 %v8258_v31  ;;  %v8242_v61 = vor.u32 %v9212_v3, %v8241_v48  ;;  %5939 = vmatpush.bf16.msra.mxu1 %v8262_v28  ;;  %v8409_v3 = vld [vmem:[%s15302_s10 + $0x60] sm:$0xf]  ;;  %v9189_v51 = vld [vmem:[%s15302_s10 + $0x64] sm:$0xf]  ;;  %v8411_v25 = vld [vmem:[%s15302_s10 + $0x70] sm:$0xf0] }
 0x858   :  { %5901 = vmatpush.bf16.msrb.mxu2 %v8234_v16  ;;  %5914 = vmatpush.bf16.msrb.mxu3 %v8238_v45  ;;  %v8462_v1 = vor.u32 %v9201_v10, %v8459_v35  ;;  %v8426_v31 = vor.u32 %v9195_v60, %v8425_v21  ;;  %v8434_v16 = vor.u32 %v9196_v50, %v8433_v57  ;;  %v5623_v36 = vld [vmem:[%s15300_s8] sm:$0x1]  ;;  %v8417_v62 = vld [vmem:[%s15302_s10 + $0x68] sm:$0xf]  ;;  %v9192_v27 = vld [vmem:[%s15302_s10 + $0x74] sm:$0xf0] }
 0x859   :  { %v5635_v7 = vsub.f32 %v5633_v23, %v5634_v34  ;;  %v9200_v23 = vld [vmem:[%s15302_s10 + $0xb4] sm:$0xf0]  ;;  %v8442_v34 = vor.u32 %v9199_v5, %v8441_v26  ;;  %v8410_v30 = vor.u32 %v9191_v49, %v8409_v3  ;;  %v8414_v11 = vor.u32 %v9189_v51, %v8411_v25  ;;  %v8393_v41 = vld [vmem:[%s15302_s10 + $0x40] sm:$0xf]  ;;  %v9187_v22 = vld [vmem:[%s15302_s10 + $0x4c] sm:$0xf0] }
 0x85a   :  { %v8450_v24 = vor.u32 %v9200_v23, %v8449_v4  ;;  %v9185_v33 = vld [vmem:[%s15302_s10 + $0x44] sm:$0xf]  ;;  %v8395_v55 = vld [vmem:[%s15302_s10 + $0x50] sm:$0xf0]  ;;  %v9188_v35 = vld [vmem:[%s15302_s10 + $0x54] sm:$0xf0] }
 0x85b   :  { %v14546_v46 = vadd.f32 1e-05, %v5635_v7  ;;  %5927 = vmatpush.bf16.msra.mxu0 %v8242_v61  ;;  %5940 = vmatpush.bf16.msra.mxu1 %v8246_v14  ;;  %v8427_v7 = vld [vmem:[%s15302_s10 + $0x90] sm:$0xf0]  ;;  %v9190_v61 = vld [vmem:[%s15302_s10 + $0x6c] sm:$0xf] }
 0x85c   :  { %6106 = vmatpush.bf16.msra.mxu2 %v8474_v54  ;;  %6119 = vmatpush.bf16.msra.mxu3 %v8478_v63  ;;  %v8430_v28 = vor.u32 %v9193_v47, %v8427_v7  ;;  %v8438_v54 = vor.u32 %v9194_v12, %v8435_v13  ;;  %v9186_v18 = vld [vmem:[%s15302_s10 + $0x4c] sm:$0xf]  ;;  %v8403_v56 = vld [vmem:[%s15302_s10 + $0x58] sm:$0xf0]  ;;  %v8377_v26 = vld [vmem:[%s15302_s10 + $0x20] sm:$0xf] }
 0x85d   :  { %9495 = vrsqrt.f32 %v14546_v46  ;;  %vm5643_vm13 = vweird.f32 %v14546_v46  ;;  %v8379_v29 = vld [vmem:[%s15302_s10 + $0x30] sm:$0xf0]  ;;  %v5624_v44 = vld [vmem:[%s15301_s9] sm:$0x1]  ;;  %v8387_v39 = vld [vmem:[%s15302_s10 + $0x38] sm:$0xf0] }
 0x85e   :  { %v9177_v47 = vld [vmem:[%s15302_s10 + $0x4] sm:$0xf]  ;;  %v8363_v7 = vld [vmem:[%s15302_s10 + $0x10] sm:$0xf0]  ;;  %v8371_v12 = vld [vmem:[%s15302_s10 + $0x18] sm:$0xf0] }
 0x85f   :  { %6132 = vmatpush.bf16.msrb.mxu0 %v8482_v37  ;;  %6145 = vmatpush.bf16.msrb.mxu1 %v8486_v6  ;;  %v8418_v37 = vor.u32 %v9192_v27, %v8417_v62  ;;  %v8401_v6 = vld [vmem:[%s15302_s10 + $0x48] sm:$0xf]  ;;  %v8601_v13 = vld [vmem:[%s15302_s10 + $0x2e0] sm:$0xf]  ;;  %v9271_v49 = vld [vmem:[%s15302_s10 + $0x2ec] sm:$0xf0] }
 0x860   :  { %6107 = vmatpush.bf16.msra.mxu2 %v8458_v9  ;;  %6120 = vmatpush.bf16.msra.mxu3 %v8462_v1  ;;  %v8394_v9 = vor.u32 %v9187_v22, %v8393_v41  ;;  %v8398_v1 = vor.u32 %v9185_v33, %v8395_v55  ;;  %v8603_v25 = vld [vmem:[%s15302_s10 + $0x2f0] sm:$0xf0]  ;;  %v9270_v27 = vld [vmem:[%s15302_s10 + $0x2ec] sm:$0xf]  ;;  %v9267_v41 = vld [vmem:[%s15302_s10 + $0x2cc] sm:$0xf0] }
 0x861   :  { %v9265_v22 = vld [vmem:[%s15302_s10 + $0x2c4] sm:$0xf]  ;;  %v8593_v33 = vld [vmem:[%s15302_s10 + $0x2c8] sm:$0xf]  ;;  %v9268_v55 = vld [vmem:[%s15302_s10 + $0x2d4] sm:$0xf0] }
 0x863   :  { %v9496_v8 = vpop.eup %9495  ;;  %6133 = vmatpush.bf16.msrb.mxu0 %v8466_v19  ;;  %6146 = vmatpush.bf16.msrb.mxu1 %v8470_v52  ;;  %v9181_v19 = vld [vmem:[%s15302_s10 + $0x24] sm:$0xf]  ;;  %v9184_v52 = vld [vmem:[%s15302_s10 + $0x34] sm:$0xf0] }
 0x864   :  { %v5638_v58 = vmul.f32 %v9496_v8, %v14546_v46  ;;  %6108 = vmatpush.bf16.msra.mxu2 %v8442_v34  ;;  %vm5644_vm12 = vweird.f32 %v9496_v8  ;;  %6121 = vmatpush.bf16.msra.mxu3 %v8446_v20  ;;  %v8419_v46 = vld [vmem:[%s15302_s10 + $0x78] sm:$0xf0]  ;;  %v9182_v34 = vld [vmem:[%s15302_s10 + $0x2c] sm:$0xf]  ;;  %v8382_v59 = vor.u32 %v9181_v19, %v8379_v29  ;;  %v9179_v20 = vld [vmem:[%s15302_s10 + $0xc] sm:$0xf0] }
 0x865   :  { %vm5645_vm14 = vmor %vm5643_vm13, %vm5644_vm12  ;;  %v8422_v10 = vor.u32 %v9190_v61, %v8419_v46  ;;  %v8602_v61 = vor.u32 %v9271_v49, %v8601_v13  ;;  %v9262_v29 = vld [vmem:[%s15302_s10 + $0x2ac] sm:$0xf]  ;;  %v8545_v13 = vld [vmem:[%s15302_s10 + $0x268] sm:$0xf] }
 0x866   :  { %v5639_v15 = vmul.f32 %v9496_v8, %v5638_v58  ;;  %v8406_v58 = vor.u32 %v9186_v18, %v8403_v56  ;;  %v8569_v18 = vld [vmem:[%s15302_s10 + $0x2a0] sm:$0xf]  ;;  %v9263_v56 = vld [vmem:[%s15302_s10 + $0x2ac] sm:$0xf0]  ;;  %v8547_v49 = vld [vmem:[%s15302_s10 + $0x278] sm:$0xf0] }
 0x867   :  { %6134 = vmatpush.bf16.msrb.mxu0 %v8450_v24  ;;  %6147 = vmatpush.bf16.msrb.mxu1 %v8454_v53  ;;  %v8369_v53 = vld [vmem:[%s15302_s10 + $0x8] sm:$0xf] }
 0x868   :  { %v5640_v17 = vmul.f32 0.5, %v5639_v15  ;;  %6109 = vmatpush.bf16.msra.mxu2 %v8426_v31  ;;  %6122 = vmatpush.bf16.msra.mxu3 %v8430_v28  ;;  %v8361_v15 = vld [vmem:[%s15302_s10] sm:$0xf]  ;;  %v9178_v31 = vld [vmem:[%s15302_s10 + $0xc] sm:$0xf]  ;;  %v8366_v28 = vor.u32 %v9177_v47, %v8363_v7 }
 0x869   :  { %v8362_v50 = vor.u32 %v9179_v20, %v8361_v15  ;;  %v8561_v15 = vld [vmem:[%s15302_s10 + $0x288] sm:$0xf]  ;;  %v9260_v20 = vld [vmem:[%s15302_s10 + $0x294] sm:$0xf0] }
 0x86a   :  { %v5641_v48 = vsub.f32 1.5, %v5640_v17  ;;  %v8390_v17 = vor.u32 %v9182_v34, %v8387_v39  ;;  %v9257_v34 = vld [vmem:[%s15302_s10 + $0x284] sm:$0xf] }
 0x86b   :  { %6135 = vmatpush.bf16.msrb.mxu0 %v8434_v16  ;;  %6148 = vmatpush.bf16.msrb.mxu1 %v8438_v54  ;;  %v9269_v16 = vld [vmem:[%s15302_s10 + $0x2e4] sm:$0xf]  ;;  %v8374_v54 = vor.u32 %v9178_v31, %v8371_v12  ;;  %v8539_v12 = vld [vmem:[%s15302_s10 + $0x270] sm:$0xf0] }
 0x86c   :  { %v5642_v45 = vmul.f32 %v9496_v8, %v5641_v48  ;;  %6110 = vmatpush.bf16.msra.mxu2 %v8410_v30  ;;  %6123 = vmatpush.bf16.msra.mxu3 %v8414_v11  ;;  %v8611_v30 = vld [vmem:[%s15302_s10 + $0x2f8] sm:$0xf0]  ;;  %v8606_v46 = vor.u32 %v9269_v16, %v8603_v25  ;;  %v8585_v11 = vld [vmem:[%s15302_s10 + $0x2c0] sm:$0xf] }
 0x86e   :  { %v5646_v63 = vsel %vm5645_vm14, %v9496_v8, %v5642_v45  ;;  %v8402_v8 = vor.u32 %v9188_v35, %v8401_v6  ;;  %v9272_v45 = vld [vmem:[%s15302_s10 + $0x2f4] sm:$0xf0]  ;;  %v8595_v6 = vld [vmem:[%s15302_s10 + $0x2d8] sm:$0xf0]  ;;  %v8586_v35 = vor.u32 %v9267_v41, %v8585_v11 }
 0x86f   :  { %v5647_v14 = vmul.f32 %v5646_v63, %v5623_v36  ;;  %6136 = vmatpush.bf16.msrb.mxu0 %v8418_v37  ;;  %6149 = vmatpush.bf16.msrb.mxu1 %v8422_v10  ;;  %v8609_v36 = vld [vmem:[%s15302_s10 + $0x2e8] sm:$0xf]  ;;  %v8587_v37 = vld [vmem:[%s15302_s10 + $0x2d0] sm:$0xf0]  ;;  %v9266_v10 = vld [vmem:[%s15302_s10 + $0x2cc] sm:$0xf] }
 0x870   :  { %6111 = vmatpush.bf16.msra.mxu2 %v8394_v9  ;;  %6124 = vmatpush.bf16.msra.mxu3 %v8398_v1  ;;  %v8610_v63 = vor.u32 %v9272_v45, %v8609_v36  ;;  %v8594_v9 = vor.u32 %v9268_v55, %v8593_v33  ;;  %v9261_v1 = vld [vmem:[%s15302_s10 + $0x2a4] sm:$0xf]  ;;  %v8521_v45 = vld [vmem:[%s15302_s10 + $0x240] sm:$0xf]  ;;  %v8531_v11 = vld [vmem:[%s15302_s10 + $0x258] sm:$0xf0] }
 0x871   :  { %v5648_v38 = vmul.f32 %v5647_v14, %v14488_v43  ;;  %v14703_v2 = vperm.slane %v5647_v14, 0  ;;  %v9183_v43 = vld [vmem:[%s15302_s10 + $0x2c] sm:$0xf0]  ;;  %v8614_v14 = vor.u32 %v9270_v27, %v8611_v30  ;;  %v8523_v30 = vld [vmem:[%s15302_s10 + $0x250] sm:$0xf0] }
 0x872   :  { %v8378_v23 = vor.u32 %v9183_v43, %v8377_v26  ;;  %v8598_v26 = vor.u32 %v9266_v10, %v8595_v6  ;;  %v8571_v43 = vld [vmem:[%s15302_s10 + $0x2b0] sm:$0xf0]  ;;  %v9247_v33 = vld [vmem:[%s15302_s10 + $0x22c] sm:$0xf0]  ;;  %v9245_v55 = vld [vmem:[%s15302_s10 + $0x224] sm:$0xf] }
 0x873   :  { %v5665_v5 = vmul.f32 %v14703_v2, %v14367_v0  ;;  %v8385_v0 = vld [vmem:[%s15302_s10 + $0x28] sm:$0xf]  ;;  %v5649_v4 = vsub.f32 %v5624_v44, %v5648_v38  ;;  %v5659_v60 = vmul.f32 %v14703_v2, %v14318_v40  ;;  %6137 = vmatpush.bf16.msrb.mxu0 %v8402_v8  ;;  %6150 = vmatpush.bf16.msrb.mxu1 %v8406_v58  ;;  %v9180_v40 = vld [vmem:[%s15302_s10 + $0x14] sm:$0xf0]  ;;  %v8579_v44 = vld [vmem:[%s15302_s10 + $0x2b8] sm:$0xf0] }
 0x874   :  { %v8386_v24 = vor.u32 %v9184_v52, %v8385_v0  ;;  %6112 = vmatpush.bf16.msra.mxu2 %v8378_v23  ;;  %6125 = vmatpush.bf16.msra.mxu3 %v8382_v59  ;;  %v8370_v51 = vor.u32 %v9180_v40, %v8369_v53  ;;  %v8590_v38 = vor.u32 %v9265_v22, %v8587_v37  ;;  %v9264_v8 = vld [vmem:[%s15302_s10 + $0x2b4] sm:$0xf0]  ;;  %v9259_v23 = vld [vmem:[%s15302_s10 + $0x28c] sm:$0xf0]  ;;  %v8555_v59 = vld [vmem:[%s15302_s10 + $0x290] sm:$0xf0] }
 0x875   :  { %v14746_v21 = vperm.slane %v5649_v4, 0  ;;  %v5653_v19 = vmul.f32 %v14703_v2, %v14258_v42  ;;  %v8570_v58 = vor.u32 %v9263_v56, %v8569_v18  ;;  %v8574_v52 = vor.u32 %v9261_v1, %v8571_v43  ;;  %v8553_v42 = vld [vmem:[%s15302_s10 + $0x280] sm:$0xf]  ;;  %v8507_v6 = vld [vmem:[%s15302_s10 + $0x230] sm:$0xf0] }
 0x876   :  { %v8582_v39 = vor.u32 %v9262_v29, %v8579_v44  ;;  %v8554_v47 = vor.u32 %v9259_v23, %v8553_v42  ;;  %v8562_v53 = vor.u32 %v9260_v20, %v8561_v15  ;;  %v8537_v40 = vld [vmem:[%s15302_s10 + $0x260] sm:$0xf]  ;;  %v8515_v18 = vld [vmem:[%s15302_s10 + $0x238] sm:$0xf0]  ;;  %v5662_v43 = vmul.f32 %v14703_v2, %v14320_v32  ;;  %v8491_v29 = vld [vmem:[%s15302_s10 + $0x210] sm:$0xf0] }
 0x877   :  { %v5660_v57 = vadd.f32 %v5659_v60, %v14746_v21  ;;  %v14773_v48 = vadd.f32 %v5665_v5, %v14746_v21  ;;  %6138 = vmatpush.bf16.msrb.mxu0 %v8386_v24  ;;  %6151 = vmatpush.bf16.msrb.mxu1 %v8390_v17  ;;  %v8577_v5 = vld [vmem:[%s15302_s10 + $0x2a8] sm:$0xf]  ;;  %v5657_v0 = vadd.f32 %v14746_v21, %v5653_v19  ;;  %v9258_v60 = vld [vmem:[%s15302_s10 + $0x28c] sm:$0xf]  ;;  %v8563_v24 = vld [vmem:[%s15302_s10 + $0x298] sm:$0xf0] }
 0x878   :  { %6113 = vmatpush.bf16.msra.mxu2 %v8362_v50  ;;  %6126 = vmatpush.bf16.msra.mxu3 %v8366_v28  ;;  %v8578_v4 = vor.u32 %v9264_v8, %v8577_v5  ;;  %v8558_v17 = vor.u32 %v9257_v34, %v8555_v59  ;;  %v9253_v50 = vld [vmem:[%s15302_s10 + $0x264] sm:$0xf]  ;;  %v8566_v31 = vor.u32 %v9258_v60, %v8563_v24  ;;  %v9256_v28 = vld [vmem:[%s15302_s10 + $0x274] sm:$0xf0]  ;;  %v8505_v37 = vld [vmem:[%s15302_s10 + $0x220] sm:$0xf] }
 0x879   :  { %v5661_v3 = vmax.f32 %v5660_v57, 0.0  ;;  %v5658_v7 = vmax.f32 %v5657_v0, 0.0  ;;  %v9255_v57 = vld [vmem:[%s15302_s10 + $0x26c] sm:$0xf0]  ;;  %v8542_v25 = vor.u32 %v9253_v50, %v8539_v12  ;;  %v8546_v36 = vor.u32 %v9256_v28, %v8545_v13  ;;  %v8489_v1 = vld [vmem:[%s15302_s10 + $0x200] sm:$0xf] }
 0x87a   :  { %v8506_v56 = vor.u32 %v9247_v33, %v8505_v37  ;;  %v8510_v5 = vor.u32 %v9245_v55, %v8507_v6  ;;  %v9241_v19 = vld [vmem:[%s15302_s10 + $0x204] sm:$0xf]  ;;  %v8497_v44 = vld [vmem:[%s15302_s10 + $0x208] sm:$0xf]  ;;  %v9244_v32 = vld [vmem:[%s15302_s10 + $0x214] sm:$0xf0] }
 0x87b   :  { %v5701_v62 = vpack.c.bf16 %v5661_v3, %v5661_v3  ;;  %6139 = vmatpush.bf16.msrb.mxu0 %v8370_v51  ;;  %6152 = vmatpush.bf16.msrb.mxu1 %v8374_v54  ;;  %v9254_v3 = vld [vmem:[%s15302_s10 + $0x26c] sm:$0xf]  ;;  %v5668_v16 = vpack.c.bf16 %v5658_v7, %v5658_v7  ;;  %v8538_v51 = vor.u32 %v9255_v57, %v8537_v40  ;;  %v9251_v54 = vld [vmem:[%s15302_s10 + $0x24c] sm:$0xf0]  ;;  %v8499_v0 = vld [vmem:[%s15302_s10 + $0x218] sm:$0xf0] }
 0x87c   :  { %v8550_v27 = vor.u32 %v9254_v3, %v8547_v49  ;;  %v8522_v41 = vor.u32 %v9251_v54, %v8521_v45  ;;  %v9242_v2 = vld [vmem:[%s15302_s10 + $0x20c] sm:$0xf]  ;;  %v9303_v42 = vld [vmem:[%s15302_s10 + $0x3ec] sm:$0xf0]  ;;  %v9301_v23 = vld [vmem:[%s15302_s10 + $0x3e4] sm:$0xf]  ;;  %v8494_v15 = vor.u32 %v9241_v19, %v8491_v29  ;;  %v8498_v20 = vor.u32 %v9244_v32, %v8497_v44 }
 0x87d   :  { %5902 = vmatmul.bf16.vlgmr.msrb.gmra.mxu2 %v5701_v62  ;;  %5915 = vmatmul.bf16.vlgmr.msrb.gmra.mxu3 %v5701_v62  ;;  %v9304_v59 = vld [vmem:[%s15302_s10 + $0x3f4] sm:$0xf0]  ;;  %v9302_v60 = vld [vmem:[%s15302_s10 + $0x3ec] sm:$0xf]  ;;  %v8739_v24 = vld [vmem:[%s15302_s10 + $0x3f8] sm:$0xf0] }
 0x87e   :  { %5928 = vmatmul.bf16.vlgmr.msra.gmra.mxu0 %v5701_v62  ;;  %5941 = vmatmul.bf16.vlgmr.msra.gmra.mxu1 %v5701_v62  ;;  %v9249_v62 = vld [vmem:[%s15302_s10 + $0x244] sm:$0xf]  ;;  %v8713_v57 = vld [vmem:[%s15302_s10 + $0x3c0] sm:$0xf]  ;;  %v9299_v50 = vld [vmem:[%s15302_s10 + $0x3cc] sm:$0xf0]  ;;  %v8742_v12 = vor.u32 %v9302_v60, %v8739_v24 }
 0x87f   :  { %6351 = vmatpush.bf16.msrb.mxu2 %v8602_v61  ;;  %6364 = vmatpush.bf16.msrb.mxu3 %v8606_v46  ;;  %v8529_v61 = vld [vmem:[%s15302_s10 + $0x248] sm:$0xf]  ;;  %v9252_v46 = vld [vmem:[%s15302_s10 + $0x254] sm:$0xf0]  ;;  %v8526_v22 = vor.u32 %v9249_v62, %v8523_v30  ;;  %v8715_v13 = vld [vmem:[%s15302_s10 + $0x3d0] sm:$0xf0] }
 0x880   :  { %6377 = vmatpush.bf16.msra.mxu0 %v8610_v63  ;;  %6390 = vmatpush.bf16.msra.mxu1 %v8614_v14  ;;  %v9250_v63 = vld [vmem:[%s15302_s10 + $0x24c] sm:$0xf]  ;;  %v8530_v14 = vor.u32 %v9252_v46, %v8529_v61  ;;  %v8721_v28 = vld [vmem:[%s15302_s10 + $0x3c8] sm:$0xf]  ;;  %v9300_v3 = vld [vmem:[%s15302_s10 + $0x3d4] sm:$0xf0] }
 0x881   :  { %v8534_v10 = vor.u32 %v9250_v63, %v8531_v11  ;;  %v9298_v49 = vld [vmem:[%s15302_s10 + $0x3cc] sm:$0xf]  ;;  %v8722_v45 = vor.u32 %v9300_v3, %v8721_v28  ;;  %v8697_v54 = vld [vmem:[%s15302_s10 + $0x3a0] sm:$0xf]  ;;  %v9295_v62 = vld [vmem:[%s15302_s10 + $0x3ac] sm:$0xf0] }
 0x882   :  { %v8699_v61 = vld [vmem:[%s15302_s10 + $0x3b0] sm:$0xf0]  ;;  %v8705_v46 = vld [vmem:[%s15302_s10 + $0x3a8] sm:$0xf]  ;;  %v9296_v63 = vld [vmem:[%s15302_s10 + $0x3b4] sm:$0xf0] }
 0x883   :  { %6352 = vmatpush.bf16.msrb.mxu2 %v8586_v35  ;;  %6365 = vmatpush.bf16.msrb.mxu3 %v8590_v38  ;;  %v8513_v35 = vld [vmem:[%s15302_s10 + $0x228] sm:$0xf]  ;;  %v9248_v38 = vld [vmem:[%s15302_s10 + $0x234] sm:$0xf0]  ;;  %v9294_v11 = vld [vmem:[%s15302_s10 + $0x3ac] sm:$0xf]  ;;  %v8706_v37 = vor.u32 %v9296_v63, %v8705_v46 }
 0x884   :  { %6378 = vmatpush.bf16.msra.mxu0 %v8594_v9  ;;  %6391 = vmatpush.bf16.msra.mxu1 %v8598_v26  ;;  %v9246_v9 = vld [vmem:[%s15302_s10 + $0x22c] sm:$0xf]  ;;  %v9243_v26 = vld [vmem:[%s15302_s10 + $0x20c] sm:$0xf0]  ;;  %v8514_v8 = vor.u32 %v9248_v38, %v8513_v35  ;;  %v8681_v33 = vld [vmem:[%s15302_s10 + $0x380] sm:$0xf] }
 0x885   :  { %v8490_v34 = vor.u32 %v9243_v26, %v8489_v1  ;;  %v9291_v55 = vld [vmem:[%s15302_s10 + $0x38c] sm:$0xf0]  ;;  %v8683_v35 = vld [vmem:[%s15302_s10 + $0x390] sm:$0xf0]  ;;  %v8689_v38 = vld [vmem:[%s15302_s10 + $0x388] sm:$0xf] }
 0x886   :  { %v8682_v1 = vor.u32 %v9291_v55, %v8681_v33  ;;  %v9285_v19 = vld [vmem:[%s15302_s10 + $0x364] sm:$0xf]  ;;  %v8667_v44 = vld [vmem:[%s15302_s10 + $0x370] sm:$0xf0]  ;;  %v9288_v32 = vld [vmem:[%s15302_s10 + $0x374] sm:$0xf0] }
 0x887   :  { %6353 = vmatpush.bf16.msrb.mxu2 %v8570_v58  ;;  %6366 = vmatpush.bf16.msrb.mxu3 %v8574_v52  ;;  %v8518_v58 = vor.u32 %v9246_v9, %v8515_v18  ;;  %v5663_v52 = vadd.f32 %v5662_v43, %v14746_v21  ;;  %v8737_v21 = vld [vmem:[%s15302_s10 + $0x3e8] sm:$0xf]  ;;  %v9292_v9 = vld [vmem:[%s15302_s10 + $0x394] sm:$0xf0]  ;;  %v9290_v18 = vld [vmem:[%s15302_s10 + $0x38c] sm:$0xf] }
 0x888   :  { %6379 = vmatpush.bf16.msra.mxu0 %v8578_v4  ;;  %6392 = vmatpush.bf16.msra.mxu1 %v8582_v39  ;;  %v8729_v4 = vld [vmem:[%s15302_s10 + $0x3e0] sm:$0xf]  ;;  %v8731_v39 = vld [vmem:[%s15302_s10 + $0x3f0] sm:$0xf0]  ;;  %v8738_v40 = vor.u32 %v9304_v59, %v8737_v21  ;;  %v8690_v43 = vor.u32 %v9292_v9, %v8689_v38  ;;  %v9282_v60 = vld [vmem:[%s15302_s10 + $0x34c] sm:$0xf] }
 0x889   :  { %v8730_v7 = vor.u32 %v9303_v42, %v8729_v4  ;;  %v8670_v4 = vor.u32 %v9285_v19, %v8667_v44  ;;  %v8651_v59 = vld [vmem:[%s15302_s10 + $0x350] sm:$0xf0]  ;;  %v8659_v24 = vld [vmem:[%s15302_s10 + $0x358] sm:$0xf0]  ;;  %v9278_v28 = vld [vmem:[%s15302_s10 + $0x32c] sm:$0xf] }
 0x88a   :  { %v8643_v3 = vld [vmem:[%s15302_s10 + $0x338] sm:$0xf0]  ;;  %v9326_v19 = vld [vmem:[%s15304_s12 + $0xa8] sm:$0xff]  ;;  %v9311_v44 = vld [vmem:[%s15304_s12 + $0x30] sm:$0xff] }
 0x88b   :  { %6354 = vmatpush.bf16.msrb.mxu2 %v8554_v47  ;;  %6367 = vmatpush.bf16.msrb.mxu3 %v8558_v17  ;;  %v8502_v47 = vor.u32 %v9242_v2, %v8499_v0  ;;  %v5664_v17 = vmax.f32 %v5663_v52, 0.0  ;;  %v9286_v2 = vld [vmem:[%s15302_s10 + $0x36c] sm:$0xf]  ;;  %v8675_v0 = vld [vmem:[%s15302_s10 + $0x378] sm:$0xf0] }
 0x88c   :  { %6380 = vmatpush.bf16.msra.mxu0 %v8562_v53  ;;  %6393 = vmatpush.bf16.msra.mxu1 %v8566_v31  ;;  %v8734_v53 = vor.u32 %v9301_v23, %v8731_v39  ;;  %v9297_v31 = vld [vmem:[%s15302_s10 + $0x3c4] sm:$0xf]  ;;  %v8649_v23 = vld [vmem:[%s15302_s10 + $0x340] sm:$0xf]  ;;  %v8678_v21 = vor.u32 %v9286_v2, %v8675_v0  ;;  %v8627_v46 = vld [vmem:[%s15302_s10 + $0x318] sm:$0xf0] }
 0x88d   :  { %6114 = vmatmul.bf16.vlgmr.msra.gmra.mxu2 %v5668_v16  ;;  %6127 = vmatmul.bf16.vlgmr.msra.gmra.mxu3 %v5668_v16  ;;  %v9281_v39 = vld [vmem:[%s15302_s10 + $0x344] sm:$0xf]  ;;  %v9328_v38 = vld [vmem:[%s15304_s12 + $0xb8] sm:$0xff]  ;;  %v9310_v2 = vld [vmem:[%s15304_s12 + $0x28] sm:$0xff] }
 0x88e   :  { %6140 = vmatmul.bf16.vlgmr.msrb.gmra.mxu0 %v5668_v16  ;;  %6153 = vmatmul.bf16.vlgmr.msrb.gmra.mxu1 %v5668_v16  ;;  %v8723_v16 = vld [vmem:[%s15302_s10 + $0x3d8] sm:$0xf0]  ;;  %v9325_v0 = vld [vmem:[%s15304_s12 + $0xa0] sm:$0xff] }
 0x88f   :  { %6355 = vmatpush.bf16.msrb.mxu2 %v8538_v51  ;;  %6368 = vmatpush.bf16.msrb.mxu3 %v8542_v25  ;;  %v6158_v51 = vpack.c.bf16 %v5664_v17, %v5664_v17  ;;  %v8714_v25 = vor.u32 %v9299_v50, %v8713_v57  ;;  %v8726_v30 = vor.u32 %v9298_v49, %v8723_v16  ;;  %v9277_v57 = vld [vmem:[%s15302_s10 + $0x324] sm:$0xf]  ;;  %v9336_v9 = vld [vmem:[%s15304_s12 + $0xf8] sm:$0xff] }
 0x890   :  { %6381 = vmatpush.bf16.msra.mxu0 %v8546_v36  ;;  %6394 = vmatpush.bf16.msra.mxu1 %v8550_v27  ;;  %v8718_v36 = vor.u32 %v9297_v31, %v8715_v13  ;;  %v9293_v27 = vld [vmem:[%s15302_s10 + $0x3a4] sm:$0xf]  ;;  %v8662_v50 = vor.u32 %v9282_v60, %v8659_v24  ;;  %v8635_v31 = vld [vmem:[%s15302_s10 + $0x330] sm:$0xf0]  ;;  %v9280_v13 = vld [vmem:[%s15302_s10 + $0x334] sm:$0xf0] }
 0x891   :  { %v8638_v16 = vor.u32 %v9277_v57, %v8635_v31  ;;  %v9323_v60 = vld [vmem:[%s15304_s12 + $0x90] sm:$0xff]  ;;  %v9308_v57 = vld [vmem:[%s15304_s12 + $0x18] sm:$0xff]  ;;  %v9322_v31 = vld [vmem:[%s15304_s12 + $0x88] sm:$0xff] }
 0x892   :  { %v9331_v24 = vld [vmem:[%s15304_s12 + $0xd0] sm:$0xff] }
 0x893   :  { %6356 = vmatpush.bf16.msrb.mxu2 %v8522_v41  ;;  %6369 = vmatpush.bf16.msrb.mxu3 %v8526_v22  ;;  %v8707_v41 = vld [vmem:[%s15302_s10 + $0x3b8] sm:$0xf0]  ;;  %v8698_v22 = vor.u32 %v9295_v62, %v8697_v54  ;;  %v8646_v54 = vor.u32 %v9278_v28, %v8643_v3  ;;  %v8619_v62 = vld [vmem:[%s15302_s10 + $0x310] sm:$0xf0] }
 0x894   :  { %6382 = vmatpush.bf16.msra.mxu0 %v8530_v14  ;;  %6395 = vmatpush.bf16.msra.mxu1 %v8534_v10  ;;  %v8702_v14 = vor.u32 %v9293_v27, %v8699_v61  ;;  %v9289_v10 = vld [vmem:[%s15302_s10 + $0x384] sm:$0xf]  ;;  %v8710_v6 = vor.u32 %v9294_v11, %v8707_v41  ;;  %v8625_v27 = vld [vmem:[%s15302_s10 + $0x308] sm:$0xf]  ;;  %v9274_v61 = vld [vmem:[%s15302_s10 + $0x30c] sm:$0xf] }
 0x895   :  { %v8686_v26 = vor.u32 %v9289_v10, %v8683_v35  ;;  %v9307_v28 = vld [vmem:[%s15304_s12 + $0x10] sm:$0xff] }
 0x896   :  { %v9315_v3 = vld [vmem:[%s15304_s12 + $0x50] sm:$0xff] }
 0x897   :  { %6357 = vmatpush.bf16.msrb.mxu2 %v8506_v56  ;;  %6370 = vmatpush.bf16.msrb.mxu3 %v8510_v5  ;;  %v8691_v56 = vld [vmem:[%s15302_s10 + $0x398] sm:$0xf0]  ;;  %v8665_v5 = vld [vmem:[%s15302_s10 + $0x360] sm:$0xf] }
 0x898   :  { %6383 = vmatpush.bf16.msra.mxu0 %v8514_v8  ;;  %6396 = vmatpush.bf16.msra.mxu1 %v8518_v58  ;;  %v9287_v8 = vld [vmem:[%s15302_s10 + $0x36c] sm:$0xf0]  ;;  %v8694_v29 = vor.u32 %v9290_v18, %v8691_v56  ;;  %v8673_v58 = vld [vmem:[%s15302_s10 + $0x368] sm:$0xf] }
 0x899   :  { %v8666_v52 = vor.u32 %v9287_v8, %v8665_v5  ;;  %v8674_v42 = vor.u32 %v9288_v32, %v8673_v58  ;;  %v9327_v18 = vld [vmem:[%s15304_s12 + $0xb0] sm:$0xff] }
 0x89a   :  { %v9335_v56 = vld [vmem:[%s15304_s12 + $0xf0] sm:$0xff] }
 0x89b   :  { %6358 = vmatpush.bf16.msrb.mxu2 %v8490_v34  ;;  %6371 = vmatpush.bf16.msrb.mxu3 %v8494_v15  ;;  %v9283_v34 = vld [vmem:[%s15302_s10 + $0x34c] sm:$0xf0]  ;;  %v8657_v15 = vld [vmem:[%s15302_s10 + $0x348] sm:$0xf] }
 0x89c   :  { %6384 = vmatpush.bf16.msra.mxu0 %v8498_v20  ;;  %6397 = vmatpush.bf16.msra.mxu1 %v8502_v47  ;;  %v9284_v20 = vld [vmem:[%s15302_s10 + $0x354] sm:$0xf0]  ;;  %v8650_v47 = vor.u32 %v9283_v34, %v8649_v23  ;;  %v9319_v32 = vld [vmem:[%s15304_s12 + $0x70] sm:$0xff]  ;;  %v9309_v34 = vld [vmem:[%s15304_s12 + $0x20] sm:$0xff] }
 0x89d   :  { %v8658_v17 = vor.u32 %v9284_v20, %v8657_v15  ;;  %v9317_v15 = vld [vmem:[%s15304_s12 + $0x60] sm:$0xff] }
 0x89e   :  { %6359 = vmatmul.bf16.vlgmr.msrb.gmra.mxu2 %v6158_v51  ;;  %6372 = vmatmul.bf16.vlgmr.msrb.gmra.mxu3 %v6158_v51 }
 0x89f   :  { %6600 = vmatpush.bf16.msra.mxu2 %v8730_v7  ;;  %6613 = vmatpush.bf16.msra.mxu3 %v8734_v53  ;;  %v8654_v7 = vor.u32 %v9281_v39, %v8651_v59  ;;  %v8633_v53 = vld [vmem:[%s15302_s10 + $0x320] sm:$0xf]  ;;  %v9324_v39 = vld [vmem:[%s15304_s12 + $0x98] sm:$0xff] }
 0x8a0   :  { %6626 = vmatpush.bf16.msrb.mxu0 %v8738_v40  ;;  %6639 = vmatpush.bf16.msrb.mxu1 %v8742_v12  ;;  %v9279_v40 = vld [vmem:[%s15302_s10 + $0x32c] sm:$0xf0]  ;;  %v8641_v12 = vld [vmem:[%s15302_s10 + $0x328] sm:$0xf] }
 0x8a1   :  { %6385 = vmatmul.bf16.vlgmr.msra.gmra.mxu0 %v6158_v51  ;;  %6398 = vmatmul.bf16.vlgmr.msra.gmra.mxu1 %v6158_v51  ;;  %v8634_v49 = vor.u32 %v9279_v40, %v8633_v53  ;;  %v8642_v51 = vor.u32 %v9280_v13, %v8641_v12  ;;  %v9330_v13 = vld [vmem:[%s15304_s12 + $0xc8] sm:$0xff] }
 0x8a3   :  { %6601 = vmatpush.bf16.msra.mxu2 %v8714_v25  ;;  %6614 = vmatpush.bf16.msra.mxu3 %v8718_v36  ;;  %v8617_v25 = vld [vmem:[%s15302_s10 + $0x300] sm:$0xf]  ;;  %v9275_v36 = vld [vmem:[%s15302_s10 + $0x30c] sm:$0xf0] }
 0x8a4   :  { %6627 = vmatpush.bf16.msrb.mxu0 %v8722_v45  ;;  %6640 = vmatpush.bf16.msrb.mxu1 %v8726_v30  ;;  %v9273_v45 = vld [vmem:[%s15302_s10 + $0x304] sm:$0xf]  ;;  %v9276_v30 = vld [vmem:[%s15302_s10 + $0x314] sm:$0xf0]  ;;  %v8618_v63 = vor.u32 %v9275_v36, %v8617_v25  ;;  %v9306_v36 = vld [vmem:[%s15304_s12 + $0x8] sm:$0xff] }
 0x8a5   :  { %v8622_v11 = vor.u32 %v9273_v45, %v8619_v62  ;;  %v8626_v41 = vor.u32 %v9276_v30, %v8625_v27  ;;  %v9329_v25 = vld [vmem:[%s15304_s12 + $0xc0] sm:$0xff]  ;;  %v9314_v45 = vld [vmem:[%s15304_s12 + $0x48] sm:$0xff] }
 0x8a6   :  { %v9305_v27 = vld [vmem:[%s15304_s12] sm:$0xff] }
 0x8a7   :  { %6602 = vmatpush.bf16.msra.mxu2 %v8698_v22  ;;  %6615 = vmatpush.bf16.msra.mxu3 %v8702_v14  ;;  %v5667_v22 = vmax.f32 %v14773_v48, 0.0  ;;  %v8630_v14 = vor.u32 %v9274_v61, %v8627_v46  ;;  %v9313_v30 = vld [vmem:[%s15304_s12 + $0x40] sm:$0xff] }
 0x8a8   :  { %6628 = vmatpush.bf16.msrb.mxu0 %v8706_v37  ;;  %6641 = vmatpush.bf16.msrb.mxu1 %v8710_v6  ;;  %v6656_v61 = vld [vmem:[%s15303_s11] sm:$0xf] }
 0x8a9   :  { %v6407_v37 = vpack.c.bf16 %v5667_v22, %v5667_v22 }
 0x8ab   :  { %6603 = vmatpush.bf16.msra.mxu2 %v8682_v1  ;;  %6616 = vmatpush.bf16.msra.mxu3 %v8686_v26  ;;  %v9312_v1 = vld [vmem:[%s15304_s12 + $0x38] sm:$0xff] }
 0x8ac   :  { %6629 = vmatpush.bf16.msrb.mxu0 %v8690_v43  ;;  %6642 = vmatpush.bf16.msrb.mxu1 %v8694_v29  ;;  %v9320_v43 = vld [vmem:[%s15304_s12 + $0x78] sm:$0xff]  ;;  %v9334_v29 = vld [vmem:[%s15304_s12 + $0xe8] sm:$0xff] }
 0x8af   :  { %6604 = vmatpush.bf16.msra.mxu2 %v8666_v52  ;;  %6617 = vmatpush.bf16.msra.mxu3 %v8670_v4  ;;  %v9333_v52 = vld [vmem:[%s15304_s12 + $0xe0] sm:$0xff]  ;;  %v9318_v4 = vld [vmem:[%s15304_s12 + $0x68] sm:$0xff] }
 0x8b0   :  { %6630 = vmatpush.bf16.msrb.mxu0 %v8674_v42  ;;  %6643 = vmatpush.bf16.msrb.mxu1 %v8678_v21  ;;  %v9332_v21 = vld [vmem:[%s15304_s12 + $0xd8] sm:$0xff] }
 0x8b3   :  { %6605 = vmatpush.bf16.msra.mxu2 %v8650_v47  ;;  %6618 = vmatpush.bf16.msra.mxu3 %v8654_v7 }
 0x8b4   :  { %6631 = vmatpush.bf16.msrb.mxu0 %v8658_v17  ;;  %6644 = vmatpush.bf16.msrb.mxu1 %v8662_v50  ;;  %v9316_v50 = vld [vmem:[%s15304_s12 + $0x58] sm:$0xff] }
 0x8b7   :  { %6606 = vmatpush.bf16.msra.mxu2 %v8634_v49  ;;  %6619 = vmatpush.bf16.msra.mxu3 %v8638_v16 }
 0x8b8   :  { %6632 = vmatpush.bf16.msrb.mxu0 %v8642_v51  ;;  %6645 = vmatpush.bf16.msrb.mxu1 %v8646_v54  ;;  %v9321_v51 = vld [vmem:[%s15304_s12 + $0x80] sm:$0xff] }
 0x8bb   :  { %6607 = vmatpush.bf16.msra.mxu2 %v8618_v63  ;;  %6620 = vmatpush.bf16.msra.mxu3 %v8622_v11 }
 0x8bc   :  { %6633 = vmatpush.bf16.msrb.mxu0 %v8626_v41  ;;  %6646 = vmatpush.bf16.msrb.mxu1 %v8630_v14  ;;  %v6660_v41 = vperm.slane %v6656_v61, 2 }
 0x8be   :  { %6608 = vmatmul.bf16.vlgmr.msra.gmra.mxu2 %v6407_v37  ;;  %6621 = vmatmul.bf16.vlgmr.msra.gmra.mxu3 %v6407_v37 }
 0x8bf   :  { %6634 = vmatmul.bf16.vlgmr.msrb.gmra.mxu0 %v6407_v37  ;;  %6647 = vmatmul.bf16.vlgmr.msrb.gmra.mxu1 %v6407_v37  ;;  %v6661_v37 = vperm.slane %v6656_v61, 3 }
 0x8c0   :  { %6964 = vmatpush.bf16.msra.mxu0 %v9328_v38  ;;  %6977 = vmatpush.bf16.msra.mxu1 %v9336_v9 }
 0x8c1   :  { %6938 = vmatpush.bf16.msrb.mxu2 %v9312_v1  ;;  %6951 = vmatpush.bf16.msrb.mxu3 %v9320_v43 }
 0x8c4   :  { %6965 = vmatpush.bf16.msra.mxu0 %v9327_v18  ;;  %6978 = vmatpush.bf16.msra.mxu1 %v9335_v56 }
 0x8c5   :  { %6939 = vmatpush.bf16.msrb.mxu2 %v9311_v44  ;;  %6952 = vmatpush.bf16.msrb.mxu3 %v9319_v32 }
 0x8c8   :  { %6966 = vmatpush.bf16.msra.mxu0 %v9326_v19  ;;  %6979 = vmatpush.bf16.msra.mxu1 %v9334_v29 }
 0x8c9   :  { %6940 = vmatpush.bf16.msrb.mxu2 %v9310_v2  ;;  %6953 = vmatpush.bf16.msrb.mxu3 %v9318_v4 }
 0x8cc   :  { %6967 = vmatpush.bf16.msra.mxu0 %v9325_v0  ;;  %6980 = vmatpush.bf16.msra.mxu1 %v9333_v52 }
 0x8cd   :  { %6941 = vmatpush.bf16.msrb.mxu2 %v9309_v34  ;;  %6954 = vmatpush.bf16.msrb.mxu3 %v9317_v15 }
 0x8d0   :  { %6968 = vmatpush.bf16.msra.mxu0 %v9324_v39  ;;  %6981 = vmatpush.bf16.msra.mxu1 %v9332_v21 }
 0x8d1   :  { %6942 = vmatpush.bf16.msrb.mxu2 %v9308_v57  ;;  %6955 = vmatpush.bf16.msrb.mxu3 %v9316_v50 }
 0x8d4   :  { %6969 = vmatpush.bf16.msra.mxu0 %v9323_v60  ;;  %6982 = vmatpush.bf16.msra.mxu1 %v9331_v24  ;;  %v9484_v60 = vld [vmem:[%s15305_s13] ss:$0 sm:$0xff] }
 0x8d5   :  { %6943 = vmatpush.bf16.msrb.mxu2 %v9307_v28  ;;  %6956 = vmatpush.bf16.msrb.mxu3 %v9315_v3 }
 0x8d8   :  { %6970 = vmatpush.bf16.msra.mxu0 %v9322_v31  ;;  %6983 = vmatpush.bf16.msra.mxu1 %v9330_v13 }
 0x8d9   :  { %6944 = vmatpush.bf16.msrb.mxu2 %v9306_v36  ;;  %6957 = vmatpush.bf16.msrb.mxu3 %v9314_v45 }
 0x8dc   :  { %6971 = vmatpush.bf16.msra.mxu0 %v9321_v51  ;;  %6984 = vmatpush.bf16.msra.mxu1 %v9329_v25 }
 0x8dd   :  { %6945 = vmatpush.bf16.msrb.mxu2 %v9305_v27  ;;  %6958 = vmatpush.bf16.msrb.mxu3 %v9313_v30 }
 0x8fb   :  { %v15163_v33 = vpop.f32.mrf.mxu0  ;;  %v15165_v55 = vpop.f32.mrf.mxu1 }
 0x900   :  { %v15167_v10 = vpop.f32.mrf.mxu2  ;;  %v15169_v6 = vpop.f32.mrf.mxu3 }
 0x903   :  { %v5931_v48 = vpop.f32.mrf.mxu0  ;;  %v5944_v35 = vpop.f32.mrf.mxu1 }
 0x908   :  { %v5905_v26 = vpop.f32.mrf.mxu2  ;;  %v5918_v5 = vpop.f32.mrf.mxu3 }
 0x909   :  { %v6658_v26 = vperm.slane %v6656_v61, 0 }
 0x90b   :  { %v15189_v8 = vpop.f32.mrf.mxu0  ;;  %v15200_v58 = vpop.f32.mrf.mxu1 }
 0x90c   :  { %v6142_v46 = vadd.f32 %v15189_v8, %v15163_v33  ;;  %v6155_v63 = vadd.f32 %v15200_v58, %v15165_v55  ;;  %v6659_v8 = vperm.slane %v6656_v61, 1 }
 0x910   :  { %v15217_v42 = vpop.f32.mrf.mxu2  ;;  %v15219_v23 = vpop.f32.mrf.mxu3 }
 0x911   :  { %v6116_v38 = vadd.f32 %v15217_v42, %v15167_v10  ;;  %v6129_v18 = vadd.f32 %v15219_v23, %v15169_v6 }
 0x913   :  { %v6143_v59 = vpop.f32.mrf.mxu0  ;;  %v6156_v20 = vpop.f32.mrf.mxu1 }
 0x918   :  { %v6117_v47 = vpop.f32.mrf.mxu2  ;;  %v6130_v7 = vpop.f32.mrf.mxu3 }
 0x91e   :  { %v6386_v17 = vpop.f32.mrf.mxu0  ;;  %v6399_v53 = vpop.f32.mrf.mxu1 }
 0x91f   :  { %v6405_v11 = vadd.f32 %v6386_v17, %v6142_v46  ;;  %v6406_v22 = vadd.f32 %v6399_v53, %v6155_v63 }
 0x921   :  { %v6360_v40 = vpop.f32.mrf.mxu2  ;;  %v6373_v12 = vpop.f32.mrf.mxu3 }
 0x922   :  { %v6403_v1 = vadd.f32 %v6360_v40, %v6116_v38  ;;  %v6404_v43 = vadd.f32 %v6373_v12, %v6129_v18 }
 0x926   :  { %v6388_v49 = vpop.f32.mrf.mxu0  ;;  %v6401_v16 = vpop.f32.mrf.mxu1 }
 0x929   :  { %v6362_v54 = vpop.f32.mrf.mxu2  ;;  %v6375_v62 = vpop.f32.mrf.mxu3 }
 0x93c   :  { %v6635_v14 = vpop.f32.mrf.mxu0  ;;  %v6648_v35 = vpop.f32.mrf.mxu1 }
 0x93d   :  { %v6654_v48 = vadd.f32 %v6635_v14, %v6405_v11  ;;  %v6655_v9 = vadd.f32 %v6648_v35, %v6406_v22 }
 0x93f   :  { %v6668_v56 = vadd.f32 %v6660_v41, %v6654_v48  ;;  %v6669_v33 = vadd.f32 %v6661_v37, %v6655_v9 }
 0x941   :  { %v6672_v55 = vmax.f32 %v6668_v56, 0.0  ;;  %v6609_v5 = vpop.f32.mrf.mxu2  ;;  %v6673_v19 = vmax.f32 %v6669_v33, 0.0  ;;  %v6622_v44 = vpop.f32.mrf.mxu3 }
 0x942   :  { %v6652_v29 = vadd.f32 %v6609_v5, %v6403_v1  ;;  %v6653_v32 = vadd.f32 %v6622_v44, %v6404_v43 }
 0x943   :  { %v6676_v58 = vpack.c.bf16 %v6672_v55, %v6672_v55  ;;  %v6677_v2 = vpack.c.bf16 %v6673_v19, %v6673_v19 }
 0x944   :  { %v6666_v0 = vadd.f32 %v6658_v26, %v6652_v29  ;;  %v6637_v10 = vpop.f32.mrf.mxu0  ;;  %v6667_v52 = vadd.f32 %v6659_v8, %v6653_v32  ;;  %v6650_v4 = vpop.f32.mrf.mxu1 }
 0x945   :  { %6972 = vmatmul.bf16.vlgmr.msra.gmra.mxu0 %v6676_v58  ;;  %6985 = vmatmul.bf16.vlgmr.msra.gmra.mxu1 %v6677_v2 }
 0x946   :  { %v6670_v6 = vmax.f32 %v6666_v0, 0.0  ;;  %v6671_v42 = vmax.f32 %v6667_v52, 0.0 }
 0x948   :  { %v6674_v23 = vpack.c.bf16 %v6670_v6, %v6670_v6  ;;  %v6675_v34 = vpack.c.bf16 %v6671_v42, %v6671_v42 }
 0x949   :  { %v6611_v39 = vpop.f32.mrf.mxu2  ;;  %v6624_v21 = vpop.f32.mrf.mxu3 }
 0x94a   :  { %6946 = vmatmul.bf16.vlgmr.msrb.gmra.mxu2 %v6674_v23  ;;  %6959 = vmatmul.bf16.vlgmr.msrb.gmra.mxu3 %v6675_v34 }
 0x9c2   :  { %v6973_v59 = vpop.f32.mrf.mxu0  ;;  %v6986_v15 = vpop.f32.mrf.mxu1 }
 0x9ca   :  { %v6975_v20 = vpop.f32.mrf.mxu0  ;;  %v6988_v24 = vpop.f32.mrf.mxu1 }
 0x9cd   :  { %v6947_v47 = vpop.f32.mrf.mxu2  ;;  %v6960_v17 = vpop.f32.mrf.mxu3 }
 0x9ce   :  { %v6948_v7 = vadd.f32 %v9484_v60, %v6947_v47 }
 0x9d0   :  { %v6961_v53 = vadd.f32 %v6960_v17, %v6948_v7 }
 0x9d2   :  { %v6974_v40 = vadd.f32 %v6973_v59, %v6961_v53 }
 0x9d4   :  { %v6987_v57 = vadd.f32 %v6986_v15, %v6974_v40 }
 0x9d5   :  { %v6949_v50 = vpop.f32.mrf.mxu2  ;;  %v6962_v31 = vpop.f32.mrf.mxu3 }
 0x9d6   :  { %6990 = vst [vmem:[#allocation3] sm:$0x3] %v6987_v57 }
 0x9d7   :  { %7001 = dma.vmem_to_hbm [thread:$0]  %s6997_s7, 32, %s6999_s20, [#allocation4]  }
 0x9d8   :  { %9713 = dma.done.wait [#allocation4], 32  }
 0x9d9   :  { %9714 = vsyncadd [#allocation4], 4294967264 }
 0x9da   :  { %7006 = vsyncpa [#allocation4], 1 }

</bundles_post_ra>
